<compile_context>
chip_gen: v7x
topology: tpu7x:2x2x1
jax: 0.10.0
libtpu: 0.0.40
codegen_flags: <defaults>
</compile_context>

<pallas_src>
import functools
import math

import jax
import jax.numpy as jnp
import numpy as np
from jax import lax
from jax.experimental import pallas as pl
from jax.experimental.pallas import tpu as pltpu


_PARAM_ORDER = ("w1", "b1", "w2", "b2",
                "wqi", "bqi", "wki", "bki", "wvi", "bvi",
                "wqp", "bqp", "wkp", "bkp", "wvp", "bvp")


def _cross_modal_kernel(
    pf_ref, if_ref,
    w1_ref, b1_ref, w2_ref, b2_ref,
    wqi_ref, bqi_ref, wki_ref, bki_ref, wvi_ref, bvi_ref,
    wqp_ref, bqp_ref, wkp_ref, bkp_ref, wvp_ref, bvp_ref,
    out_ref,
    *, q_tile,
):
    BT, N, Dp = pf_ref.shape
    n_q = N // q_tile

    # Lane-major row-sum helper operand (constant, hoisted out of all loops).
    ones_row = jnp.ones((1, N), dtype=jnp.bfloat16)

    for bt in range(BT):
        pf = pf_ref[bt]                       # (N, Dp) f32   point features
        imf_bf = if_ref[bt]                   # (N, Di) bf16  raw image features (host cast)
        pf_bf = pf.astype(jnp.bfloat16)

        # ---- img_mlp: Conv1d(Di->128,1) [BN folded on host] -> ReLU -> Conv1d(128->Dp,1)
        # bf16 MXU operands, f32 accumulation; elementwise math stays f32.
        h = jnp.dot(imf_bf, w1_ref[...], preferred_element_type=jnp.float32) + b1_ref[...]
        h = jnp.maximum(h, 0.0).astype(jnp.bfloat16)
        img = jnp.dot(h, w2_ref[...], preferred_element_type=jnp.float32) + b2_ref[...]
        img_bf = img.astype(jnp.bfloat16)     # (N, Dp)

        # Residuals in transposed (feature-major) form.  These only depend on the inputs /
        # MLP output, so the XLU transposes hide under the projection matmuls instead of
        # sitting in the critical tail after the attention.
        pf_T = pf.T                            # (Dp, N) f32
        img_T = img.T                          # (Dp, N) f32

        def proj(x_bf, w_ref, b_ref):
            return (jnp.dot(x_bf, w_ref[...], preferred_element_type=jnp.float32)
                    + b_ref[...]).astype(jnp.bfloat16)

        # in-projections (1/sqrt(Dp) already folded into wqi/bqi/wqp/bqp on host).
        img_q = proj(img_bf, wqi_ref, bqi_ref)            # (N, Dp)
        img_k = proj(img_bf, wki_ref, bki_ref)            # (N, Dp)
        img_vT = proj(img_bf, wvi_ref, bvi_ref).T         # (Dp, N) bf16
        pt_q = proj(pf_bf, wqp_ref, bqp_ref)              # (N, Dp)
        pt_k = proj(pf_bf, wkp_ref, bkp_ref)              # (N, Dp)
        pt_vT = proj(pf_bf, wvp_ref, bvp_ref).T           # (Dp, N) bf16

        def attn_T(q_blk, k_bf, vT_bf):
            # Single-head scaled dot-product attention (FlashCrossAttention, eval mode).
            # Output is produced transposed (Dp, TQ) directly on the MXU; softmax
            # normalization is deferred and applied once via an EUP approx reciprocal.
            s = lax.dot_general(q_blk, k_bf, (((1,), (1,)), ((), ())),
                                preferred_element_type=jnp.float32)        # (TQ, N) f32
            s = s - jnp.max(s, axis=-1, keepdims=True)
            p = jnp.exp(s).astype(jnp.bfloat16)                            # (TQ, N)
            oT = lax.dot_general(vT_bf, p, (((1,), (1,)), ((), ())),
                                 preferred_element_type=jnp.float32)       # (Dp, TQ) f32
            rs = lax.dot_general(ones_row, p, (((1,), (1,)), ((), ())),
                                 preferred_element_type=jnp.float32)       # (1, TQ) f32
            return oT * pl.reciprocal(rs, approx=True)

        # q-row tiling: caps the (TQ, N) softmax intermediates; K/V stay resident,
        # nothing is recomputed across tiles.
        for qi in range(n_q):
            q0, q1 = qi * q_tile, (qi + 1) * q_tile
            point_T = pf_T[:, q0:q1] + attn_T(img_q[q0:q1], pt_k, pt_vT)   # (Dp, TQ) f32
            image_T = img_T[:, q0:q1] + attn_T(pt_q[q0:q1], img_k, img_vT)  # (Dp, TQ) f32
            # concat along feature dim + permute(0,2,1) == direct slab writes of each half
            # (lane-dense: last dim is the sequence axis).
            out_ref[bt, :Dp, q0:q1] = point_T.astype(out_ref.dtype)
            out_ref[bt, Dp:, q0:q1] = image_T.astype(out_ref.dtype)


def _prepare_params(params, point_dim):
    """Host-side folds: eval BN into conv1, 1/sqrt(Dp) into q projections (in f32),
    kv projections split into separate k / v matrices, then all weight matrices cast
    to bf16 (biases stay f32)."""
    Dp = point_dim
    scale = 1.0 / math.sqrt(Dp)

    def bf(x):
        return x.astype(jnp.bfloat16)

    w1 = bf(params["w1"] * params["bn_scale"])
    b1 = params["b1"] * params["bn_scale"] + params["bn_shift"]

    wki, wvi = params["wkvi"][:, :Dp], params["wkvi"][:, Dp:]
    bki, bvi = params["bkvi"][:, :Dp], params["bkvi"][:, Dp:]
    wkp, wvp = params["wkvp"][:, :Dp], params["wkvp"][:, Dp:]
    bkp, bvp = params["bkvp"][:, :Dp], params["bkvp"][:, Dp:]

    return {
        "w1": w1, "b1": b1,
        "w2": bf(params["w2"]), "b2": params["b2"],
        "wqi": bf(params["wqi"] * scale), "bqi": params["bqi"] * scale,
        "wki": bf(wki), "bki": bki,
        "wvi": bf(wvi), "bvi": bvi,
        "wqp": bf(params["wqp"] * scale), "bqp": params["bqp"] * scale,
        "wkp": bf(wkp), "bkp": bkp,
        "wvp": bf(wvp), "bvp": bvp,
    }


def _pick_block_b(batch):
    """Amortize per-grid-step overhead (v6e) while keeping >= 2 grid steps so both v7x
    TensorCores get work."""
    for bt in (2, 1):
        if batch % bt == 0 and batch // bt >= 2:
            return bt
    return 1


def cross_modal_attention(point_feat, img_feat, params, *,
                          q_tile=512, out_dtype=jnp.float32):
    B, N, Dp = point_feat.shape
    Di = img_feat.shape[-1]
    prepared = _prepare_params(params, Dp)

    bt = _pick_block_b(B)
    tq = min(q_tile, N)
    if N % tq != 0:
        tq = N

    # Raw image features are only ever consumed as bf16 MXU operands -> cast on host,
    # halving their HBM->VMEM DMA.  point_feat stays f32 (it is the residual).
    img_feat_bf = img_feat.astype(jnp.bfloat16)

    in_specs = [
        pl.BlockSpec((bt, N, Dp), lambda b: (b, 0, 0)),
        pl.BlockSpec((bt, N, Di), lambda b: (b, 0, 0)),
    ]
    args = [point_feat, img_feat_bf]
    for name in _PARAM_ORDER:
        p = prepared[name]
        in_specs.append(pl.BlockSpec(tuple(p.shape), lambda b: (0, 0)))
        args.append(p)

    out_shape = jax.ShapeDtypeStruct((B, 2 * Dp, N), out_dtype)
    out_spec = pl.BlockSpec((bt, 2 * Dp, N), lambda b: (b, 0, 0))

    kernel = functools.partial(_cross_modal_kernel, q_tile=tq)

    return pl.pallas_call(
        kernel,
        out_shape=out_shape,
        grid=(B // bt,),
        in_specs=in_specs,
        out_specs=out_spec,
        compiler_params=pltpu.CompilerParams(
            dimension_semantics=("parallel",),
            vmem_limit_bytes=48 * 1024 * 1024,
        ),
    )(*args)


def reference(point_feat, img_feat, p):
    """Pure-JAX f32 reference mirroring the PyTorch forward (eval mode)."""
    Dp = point_feat.shape[-1]
    scale = 1.0 / math.sqrt(Dp)

    h = img_feat @ p["w1"] + p["b1"]
    h = h * p["bn_scale"] + p["bn_shift"]
    h = jnp.maximum(h, 0.0)
    img = h @ p["w2"] + p["b2"]                                 # (B, N, Dp)

    img_q = img @ p["wqi"] + p["bqi"]
    img_kv = img @ p["wkvi"] + p["bkvi"]
    pt_q = point_feat @ p["wqp"] + p["bqp"]
    pt_kv = point_feat @ p["wkvp"] + p["bkvp"]

    pt_k, pt_v = pt_kv[..., :Dp], pt_kv[..., Dp:]
    img_k, img_v = img_kv[..., :Dp], img_kv[..., Dp:]

    def attn(q, k, v):
        s = jnp.einsum("bnd,bmd->bnm", q, k) * scale
        s = s - jnp.max(s, axis=-1, keepdims=True)
        pr = jnp.exp(s)
        pr = pr / jnp.sum(pr, axis=-1, keepdims=True)
        return jnp.einsum("bnm,bmd->bnd", pr, v)

    point_fuse = point_feat + attn(img_q, pt_k, pt_v)
    image_fuse = img + attn(pt_q, img_k, img_v)
    fused = jnp.concatenate([point_fuse, image_fuse], axis=2)    # (B, N, 2*Dp)
    return jnp.transpose(fused, (0, 2, 1))                       # (B, 2*Dp, N)


if __name__ == "__main__":
    # Small shapes consistent with the module (point_dim=256, img_dim=64, hidden=128),
    # batch/seq scaled down.
    B, N, Dp, Di, H = 4, 256, 256, 64, 128

    key = jax.random.PRNGKey(0)
    ks = jax.random.split(key, 20)

    def nrm(k, shape, s=0.05):
        return jax.random.normal(k, shape, jnp.float32) * s

    eps = 1e-5
    gamma = 1.0 + nrm(ks[2], (1, H))
    beta = nrm(ks[3], (1, H))
    # eval-mode BatchNorm1d folded with running_mean=0, running_var=1
    bn_scale = gamma / jnp.sqrt(1.0 + eps)
    bn_shift = beta

    params = {
        "w1": nrm(ks[0], (Di, H)),         "b1": nrm(ks[1], (1, H)),
        "bn_scale": bn_scale,              "bn_shift": bn_shift,
        "w2": nrm(ks[4], (H, Dp)),         "b2": nrm(ks[5], (1, Dp)),
        "wqi": nrm(ks[6], (Dp, Dp)),       "bqi": nrm(ks[7], (1, Dp)),
        "wkvi": nrm(ks[8], (Dp, 2 * Dp)),  "bkvi": nrm(ks[9], (1, 2 * Dp)),
        "wqp": nrm(ks[10], (Dp, Dp)),      "bqp": nrm(ks[11], (1, Dp)),
        "wkvp": nrm(ks[12], (Dp, 2 * Dp)), "bkvp": nrm(ks[13], (1, 2 * Dp)),
    }

    point_feat = jax.random.normal(ks[14], (B, N, Dp), jnp.float32)
    img_feat = jax.random.normal(ks[15], (B, N, Di), jnp.float32)

    # Case 1: B=2 -> batch block 1, single q tile (covers the simple path).
    out_a = jax.block_until_ready(
        cross_modal_attention(point_feat[:2], img_feat[:2], params))
    assert out_a.shape == (2, 2 * Dp, N), out_a.shape
    assert bool(jnp.all(jnp.isfinite(out_a)))
    ref_a = jax.block_until_ready(reference(point_feat[:2], img_feat[:2], params))
    np.testing.assert_allclose(np.asarray(out_a), np.asarray(ref_a), atol=1e-1, rtol=1e-1)

    # Case 2: B=4 -> batch block 2 per grid step, q_tile=128 -> 2 q tiles per batch
    # (covers the multi-batch-block and q-tiled paths).
    out_b = jax.block_until_ready(
        cross_modal_attention(point_feat, img_feat, params, q_tile=128))
    assert out_b.shape == (B, 2 * Dp, N), out_b.shape
    assert bool(jnp.all(jnp.isfinite(out_b)))
    ref_b = jax.block_until_ready(reference(point_feat, img_feat, params))
    np.testing.assert_allclose(np.asarray(out_b), np.asarray(ref_b), atol=1e-1, rtol=1e-1)

    print("KERNEL_OK")
</pallas_src>

<mosaic_0001>
module attributes {stable_mosaic.version = 11 : i64} {
  func.func @_cross_modal_kernel(%arg0: i32, %arg1: memref<1x256x256xf32, #tpu.memory_space<vmem>>, %arg2: memref<1x256x64xbf16, #tpu.memory_space<vmem>>, %arg3: memref<64x128xbf16, #tpu.memory_space<vmem>>, %arg4: memref<1x128xf32, #tpu.memory_space<vmem>>, %arg5: memref<128x256xbf16, #tpu.memory_space<vmem>>, %arg6: memref<1x256xf32, #tpu.memory_space<vmem>>, %arg7: memref<256x256xbf16, #tpu.memory_space<vmem>>, %arg8: memref<1x256xf32, #tpu.memory_space<vmem>>, %arg9: memref<256x256xbf16, #tpu.memory_space<vmem>>, %arg10: memref<1x256xf32, #tpu.memory_space<vmem>>, %arg11: memref<256x256xbf16, #tpu.memory_space<vmem>>, %arg12: memref<1x256xf32, #tpu.memory_space<vmem>>, %arg13: memref<256x256xbf16, #tpu.memory_space<vmem>>, %arg14: memref<1x256xf32, #tpu.memory_space<vmem>>, %arg15: memref<256x256xbf16, #tpu.memory_space<vmem>>, %arg16: memref<1x256xf32, #tpu.memory_space<vmem>>, %arg17: memref<256x256xbf16, #tpu.memory_space<vmem>>, %arg18: memref<1x256xf32, #tpu.memory_space<vmem>>, %arg19: memref<1x512x256xf32, #tpu.memory_space<vmem>>) attributes {dimension_semantics = [#tpu.dimension_semantics<parallel>], iteration_bounds = array<i64: 2>, scalar_prefetch = 0 : i64, scratch_operands = 0 : i64, tpu.core_type = #tpu.core_type<tc>, window_params = [{transform_indices = @transform_0, window_bounds = array<i64: 1, 256, 256>}, {transform_indices = @transform_1, window_bounds = array<i64: 1, 256, 64>}, {pipeline_mode = #tpu.pipeline_mode<synchronous>, transform_indices = @transform_2, window_bounds = array<i64: 64, 128>}, {pipeline_mode = #tpu.pipeline_mode<synchronous>, transform_indices = @transform_3, window_bounds = array<i64: 1, 128>}, {pipeline_mode = #tpu.pipeline_mode<synchronous>, transform_indices = @transform_4, window_bounds = array<i64: 128, 256>}, {pipeline_mode = #tpu.pipeline_mode<synchronous>, transform_indices = @transform_5, window_bounds = array<i64: 1, 256>}, {pipeline_mode = #tpu.pipeline_mode<synchronous>, transform_indices = @transform_6, window_bounds = array<i64: 256, 256>}, {pipeline_mode = #tpu.pipeline_mode<synchronous>, transform_indices = @transform_7, window_bounds = array<i64: 1, 256>}, {pipeline_mode = #tpu.pipeline_mode<synchronous>, transform_indices = @transform_8, window_bounds = array<i64: 256, 256>}, {pipeline_mode = #tpu.pipeline_mode<synchronous>, transform_indices = @transform_9, window_bounds = array<i64: 1, 256>}, {pipeline_mode = #tpu.pipeline_mode<synchronous>, transform_indices = @transform_10, window_bounds = array<i64: 256, 256>}, {pipeline_mode = #tpu.pipeline_mode<synchronous>, transform_indices = @transform_11, window_bounds = array<i64: 1, 256>}, {pipeline_mode = #tpu.pipeline_mode<synchronous>, transform_indices = @transform_12, window_bounds = array<i64: 256, 256>}, {pipeline_mode = #tpu.pipeline_mode<synchronous>, transform_indices = @transform_13, window_bounds = array<i64: 1, 256>}, {pipeline_mode = #tpu.pipeline_mode<synchronous>, transform_indices = @transform_14, window_bounds = array<i64: 256, 256>}, {pipeline_mode = #tpu.pipeline_mode<synchronous>, transform_indices = @transform_15, window_bounds = array<i64: 1, 256>}, {pipeline_mode = #tpu.pipeline_mode<synchronous>, transform_indices = @transform_16, window_bounds = array<i64: 256, 256>}, {pipeline_mode = #tpu.pipeline_mode<synchronous>, transform_indices = @transform_17, window_bounds = array<i64: 1, 256>}, {transform_indices = @transform_18, window_bounds = array<i64: 1, 512, 256>}]} {
    %cst = arith.constant 1.000000e+00 : bf16
    %0 = vector.broadcast %cst : bf16 to vector<1x256xbf16>
    %c0 = arith.constant 0 : index
    %c0_0 = arith.constant 0 : index
    %c0_1 = arith.constant 0 : index
    %1 = vector.load %arg1[%c0, %c0_0, %c0_1] : memref<1x256x256xf32, #tpu.memory_space<vmem>>, vector<1x256x256xf32>
    %2 = vector.shape_cast %1 : vector<1x256x256xf32> to vector<256x256xf32>
    %c0_2 = arith.constant 0 : index
    %c0_3 = arith.constant 0 : index
    %c0_4 = arith.constant 0 : index
    %3 = vector.load %arg2[%c0_2, %c0_3, %c0_4] : memref<1x256x64xbf16, #tpu.memory_space<vmem>>, vector<1x256x64xbf16>
    %4 = vector.shape_cast %3 : vector<1x256x64xbf16> to vector<256x64xbf16>
    %5 = arith.truncf %2 : vector<256x256xf32> to vector<256x256xbf16>
    %c0_5 = arith.constant 0 : index
    %c0_6 = arith.constant 0 : index
    %6 = vector.load %arg3[%c0_5, %c0_6] : memref<64x128xbf16, #tpu.memory_space<vmem>>, vector<64x128xbf16>
    %cst_7 = arith.constant dense<0.000000e+00> : vector<256x128xf32>
    %7 = tpu.matmul %4, %6, %cst_7 {dimension_numbers = #tpu.dot_dimension_numbers<[1], [0], [0], [1], [0, 0, 1, 1], [], []>} : vector<256x64xbf16>, vector<64x128xbf16>, vector<256x128xf32> -> vector<256x128xf32>
    %c0_8 = arith.constant 0 : index
    %c0_9 = arith.constant 0 : index
    %8 = vector.load %arg4[%c0_8, %c0_9] : memref<1x128xf32, #tpu.memory_space<vmem>>, vector<1x128xf32>
    %9 = vector.broadcast %8 : vector<1x128xf32> to vector<256x128xf32>
    %10 = arith.addf %7, %9 : vector<256x128xf32>
    %cst_10 = arith.constant 0.000000e+00 : f32
    %11 = vector.broadcast %cst_10 : f32 to vector<256x128xf32>
    %12 = arith.maximumf %10, %11 : vector<256x128xf32>
    %13 = arith.truncf %12 : vector<256x128xf32> to vector<256x128xbf16>
    %c0_11 = arith.constant 0 : index
    %c0_12 = arith.constant 0 : index
    %14 = vector.load %arg5[%c0_11, %c0_12] : memref<128x256xbf16, #tpu.memory_space<vmem>>, vector<128x256xbf16>
    %cst_13 = arith.constant dense<0.000000e+00> : vector<256x256xf32>
    %15 = tpu.matmul %13, %14, %cst_13 {dimension_numbers = #tpu.dot_dimension_numbers<[1], [0], [0], [1], [0, 0, 1, 1], [], []>} : vector<256x128xbf16>, vector<128x256xbf16>, vector<256x256xf32> -> vector<256x256xf32>
    %c0_14 = arith.constant 0 : index
    %c0_15 = arith.constant 0 : index
    %16 = vector.load %arg6[%c0_14, %c0_15] : memref<1x256xf32, #tpu.memory_space<vmem>>, vector<1x256xf32>
    %17 = vector.broadcast %16 : vector<1x256xf32> to vector<256x256xf32>
    %18 = arith.addf %15, %17 : vector<256x256xf32>
    %19 = arith.truncf %18 : vector<256x256xf32> to vector<256x256xbf16>
    %20 = tpu.transpose %2, [1, 0] : vector<256x256xf32> -> vector<256x256xf32>
    %21 = tpu.transpose %18, [1, 0] : vector<256x256xf32> -> vector<256x256xf32>
    %c0_16 = arith.constant 0 : index
    %c0_17 = arith.constant 0 : index
    %22 = vector.load %arg7[%c0_16, %c0_17] : memref<256x256xbf16, #tpu.memory_space<vmem>>, vector<256x256xbf16>
    %cst_18 = arith.constant dense<0.000000e+00> : vector<256x256xf32>
    %23 = tpu.matmul %19, %22, %cst_18 {dimension_numbers = #tpu.dot_dimension_numbers<[1], [0], [0], [1], [0, 0, 1, 1], [], []>} : vector<256x256xbf16>, vector<256x256xbf16>, vector<256x256xf32> -> vector<256x256xf32>
    %c0_19 = arith.constant 0 : index
    %c0_20 = arith.constant 0 : index
    %24 = vector.load %arg8[%c0_19, %c0_20] : memref<1x256xf32, #tpu.memory_space<vmem>>, vector<1x256xf32>
    %25 = vector.broadcast %24 : vector<1x256xf32> to vector<256x256xf32>
    %26 = arith.addf %23, %25 : vector<256x256xf32>
    %27 = arith.truncf %26 : vector<256x256xf32> to vector<256x256xbf16>
    %c0_21 = arith.constant 0 : index
    %c0_22 = arith.constant 0 : index
    %28 = vector.load %arg9[%c0_21, %c0_22] : memref<256x256xbf16, #tpu.memory_space<vmem>>, vector<256x256xbf16>
    %cst_23 = arith.constant dense<0.000000e+00> : vector<256x256xf32>
    %29 = tpu.matmul %19, %28, %cst_23 {dimension_numbers = #tpu.dot_dimension_numbers<[1], [0], [0], [1], [0, 0, 1, 1], [], []>} : vector<256x256xbf16>, vector<256x256xbf16>, vector<256x256xf32> -> vector<256x256xf32>
    %c0_24 = arith.constant 0 : index
    %c0_25 = arith.constant 0 : index
    %30 = vector.load %arg10[%c0_24, %c0_25] : memref<1x256xf32, #tpu.memory_space<vmem>>, vector<1x256xf32>
    %31 = vector.broadcast %30 : vector<1x256xf32> to vector<256x256xf32>
    %32 = arith.addf %29, %31 : vector<256x256xf32>
    %33 = arith.truncf %32 : vector<256x256xf32> to vector<256x256xbf16>
    %c0_26 = arith.constant 0 : index
    %c0_27 = arith.constant 0 : index
    %34 = vector.load %arg11[%c0_26, %c0_27] : memref<256x256xbf16, #tpu.memory_space<vmem>>, vector<256x256xbf16>
    %cst_28 = arith.constant dense<0.000000e+00> : vector<256x256xf32>
    %35 = tpu.matmul %19, %34, %cst_28 {dimension_numbers = #tpu.dot_dimension_numbers<[1], [0], [0], [1], [0, 0, 1, 1], [], []>} : vector<256x256xbf16>, vector<256x256xbf16>, vector<256x256xf32> -> vector<256x256xf32>
    %c0_29 = arith.constant 0 : index
    %c0_30 = arith.constant 0 : index
    %36 = vector.load %arg12[%c0_29, %c0_30] : memref<1x256xf32, #tpu.memory_space<vmem>>, vector<1x256xf32>
    %37 = vector.broadcast %36 : vector<1x256xf32> to vector<256x256xf32>
    %38 = arith.addf %35, %37 : vector<256x256xf32>
    %39 = arith.truncf %38 : vector<256x256xf32> to vector<256x256xbf16>
    %40 = tpu.transpose %39, [1, 0] : vector<256x256xbf16> -> vector<256x256xbf16>
    %c0_31 = arith.constant 0 : index
    %c0_32 = arith.constant 0 : index
    %41 = vector.load %arg13[%c0_31, %c0_32] : memref<256x256xbf16, #tpu.memory_space<vmem>>, vector<256x256xbf16>
    %cst_33 = arith.constant dense<0.000000e+00> : vector<256x256xf32>
    %42 = tpu.matmul %5, %41, %cst_33 {dimension_numbers = #tpu.dot_dimension_numbers<[1], [0], [0], [1], [0, 0, 1, 1], [], []>} : vector<256x256xbf16>, vector<256x256xbf16>, vector<256x256xf32> -> vector<256x256xf32>
    %c0_34 = arith.constant 0 : index
    %c0_35 = arith.constant 0 : index
    %43 = vector.load %arg14[%c0_34, %c0_35] : memref<1x256xf32, #tpu.memory_space<vmem>>, vector<1x256xf32>
    %44 = vector.broadcast %43 : vector<1x256xf32> to vector<256x256xf32>
    %45 = arith.addf %42, %44 : vector<256x256xf32>
    %46 = arith.truncf %45 : vector<256x256xf32> to vector<256x256xbf16>
    %c0_36 = arith.constant 0 : index
    %c0_37 = arith.constant 0 : index
    %47 = vector.load %arg15[%c0_36, %c0_37] : memref<256x256xbf16, #tpu.memory_space<vmem>>, vector<256x256xbf16>
    %cst_38 = arith.constant dense<0.000000e+00> : vector<256x256xf32>
    %48 = tpu.matmul %5, %47, %cst_38 {dimension_numbers = #tpu.dot_dimension_numbers<[1], [0], [0], [1], [0, 0, 1, 1], [], []>} : vector<256x256xbf16>, vector<256x256xbf16>, vector<256x256xf32> -> vector<256x256xf32>
    %c0_39 = arith.constant 0 : index
    %c0_40 = arith.constant 0 : index
    %49 = vector.load %arg16[%c0_39, %c0_40] : memref<1x256xf32, #tpu.memory_space<vmem>>, vector<1x256xf32>
    %50 = vector.broadcast %49 : vector<1x256xf32> to vector<256x256xf32>
    %51 = arith.addf %48, %50 : vector<256x256xf32>
    %52 = arith.truncf %51 : vector<256x256xf32> to vector<256x256xbf16>
    %c0_41 = arith.constant 0 : index
    %c0_42 = arith.constant 0 : index
    %53 = vector.load %arg17[%c0_41, %c0_42] : memref<256x256xbf16, #tpu.memory_space<vmem>>, vector<256x256xbf16>
    %cst_43 = arith.constant dense<0.000000e+00> : vector<256x256xf32>
    %54 = tpu.matmul %5, %53, %cst_43 {dimension_numbers = #tpu.dot_dimension_numbers<[1], [0], [0], [1], [0, 0, 1, 1], [], []>} : vector<256x256xbf16>, vector<256x256xbf16>, vector<256x256xf32> -> vector<256x256xf32>
    %c0_44 = arith.constant 0 : index
    %c0_45 = arith.constant 0 : index
    %55 = vector.load %arg18[%c0_44, %c0_45] : memref<1x256xf32, #tpu.memory_space<vmem>>, vector<1x256xf32>
    %56 = vector.broadcast %55 : vector<1x256xf32> to vector<256x256xf32>
    %57 = arith.addf %54, %56 : vector<256x256xf32>
    %58 = arith.truncf %57 : vector<256x256xf32> to vector<256x256xbf16>
    %59 = tpu.transpose %58, [1, 0] : vector<256x256xbf16> -> vector<256x256xbf16>
    %cst_46 = arith.constant dense<0.000000e+00> : vector<256x256xf32>
    %60 = tpu.matmul %27, %52, %cst_46 {dimension_numbers = #tpu.dot_dimension_numbers<[1], [1], [0], [0], [0, 0, 1, 0], [], []>} : vector<256x256xbf16>, vector<256x256xbf16>, vector<256x256xf32> -> vector<256x256xf32>
    %cst_47 = arith.constant dense<0xFF800000> : vector<256xf32>
    %61 = vector.multi_reduction <maximumf>, %60, %cst_47 [1] : vector<256x256xf32> to vector<256xf32>
    %62 = vector.shape_cast %61 : vector<256xf32> to vector<256x1xf32>
    %63 = vector.broadcast %62 : vector<256x1xf32> to vector<256x256xf32>
    %64 = arith.subf %60, %63 : vector<256x256xf32>
    %65 = math.exp %64 : vector<256x256xf32>
    %66 = arith.truncf %65 : vector<256x256xf32> to vector<256x256xbf16>
    %cst_48 = arith.constant dense<0.000000e+00> : vector<256x256xf32>
    %67 = tpu.matmul %59, %66, %cst_48 {dimension_numbers = #tpu.dot_dimension_numbers<[1], [1], [0], [0], [0, 0, 1, 0], [], []>} : vector<256x256xbf16>, vector<256x256xbf16>, vector<256x256xf32> -> vector<256x256xf32>
    %cst_49 = arith.constant dense<0.000000e+00> : vector<1x256xf32>
    %68 = tpu.matmul %0, %66, %cst_49 {dimension_numbers = #tpu.dot_dimension_numbers<[1], [1], [0], [0], [0, 0, 1, 0], [], []>} : vector<1x256xbf16>, vector<256x256xbf16>, vector<1x256xf32> -> vector<1x256xf32>
    %69 = tpu.reciprocal %68 {approx = true} : vector<1x256xf32> -> vector<1x256xf32>
    %70 = vector.broadcast %69 : vector<1x256xf32> to vector<256x256xf32>
    %71 = arith.mulf %67, %70 : vector<256x256xf32>
    %72 = arith.addf %20, %71 : vector<256x256xf32>
    %cst_50 = arith.constant dense<0.000000e+00> : vector<256x256xf32>
    %73 = tpu.matmul %46, %33, %cst_50 {dimension_numbers = #tpu.dot_dimension_numbers<[1], [1], [0], [0], [0, 0, 1, 0], [], []>} : vector<256x256xbf16>, vector<256x256xbf16>, vector<256x256xf32> -> vector<256x256xf32>
    %cst_51 = arith.constant dense<0xFF800000> : vector<256xf32>
    %74 = vector.multi_reduction <maximumf>, %73, %cst_51 [1] : vector<256x256xf32> to vector<256xf32>
    %75 = vector.shape_cast %74 : vector<256xf32> to vector<256x1xf32>
    %76 = vector.broadcast %75 : vector<256x1xf32> to vector<256x256xf32>
    %77 = arith.subf %73, %76 : vector<256x256xf32>
    %78 = math.exp %77 : vector<256x256xf32>
    %79 = arith.truncf %78 : vector<256x256xf32> to vector<256x256xbf16>
    %cst_52 = arith.constant dense<0.000000e+00> : vector<256x256xf32>
    %80 = tpu.matmul %40, %79, %cst_52 {dimension_numbers = #tpu.dot_dimension_numbers<[1], [1], [0], [0], [0, 0, 1, 0], [], []>} : vector<256x256xbf16>, vector<256x256xbf16>, vector<256x256xf32> -> vector<256x256xf32>
    %cst_53 = arith.constant dense<0.000000e+00> : vector<1x256xf32>
    %81 = tpu.matmul %0, %79, %cst_53 {dimension_numbers = #tpu.dot_dimension_numbers<[1], [1], [0], [0], [0, 0, 1, 0], [], []>} : vector<1x256xbf16>, vector<256x256xbf16>, vector<1x256xf32> -> vector<1x256xf32>
    %82 = tpu.reciprocal %81 {approx = true} : vector<1x256xf32> -> vector<1x256xf32>
    %83 = vector.broadcast %82 : vector<1x256xf32> to vector<256x256xf32>
    %84 = arith.mulf %80, %83 : vector<256x256xf32>
    %85 = arith.addf %21, %84 : vector<256x256xf32>
    %c0_54 = arith.constant 0 : index
    %c0_55 = arith.constant 0 : index
    %c0_56 = arith.constant 0 : index
    %86 = vector.load %arg19[%c0_54, %c0_55, %c0_56] : memref<1x512x256xf32, #tpu.memory_space<vmem>>, vector<1x256x256xf32>
    %87 = vector.shape_cast %86 : vector<1x256x256xf32> to vector<256x256xf32>
    %88 = vector.shape_cast %72 : vector<256x256xf32> to vector<1x256x256xf32>
    tpu.vector_store %arg19[%c0_54, %c0_55, %c0_56], %88 {strides = array<i32>} : memref<1x512x256xf32, #tpu.memory_space<vmem>>, vector<1x256x256xf32>,
    %c0_57 = arith.constant 0 : index
    %c256 = arith.constant 256 : index
    %c0_58 = arith.constant 0 : index
    %89 = vector.load %arg19[%c0_57, %c256, %c0_58] : memref<1x512x256xf32, #tpu.memory_space<vmem>>, vector<1x256x256xf32>
    %90 = vector.shape_cast %89 : vector<1x256x256xf32> to vector<256x256xf32>
    %91 = vector.shape_cast %85 : vector<256x256xf32> to vector<1x256x256xf32>
    tpu.vector_store %arg19[%c0_57, %c256, %c0_58], %91 {strides = array<i32>} : memref<1x512x256xf32, #tpu.memory_space<vmem>>, vector<1x256x256xf32>,
    return
  }
  func.func @transform_0(%arg0: i32) -> (i32, i32, i32) {
    %c0_i32 = arith.constant 0 : i32
    %c0_i32_0 = arith.constant 0 : i32
    %c0_i32_1 = arith.constant 0 : i32
    return %arg0, %c0_i32, %c0_i32_0 : i32, i32, i32
  }
  func.func @transform_1(%arg0: i32) -> (i32, i32, i32) {
    %c0_i32 = arith.constant 0 : i32
    %c0_i32_0 = arith.constant 0 : i32
    %c0_i32_1 = arith.constant 0 : i32
    return %arg0, %c0_i32, %c0_i32_0 : i32, i32, i32
  }
  func.func @transform_2(%arg0: i32) -> (i32, i32) {
    %c0_i32 = arith.constant 0 : i32
    %c0_i32_0 = arith.constant 0 : i32
    %c0_i32_1 = arith.constant 0 : i32
    return %c0_i32, %c0_i32_0 : i32, i32
  }
  func.func @transform_3(%arg0: i32) -> (i32, i32) {
    %c0_i32 = arith.constant 0 : i32
    %c0_i32_0 = arith.constant 0 : i32
    %c0_i32_1 = arith.constant 0 : i32
    return %c0_i32, %c0_i32_0 : i32, i32
  }
  func.func @transform_4(%arg0: i32) -> (i32, i32) {
    %c0_i32 = arith.constant 0 : i32
    %c0_i32_0 = arith.constant 0 : i32
    %c0_i32_1 = arith.constant 0 : i32
    return %c0_i32, %c0_i32_0 : i32, i32
  }
  func.func @transform_5(%arg0: i32) -> (i32, i32) {
    %c0_i32 = arith.constant 0 : i32
    %c0_i32_0 = arith.constant 0 : i32
    %c0_i32_1 = arith.constant 0 : i32
    return %c0_i32, %c0_i32_0 : i32, i32
  }
  func.func @transform_6(%arg0: i32) -> (i32, i32) {
    %c0_i32 = arith.constant 0 : i32
    %c0_i32_0 = arith.constant 0 : i32
    %c0_i32_1 = arith.constant 0 : i32
    return %c0_i32, %c0_i32_0 : i32, i32
  }
  func.func @transform_7(%arg0: i32) -> (i32, i32) {
    %c0_i32 = arith.constant 0 : i32
    %c0_i32_0 = arith.constant 0 : i32
    %c0_i32_1 = arith.constant 0 : i32
    return %c0_i32, %c0_i32_0 : i32, i32
  }
  func.func @transform_8(%arg0: i32) -> (i32, i32) {
    %c0_i32 = arith.constant 0 : i32
    %c0_i32_0 = arith.constant 0 : i32
    %c0_i32_1 = arith.constant 0 : i32
    return %c0_i32, %c0_i32_0 : i32, i32
  }
  func.func @transform_9(%arg0: i32) -> (i32, i32) {
    %c0_i32 = arith.constant 0 : i32
    %c0_i32_0 = arith.constant 0 : i32
    %c0_i32_1 = arith.constant 0 : i32
    return %c0_i32, %c0_i32_0 : i32, i32
  }
  func.func @transform_10(%arg0: i32) -> (i32, i32) {
    %c0_i32 = arith.constant 0 : i32
    %c0_i32_0 = arith.constant 0 : i32
    %c0_i32_1 = arith.constant 0 : i32
    return %c0_i32, %c0_i32_0 : i32, i32
  }
  func.func @transform_11(%arg0: i32) -> (i32, i32) {
    %c0_i32 = arith.constant 0 : i32
    %c0_i32_0 = arith.constant 0 : i32
    %c0_i32_1 = arith.constant 0 : i32
    return %c0_i32, %c0_i32_0 : i32, i32
  }
  func.func @transform_12(%arg0: i32) -> (i32, i32) {
    %c0_i32 = arith.constant 0 : i32
    %c0_i32_0 = arith.constant 0 : i32
    %c0_i32_1 = arith.constant 0 : i32
    return %c0_i32, %c0_i32_0 : i32, i32
  }
  func.func @transform_13(%arg0: i32) -> (i32, i32) {
    %c0_i32 = arith.constant 0 : i32
    %c0_i32_0 = arith.constant 0 : i32
    %c0_i32_1 = arith.constant 0 : i32
    return %c0_i32, %c0_i32_0 : i32, i32
  }
  func.func @transform_14(%arg0: i32) -> (i32, i32) {
    %c0_i32 = arith.constant 0 : i32
    %c0_i32_0 = arith.constant 0 : i32
    %c0_i32_1 = arith.constant 0 : i32
    return %c0_i32, %c0_i32_0 : i32, i32
  }
  func.func @transform_15(%arg0: i32) -> (i32, i32) {
    %c0_i32 = arith.constant 0 : i32
    %c0_i32_0 = arith.constant 0 : i32
    %c0_i32_1 = arith.constant 0 : i32
    return %c0_i32, %c0_i32_0 : i32, i32
  }
  func.func @transform_16(%arg0: i32) -> (i32, i32) {
    %c0_i32 = arith.constant 0 : i32
    %c0_i32_0 = arith.constant 0 : i32
    %c0_i32_1 = arith.constant 0 : i32
    return %c0_i32, %c0_i32_0 : i32, i32
  }
  func.func @transform_17(%arg0: i32) -> (i32, i32) {
    %c0_i32 = arith.constant 0 : i32
    %c0_i32_0 = arith.constant 0 : i32
    %c0_i32_1 = arith.constant 0 : i32
    return %c0_i32, %c0_i32_0 : i32, i32
  }
  func.func @transform_18(%arg0: i32) -> (i32, i32, i32) {
    %c0_i32 = arith.constant 0 : i32
    %c0_i32_0 = arith.constant 0 : i32
    %c0_i32_1 = arith.constant 0 : i32
    return %arg0, %c0_i32, %c0_i32_0 : i32, i32, i32
  }
}

</mosaic_0001>

<bundles_post_ra>
// kernel: tpu_custom_call.1
= control target key start
LH: loop header
LB: loop body
LE: loop exit
PB: predicated region body
PF: predicated region fallthrough
CT: control target
= control target key end

     0   :  { %s12438_s0 = inlined_call_operand.hbm [shape: f32[2,256,256], index: 0, kind: input, shape index: {}]   ;;  %s12439_s1 = inlined_call_operand.vmem [shape: bf16[2,256,64], index: 1, kind: input, shape index: {}]   ;;  %s12440_s2 = inlined_call_operand.hbm [shape: bf16[64,128], index: 2, kind: input, shape index: {}]   ;;  %s12441_s3 = inlined_call_operand.vmem [shape: f32[1,128], index: 3, kind: input, shape index: {}]   ;;  %s12442_s4 = inlined_call_operand.vmem [shape: bf16[128,256], index: 4, kind: input, shape index: {}]   ;;  %s12443_s5 = inlined_call_operand.vmem [shape: f32[1,256], index: 5, kind: input, shape index: {}]   ;;  %s12444_s6 = inlined_call_operand.vmem [shape: bf16[256,256], index: 6, kind: input, shape index: {}]   ;;  %s12445_s7 = inlined_call_operand.vmem [shape: f32[1,256], index: 7, kind: input, shape index: {}]   ;;  %s12446_s8 = inlined_call_operand.hbm [shape: bf16[256,256], index: 8, kind: input, shape index: {}]   ;;  %s12447_s9 = inlined_call_operand.vmem [shape: f32[1,256], index: 9, kind: input, shape index: {}]   ;;  %s12448_s10 = inlined_call_operand.hbm [shape: bf16[256,256], index: 10, kind: input, shape index: {}]   ;;  %s12449_s11 = inlined_call_operand.vmem [shape: f32[1,256], index: 11, kind: input, shape index: {}]   ;;  %s12450_s12 = inlined_call_operand.hbm [shape: bf16[256,256], index: 12, kind: input, shape index: {}]   ;;  %s12451_s13 = inlined_call_operand.vmem [shape: f32[1,256], index: 13, kind: input, shape index: {}]   ;;  %s12452_s14 = inlined_call_operand.hbm [shape: bf16[256,256], index: 14, kind: input, shape index: {}]   ;;  %s12453_s15 = inlined_call_operand.vmem [shape: f32[1,256], index: 15, kind: input, shape index: {}]   ;;  %s12454_s16 = inlined_call_operand.hbm [shape: bf16[256,256], index: 16, kind: input, shape index: {}]   ;;  %s12455_s17 = inlined_call_operand.vmem [shape: f32[1,256], index: 17, kind: input, shape index: {}]   ;;  %s12456_s18 = inlined_call_operand.hbm [shape: f32[2,512,256], index: 18, kind: output, shape index: {}]  }
   0x1   :  { %12863 = sst [smem:[#allocation354_spill]] %s12438_s0 }
   0x2   :  { %12864 = sst [smem:[#allocation355_spill]] %s12439_s1 }
   0x3   :  { %12865 = sst [smem:[#allocation356_spill]] %s12440_s2 }
   0x4   :  { %12866 = sst [smem:[#allocation357_spill]] %s12443_s5 }
   0x5   :  { %12867 = sst [smem:[#allocation358_spill]] %s12445_s7 }
   0x6   :  { %12868 = sst [smem:[#allocation359_spill]] %s12447_s9 }
   0x7   :  { %12869 = sst [smem:[#allocation360_spill]] %s12449_s11 }
   0x8   :  { %12870 = sst [smem:[#allocation361_spill]] %s12451_s13 }
   0x9   :  { %12871 = sst [smem:[#allocation362_spill]] %s12453_s15 }
   0xa   :  { %12872 = sst [smem:[#allocation363_spill]] %s12455_s17 }
   0xb   :  { %12873 = sst [smem:[#allocation364_spill]] %s12456_s18 }
   0xc   :  { %23 = vsyncpa [#allocation3], 0 }
   0xd   :  { %25 = vsyncpa [#allocation3 + $0x1], 0 }
   0xe   :  { %26 = vsyncpa [#allocation6], 0 }
   0xf   :  { %27 = vsyncpa [#allocation9], 0 }
  0x10   :  { %28 = vsyncpa [#allocation12], 0 }
  0x11   :  { %29 = vsyncpa [#allocation4], 0 }
  0x12   :  { %31 = vsyncpa [#allocation4 + $0x1], 0  ;;  %s8057_s27 = smov 0   ;;  %s8059_s28 = smov 0  }
  0x13   :  { %s8061_s29 = smov 0   ;;  %s8063_s30 = smov 0  }
  0x14 LB: > { %s7944_s0 = smov [#allocation5]   ;;  %s8078_s1 = sadd.s32 4294967295, %s7942_s30   ;;  %s7942_s30 = sphi %s8063_s30, %s13994_s30   ;;  %s7938_s29 = sphi %s8061_s29, %s13993_s29   ;;  %s7934_s28 = sphi %s8059_s28, %s13992_s28   ;;  %s7930_s27 = sphi %s8057_s27, %s13991_s27  }
  0x15   : > { %s468_s19 = sshll.u32 %s7944_s0, 4  ;;  %p6554_p0 = scmp.ge.s32.totalorder %s7942_s30, 1  ;;  %s8083_s19 = int_to_ptr.vmem [resolvable:$true] %s468_s19 }
  0x16   : > { %p12460_p1 = scmp.eq.s32.totalorder %s8078_s1, 0  ;;  %p456_p2 = scmp.lt.s32.totalorder %s7942_s30, 3 }
  0x17   : > { %s7945_s22 = smov [#allocation8]   ;;  %s7946_s23 = smov [#allocation11]  }
  0x18   : > { %p8085_p3 = pnand %p6554_p0, %p456_p2  ;;  %s512_s2 = sshll.u32 %s7945_s22, 4  ;;  %s8098_s2 = int_to_ptr.vmem [resolvable:$true] %s512_s2 }
  0x19   : > { %s8100_s24 = sshll.u32 %s7946_s23, 4  ;;  %s12876_s0 = sld [smem:[#allocation356_spill]]  ;;  %s545_s24 = int_to_ptr.vmem [resolvable:$true] %s8100_s24 }
  0x1a   : > { %s12874_s20 = scalar_select %p8085_p3, 1, 0 }
  0x1b   : > { %p6917_p5 = pneg %p8085_p3 }
  0x1d   : > { %p8094_p6 = pnand %p6917_p5, %p12460_p1 }
  0x1f   : > { %s7666_s18 = scalar_lea.hbm %s12876_s0, 512  ;;  %p8110_p8 = pneg %p8094_p6 }
  0x20   : > { %p7667_p7 = scmp.ne.s32.totalorder %s12876_s0, %s7666_s18  ;;  %p7673_p11 = scmp.lt.u32.totalorder %s7666_s18, %s12876_s0 }
  0x22   : > { %p7669_p9 = pnand %p8110_p8, %p7667_p7 }
  0x24   : > { %p7670_p10 = pneg %p7669_p9 }
  0x26   : > { %p7675_p12 = pnand %p7673_p11, %p7670_p10 }
  0x28   : > { %7678 = shalt.err (!%p7675_p12)
}
  0x29   : > { %s7679_s13 = scalar_lea.vmem %s8083_s19, 512  ;;  %p7687_p5 = scmp.lt.s32.totalorder %s8083_s19, %s8083_s19 }
  0x2a   : > { %p7680_p13 = scmp.ne.s32.totalorder %s8083_s19, %s7679_s13  ;;  %p7688_p4 = scmp.lt.s32.totalorder %s7679_s13, %s7679_s13 }
  0x2c   : > { %p7682_p0 = pnand %p7680_p13, %p8110_p8  ;;  %p7689_p7 = por %p7688_p4, %p7687_p5 }
  0x2e   : > { %p7683_p2 = pneg %p7682_p0 }
  0x30   : > { %p7690_p9 = pnand %p7689_p7, %p7683_p2 }
  0x32   : > { %7693 = shalt.err (!%p7690_p9)
}
  0x33   : > { %s7947_s17 = smov 64   ;;  %s7948_s18 = smov 4  }
  0x34   : > { %6920 = dma.hbm_to_vmem [thread:$0]  (!%p8094_p6), %s12876_s0, 512, %s8083_s19, [#allocation6], %s7947_s17, %s7947_s17, %s7948_s18  }
  0x35   : > { %s7694_s11 = scalar_lea.hbm %s12448_s10, 4096 }
  0x36   : > { %p7695_p4 = scmp.ne.s32.totalorder %s12448_s10, %s7694_s11  ;;  %p7701_p12 = scmp.lt.u32.totalorder %s7694_s11, %s12448_s10 }
  0x38   : > { %p7697_p10 = pnand %p7695_p4, %p8110_p8 }
  0x3a   : > { %p7698_p11 = pneg %p7697_p10 }
  0x3c   : > { %p7703_p13 = pnand %p7701_p12, %p7698_p11 }
  0x3e   : > { %7706 = shalt.err (!%p7703_p13)
}
  0x3f   : > { %s7707_s19 = scalar_lea.vmem %s8098_s2, 4096  ;;  %p7715_p7 = scmp.lt.s32.totalorder %s8098_s2, %s8098_s2 }
  0x40   : > { %p7708_p0 = scmp.ne.s32.totalorder %s8098_s2, %s7707_s19  ;;  %p7716_p9 = scmp.lt.s32.totalorder %s7707_s19, %s7707_s19 }
  0x42   : > { %p7710_p2 = pnand %p7708_p0, %p8110_p8  ;;  %p7717_p4 = por %p7716_p9, %p7715_p7 }
  0x44   : > { %p7711_p5 = pneg %p7710_p2 }
  0x46   : > { %p7718_p10 = pnand %p7717_p4, %p7711_p5 }
  0x48   : > { %7721 = shalt.err (!%p7718_p10)
}
  0x49   : > { %s7949_s7 = smov 128   ;;  %s7950_s5 = smov 8  }
  0x4a   : > { %6926 = dma.hbm_to_vmem [thread:$0]  (!%p8094_p6), %s12448_s10, 4096, %s8098_s2, [#allocation9], %s7949_s7, %s7949_s7, %s7950_s5  }
  0x4b   : > { %s7722_s25 = scalar_lea.hbm %s12452_s14, 4096 }
  0x4c   : > { %p7723_p11 = scmp.ne.s32.totalorder %s12452_s14, %s7722_s25  ;;  %p7729_p0 = scmp.lt.u32.totalorder %s7722_s25, %s12452_s14 }
  0x4e   : > { %p7725_p12 = pnand %p7723_p11, %p8110_p8 }
  0x50   : > { %p7726_p13 = pneg %p7725_p12 }
  0x52   : > { %p7731_p2 = pnand %p7729_p0, %p7726_p13 }
  0x54   : > { %7734 = shalt.err (!%p7731_p2)
}
  0x55   : > { %s7735_s19 = scalar_lea.vmem %s545_s24, 4096  ;;  %p7743_p4 = scmp.lt.s32.totalorder %s545_s24, %s545_s24 }
  0x56   : > { %p7736_p5 = scmp.ne.s32.totalorder %s545_s24, %s7735_s19  ;;  %p7744_p10 = scmp.lt.s32.totalorder %s7735_s19, %s7735_s19 }
  0x58   : > { %p7738_p7 = pnand %p7736_p5, %p8110_p8  ;;  %p7745_p1 = por %p7744_p10, %p7743_p4 }
  0x5a   : > { %p7739_p9 = pneg %p7738_p7 }
  0x5c   : > { %p7746_p3 = pnand %p7745_p1, %p7739_p9 }
  0x5e   : > { %7749 = shalt.err (!%p7746_p3)
}
  0x5f   : > { %6932 = dma.hbm_to_vmem [thread:$0]  (!%p8094_p6), %s12452_s14, 4096, %s545_s24, [#allocation12], %s7949_s7, %s7949_s7, %s7950_s5  }
  0x60   : > { %s7951_s11 = smov [#allocation7]   ;;  %s7952_s18 = smov [#allocation10]  }
  0x61   : > { %s496_s17 = sshll.u32 %s7951_s11, 4  ;;  %s528_s25 = sshll.u32 %s7952_s18, 4  ;;  %s497_s17 = int_to_ptr.vmem [resolvable:$true] %s496_s17  ;;  %s529_s25 = int_to_ptr.vmem [resolvable:$true] %s528_s25 }
  0x62   : > { %s7750_s23 = scalar_lea.hbm %s12446_s8, 4096 }
  0x63   : > { %p7751_p1 = scmp.ne.s32.totalorder %s12446_s8, %s7750_s23  ;;  %p7757_p12 = scmp.lt.u32.totalorder %s7750_s23, %s12446_s8 }
  0x65   : > { %p7753_p3 = pnand %p7751_p1, %p8110_p8 }
  0x67   : > { %p7754_p11 = pneg %p7753_p3 }
  0x69   : > { %p7759_p13 = pnand %p7757_p12, %p7754_p11 }
  0x6b   : > { %7762 = shalt.err (!%p7759_p13)
}
  0x6c   : > { %s7763_s24 = scalar_lea.vmem %s497_s17, 4096  ;;  %p7771_p7 = scmp.lt.s32.totalorder %s497_s17, %s497_s17 }
  0x6d   : > { %p7764_p0 = scmp.ne.s32.totalorder %s497_s17, %s7763_s24  ;;  %p7772_p9 = scmp.lt.s32.totalorder %s7763_s24, %s7763_s24 }
  0x6f   : > { %p7766_p2 = pnand %p7764_p0, %p8110_p8  ;;  %p7773_p4 = por %p7772_p9, %p7771_p7 }
  0x71   : > { %p7767_p5 = pneg %p7766_p2 }
  0x73   : > { %p7774_p10 = pnand %p7773_p4, %p7767_p5 }
  0x75   : > { %7777 = shalt.err (!%p7774_p10)
}
  0x76   : > { %6923 = dma.hbm_to_vmem [thread:$0]  (!%p8094_p6), %s12446_s8, 4096, %s497_s17, [#allocation6], %s7949_s7, %s7949_s7, %s7950_s5  }
  0x77   : > { %s7778_s26 = scalar_lea.hbm %s12450_s12, 4096 }
  0x78   : > { %p7779_p1 = scmp.ne.s32.totalorder %s12450_s12, %s7778_s26  ;;  %p7785_p12 = scmp.lt.u32.totalorder %s7778_s26, %s12450_s12 }
  0x7a   : > { %p7781_p3 = pnand %p7779_p1, %p8110_p8 }
  0x7c   : > { %p7782_p11 = pneg %p7781_p3 }
  0x7e   : > { %p7787_p13 = pnand %p7785_p12, %p7782_p11 }
  0x80   : > { %7790 = shalt.err (!%p7787_p13)
}
  0x81   : > { %s7791_s2 = scalar_lea.vmem %s529_s25, 4096  ;;  %p7799_p7 = scmp.lt.s32.totalorder %s529_s25, %s529_s25 }
  0x82   : > { %p7792_p0 = scmp.ne.s32.totalorder %s529_s25, %s7791_s2  ;;  %p7800_p9 = scmp.lt.s32.totalorder %s7791_s2, %s7791_s2 }
  0x84   : > { %p7794_p2 = pnand %p7792_p0, %p8110_p8  ;;  %p7801_p4 = por %p7800_p9, %p7799_p7 }
  0x86   : > { %p7795_p5 = pneg %p7794_p2 }
  0x88   : > { %p7802_p10 = pnand %p7801_p4, %p7795_p5 }
  0x8a   : > { %7805 = shalt.err (!%p7802_p10)
}
  0x8b   : > { %6929 = dma.hbm_to_vmem [thread:$0]  (!%p8094_p6), %s12450_s12, 4096, %s529_s25, [#allocation9], %s7949_s7, %s7949_s7, %s7950_s5  }
  0x8c   : > { %s7953_s0 = smov [#allocation13]   ;;  %s7806_s26 = scalar_lea.hbm %s12454_s16, 4096 }
  0x8d   : > { %s560_s9 = sshll.u32 %s7953_s0, 4  ;;  %p7807_p1 = scmp.ne.s32.totalorder %s12454_s16, %s7806_s26  ;;  %s561_s9 = int_to_ptr.vmem [resolvable:$true] %s560_s9 }
  0x8e   : > { %p7813_p12 = scmp.lt.u32.totalorder %s7806_s26, %s12454_s16 }
  0x8f   : > { %p7809_p3 = pnand %p7807_p1, %p8110_p8 }
  0x91   : > { %p7810_p11 = pneg %p7809_p3 }
  0x93   : > { %p7815_p13 = pnand %p7813_p12, %p7810_p11 }
  0x95   : > { %7818 = shalt.err (!%p7815_p13)
}
  0x96   : > { %s7819_s25 = scalar_lea.vmem %s561_s9, 4096  ;;  %p7827_p7 = scmp.lt.s32.totalorder %s561_s9, %s561_s9 }
  0x97   : > { %p7820_p0 = scmp.ne.s32.totalorder %s561_s9, %s7819_s25  ;;  %p7828_p9 = scmp.lt.s32.totalorder %s7819_s25, %s7819_s25 }
  0x99   : > { %p7822_p2 = pnand %p7820_p0, %p8110_p8  ;;  %p7829_p4 = por %p7828_p9, %p7827_p7 }
  0x9b   : > { %p7823_p5 = pneg %p7822_p2 }
  0x9d   : > { %p7830_p10 = pnand %p7829_p4, %p7823_p5 }
  0x9f   : > { %7833 = shalt.err (!%p7830_p10)
}
  0xa0   : > { %6935 = dma.hbm_to_vmem [thread:$0]  (!%p8094_p6), %s12454_s16, 4096, %s561_s9, [#allocation12], %s7949_s7, %s7949_s7, %s7950_s5  }
  0xa1   : > { %s6553_s15 = sadd.s32 4294967294, %s7942_s30   ;;  %s8244_s21 = sadd.s32 1, %s7942_s30  }
  0xa2   : > { %s41_s24 = ssub.s32 %s7942_s30, %s8244_s21  ;;  %s44_s0 = sadd.s32 1, %s7938_s29 }
  0xa3   : > { %p42_p8 = scmp.eq.s32.totalorder %s41_s24, 0  ;;  %p51_p1 = scmp.ne.s32.totalorder %s7938_s29, %s7934_s28 }
  0xa4   : > { %p52_p3 = scmp.eq.s32.totalorder %s7942_s30, 0  ;;  %p57_p11 = scmp.ne.s32.totalorder %s7934_s28, %s7930_s27 }
  0xa5   : > { %s8255_s11 = scalar_select %p42_p8, %s7938_s29, %s44_s0  }
  0xa6   : > { %p8257_p12 = por %p52_p3, %p51_p1  ;;  %p12879_p13 = scmp.eq.s32.totalorder %s8078_s1, 0 }
  0xa7   : > { %p443_p0 = scmp.eq.s32.totalorder %s8078_s1, 1  ;;  %p449_p2 = scmp.eq.s32.totalorder %s6553_s15, 1 }
  0xa8   : > { %p8263_p6 = por %p12879_p13, %p57_p11  ;;  %p6950_p5 = scmp.lt.s32.totalorder %s7942_s30, 2 }
  0xa9   : > { %s577_s5 = sand.u32 1, %s7938_s29   ;;  %p8270_p7 = por %p443_p0, %p51_p1 }
  0xaa   : > { %p8274_p9 = por %p449_p2, %p57_p11  ;;  %s6562_s22 = sshll.u32 %s577_s5, 9 }
  0xab   : > { %s12881_s9 = scalar_select %p8270_p7, 1, 0 }
  0xac   : > { %s12882_s26 = scalar_select %p8274_p9, 1, 0 }
  0xad   : > { %s6826_s23 = sshll.u32 %s7942_s30, 13  ;;  %s12883_s25 = sld [smem:[#allocation354_spill]] }
  0xae   : > { %s581_s17 = scalar_lea.vmem [#allocation2], %s6562_s22  ;;  %p8288_p4 = pnand %p6950_p5, %p8257_p12 }
  0xaf   : > { %s588_s15 = sshll.u32 %s581_s17, 4  ;;  %s8292_s0 = scalar_lea.sflag [#allocation3], %s577_s5  ;;  %s8284_s15 = int_to_ptr.vmem [resolvable:$true] %s588_s15 }
  0xb0   : > { %p7836_p8 = pneg %p8288_p4 }
  0xb3   : > { %s8282_s2 = scalar_lea.hbm %s12883_s25, %s6826_s23  ;;  %s7839_s18 = scalar_lea.hbm %s12883_s25, 16384 }
  0xb4   : > { %s7834_s13 = scalar_lea.hbm %s8282_s2, 8192  ;;  %p7840_p11 = scmp.lt.u32.totalorder %s8282_s2, %s12883_s25 }
  0xb5   : > { %p7835_p10 = scmp.ne.s32.totalorder %s8282_s2, %s7834_s13  ;;  %p7841_p12 = scmp.lt.u32.totalorder %s7839_s18, %s7834_s13 }
  0xb6   : > { %p7843_p0 = scmp.lt.u32.totalorder %s7834_s13, %s8282_s2 }
  0xb7   : > { %p7837_p1 = pnand %p7836_p8, %p7835_p10  ;;  %p7842_p13 = por %p7841_p12, %p7840_p11 }
  0xb9   : > { %p7838_p3 = pneg %p7837_p1  ;;  %p7844_p2 = por %p7843_p0, %p7842_p13 }
  0xbb   : > { %p7845_p5 = pnand %p7844_p2, %p7838_p3 }
  0xbd   : > { %7848 = shalt.err (!%p7845_p5)
}
  0xbe   : > { %s7849_s5 = scalar_lea.vmem %s8284_s15, 8192  ;;  %s7954_s22 = smov [#allocation2]  }
  0xbf   : > { %p7850_p10 = scmp.ne.s32.totalorder %s8284_s15, %s7849_s5  ;;  %s7854_s23 = sshll.u32 %s7954_s22, 4  ;;  %s7855_s23 = int_to_ptr.vmem [resolvable:$false] %s7854_s23 }
  0xc0   : > { %s7856_s19 = scalar_lea.vmem %s7855_s23, 16384  ;;  %p7857_p7 = scmp.lt.s32.totalorder %s8284_s15, %s7855_s23 }
  0xc1   : > { %p7852_p1 = pnand %p7850_p10, %p7836_p8  ;;  %p7858_p11 = scmp.lt.s32.totalorder %s7856_s19, %s7849_s5 }
  0xc3   : > { %p7853_p9 = pneg %p7852_p1  ;;  %p7859_p12 = por %p7858_p11, %p7857_p7 }
  0xc5   : > { %p7860_p13 = pnand %p7859_p12, %p7853_p9 }
  0xc7   : > { %7863 = shalt.err (!%p7860_p13)
}
  0xc8   : > { %s7955_s13 = smov 256   ;;  %s7956_s18 = smov 16  }
  0xc9   : > { %6939 = dma.hbm_to_vmem [thread:$0]  (!%p8288_p4), %s8282_s2, 8192, %s8284_s15, %s8292_s0, %s7955_s13, %s7955_s13, %s7956_s18  }
  0xca   : > { %p12885_p8 = scmp.ne.s32.totalorder %s12874_s20, 0 }
  0xcc   : > { %608 = sbr.rel (%p12885_p8) target bundleno = 2781 (0xadd), region = 92 }
  0xd3   : > { %s8323_s17 = sand.u32 1, %s7934_s28  }
  0xd4   : > { %s6566_s5 = sshll.u32 %s8323_s17, 9  ;;  %s611_s22 = scalar_lea.sflag [#allocation3], %s8323_s17 }
  0xd5   : > { %s8327_s23 = scalar_lea.vmem [#allocation2], %s6566_s5 }
  0xd6   : > { %7909 = dma.done.wait (%p8263_p6), %s611_s22, 8192  }
  0xd7   : > { %7911 = vsyncadd (%p8263_p6), %s611_s22, 4294959104  ;;  %p12886_p7 = scmp.eq.s32.totalorder %s8078_s1, 0 }
  0xd9   : > { %7913 = dma.done.wait (%p12886_p7), [#allocation6], 4608   ;;  %p12887_p9 = pmov %p12886_p7 }
  0xda   : > { %p12888_p4 = pmov %p12886_p7 }
  0xdb   : > { %7915 = vsyncadd (%p12887_p9), [#allocation6], 4294962688 }
  0xdc   : > { %7917 = dma.done.wait (%p12888_p4), [#allocation9], 8192   ;;  %p12889_p3 = pmov %p12888_p4 }
  0xde   : > { %7919 = vsyncadd (%p12889_p3), [#allocation9], 4294959104  ;;  %p12890_p0 = pmov %p12889_p3 }
  0xe0   : > { %7921 = dma.done.wait (%p12890_p0), [#allocation12], 8192   ;;  %p12891_p2 = pmov %p12890_p0 }
  0xe1   : > { %p696_p6 = scmp.lt.s32.totalorder %s8078_s1, 1  ;;  %v7006_v0 = vld [vmem:[#allocation5] sm:$0xff]   ;;  %v7007_v1 = vld [vmem:[#allocation5 + $0x8] sm:$0xff]   ;;  %s12892_s24 = sld [smem:[#allocation355_spill]]  ;;  %v7008_v2 = vld [vmem:[#allocation5 + $0x10] sm:$0xff]   ;;  %vm950_vm0 = vcmask 523264  }
  0xe2   : > { %7923 = vsyncadd (%p12891_p2), [#allocation12], 4294959104  ;;  %6849 = vmatprep.subr.bf16.mxu0 %v7006_v0  ;;  %v7009_v4 = vld [vmem:[#allocation5 + $0x18] sm:$0xff]   ;;  %v7026_v7 = vld [vmem:[%s12442_s4 + $0x4] ss:$8 sps:$4 sm:$0xff]   ;;  %v7957_v36 = vmov 0  }
  0xe3   : > { %s697_s20 = scalar_select %p696_p6, %s8078_s1, 1  ;;  %6850 = vmatpush3.bf16.msra.mxu0 %v7006_v0  ;;  %v7028_v8 = vld [vmem:[%s12442_s4] ss:$8 sps:$4 sm:$0xff]   ;;  %1316 = vmatprep.subr.bf16.mxu1 %v7026_v7  ;;  %v7029_v10 = vld [vmem:[%s12442_s4 + $0x14] ss:$8 sps:$4 sm:$0xff]  }
  0xe4   : > { %6851 = vmatprep.subr.bf16.mxu0 %v7007_v1  ;;  %1317 = vmatpush1.bf16.msra.mxu1 %v7028_v8  ;;  %v7031_v12 = vld [vmem:[%s12442_s4 + $0x10] ss:$8 sps:$4 sm:$0xff]   ;;  %v7032_v13 = vld [vmem:[%s12442_s4 + $0x24] ss:$8 sps:$4 sm:$0xff]   ;;  %v7034_v14 = vld [vmem:[%s12442_s4 + $0x20] ss:$8 sps:$4 sm:$0xff]  }
  0xe5   : > { %s6827_s7 = sshll.u32 %s697_s20, 7  ;;  %1318 = vmatprep.subr.bf16.mxu1 %v7029_v10  ;;  %v7035_v15 = vld [vmem:[%s12442_s4 + $0x34] ss:$8 sps:$4 sm:$0xff]   ;;  %v7037_v18 = vld [vmem:[%s12442_s4 + $0x30] ss:$8 sps:$4 sm:$0xff]   ;;  %1348 = vmatprep.mubr.bf16.mxu1 %v7957_v36  ;;  %s12893_s5 = sld [smem:[#allocation357_spill]] }
  0xe6   : > { %v7038_v19 = vld [vmem:[%s12442_s4 + $0x44] ss:$8 sps:$4 sm:$0xff]   ;;  %v7040_v20 = vld [vmem:[%s12442_s4 + $0x40] ss:$8 sps:$4 sm:$0xff]   ;;  %v7041_v21 = vld [vmem:[%s12442_s4 + $0x54] ss:$8 sps:$4 sm:$0xff]  }
  0xe7   : > { %s8350_s0 = scalar_lea.vmem %s12892_s24, %s6827_s7  ;;  %6852 = vmatpush3.bf16.msra.mxu0 %v7007_v1  ;;  %v7043_v24 = vld [vmem:[%s12442_s4 + $0x50] ss:$8 sps:$4 sm:$0xff]   ;;  %v7044_v32 = vld [vmem:[%s12442_s4 + $0x64] ss:$8 sps:$4 sm:$0xff]   ;;  %v7046_v33 = vld [vmem:[%s12442_s4 + $0x60] ss:$8 sps:$4 sm:$0xff]  }
  0xe8   : > { %v7010_v3 = vld [vmem:[%s8350_s0] sm:$0xff]   ;;  %6853 = vmatprep.subr.bf16.mxu0 %v7008_v2  ;;  %v7011_v5 = vld [vmem:[%s8350_s0 + $0x8] sm:$0xff]   ;;  %v7012_v6 = vld [vmem:[%s8350_s0 + $0x10] sm:$0xff]   ;;  %1319 = vmatpush1.bf16.msra.mxu1 %v7031_v12  ;;  %s12959_s7 = sld [smem:[#allocation358_spill]]  ;;  %s12960_s24 = sld [smem:[#allocation359_spill]] }
  0xe9   : > { %6857 = vmatprep.mubr.msk.bf16.mxu0 %vm950_vm0, %v7010_v3  ;;  %v7013_v9 = vld [vmem:[%s8350_s0 + $0x18] sm:$0xff]   ;;  %v7014_v11 = vld [vmem:[%s8350_s0 + $0x20] sm:$0xff]   ;;  %v7015_v16 = vld [vmem:[%s8350_s0 + $0x28] sm:$0xff]   ;;  %1320 = vmatprep.subr.bf16.mxu1 %v7032_v13  ;;  %s13141_s22 = sld [smem:[#allocation362_spill]]  ;;  %s13148_s2 = sld [smem:[#allocation361_spill]] }
  0xea   : > { %v7016_v17 = vld [vmem:[%s8350_s0 + $0x30] sm:$0xff]   ;;  %v7017_v22 = vld [vmem:[%s8350_s0 + $0x38] sm:$0xff]   ;;  %v7018_v23 = vld [vmem:[%s8350_s0 + $0x40] sm:$0xff]   ;;  %s13288_s19 = sld [smem:[#allocation363_spill]]  ;;  %s6573_s13 = sshll.u32 %s8323_s17, 10 }
  0xeb   : > { %6854 = vmatpush3.bf16.msra.mxu0 %v7008_v2  ;;  %v7019_v25 = vld [vmem:[%s8350_s0 + $0x48] sm:$0xff]   ;;  %v7020_v26 = vld [vmem:[%s8350_s0 + $0x50] sm:$0xff]   ;;  %v7021_v27 = vld [vmem:[%s8350_s0 + $0x58] sm:$0xff]   ;;  %s13987_s20 = sld [smem:[#allocation364_spill]]  ;;  %p13988_p10 = scmp.ne.s32.totalorder %s12881_s9, 0 }
  0xec   : > { %6855 = vmatprep.subr.bf16.mxu0 %v7009_v4  ;;  %1321 = vmatpush1.bf16.msra.mxu1 %v7034_v14  ;;  %v7022_v28 = vld [vmem:[%s8350_s0 + $0x60] sm:$0xff]   ;;  %v7023_v29 = vld [vmem:[%s8350_s0 + $0x68] sm:$0xff]   ;;  %v7024_v30 = vld [vmem:[%s8350_s0 + $0x70] sm:$0xff]   ;;  %s7959_s15 = smov [#allocation14]  }
  0xed   : > { %1322 = vmatprep.subr.bf16.mxu1 %v7035_v15  ;;  %v7025_v31 = vld [vmem:[%s8350_s0 + $0x78] sm:$0xff]   ;;  %v8436_v37 = vld [vmem:[%s12441_s3] ss:$0 sm:$0xff]  ;;  %v7052_v44 = vld [vmem:[%s12444_s6 + $0x4] ss:$8 sps:$4 sm:$0xff]   ;;  %s13075_s0 = sld [smem:[#allocation360_spill]] }
  0xee   : > { %v7047_v34 = vld [vmem:[%s12442_s4 + $0x74] ss:$8 sps:$4 sm:$0xff]   ;;  %v7049_v35 = vld [vmem:[%s12442_s4 + $0x70] ss:$8 sps:$4 sm:$0xff]   ;;  %v7050_v43 = vld [vmem:[%s12444_s6] ss:$8 sps:$4 sm:$0xff]  }
  0xef   : > { %6856 = vmatpush3.bf16.msra.mxu0 %v7009_v4  ;;  %v7055_v47 = vld [vmem:[#allocation7 + $0x4] ss:$8 sps:$4 sm:$0xff]   ;;  %v7058_v49 = vld [vmem:[%s12444_s6 + $0x14] ss:$8 sps:$4 sm:$0xff]   ;;  %v7056_v52 = vld [vmem:[%s12444_s6 + $0x10] ss:$8 sps:$4 sm:$0xff]  }
  0xf0   : > { %1323 = vmatpush1.bf16.msra.mxu1 %v7037_v18  ;;  %2001 = vmatprep.subr.bf16.mxu0 %v7052_v44  ;;  %v7064_v55 = vld [vmem:[%s12444_s6 + $0x24] ss:$8 sps:$4 sm:$0xff]   ;;  %v7053_v57 = vld [vmem:[#allocation7] ss:$8 sps:$4 sm:$0xff]   ;;  %v7061_v60 = vld [vmem:[#allocation7 + $0x14] ss:$8 sps:$4 sm:$0xff]  }
  0xf1   : > { %1324 = vmatprep.subr.bf16.mxu1 %v7038_v19  ;;  %v7062_v63 = vld [vmem:[%s12444_s6 + $0x20] ss:$8 sps:$4 sm:$0xff]   ;;  %v7070_v2 = vld [vmem:[%s12444_s6 + $0x34] ss:$8 sps:$4 sm:$0xff]   ;;  %v7076_v13 = vld [vmem:[%s12444_s6 + $0x44] ss:$8 sps:$4 sm:$0xff]  }
  0xf2   : > { %6858 = vmatmul.mubr.msk.bf16.vlgmr.msra.gmra.mrb[0].mxu0 %vm950_vm0, %v7011_v5  ;;  %v7065_v15 = vld [vmem:[#allocation7 + $0x20] ss:$8 sps:$4 sm:$0xff]   ;;  %v7073_v18 = vld [vmem:[#allocation7 + $0x34] ss:$8 sps:$4 sm:$0xff]  }
  0xf3   : > { %6861 = vmatprep.mubr.msk.bf16.mxu0 %vm950_vm0, %v7012_v6  ;;  %2002 = vmatpush1.bf16.msra.mxu0 %v7050_v43  ;;  %v7059_v6 = vld [vmem:[#allocation7 + $0x10] ss:$8 sps:$4 sm:$0xff]  }
  0xf4   : > { %1325 = vmatpush1.bf16.msra.mxu1 %v7040_v20  ;;  %2003 = vmatprep.subr.bf16.mxu0 %v7058_v49 }
  0xf5   : > { %1326 = vmatprep.subr.bf16.mxu1 %v7041_v21  ;;  %v7074_v21 = vld [vmem:[%s12444_s6 + $0x40] ss:$8 sps:$4 sm:$0xff]  }
  0xf7   : > { %2004 = vmatpush1.bf16.msra.mxu0 %v7056_v52  ;;  %v7083_v52 = vld [vmem:[#allocation7 + $0x50] ss:$8 sps:$4 sm:$0xff]  }
  0xf8   : > { %1327 = vmatpush1.bf16.msra.mxu1 %v7043_v24  ;;  %2005 = vmatprep.subr.bf16.mxu0 %v7064_v55  ;;  %v7082_v24 = vld [vmem:[%s12444_s6 + $0x54] ss:$8 sps:$4 sm:$0xff]   ;;  %v7091_v55 = vld [vmem:[#allocation7 + $0x64] ss:$8 sps:$4 sm:$0xff]  }
  0xf9   : > { %1328 = vmatprep.subr.bf16.mxu1 %v7044_v32 }
  0xfa   : > { %6862 = vmatmul.mubr.msk.bf16.gmra.mrb[4].mxu0 %vm950_vm0, %v7013_v9  ;;  %v7067_v9 = vld [vmem:[#allocation7 + $0x24] ss:$8 sps:$4 sm:$0xff]  }
  0xfb   : > { %6865 = vmatprep.mubr.msk.bf16.mxu0 %vm950_vm0, %v7014_v11  ;;  %2006 = vmatpush1.bf16.msra.mxu0 %v7062_v63  ;;  %v7068_v11 = vld [vmem:[%s12444_s6 + $0x30] ss:$8 sps:$4 sm:$0xff]  }
  0xfc   : > { %1329 = vmatpush1.bf16.msra.mxu1 %v7046_v33  ;;  %2007 = vmatprep.subr.bf16.mxu0 %v7070_v2  ;;  %v7080_v33 = vld [vmem:[%s12444_s6 + $0x50] ss:$8 sps:$4 sm:$0xff]  }
  0xfd   : > { %1330 = vmatprep.subr.bf16.mxu1 %v7047_v34 }
  0xff   : > { %2008 = vmatpush1.bf16.msra.mxu0 %v7068_v11 }
 0x100   : > { %1331 = vmatpush1.bf16.msra.mxu1 %v7049_v35  ;;  %2009 = vmatprep.subr.bf16.mxu0 %v7076_v13  ;;  %v7088_v35 = vld [vmem:[%s12444_s6 + $0x64] ss:$8 sps:$4 sm:$0xff]  }
 0x101   : > { %2430 = vmatprep.subr.bf16.mxu1 %v7055_v47  ;;  %v7103_v13 = vld [vmem:[#allocation7 + $0x84] ss:$8 sps:$4 sm:$0xff]  }
 0x102   : > { %6866 = vmatmul.mubr.msk.bf16.gmra.mrb[8].mxu0 %vm950_vm0, %v7015_v16 }
 0x103   : > { %6869 = vmatprep.mubr.msk.bf16.mxu0 %vm950_vm0, %v7016_v17  ;;  %2010 = vmatpush1.bf16.msra.mxu0 %v7074_v21 }
 0x104   : > { %2011 = vmatprep.subr.bf16.mxu0 %v7082_v24 }
 0x107   : > { %2012 = vmatpush1.bf16.msra.mxu0 %v7080_v33 }
 0x108   : > { %2013 = vmatprep.subr.bf16.mxu0 %v7088_v35  ;;  %v7115_v35 = vld [vmem:[#allocation7 + $0xa4] ss:$8 sps:$4 sm:$0xff]  }
 0x10a   : > { %6870 = vmatmul.mubr.msk.bf16.gmra.mrb[12].mxu0 %vm950_vm0, %v7017_v22 }
 0x10b   : > { %6873 = vmatprep.mubr.msk.bf16.mxu0 %vm950_vm0, %v7018_v23 }
 0x112   : > { %6874 = vmatmul.mubr.msk.bf16.gmra.mrb[16].mxu0 %vm950_vm0, %v7019_v25 }
 0x113   : > { %6877 = vmatprep.mubr.msk.bf16.mxu0 %vm950_vm0, %v7020_v26 }
 0x11a   : > { %6878 = vmatmul.mubr.msk.bf16.gmra.mrb[20].mxu0 %vm950_vm0, %v7021_v27 }
 0x11b   : > { %6881 = vmatprep.mubr.msk.bf16.mxu0 %vm950_vm0, %v7022_v28  ;;  %v7071_v28 = vld [vmem:[#allocation7 + $0x30] ss:$8 sps:$4 sm:$0xff]  }
 0x122   : > { %6882 = vmatmul.mubr.msk.bf16.gmra.mrb[24].mxu0 %vm950_vm0, %v7023_v29 }
 0x123   : > { %6885 = vmatprep.mubr.msk.bf16.mxu0 %vm950_vm0, %v7024_v30 }
 0x12a   : > { %6886 = vmatmul.mubr.msk.bf16.gmra.mrb[28].mxu0 %vm950_vm0, %v7025_v31  ;;  %v7079_v31 = vld [vmem:[#allocation7 + $0x44] ss:$8 sps:$4 sm:$0xff]  }
 0x1c5   : > { %v6859_v38 = vpop.f32.mrb[0].mxu0 }
 0x1c6   : > { %v1042_v39 = vadd.f32 %v6859_v38, %v8436_v37  ;;  %v1033_v40 = vpop.f32.mrb[1].mxu0 }
 0x1c7   : > { %v1034_v41 = vadd.f32 %v8436_v37, %v1033_v40  ;;  %v6860_v42 = vpop.f32.mrb[2].mxu0 }
 0x1c8   : > { %v1045_v45 = vadd.f32 %v6860_v42, %v8436_v37  ;;  %v1036_v46 = vpop.f32.mrb[3].mxu0  ;;  %v1162_v50 = vmax.f32 %v1042_v39, 0.0  ;;  %v7077_v39 = vld [vmem:[#allocation7 + $0x40] ss:$8 sps:$4 sm:$0xff]   ;;  %v7085_v42 = vld [vmem:[#allocation7 + $0x54] ss:$8 sps:$4 sm:$0xff]  }
 0x1c9   : > { %v1037_v48 = vadd.f32 %v8436_v37, %v1036_v46  ;;  %v1160_v53 = vmax.f32 %v1034_v41, 0.0 }
 0x1ca   : > { %v1163_v51 = vmax.f32 %v1045_v45, 0.0  ;;  %v7086_v45 = vld [vmem:[%s12444_s6 + $0x60] ss:$8 sps:$4 sm:$0xff]  }
 0x1cb   : > { %v1161_v54 = vmax.f32 %v1037_v48, 0.0  ;;  %v7094_v48 = vld [vmem:[%s12444_s6 + $0x74] ss:$8 sps:$4 sm:$0xff]   ;;  %2014 = vmatpush1.bf16.msra.mxu0 %v7086_v45 }
 0x1cc   : > { %v1193_v56 = vpack.c.bf16 %v1163_v51, %v1162_v50  ;;  %2015 = vmatprep.subr.bf16.mxu0 %v7094_v48 }
 0x1cd   : > { %v1192_v58 = vpack.c.bf16 %v1161_v54, %v1160_v53  ;;  %v6863_v59 = vpop.f32.mrb[4].mxu0 }
 0x1ce   : > { %v1058_v61 = vadd.f32 %v6863_v59, %v8436_v37  ;;  %v1049_v62 = vpop.f32.mrb[5].mxu0  ;;  %v7100_v59 = vld [vmem:[%s12444_s6 + $0x84] ss:$8 sps:$4 sm:$0xff]  }
 0x1cf   : > { %1349 = vmatmul.mubr.bf16.vlgmr.msra.gmra.mrb[0].mxu1 %v1192_v58  ;;  %v1050_v0 = vadd.f32 %v8436_v37, %v1049_v62  ;;  %v6864_v1 = vpop.f32.mrb[6].mxu0 }
 0x1d0   : > { %v1166_v3 = vmax.f32 %v1058_v61, 0.0  ;;  %v1061_v4 = vadd.f32 %v6864_v1, %v8436_v37  ;;  %v1052_v5 = vpop.f32.mrb[7].mxu0  ;;  %1358 = vmatprep.mubr.bf16.mxu1 %v7957_v36  ;;  %2431 = vmatpush1.bf16.msra.mxu1 %v7053_v57  ;;  %v7092_v57 = vld [vmem:[%s12444_s6 + $0x70] ss:$8 sps:$4 sm:$0xff]   ;;  %v7089_v61 = vld [vmem:[#allocation7 + $0x60] ss:$8 sps:$4 sm:$0xff]  }
 0x1d1   : > { %v1164_v7 = vmax.f32 %v1050_v0, 0.0  ;;  %v1053_v8 = vadd.f32 %v8436_v37, %v1052_v5  ;;  %2432 = vmatprep.subr.bf16.mxu1 %v7061_v60  ;;  %v7097_v0 = vld [vmem:[#allocation7 + $0x74] ss:$8 sps:$4 sm:$0xff]   ;;  %2016 = vmatpush1.bf16.msra.mxu0 %v7092_v57  ;;  %v7119_v57 = vld [vmem:[#allocation7 + $0xb0] ss:$8 sps:$4 sm:$0xff]  }
 0x1d2   : > { %v1167_v10 = vmax.f32 %v1061_v4, 0.0  ;;  %2017 = vmatprep.subr.bf16.mxu0 %v7100_v59 }
 0x1d3   : > { %v1165_v12 = vmax.f32 %v1053_v8, 0.0 }
 0x1d4   : > { %v8474_v14 = vpack.c.bf16 %v1167_v10, %v1166_v3  ;;  %2433 = vmatpush1.bf16.msra.mxu1 %v7059_v6  ;;  %v7098_v3 = vld [vmem:[%s12444_s6 + $0x80] ss:$8 sps:$4 sm:$0xff]   ;;  %v7106_v6 = vld [vmem:[%s12444_s6 + $0x94] ss:$8 sps:$4 sm:$0xff]   ;;  %v7095_v10 = vld [vmem:[#allocation7 + $0x70] ss:$8 sps:$4 sm:$0xff]  }
 0x1d5   : > { %v1194_v16 = vpack.c.bf16 %v1165_v12, %v1164_v7  ;;  %v6867_v17 = vpop.f32.mrb[8].mxu0  ;;  %2434 = vmatprep.subr.bf16.mxu1 %v7067_v9  ;;  %2018 = vmatpush1.bf16.msra.mxu0 %v7098_v3 }
 0x1d6   : > { %v1074_v19 = vadd.f32 %v6867_v17, %v8436_v37  ;;  %v1065_v20 = vpop.f32.mrb[9].mxu0  ;;  %2019 = vmatprep.subr.bf16.mxu0 %v7106_v6  ;;  %v7112_v17 = vld [vmem:[%s12444_s6 + $0xa4] ss:$8 sps:$4 sm:$0xff]  }
 0x1d7   : > { %1359 = vmatmul.mubr.bf16.gmra.mrb[4].mxu1 %v1193_v56  ;;  %v1066_v22 = vadd.f32 %v8436_v37, %v1065_v20  ;;  %v6868_v23 = vpop.f32.mrb[10].mxu0 }
 0x1d8   : > { %1368 = vmatprep.mubr.bf16.mxu1 %v7957_v36  ;;  %v1170_v25 = vmax.f32 %v1074_v19, 0.0  ;;  %v1077_v26 = vadd.f32 %v6868_v23, %v8436_v37  ;;  %v1068_v27 = vpop.f32.mrb[11].mxu0  ;;  %2435 = vmatpush1.bf16.msra.mxu1 %v7065_v15  ;;  %v7104_v15 = vld [vmem:[%s12444_s6 + $0x90] ss:$8 sps:$4 sm:$0xff]   ;;  %v7101_v19 = vld [vmem:[#allocation7 + $0x80] ss:$8 sps:$4 sm:$0xff]  }
 0x1d9   : > { %v1168_v29 = vmax.f32 %v1066_v22, 0.0  ;;  %v1069_v30 = vadd.f32 %v8436_v37, %v1068_v27  ;;  %2436 = vmatprep.subr.bf16.mxu1 %v7073_v18  ;;  %v7109_v22 = vld [vmem:[#allocation7 + $0x94] ss:$8 sps:$4 sm:$0xff]   ;;  %2020 = vmatpush1.bf16.msra.mxu0 %v7104_v15 }
 0x1da   : > { %v1171_v32 = vmax.f32 %v1077_v26, 0.0  ;;  %2021 = vmatprep.subr.bf16.mxu0 %v7112_v17 }
 0x1db   : > { %v1169_v34 = vmax.f32 %v1069_v30, 0.0 }
 0x1dc   : > { %v8493_v38 = vpack.c.bf16 %v1171_v32, %v1170_v25  ;;  %2437 = vmatpush1.bf16.msra.mxu1 %v7071_v28  ;;  %v7110_v25 = vld [vmem:[%s12444_s6 + $0xa0] ss:$8 sps:$4 sm:$0xff]   ;;  %v7118_v28 = vld [vmem:[%s12444_s6 + $0xb4] ss:$8 sps:$4 sm:$0xff]   ;;  %v7107_v32 = vld [vmem:[#allocation7 + $0x90] ss:$8 sps:$4 sm:$0xff]  }
 0x1dd   : > { %v8495_v40 = vpack.c.bf16 %v1169_v34, %v1168_v29  ;;  %v6871_v41 = vpop.f32.mrb[12].mxu0  ;;  %2438 = vmatprep.subr.bf16.mxu1 %v7079_v31  ;;  %2022 = vmatpush1.bf16.msra.mxu0 %v7110_v25  ;;  %v7148_v25 = vld [vmem:[#allocation8 + $0x4] ss:$8 sps:$4 sm:$0xff]  }
 0x1de   : > { %v1090_v43 = vadd.f32 %v6871_v41, %v8436_v37  ;;  %v1081_v44 = vpop.f32.mrb[13].mxu0  ;;  %2023 = vmatprep.subr.bf16.mxu0 %v7118_v28 }
 0x1df   : > { %1369 = vmatmul.mubr.bf16.gmra.mrb[8].mxu1 %v1194_v16  ;;  %v1082_v46 = vadd.f32 %v8436_v37, %v1081_v44  ;;  %v6872_v47 = vpop.f32.mrb[14].mxu0  ;;  %v7113_v44 = vld [vmem:[#allocation7 + $0xa0] ss:$8 sps:$4 sm:$0xff]  }
 0x1e0   : > { %1378 = vmatprep.mubr.bf16.mxu1 %v7957_v36  ;;  %v1174_v49 = vmax.f32 %v1090_v43, 0.0  ;;  %v1093_v50 = vadd.f32 %v6872_v47, %v8436_v37  ;;  %v1084_v51 = vpop.f32.mrb[15].mxu0  ;;  %2439 = vmatpush1.bf16.msra.mxu1 %v7077_v39  ;;  %v7121_v47 = vld [vmem:[#allocation7 + $0xb4] ss:$8 sps:$4 sm:$0xff]  }
 0x1e1   : > { %v1172_v53 = vmax.f32 %v1082_v46, 0.0  ;;  %v1085_v54 = vadd.f32 %v8436_v37, %v1084_v51  ;;  %2440 = vmatprep.subr.bf16.mxu1 %v7085_v42  ;;  %v7124_v42 = vld [vmem:[%s12444_s6 + $0xc4] ss:$8 sps:$4 sm:$0xff]  }
 0x1e2   : > { %v1175_v56 = vmax.f32 %v1093_v50, 0.0  ;;  %v7122_v50 = vld [vmem:[%s12444_s6 + $0xc0] ss:$8 sps:$4 sm:$0xff]  }
 0x1e3   : > { %v1173_v58 = vmax.f32 %v1085_v54, 0.0 }
 0x1e4   : > { %v8514_v60 = vpack.c.bf16 %v1175_v56, %v1174_v49  ;;  %2441 = vmatpush1.bf16.msra.mxu1 %v7083_v52 }
 0x1e5   : > { %v8516_v62 = vpack.c.bf16 %v1173_v58, %v1172_v53  ;;  %v6875_v63 = vpop.f32.mrb[16].mxu0  ;;  %2442 = vmatprep.subr.bf16.mxu1 %v7091_v55  ;;  %v7130_v53 = vld [vmem:[%s12444_s6 + $0xd4] ss:$8 sps:$4 sm:$0xff]  }
 0x1e6   : > { %v1106_v1 = vadd.f32 %v6875_v63, %v8436_v37  ;;  %v1097_v2 = vpop.f32.mrb[17].mxu0  ;;  %v7128_v63 = vld [vmem:[%s12444_s6 + $0xd0] ss:$8 sps:$4 sm:$0xff]  }
 0x1e7   : > { %1379 = vmatmul.mubr.bf16.gmra.mrb[12].mxu1 %v8474_v14  ;;  %v1098_v4 = vadd.f32 %v8436_v37, %v1097_v2  ;;  %v6876_v5 = vpop.f32.mrb[18].mxu0  ;;  %v7125_v2 = vld [vmem:[#allocation7 + $0xc0] ss:$8 sps:$4 sm:$0xff]  }
 0x1e8   : > { %1388 = vmatprep.mubr.bf16.mxu1 %v7957_v36  ;;  %v1178_v7 = vmax.f32 %v1106_v1, 0.0  ;;  %v1109_v8 = vadd.f32 %v6876_v5, %v8436_v37  ;;  %v1100_v9 = vpop.f32.mrb[19].mxu0  ;;  %2443 = vmatpush1.bf16.msra.mxu1 %v7089_v61  ;;  %v7133_v5 = vld [vmem:[#allocation7 + $0xd4] ss:$8 sps:$4 sm:$0xff]  }
 0x1e9   : > { %v1176_v11 = vmax.f32 %v1098_v4, 0.0  ;;  %v1101_v12 = vadd.f32 %v8436_v37, %v1100_v9  ;;  %2444 = vmatprep.subr.bf16.mxu1 %v7097_v0 }
 0x1ea   : > { %v1179_v14 = vmax.f32 %v1109_v8, 0.0 }
 0x1eb   : > { %v1177_v16 = vmax.f32 %v1101_v12, 0.0 }
 0x1ec   : > { %v8536_v18 = vpack.c.bf16 %v1179_v14, %v1178_v7  ;;  %2445 = vmatpush1.bf16.msra.mxu1 %v7095_v10 }
 0x1ed   : > { %v8538_v20 = vpack.c.bf16 %v1177_v16, %v1176_v11  ;;  %v6879_v21 = vpop.f32.mrb[20].mxu0  ;;  %2446 = vmatprep.subr.bf16.mxu1 %v7103_v13  ;;  %v7131_v13 = vld [vmem:[#allocation7 + $0xd0] ss:$8 sps:$4 sm:$0xff]  }
 0x1ee   : > { %v1122_v23 = vadd.f32 %v6879_v21, %v8436_v37  ;;  %v1113_v24 = vpop.f32.mrb[21].mxu0  ;;  %v7139_v21 = vld [vmem:[#allocation7 + $0xe4] ss:$8 sps:$4 sm:$0xff]  }
 0x1ef   : > { %1389 = vmatmul.mubr.bf16.gmra.mrb[16].mxu1 %v8495_v40  ;;  %v1114_v26 = vadd.f32 %v8436_v37, %v1113_v24  ;;  %v6880_v27 = vpop.f32.mrb[22].mxu0  ;;  %v7116_v40 = vld [vmem:[%s12444_s6 + $0xb0] ss:$8 sps:$4 sm:$0xff]  }
 0x1f0   : > { %1398 = vmatprep.mubr.bf16.mxu1 %v7957_v36  ;;  %v1182_v29 = vmax.f32 %v1122_v23, 0.0  ;;  %v1125_v30 = vadd.f32 %v6880_v27, %v8436_v37  ;;  %v1116_v31 = vpop.f32.mrb[23].mxu0  ;;  %2447 = vmatpush1.bf16.msra.mxu1 %v7101_v19  ;;  %v7140_v23 = vld [vmem:[%s12444_s6 + $0xf0] ss:$8 sps:$4 sm:$0xff]  }
 0x1f1   : > { %v1180_v33 = vmax.f32 %v1114_v26, 0.0  ;;  %v1117_v34 = vadd.f32 %v8436_v37, %v1116_v31  ;;  %2448 = vmatprep.subr.bf16.mxu1 %v7109_v22  ;;  %2024 = vmatpush1.bf16.msra.mxu0 %v7116_v40  ;;  %v7137_v22 = vld [vmem:[#allocation7 + $0xe0] ss:$8 sps:$4 sm:$0xff]   ;;  %v7143_v24 = vld [vmem:[#allocation7 + $0xf0] ss:$8 sps:$4 sm:$0xff]   ;;  %v1226_v26 = vlaneseq }
 0x1f2   : > { %v1183_v39 = vmax.f32 %v1125_v30, 0.0  ;;  %2025 = vmatprep.subr.bf16.mxu0 %v7124_v42 }
 0x1f3   : > { %v1181_v41 = vmax.f32 %v1117_v34, 0.0  ;;  %v1227_v27 = vshrl.u32 %v1226_v26, 7  ;;  %v7167_v26 = vld [vmem:[#allocation8 + $0x70] ss:$8 sps:$4 sm:$0xff]  }
 0x1f4   : > { %v8558_v43 = vpack.c.bf16 %v1183_v39, %v1182_v29  ;;  %2449 = vmatpush1.bf16.msra.mxu1 %v7107_v32  ;;  %v1224_v29 = vld [vmem:[%s12893_s5] sm:$0x3] }
 0x1f5   : > { %v1202_v45 = vpack.c.bf16 %v1181_v41, %v1180_v33  ;;  %v6883_v46 = vpop.f32.mrb[24].mxu0  ;;  %2450 = vmatprep.subr.bf16.mxu1 %v7115_v35  ;;  %2026 = vmatpush1.bf16.msra.mxu0 %v7122_v50  ;;  %v8605_v28 = vsub.s32 1, %v1227_v27  ;;  %v8610_v30 = vsub.s32 0, %v1227_v27  ;;  %v7149_v50 = vld [vmem:[#allocation8 + $0x10] ss:$8 sps:$4 sm:$0xff]  }
 0x1f6   : > { %v1138_v48 = vadd.f32 %v6883_v46, %v8436_v37  ;;  %v1129_v49 = vpop.f32.mrb[25].mxu0  ;;  %2027 = vmatprep.subr.bf16.mxu0 %v7130_v53  ;;  %v7151_v46 = vld [vmem:[#allocation8 + $0x14] ss:$8 sps:$4 sm:$0xff]   ;;  %v7154_v53 = vld [vmem:[#allocation8 + $0x24] ss:$8 sps:$4 sm:$0xff]  }
 0x1f7   : > { %1399 = vmatmul.mubr.bf16.gmra.mrb[20].mxu1 %v8493_v38  ;;  %v1130_v51 = vadd.f32 %v8436_v37, %v1129_v49  ;;  %v6884_v52 = vpop.f32.mrb[26].mxu0  ;;  %v7127_v38 = vld [vmem:[#allocation7 + $0xc4] ss:$8 sps:$4 sm:$0xff]   ;;  %12894 = vst [vmem:[#allocation20_spill] sm:$0xff] %v8610_v30  ;;  %v8613_v32 = vrot.slane %v1224_v29, %v8605_v28  ;;  %v8616_v33 = vrot.slane %v1224_v29, %v8610_v30 }
 0x1f8   : > { %1408 = vmatprep.mubr.bf16.mxu1 %v7957_v36  ;;  %v1186_v54 = vmax.f32 %v1138_v48, 0.0  ;;  %v1141_v55 = vadd.f32 %v6884_v52, %v8436_v37  ;;  %v1132_v56 = vpop.f32.mrb[27].mxu0  ;;  %2451 = vmatpush1.bf16.msra.mxu1 %v7113_v44  ;;  %v7146_v44 = vld [vmem:[#allocation8] ss:$8 sps:$4 sm:$0xff]  }
 0x1f9   : > { %v1184_v58 = vmax.f32 %v1130_v51, 0.0  ;;  %v1133_v59 = vadd.f32 %v8436_v37, %v1132_v56  ;;  %2452 = vmatprep.subr.bf16.mxu1 %v7121_v47  ;;  %2028 = vmatpush1.bf16.msra.mxu0 %v7128_v63 }
 0x1fa   : > { %v1187_v61 = vmax.f32 %v1141_v55, 0.0 }
 0x1fb   : > { %v1185_v0 = vmax.f32 %v1133_v59, 0.0 }
 0x1fc   : > { %v1205_v1 = vpack.c.bf16 %v1187_v61, %v1186_v54  ;;  %2453 = vmatpush1.bf16.msra.mxu1 %v7119_v57 }
 0x1fd   : > { %v1204_v3 = vpack.c.bf16 %v1185_v0, %v1184_v58  ;;  %v6887_v4 = vpop.f32.mrb[28].mxu0  ;;  %2454 = vmatprep.subr.bf16.mxu1 %v7127_v38  ;;  %v7152_v58 = vld [vmem:[#allocation8 + $0x20] ss:$8 sps:$4 sm:$0xff]   ;;  %v7157_v38 = vld [vmem:[#allocation8 + $0x34] ss:$8 sps:$4 sm:$0xff]  }
 0x1fe   : > { %v1154_v6 = vadd.f32 %v6887_v4, %v8436_v37  ;;  %v1145_v7 = vpop.f32.mrb[29].mxu0  ;;  %v7160_v4 = vld [vmem:[#allocation8 + $0x44] ss:$8 sps:$4 sm:$0xff]  }
 0x1ff   : > { %1409 = vmatmul.mubr.bf16.gmra.mrb[24].mxu1 %v8516_v62  ;;  %v1146_v8 = vadd.f32 %v8436_v37, %v1145_v7  ;;  %v6888_v9 = vpop.f32.mrb[30].mxu0 }
 0x200   : > { %1418 = vmatprep.mubr.bf16.mxu1 %v7957_v36  ;;  %v1190_v10 = vmax.f32 %v1154_v6, 0.0  ;;  %v1157_v11 = vadd.f32 %v6888_v9, %v8436_v37  ;;  %v1148_v12 = vpop.f32.mrb[31].mxu0  ;;  %2455 = vmatpush1.bf16.msra.mxu1 %v7125_v2  ;;  %v7158_v9 = vld [vmem:[#allocation8 + $0x40] ss:$8 sps:$4 sm:$0xff]  }
 0x201   : > { %v1188_v14 = vmax.f32 %v1146_v8, 0.0  ;;  %v1149_v15 = vadd.f32 %v8436_v37, %v1148_v12  ;;  %2456 = vmatprep.subr.bf16.mxu1 %v7133_v5  ;;  %v7136_v37 = vld [vmem:[%s12444_s6 + $0xe4] ss:$8 sps:$4 sm:$0xff]  }
 0x202   : > { %v1191_v16 = vmax.f32 %v1157_v11, 0.0  ;;  %2029 = vmatprep.subr.bf16.mxu0 %v7136_v37  ;;  %v7163_v11 = vld [vmem:[#allocation8 + $0x54] ss:$8 sps:$4 sm:$0xff]  }
 0x203   : > { %v1189_v17 = vmax.f32 %v1149_v15, 0.0  ;;  %v7161_v15 = vld [vmem:[#allocation8 + $0x50] ss:$8 sps:$4 sm:$0xff]  }
 0x204   : > { %v1207_v19 = vpack.c.bf16 %v1191_v16, %v1190_v10  ;;  %2457 = vmatpush1.bf16.msra.mxu1 %v7131_v13 }
 0x205   : > { %v1206_v62 = vpack.c.bf16 %v1189_v17, %v1188_v14  ;;  %2458 = vmatprep.subr.bf16.mxu1 %v7139_v21 }
 0x207   : > { %1419 = vmatmul.mubr.bf16.gmra.mrb[28].mxu1 %v8514_v60  ;;  %v7134_v60 = vld [vmem:[%s12444_s6 + $0xe0] ss:$8 sps:$4 sm:$0xff]  }
 0x208   : > { %1428 = vmatprep.mubr.bf16.mxu1 %v7957_v36  ;;  %2030 = vmatpush1.bf16.msra.mxu0 %v7134_v60 }
 0x209   : > { %2459 = vmatpush1.bf16.msra.mxu1 %v7137_v22  ;;  %v7164_v22 = vld [vmem:[#allocation8 + $0x60] ss:$8 sps:$4 sm:$0xff]  }
 0x20f   : > { %1429 = vmatmul.mubr.bf16.gmra.mrb[32].mxu1 %v8538_v20  ;;  %v7145_v20 = vld [vmem:[#allocation7 + $0xf4] ss:$8 sps:$4 sm:$0xff]  }
 0x210   : > { %1438 = vmatprep.mubr.bf16.mxu1 %v7957_v36  ;;  %2460 = vmatprep.subr.bf16.mxu1 %v7145_v20  ;;  %v7169_v20 = vld [vmem:[#allocation8 + $0x74] ss:$8 sps:$4 sm:$0xff]  }
 0x211   : > { %2461 = vmatpush1.bf16.msra.mxu1 %v7143_v24 }
 0x217   : > { %1439 = vmatmul.mubr.bf16.gmra.mrb[36].mxu1 %v8536_v18  ;;  %v7142_v18 = vld [vmem:[%s12444_s6 + $0xf4] ss:$8 sps:$4 sm:$0xff]  }
 0x218   : > { %1448 = vmatprep.mubr.bf16.mxu1 %v7957_v36  ;;  %2031 = vmatprep.subr.bf16.mxu0 %v7142_v18 }
 0x219   : > { %2032 = vmatpush1.bf16.msra.mxu0 %v7140_v23 }
 0x21a   : > { %2859 = vmatprep.subr.bf16.mxu0 %v7148_v25 }
 0x21f   : > { %1449 = vmatmul.mubr.bf16.gmra.mrb[40].mxu1 %v1202_v45 }
 0x220   : > { %1458 = vmatprep.mubr.bf16.mxu1 %v7957_v36 }
 0x227   : > { %1459 = vmatmul.mubr.bf16.gmra.mrb[44].mxu1 %v8558_v43 }
 0x228   : > { %1468 = vmatprep.mubr.bf16.mxu1 %v7957_v36 }
 0x22f   : > { %1469 = vmatmul.mubr.bf16.gmra.mrb[48].mxu1 %v1204_v3 }
 0x230   : > { %1478 = vmatprep.mubr.bf16.mxu1 %v7957_v36 }
 0x237   : > { %1479 = vmatmul.mubr.bf16.gmra.mrb[52].mxu1 %v1205_v1  ;;  %v7155_v1 = vld [vmem:[#allocation8 + $0x30] ss:$8 sps:$4 sm:$0xff]  }
 0x238   : > { %1488 = vmatprep.mubr.bf16.mxu1 %v7957_v36 }
 0x23f   : > { %1489 = vmatmul.mubr.bf16.gmra.mrb[56].mxu1 %v1206_v62 }
 0x240   : > { %1498 = vmatprep.mubr.bf16.mxu1 %v7957_v36 }
 0x247   : > { %1499 = vmatmul.mubr.bf16.gmra.mrb[60].mxu1 %v1207_v19  ;;  %v7166_v19 = vld [vmem:[#allocation8 + $0x64] ss:$8 sps:$4 sm:$0xff]  }
 0x2a2   : > { %v1350_v31 = vpop.f32.mrb[0].mxu1 }
 0x2a3   : > { %v1352_v34 = vpop.f32.mrb[1].mxu1  ;;  %v8628_v42 = vadd.f32 %v1350_v31, %v8616_v33  ;;  %v7172_v31 = vld [vmem:[#allocation8 + $0x84] ss:$8 sps:$4 sm:$0xff]  }
 0x2a4   : > { %v1354_v36 = vpop.f32.mrb[2].mxu1  ;;  %v8622_v40 = vadd.f32 %v1352_v34, %v8613_v32 }
 0x2a5   : > { %v8619_v35 = vadd.f32 %v1354_v36, %v8616_v33  ;;  %v1356_v39 = vpop.f32.mrb[3].mxu1  ;;  %12898 = vst [vmem:[#allocation24_spill] sm:$0xff] %v8628_v42 }
 0x2a6   : > { %12896 = vst [vmem:[#allocation22_spill] sm:$0xff] %v8622_v40  ;;  %v8625_v41 = vadd.f32 %v1356_v39, %v8613_v32 }
 0x2a7   : > { %12895 = vst [vmem:[#allocation21_spill] sm:$0xff] %v8619_v35  ;;  %v8636_v45 = vpack.c.bf16 %v8619_v35, %v8628_v42  ;;  %v709_v42 = vld [vmem:[%s8327_s23 + $0x30] sm:$0xff] }
 0x2a8   : > { %12897 = vst [vmem:[#allocation23_spill] sm:$0xff] %v8625_v41  ;;  %v8632_v43 = vpack.c.bf16 %v8625_v41, %v8622_v40 }
 0x2aa   : > { %v1360_v47 = vpop.f32.mrb[4].mxu1  ;;  %2033 = vmatprep.mubr.bf16.mxu0 %v8632_v43  ;;  %2462 = vmatprep.mubr.bf16.mxu1 %v8632_v43 }
 0x2ab   : > { %v1362_v48 = vpop.f32.mrb[5].mxu1  ;;  %2034 = vmatmul.mubr.bf16.vlgmr.msra.gmra.mrb[32].mxu0 %v8636_v45  ;;  %2463 = vmatmul.mubr.bf16.vlgmr.msra.gmra.mrb[64].mxu1 %v8636_v45  ;;  %v8652_v56 = vadd.f32 %v1360_v47, %v8616_v33 }
 0x2ac   : > { %v1364_v49 = vpop.f32.mrb[6].mxu1  ;;  %2860 = vmatpush1.bf16.msra.mxu0 %v7146_v44  ;;  %v8646_v54 = vadd.f32 %v1362_v48, %v8613_v32  ;;  %v7175_v48 = vld [vmem:[#allocation8 + $0x94] ss:$8 sps:$4 sm:$0xff]  }
 0x2ad   : > { %v8643_v51 = vadd.f32 %v1364_v49, %v8616_v33  ;;  %v1366_v52 = vpop.f32.mrb[7].mxu1  ;;  %2861 = vmatprep.subr.bf16.mxu0 %v7151_v46  ;;  %12902 = vst [vmem:[#allocation28_spill] sm:$0xff] %v8652_v56  ;;  %v7170_v46 = vld [vmem:[#allocation8 + $0x80] ss:$8 sps:$4 sm:$0xff]  }
 0x2ae   : > { %12900 = vst [vmem:[#allocation26_spill] sm:$0xff] %v8646_v54  ;;  %v8649_v55 = vadd.f32 %v1366_v52, %v8613_v32 }
 0x2af   : > { %12899 = vst [vmem:[#allocation25_spill] sm:$0xff] %v8643_v51  ;;  %v8660_v59 = vpack.c.bf16 %v8643_v51, %v8652_v56 }
 0x2b0   : > { %12901 = vst [vmem:[#allocation27_spill] sm:$0xff] %v8649_v55  ;;  %v8656_v57 = vpack.c.bf16 %v8649_v55, %v8646_v54  ;;  %2862 = vmatpush1.bf16.msra.mxu0 %v7149_v50  ;;  %v705_v55 = vld [vmem:[%s8327_s23 + $0x10] sm:$0xff] }
 0x2b1   : > { %2863 = vmatprep.subr.bf16.mxu0 %v7154_v53  ;;  %v7173_v53 = vld [vmem:[#allocation8 + $0x90] ss:$8 sps:$4 sm:$0xff]  }
 0x2b2   : > { %v1370_v61 = vpop.f32.mrb[8].mxu1  ;;  %2043 = vmatprep.mubr.bf16.mxu0 %v8656_v57  ;;  %2472 = vmatprep.mubr.bf16.mxu1 %v8656_v57 }
 0x2b3   : > { %v1372_v63 = vpop.f32.mrb[9].mxu1  ;;  %2044 = vmatmul.mubr.bf16.gmra.mrb[36].mxu0 %v8660_v59  ;;  %2473 = vmatmul.mubr.bf16.gmra.mrb[68].mxu1 %v8660_v59  ;;  %v8676_v7 = vadd.f32 %v1370_v61, %v8616_v33  ;;  %v7178_v61 = vld [vmem:[#allocation8 + $0xa4] ss:$8 sps:$4 sm:$0xff]  }
 0x2b4   : > { %v1374_v0 = vpop.f32.mrb[10].mxu1  ;;  %2864 = vmatpush1.bf16.msra.mxu0 %v7152_v58  ;;  %v8670_v5 = vadd.f32 %v1372_v63, %v8613_v32 }
 0x2b5   : > { %v8667_v2 = vadd.f32 %v1374_v0, %v8616_v33  ;;  %v1376_v3 = vpop.f32.mrb[11].mxu1  ;;  %2865 = vmatprep.subr.bf16.mxu0 %v7157_v38  ;;  %12906 = vst [vmem:[#allocation32_spill] sm:$0xff] %v8676_v7 }
 0x2b6   : > { %12904 = vst [vmem:[#allocation30_spill] sm:$0xff] %v8670_v5  ;;  %v8673_v6 = vadd.f32 %v1376_v3, %v8613_v32 }
 0x2b7   : > { %12903 = vst [vmem:[#allocation29_spill] sm:$0xff] %v8667_v2  ;;  %v8684_v10 = vpack.c.bf16 %v8667_v2, %v8676_v7  ;;  %v710_v2 = vld [vmem:[%s8327_s23 + $0x38] sm:$0xff] }
 0x2b8   : > { %12905 = vst [vmem:[#allocation31_spill] sm:$0xff] %v8673_v6  ;;  %v8680_v8 = vpack.c.bf16 %v8673_v6, %v8670_v5  ;;  %2866 = vmatpush1.bf16.msra.mxu0 %v7155_v1 }
 0x2b9   : > { %2867 = vmatprep.subr.bf16.mxu0 %v7160_v4  ;;  %v7176_v4 = vld [vmem:[#allocation8 + $0xa0] ss:$8 sps:$4 sm:$0xff]  }
 0x2ba   : > { %v1380_v12 = vpop.f32.mrb[12].mxu1  ;;  %2053 = vmatprep.mubr.bf16.mxu0 %v8680_v8  ;;  %2482 = vmatprep.mubr.bf16.mxu1 %v8680_v8 }
 0x2bb   : > { %v1382_v13 = vpop.f32.mrb[13].mxu1  ;;  %2054 = vmatmul.mubr.bf16.gmra.mrb[40].mxu0 %v8684_v10  ;;  %2483 = vmatmul.mubr.bf16.gmra.mrb[72].mxu1 %v8684_v10  ;;  %v8700_v21 = vadd.f32 %v1380_v12, %v8616_v33 }
 0x2bc   : > { %v1384_v14 = vpop.f32.mrb[14].mxu1  ;;  %2868 = vmatpush1.bf16.msra.mxu0 %v7158_v9  ;;  %v8694_v62 = vadd.f32 %v1382_v13, %v8613_v32 }
 0x2bd   : > { %v8691_v16 = vadd.f32 %v1384_v14, %v8616_v33  ;;  %v1386_v17 = vpop.f32.mrb[15].mxu1  ;;  %2869 = vmatprep.subr.bf16.mxu0 %v7163_v11  ;;  %12910 = vst [vmem:[#allocation36_spill] sm:$0xff] %v8700_v21  ;;  %v7181_v11 = vld [vmem:[#allocation8 + $0xb4] ss:$8 sps:$4 sm:$0xff]  }
 0x2be   : > { %12908 = vst [vmem:[#allocation34_spill] sm:$0xff] %v8694_v62  ;;  %v8697_v37 = vadd.f32 %v1386_v17, %v8613_v32 }
 0x2bf   : > { %12907 = vst [vmem:[#allocation33_spill] sm:$0xff] %v8691_v16  ;;  %v8708_v18 = vpack.c.bf16 %v8691_v16, %v8700_v21 }
 0x2c0   : > { %12909 = vst [vmem:[#allocation35_spill] sm:$0xff] %v8697_v37  ;;  %v8704_v60 = vpack.c.bf16 %v8697_v37, %v8694_v62  ;;  %2870 = vmatpush1.bf16.msra.mxu0 %v7161_v15  ;;  %v7179_v15 = vld [vmem:[#allocation8 + $0xb0] ss:$8 sps:$4 sm:$0xff]  }
 0x2c1   : > { %2871 = vmatprep.subr.bf16.mxu0 %v7166_v19 }
 0x2c2   : > { %v1390_v23 = vpop.f32.mrb[16].mxu1  ;;  %2063 = vmatprep.mubr.bf16.mxu0 %v8704_v60  ;;  %2492 = vmatprep.mubr.bf16.mxu1 %v8704_v60 }
 0x2c3   : > { %v1392_v24 = vpop.f32.mrb[17].mxu1  ;;  %2064 = vmatmul.mubr.bf16.gmra.mrb[44].mxu0 %v8708_v18  ;;  %2493 = vmatmul.mubr.bf16.gmra.mrb[76].mxu1 %v8708_v18  ;;  %v8724_v39 = vadd.f32 %v1390_v23, %v8616_v33 }
 0x2c4   : > { %v1394_v25 = vpop.f32.mrb[18].mxu1  ;;  %2872 = vmatpush1.bf16.msra.mxu0 %v7164_v22  ;;  %v8718_v34 = vadd.f32 %v1392_v24, %v8613_v32  ;;  %v7184_v22 = vld [vmem:[#allocation8 + $0xc4] ss:$8 sps:$4 sm:$0xff]  }
 0x2c5   : > { %v8715_v27 = vadd.f32 %v1394_v25, %v8616_v33  ;;  %v1396_v29 = vpop.f32.mrb[19].mxu1  ;;  %2873 = vmatprep.subr.bf16.mxu0 %v7169_v20  ;;  %12914 = vst [vmem:[#allocation40_spill] sm:$0xff] %v8724_v39 }
 0x2c6   : > { %12912 = vst [vmem:[#allocation38_spill] sm:$0xff] %v8718_v34  ;;  %v8721_v36 = vadd.f32 %v1396_v29, %v8613_v32 }
 0x2c7   : > { %12911 = vst [vmem:[#allocation37_spill] sm:$0xff] %v8715_v27  ;;  %v8732_v47 = vpack.c.bf16 %v8715_v27, %v8724_v39 }
 0x2c8   : > { %12913 = vst [vmem:[#allocation39_spill] sm:$0xff] %v8721_v36  ;;  %v8728_v44 = vpack.c.bf16 %v8721_v36, %v8718_v34  ;;  %2874 = vmatpush1.bf16.msra.mxu0 %v7167_v26  ;;  %v7182_v26 = vld [vmem:[#allocation8 + $0xc0] ss:$8 sps:$4 sm:$0xff]  }
 0x2c9   : > { %2875 = vmatprep.subr.bf16.mxu0 %v7172_v31  ;;  %v7187_v31 = vld [vmem:[#allocation8 + $0xd4] ss:$8 sps:$4 sm:$0xff]  }
 0x2ca   : > { %v1400_v49 = vpop.f32.mrb[20].mxu1  ;;  %2073 = vmatprep.mubr.bf16.mxu0 %v8728_v44  ;;  %2502 = vmatprep.mubr.bf16.mxu1 %v8728_v44 }
 0x2cb   : > { %v1402_v50 = vpop.f32.mrb[21].mxu1  ;;  %2074 = vmatmul.mubr.bf16.gmra.mrb[48].mxu0 %v8732_v47  ;;  %2503 = vmatmul.mubr.bf16.gmra.mrb[80].mxu1 %v8732_v47  ;;  %v8748_v1 = vadd.f32 %v1400_v49, %v8616_v33 }
 0x2cc   : > { %v1404_v52 = vpop.f32.mrb[22].mxu1  ;;  %2876 = vmatpush1.bf16.msra.mxu0 %v7170_v46  ;;  %v8742_v63 = vadd.f32 %v1402_v50, %v8613_v32  ;;  %v7185_v50 = vld [vmem:[#allocation8 + $0xd0] ss:$8 sps:$4 sm:$0xff]  }
 0x2cd   : > { %v8739_v58 = vadd.f32 %v1404_v52, %v8616_v33  ;;  %v1406_v38 = vpop.f32.mrb[23].mxu1  ;;  %2877 = vmatprep.subr.bf16.mxu0 %v7175_v48  ;;  %12918 = vst [vmem:[#allocation44_spill] sm:$0xff] %v8748_v1 }
 0x2ce   : > { %12916 = vst [vmem:[#allocation42_spill] sm:$0xff] %v8742_v63  ;;  %v8745_v0 = vadd.f32 %v1406_v38, %v8613_v32  ;;  %v7190_v38 = vld [vmem:[#allocation8 + $0xe4] ss:$8 sps:$4 sm:$0xff]  }
 0x2cf   : > { %12915 = vst [vmem:[#allocation41_spill] sm:$0xff] %v8739_v58  ;;  %v8756_v9 = vpack.c.bf16 %v8739_v58, %v8748_v1 }
 0x2d0   : > { %12917 = vst [vmem:[#allocation43_spill] sm:$0xff] %v8745_v0  ;;  %v8752_v3 = vpack.c.bf16 %v8745_v0, %v8742_v63  ;;  %2878 = vmatpush1.bf16.msra.mxu0 %v7173_v53 }
 0x2d1   : > { %2879 = vmatprep.subr.bf16.mxu0 %v7178_v61 }
 0x2d2   : > { %v1410_v12 = vpop.f32.mrb[24].mxu1  ;;  %2083 = vmatprep.mubr.bf16.mxu0 %v8752_v3  ;;  %2512 = vmatprep.mubr.bf16.mxu1 %v8752_v3 }
 0x2d3   : > { %v1412_v13 = vpop.f32.mrb[25].mxu1  ;;  %2084 = vmatmul.mubr.bf16.gmra.mrb[52].mxu0 %v8756_v9  ;;  %2513 = vmatmul.mubr.bf16.gmra.mrb[84].mxu1 %v8756_v9  ;;  %v8772_v24 = vadd.f32 %v1410_v12, %v8616_v33 }
 0x2d4   : > { %v1414_v14 = vpop.f32.mrb[26].mxu1  ;;  %2880 = vmatpush1.bf16.msra.mxu0 %v7176_v4  ;;  %v8766_v20 = vadd.f32 %v1412_v13, %v8613_v32  ;;  %v7188_v13 = vld [vmem:[#allocation8 + $0xe0] ss:$8 sps:$4 sm:$0xff]  }
 0x2d5   : > { %v8763_v17 = vadd.f32 %v1414_v14, %v8616_v33  ;;  %v1416_v19 = vpop.f32.mrb[27].mxu1  ;;  %2881 = vmatprep.subr.bf16.mxu0 %v7181_v11  ;;  %12922 = vst [vmem:[#allocation48_spill] sm:$0xff] %v8772_v24 }
 0x2d6   : > { %12920 = vst [vmem:[#allocation46_spill] sm:$0xff] %v8766_v20  ;;  %v8769_v23 = vadd.f32 %v1416_v19, %v8613_v32 }
 0x2d7   : > { %12919 = vst [vmem:[#allocation45_spill] sm:$0xff] %v8763_v17  ;;  %v8780_v29 = vpack.c.bf16 %v8763_v17, %v8772_v24 }
 0x2d8   : > { %12921 = vst [vmem:[#allocation47_spill] sm:$0xff] %v8769_v23  ;;  %v8776_v25 = vpack.c.bf16 %v8769_v23, %v8766_v20  ;;  %2882 = vmatpush1.bf16.msra.mxu0 %v7179_v15  ;;  %v7193_v15 = vld [vmem:[#allocation8 + $0xf4] ss:$8 sps:$4 sm:$0xff]  }
 0x2d9   : > { %2883 = vmatprep.subr.bf16.mxu0 %v7184_v22 }
 0x2da   : > { %v1420_v46 = vpop.f32.mrb[28].mxu1  ;;  %2093 = vmatprep.mubr.bf16.mxu0 %v8776_v25  ;;  %2522 = vmatprep.mubr.bf16.mxu1 %v8776_v25 }
 0x2db   : > { %v1422_v48 = vpop.f32.mrb[29].mxu1  ;;  %2094 = vmatmul.mubr.bf16.gmra.mrb[56].mxu0 %v8780_v29  ;;  %2523 = vmatmul.mubr.bf16.gmra.mrb[88].mxu1 %v8780_v29  ;;  %v8796_v11 = vadd.f32 %v1420_v46, %v8616_v33 }
 0x2dc   : > { %v1424_v49 = vpop.f32.mrb[30].mxu1  ;;  %2884 = vmatpush1.bf16.msra.mxu0 %v7182_v26  ;;  %v8790_v61 = vadd.f32 %v1422_v48, %v8613_v32 }
 0x2dd   : > { %v8787_v52 = vadd.f32 %v1424_v49, %v8616_v33  ;;  %v1426_v53 = vpop.f32.mrb[31].mxu1  ;;  %2885 = vmatprep.subr.bf16.mxu0 %v7187_v31  ;;  %12926 = vst [vmem:[#allocation52_spill] sm:$0xff] %v8796_v11  ;;  %v7191_v31 = vld [vmem:[#allocation8 + $0xf0] ss:$8 sps:$4 sm:$0xff]   ;;  %v7196_v49 = vld [vmem:[#allocation11 + $0x4] ss:$8 sps:$4 sm:$0xff]  }
 0x2de   : > { %12924 = vst [vmem:[#allocation50_spill] sm:$0xff] %v8790_v61  ;;  %v8793_v4 = vadd.f32 %v1426_v53, %v8613_v32 }
 0x2df   : > { %12923 = vst [vmem:[#allocation49_spill] sm:$0xff] %v8787_v52  ;;  %v8804_v14 = vpack.c.bf16 %v8787_v52, %v8796_v11 }
 0x2e0   : > { %12925 = vst [vmem:[#allocation51_spill] sm:$0xff] %v8793_v4  ;;  %v8800_v12 = vpack.c.bf16 %v8793_v4, %v8790_v61  ;;  %2886 = vmatpush1.bf16.msra.mxu0 %v7185_v50 }
 0x2e1   : > { %2887 = vmatprep.subr.bf16.mxu0 %v7190_v38 }
 0x2e2   : > { %v1430_v19 = vpop.f32.mrb[32].mxu1  ;;  %2103 = vmatprep.mubr.bf16.mxu0 %v8800_v12  ;;  %2532 = vmatprep.mubr.bf16.mxu1 %v8800_v12 }
 0x2e3   : > { %v1432_v22 = vpop.f32.mrb[33].mxu1  ;;  %2104 = vmatmul.mubr.bf16.gmra.mrb[60].mxu0 %v8804_v14  ;;  %2533 = vmatmul.mubr.bf16.gmra.mrb[92].mxu1 %v8804_v14  ;;  %v8820_v38 = vadd.f32 %v1430_v19, %v8616_v33 }
 0x2e4   : > { %v1434_v26 = vpop.f32.mrb[34].mxu1  ;;  %2888 = vmatpush1.bf16.msra.mxu0 %v7188_v13  ;;  %v8814_v50 = vadd.f32 %v1432_v22, %v8613_v32 }
 0x2e5   : > { %v8811_v46 = vadd.f32 %v1434_v26, %v8616_v33  ;;  %v1436_v48 = vpop.f32.mrb[35].mxu1  ;;  %2889 = vmatprep.subr.bf16.mxu0 %v7193_v15  ;;  %12930 = vst [vmem:[#allocation56_spill] sm:$0xff] %v8820_v38 }
 0x2e6   : > { %12928 = vst [vmem:[#allocation54_spill] sm:$0xff] %v8814_v50  ;;  %v8817_v53 = vadd.f32 %v1436_v48, %v8613_v32 }
 0x2e7   : > { %12927 = vst [vmem:[#allocation53_spill] sm:$0xff] %v8811_v46  ;;  %v8828_v13 = vpack.c.bf16 %v8811_v46, %v8820_v38 }
 0x2e8   : > { %12929 = vst [vmem:[#allocation55_spill] sm:$0xff] %v8817_v53  ;;  %v8824_v4 = vpack.c.bf16 %v8817_v53, %v8814_v50  ;;  %2890 = vmatpush1.bf16.msra.mxu0 %v7191_v31 }
 0x2e9   : > { %3781 = vmatprep.subr.bf16.mxu0 %v7196_v49 }
 0x2ea   : > { %v1440_v15 = vpop.f32.mrb[36].mxu1  ;;  %2113 = vmatprep.mubr.bf16.mxu0 %v8824_v4  ;;  %2542 = vmatprep.mubr.bf16.mxu1 %v8824_v4 }
 0x2eb   : > { %v1442_v22 = vpop.f32.mrb[37].mxu1  ;;  %2114 = vmatmul.mubr.bf16.gmra.mrb[64].mxu0 %v8828_v13  ;;  %2543 = vmatmul.mubr.bf16.gmra.mrb[96].mxu1 %v8828_v13  ;;  %v8844_v53 = vadd.f32 %v1440_v15, %v8616_v33 }
 0x2ec   : > { %v1444_v19 = vpop.f32.mrb[38].mxu1  ;;  %v8838_v48 = vadd.f32 %v1442_v22, %v8613_v32 }
 0x2ed   : > { %v8835_v26 = vadd.f32 %v1444_v19, %v8616_v33  ;;  %v1446_v31 = vpop.f32.mrb[39].mxu1  ;;  %12934 = vst [vmem:[#allocation60_spill] sm:$0xff] %v8844_v53 }
 0x2ee   : > { %12932 = vst [vmem:[#allocation58_spill] sm:$0xff] %v8838_v48  ;;  %v8841_v49 = vadd.f32 %v1446_v31, %v8613_v32 }
 0x2ef   : > { %12931 = vst [vmem:[#allocation57_spill] sm:$0xff] %v8835_v26  ;;  %v8852_v46 = vpack.c.bf16 %v8835_v26, %v8844_v53 }
 0x2f0   : > { %12933 = vst [vmem:[#allocation59_spill] sm:$0xff] %v8841_v49  ;;  %v8848_v50 = vpack.c.bf16 %v8841_v49, %v8838_v48 }
 0x2f2   : > { %v1450_v19 = vpop.f32.mrb[40].mxu1  ;;  %2123 = vmatprep.mubr.bf16.mxu0 %v8848_v50  ;;  %2552 = vmatprep.mubr.bf16.mxu1 %v8848_v50 }
 0x2f3   : > { %v1452_v22 = vpop.f32.mrb[41].mxu1  ;;  %2124 = vmatmul.mubr.bf16.gmra.mrb[68].mxu0 %v8852_v46  ;;  %2553 = vmatmul.mubr.bf16.gmra.mrb[100].mxu1 %v8852_v46  ;;  %v8868_v53 = vadd.f32 %v1450_v19, %v8616_v33 }
 0x2f4   : > { %v1454_v15 = vpop.f32.mrb[42].mxu1  ;;  %v8862_v48 = vadd.f32 %v1452_v22, %v8613_v32 }
 0x2f5   : > { %v8859_v31 = vadd.f32 %v1454_v15, %v8616_v33  ;;  %v1456_v49 = vpop.f32.mrb[43].mxu1  ;;  %12938 = vst [vmem:[#allocation64_spill] sm:$0xff] %v8868_v53 }
 0x2f6   : > { %12936 = vst [vmem:[#allocation62_spill] sm:$0xff] %v8862_v48  ;;  %v8865_v26 = vadd.f32 %v1456_v49, %v8613_v32 }
 0x2f7   : > { %12935 = vst [vmem:[#allocation61_spill] sm:$0xff] %v8859_v31  ;;  %v8876_v38 = vpack.c.bf16 %v8859_v31, %v8868_v53 }
 0x2f8   : > { %12937 = vst [vmem:[#allocation63_spill] sm:$0xff] %v8865_v26  ;;  %v8872_v61 = vpack.c.bf16 %v8865_v26, %v8862_v48 }
 0x2fa   : > { %v1460_v15 = vpop.f32.mrb[44].mxu1  ;;  %2133 = vmatprep.mubr.bf16.mxu0 %v8872_v61  ;;  %2562 = vmatprep.mubr.bf16.mxu1 %v8872_v61 }
 0x2fb   : > { %v1462_v22 = vpop.f32.mrb[45].mxu1  ;;  %2134 = vmatmul.mubr.bf16.gmra.mrb[72].mxu0 %v8876_v38  ;;  %2563 = vmatmul.mubr.bf16.gmra.mrb[104].mxu1 %v8876_v38  ;;  %v8892_v53 = vadd.f32 %v1460_v15, %v8616_v33 }
 0x2fc   : > { %v1464_v49 = vpop.f32.mrb[46].mxu1  ;;  %v8886_v48 = vadd.f32 %v1462_v22, %v8613_v32 }
 0x2fd   : > { %v8883_v19 = vadd.f32 %v1464_v49, %v8616_v33  ;;  %v1466_v26 = vpop.f32.mrb[47].mxu1  ;;  %12942 = vst [vmem:[#allocation68_spill] sm:$0xff] %v8892_v53 }
 0x2fe   : > { %12940 = vst [vmem:[#allocation66_spill] sm:$0xff] %v8886_v48  ;;  %v8889_v31 = vadd.f32 %v1466_v26, %v8613_v32 }
 0x2ff   : > { %12939 = vst [vmem:[#allocation65_spill] sm:$0xff] %v8883_v19  ;;  %v8900_v52 = vpack.c.bf16 %v8883_v19, %v8892_v53 }
 0x300   : > { %12941 = vst [vmem:[#allocation67_spill] sm:$0xff] %v8889_v31  ;;  %v8896_v23 = vpack.c.bf16 %v8889_v31, %v8886_v48 }
 0x302   : > { %v1470_v49 = vpop.f32.mrb[48].mxu1  ;;  %2143 = vmatprep.mubr.bf16.mxu0 %v8896_v23  ;;  %2572 = vmatprep.mubr.bf16.mxu1 %v8896_v23 }
 0x303   : > { %v1472_v22 = vpop.f32.mrb[49].mxu1  ;;  %2144 = vmatmul.mubr.bf16.gmra.mrb[76].mxu0 %v8900_v52  ;;  %2573 = vmatmul.mubr.bf16.gmra.mrb[108].mxu1 %v8900_v52  ;;  %v8916_v53 = vadd.f32 %v1470_v49, %v8616_v33 }
 0x304   : > { %v1474_v26 = vpop.f32.mrb[50].mxu1  ;;  %v8910_v48 = vadd.f32 %v1472_v22, %v8613_v32 }
 0x305   : > { %v8907_v15 = vadd.f32 %v1474_v26, %v8616_v33  ;;  %v1476_v31 = vpop.f32.mrb[51].mxu1  ;;  %12946 = vst [vmem:[#allocation72_spill] sm:$0xff] %v8916_v53 }
 0x306   : > { %12944 = vst [vmem:[#allocation70_spill] sm:$0xff] %v8910_v48  ;;  %v8913_v19 = vadd.f32 %v1476_v31, %v8613_v32 }
 0x307   : > { %12943 = vst [vmem:[#allocation69_spill] sm:$0xff] %v8907_v15  ;;  %v8924_v11 = vpack.c.bf16 %v8907_v15, %v8916_v53 }
 0x308   : > { %12945 = vst [vmem:[#allocation71_spill] sm:$0xff] %v8913_v19  ;;  %v8920_v20 = vpack.c.bf16 %v8913_v19, %v8910_v48 }
 0x30a   : > { %v1480_v26 = vpop.f32.mrb[52].mxu1  ;;  %2153 = vmatprep.mubr.bf16.mxu0 %v8920_v20  ;;  %2582 = vmatprep.mubr.bf16.mxu1 %v8920_v20 }
 0x30b   : > { %v1482_v22 = vpop.f32.mrb[53].mxu1  ;;  %2154 = vmatmul.mubr.bf16.gmra.mrb[80].mxu0 %v8924_v11  ;;  %2583 = vmatmul.mubr.bf16.gmra.mrb[112].mxu1 %v8924_v11  ;;  %v8940_v53 = vadd.f32 %v1480_v26, %v8616_v33 }
 0x30c   : > { %v1484_v31 = vpop.f32.mrb[54].mxu1  ;;  %v8934_v48 = vadd.f32 %v1482_v22, %v8613_v32 }
 0x30d   : > { %v8931_v49 = vadd.f32 %v1484_v31, %v8616_v33  ;;  %v1486_v19 = vpop.f32.mrb[55].mxu1  ;;  %12950 = vst [vmem:[#allocation76_spill] sm:$0xff] %v8940_v53 }
 0x30e   : > { %12948 = vst [vmem:[#allocation74_spill] sm:$0xff] %v8934_v48  ;;  %v8937_v15 = vadd.f32 %v1486_v19, %v8613_v32 }
 0x30f   : > { %12947 = vst [vmem:[#allocation73_spill] sm:$0xff] %v8931_v49  ;;  %v8948_v17 = vpack.c.bf16 %v8931_v49, %v8940_v53 }
 0x310   : > { %12949 = vst [vmem:[#allocation75_spill] sm:$0xff] %v8937_v15  ;;  %v8944_v0 = vpack.c.bf16 %v8937_v15, %v8934_v48 }
 0x312   : > { %v1490_v31 = vpop.f32.mrb[56].mxu1  ;;  %2163 = vmatprep.mubr.bf16.mxu0 %v8944_v0  ;;  %2592 = vmatprep.mubr.bf16.mxu1 %v8944_v0 }
 0x313   : > { %v1492_v22 = vpop.f32.mrb[57].mxu1  ;;  %2164 = vmatmul.mubr.bf16.gmra.mrb[84].mxu0 %v8948_v17  ;;  %2593 = vmatmul.mubr.bf16.gmra.mrb[116].mxu1 %v8948_v17  ;;  %v8964_v53 = vadd.f32 %v1490_v31, %v8616_v33 }
 0x314   : > { %v1494_v19 = vpop.f32.mrb[58].mxu1  ;;  %v8958_v48 = vadd.f32 %v1492_v22, %v8613_v32 }
 0x315   : > { %v8955_v26 = vadd.f32 %v1494_v19, %v8616_v33  ;;  %v1496_v15 = vpop.f32.mrb[59].mxu1  ;;  %12954 = vst [vmem:[#allocation80_spill] sm:$0xff] %v8964_v53 }
 0x316   : > { %12952 = vst [vmem:[#allocation78_spill] sm:$0xff] %v8958_v48  ;;  %v8961_v49 = vadd.f32 %v1496_v15, %v8613_v32 }
 0x317   : > { %12951 = vst [vmem:[#allocation77_spill] sm:$0xff] %v8955_v26  ;;  %v8972_v24 = vpack.c.bf16 %v8955_v26, %v8964_v53 }
 0x318   : > { %12953 = vst [vmem:[#allocation79_spill] sm:$0xff] %v8961_v49  ;;  %v8968_v63 = vpack.c.bf16 %v8961_v49, %v8958_v48 }
 0x31a   : > { %v1500_v19 = vpop.f32.mrb[60].mxu1  ;;  %2173 = vmatprep.mubr.bf16.mxu0 %v8968_v63  ;;  %2602 = vmatprep.mubr.bf16.mxu1 %v8968_v63 }
 0x31b   : > { %v1502_v22 = vpop.f32.mrb[61].mxu1  ;;  %2174 = vmatmul.mubr.bf16.gmra.mrb[88].mxu0 %v8972_v24  ;;  %2603 = vmatmul.mubr.bf16.gmra.mrb[120].mxu1 %v8972_v24  ;;  %v8988_v53 = vadd.f32 %v1500_v19, %v8616_v33 }
 0x31c   : > { %v1504_v15 = vpop.f32.mrb[62].mxu1  ;;  %v8982_v48 = vadd.f32 %v1502_v22, %v8613_v32  ;;  %v7199_v22 = vld [vmem:[#allocation11 + $0x14] ss:$8 sps:$4 sm:$0xff]  }
 0x31d   : > { %v8979_v31 = vadd.f32 %v1504_v15, %v8616_v33  ;;  %v1506_v49 = vpop.f32.mrb[63].mxu1  ;;  %12958 = vst [vmem:[#allocation84_spill] sm:$0xff] %v8988_v53  ;;  %v706_v33 = vld [vmem:[%s8327_s23 + $0x18] sm:$0xff] }
 0x31e   : > { %12956 = vst [vmem:[#allocation82_spill] sm:$0xff] %v8982_v48  ;;  %v8985_v26 = vadd.f32 %v1506_v49, %v8613_v32  ;;  %v704_v32 = vld [vmem:[%s8327_s23 + $0x8] sm:$0xff]  ;;  %v7197_v15 = vld [vmem:[#allocation11 + $0x10] ss:$8 sps:$4 sm:$0xff]  }
 0x31f   : > { %12955 = vst [vmem:[#allocation81_spill] sm:$0xff] %v8979_v31  ;;  %v8996_v58 = vpack.c.bf16 %v8979_v31, %v8988_v53  ;;  %v7194_v49 = vld [vmem:[#allocation11] ss:$8 sps:$4 sm:$0xff]   ;;  %v9005_v19 = vpack.c.bf16 %v706_v33, %v704_v32  ;;  %v7203_v32 = vld [vmem:[#allocation11 + $0x30] ss:$8 sps:$4 sm:$0xff]  }
 0x320   : > { %12957 = vst [vmem:[#allocation83_spill] sm:$0xff] %v8985_v26  ;;  %v8992_v36 = vpack.c.bf16 %v8985_v26, %v8982_v48  ;;  %v7202_v26 = vld [vmem:[#allocation11 + $0x24] ss:$8 sps:$4 sm:$0xff]   ;;  %v7200_v48 = vld [vmem:[#allocation11 + $0x20] ss:$8 sps:$4 sm:$0xff]  }
 0x321   : > { %v7208_v33 = vld [vmem:[#allocation11 + $0x44] ss:$8 sps:$4 sm:$0xff]  }
 0x322   : > { %2183 = vmatprep.mubr.bf16.mxu0 %v8992_v36  ;;  %2612 = vmatprep.mubr.bf16.mxu1 %v8992_v36 }
 0x323   : > { %2184 = vmatmul.mubr.bf16.gmra.mrb[92].mxu0 %v8996_v58  ;;  %2613 = vmatmul.mubr.bf16.gmra.mrb[124].mxu1 %v8996_v58 }
 0x324   : > { %2891 = vmatprep.mubr.bf16.mxu0 %v8632_v43  ;;  %3384 = vmatprep.mubr.bf16.mxu1 %v9005_v19  ;;  %v7205_v43 = vld [vmem:[#allocation11 + $0x34] ss:$8 sps:$4 sm:$0xff]  }
 0x32b   : > { %2892 = vmatmul.mubr.bf16.vlgmr.msra.gmra.mrb[96].mxu0 %v8636_v45  ;;  %v7206_v45 = vld [vmem:[#allocation11 + $0x40] ss:$8 sps:$4 sm:$0xff]  }
 0x32c   : > { %2901 = vmatprep.mubr.bf16.mxu0 %v8656_v57  ;;  %3782 = vmatpush1.bf16.msra.mxu0 %v7194_v49  ;;  %v7211_v57 = vld [vmem:[#allocation11 + $0x54] ss:$8 sps:$4 sm:$0xff]   ;;  %v7209_v49 = vld [vmem:[#allocation11 + $0x50] ss:$8 sps:$4 sm:$0xff]  }
 0x32d   : > { %3783 = vmatprep.subr.bf16.mxu0 %v7199_v22  ;;  %v7220_v22 = vld [vmem:[#allocation11 + $0x84] ss:$8 sps:$4 sm:$0xff]  }
 0x330   : > { %3784 = vmatpush1.bf16.msra.mxu0 %v7197_v15  ;;  %v7221_v15 = vld [vmem:[#allocation11 + $0x90] ss:$8 sps:$4 sm:$0xff]  }
 0x331   : > { %3785 = vmatprep.subr.bf16.mxu0 %v7202_v26  ;;  %v7214_v26 = vld [vmem:[#allocation11 + $0x64] ss:$8 sps:$4 sm:$0xff]  }
 0x333   : > { %2902 = vmatmul.mubr.bf16.gmra.mrb[100].mxu0 %v8660_v59  ;;  %v7212_v59 = vld [vmem:[#allocation11 + $0x60] ss:$8 sps:$4 sm:$0xff]  }
 0x334   : > { %2911 = vmatprep.mubr.bf16.mxu0 %v8680_v8  ;;  %3786 = vmatpush1.bf16.msra.mxu0 %v7200_v48  ;;  %v7217_v8 = vld [vmem:[#allocation11 + $0x74] ss:$8 sps:$4 sm:$0xff]   ;;  %v7215_v48 = vld [vmem:[#allocation11 + $0x70] ss:$8 sps:$4 sm:$0xff]  }
 0x335   : > { %3787 = vmatprep.subr.bf16.mxu0 %v7205_v43  ;;  %v7226_v43 = vld [vmem:[#allocation11 + $0xa4] ss:$8 sps:$4 sm:$0xff]  }
 0x338   : > { %3788 = vmatpush1.bf16.msra.mxu0 %v7203_v32  ;;  %v7227_v32 = vld [vmem:[#allocation11 + $0xb0] ss:$8 sps:$4 sm:$0xff]  }
 0x339   : > { %3789 = vmatprep.subr.bf16.mxu0 %v7208_v33  ;;  %v7232_v33 = vld [vmem:[#allocation11 + $0xc4] ss:$8 sps:$4 sm:$0xff]  }
 0x33b   : > { %2912 = vmatmul.mubr.bf16.gmra.mrb[104].mxu0 %v8684_v10  ;;  %v7218_v10 = vld [vmem:[#allocation11 + $0x80] ss:$8 sps:$4 sm:$0xff]  }
 0x33c   : > { %2921 = vmatprep.mubr.bf16.mxu0 %v8704_v60  ;;  %3790 = vmatpush1.bf16.msra.mxu0 %v7206_v45  ;;  %v7223_v60 = vld [vmem:[#allocation11 + $0x94] ss:$8 sps:$4 sm:$0xff]   ;;  %v7233_v45 = vld [vmem:[#allocation11 + $0xd0] ss:$8 sps:$4 sm:$0xff]  }
 0x33d   : > { %3791 = vmatprep.subr.bf16.mxu0 %v7211_v57  ;;  %v7238_v57 = vld [vmem:[#allocation11 + $0xe4] ss:$8 sps:$4 sm:$0xff]  }
 0x340   : > { %3792 = vmatpush1.bf16.msra.mxu0 %v7209_v49  ;;  %v7239_v49 = vld [vmem:[#allocation11 + $0xf0] ss:$8 sps:$4 sm:$0xff]  }
 0x341   : > { %3793 = vmatprep.subr.bf16.mxu0 %v7214_v26 }
 0x343   : > { %2922 = vmatmul.mubr.bf16.gmra.mrb[108].mxu0 %v8708_v18  ;;  %v7224_v18 = vld [vmem:[#allocation11 + $0xa0] ss:$8 sps:$4 sm:$0xff]  }
 0x344   : > { %2931 = vmatprep.mubr.bf16.mxu0 %v8728_v44  ;;  %3794 = vmatpush1.bf16.msra.mxu0 %v7212_v59  ;;  %v7229_v44 = vld [vmem:[#allocation11 + $0xb4] ss:$8 sps:$4 sm:$0xff]  }
 0x345   : > { %3795 = vmatprep.subr.bf16.mxu0 %v7217_v8 }
 0x348   : > { %3796 = vmatpush1.bf16.msra.mxu0 %v7215_v48 }
 0x349   : > { %3797 = vmatprep.subr.bf16.mxu0 %v7220_v22 }
 0x34b   : > { %2932 = vmatmul.mubr.bf16.gmra.mrb[112].mxu0 %v8732_v47  ;;  %v7230_v47 = vld [vmem:[#allocation11 + $0xc0] ss:$8 sps:$4 sm:$0xff]  }
 0x34c   : > { %2941 = vmatprep.mubr.bf16.mxu0 %v8752_v3  ;;  %3798 = vmatpush1.bf16.msra.mxu0 %v7218_v10  ;;  %v7235_v3 = vld [vmem:[#allocation11 + $0xd4] ss:$8 sps:$4 sm:$0xff]  }
 0x34d   : > { %3799 = vmatprep.subr.bf16.mxu0 %v7223_v60 }
 0x350   : > { %3800 = vmatpush1.bf16.msra.mxu0 %v7221_v15 }
 0x351   : > { %3801 = vmatprep.subr.bf16.mxu0 %v7226_v43 }
 0x353   : > { %2942 = vmatmul.mubr.bf16.gmra.mrb[116].mxu0 %v8756_v9  ;;  %v7236_v9 = vld [vmem:[#allocation11 + $0xe0] ss:$8 sps:$4 sm:$0xff]  }
 0x354   : > { %2951 = vmatprep.mubr.bf16.mxu0 %v8776_v25  ;;  %3802 = vmatpush1.bf16.msra.mxu0 %v7224_v18  ;;  %v7241_v25 = vld [vmem:[#allocation11 + $0xf4] ss:$8 sps:$4 sm:$0xff]  }
 0x355   : > { %3803 = vmatprep.subr.bf16.mxu0 %v7229_v44 }
 0x358   : > { %3804 = vmatpush1.bf16.msra.mxu0 %v7227_v32 }
 0x359   : > { %3805 = vmatprep.subr.bf16.mxu0 %v7232_v33 }
 0x35b   : > { %2952 = vmatmul.mubr.bf16.gmra.mrb[120].mxu0 %v8780_v29  ;;  %v1829_v29 = vld [vmem:[%s12959_s7] sm:$0x3] }
 0x35c   : > { %2961 = vmatprep.mubr.bf16.mxu0 %v8800_v12  ;;  %3806 = vmatpush1.bf16.msra.mxu0 %v7230_v47  ;;  %v9037_v12 = vrot.slane %v1829_v29, %v8610_v30 }
 0x35d   : > { %3807 = vmatprep.subr.bf16.mxu0 %v7235_v3 }
 0x360   : > { %3808 = vmatpush1.bf16.msra.mxu0 %v7233_v45 }
 0x361   : > { %3809 = vmatprep.subr.bf16.mxu0 %v7238_v57 }
 0x363   : > { %2962 = vmatmul.mubr.bf16.gmra.mrb[124].mxu0 %v8804_v14 }
 0x364   : > { %2971 = vmatprep.mubr.bf16.mxu0 %v8824_v4  ;;  %3810 = vmatpush1.bf16.msra.mxu0 %v7236_v9  ;;  %v2258_v4 = vld [vmem:[%s12960_s24] sm:$0x3]  ;;  %s7868_s24 = sshll.u32 %s7959_s15, 4  ;;  %s7869_s24 = int_to_ptr.vmem [resolvable:$false] %s7868_s24 }
 0x365   : > { %3811 = vmatprep.subr.bf16.mxu0 %v7241_v25  ;;  %v9040_v14 = vrot.slane %v2258_v4, %v8610_v30 }
 0x368   : > { %3812 = vmatpush1.bf16.msra.mxu0 %v7239_v49 }
 0x36b   : > { %2972 = vmatmul.mubr.bf16.gmra.mrb[128].mxu0 %v8828_v13  ;;  %v9046_v13 = vrot.slane %v2258_v4, %v8605_v28 }
 0x36c   : > { %2981 = vmatprep.mubr.bf16.mxu0 %v8848_v50  ;;  %v9043_v50 = vrot.slane %v1829_v29, %v8605_v28 }
 0x373   : > { %2982 = vmatmul.mubr.bf16.gmra.mrb[132].mxu0 %v8852_v46 }
 0x374   : > { %2991 = vmatprep.mubr.bf16.mxu0 %v8872_v61 }
 0x37b   : > { %2992 = vmatmul.mubr.bf16.gmra.mrb[136].mxu0 %v8876_v38 }
 0x37c   : > { %3001 = vmatprep.mubr.bf16.mxu0 %v8896_v23 }
 0x37e   : > { %v2035_v46 = vpop.f32.mrb[32].mxu0  ;;  %v2464_v61 = vpop.f32.mrb[64].mxu1 }
 0x37f   : > { %v2037_v26 = vpop.f32.mrb[33].mxu0  ;;  %v2466_v59 = vpop.f32.mrb[65].mxu1  ;;  %v9049_v23 = vadd.f32 %v2035_v46, %v9037_v12  ;;  %v9052_v48 = vadd.f32 %v2464_v61, %v9040_v14 }
 0x380   : > { %v2039_v8 = vpop.f32.mrb[34].mxu0  ;;  %v2468_v38 = vpop.f32.mrb[66].mxu1  ;;  %v9061_v43 = vadd.f32 %v2037_v26, %v9043_v50  ;;  %v9064_v18 = vadd.f32 %v2466_v59, %v9046_v13 }
 0x381   : > { %12961 = vst [vmem:[#allocation85_spill] sm:$0xff] %v9052_v48  ;;  %v9055_v22 = vadd.f32 %v2039_v8, %v9037_v12  ;;  %v9058_v10 = vadd.f32 %v2468_v38, %v9040_v14  ;;  %v2041_v60 = vpop.f32.mrb[35].mxu0  ;;  %v2470_v15 = vpop.f32.mrb[67].mxu1 }
 0x382   : > { %12963 = vst [vmem:[#allocation87_spill] sm:$0xff] %v9064_v18  ;;  %v9067_v44 = vadd.f32 %v2041_v60, %v9043_v50  ;;  %v9070_v32 = vadd.f32 %v2470_v15, %v9046_v13  ;;  %v726_v18 = vld [vmem:[%s8327_s23 + $0xb8] sm:$0xff] }
 0x383   : > { %12962 = vst [vmem:[#allocation86_spill] sm:$0xff] %v9058_v10  ;;  %3002 = vmatmul.mubr.bf16.gmra.mrb[140].mxu0 %v8900_v52 }
 0x384   : > { %12964 = vst [vmem:[#allocation88_spill] sm:$0xff] %v9070_v32  ;;  %3011 = vmatprep.mubr.bf16.mxu0 %v8920_v20 }
 0x386   : > { %v2045_v57 = vpop.f32.mrb[36].mxu0  ;;  %v2474_v9 = vpop.f32.mrb[68].mxu1 }
 0x387   : > { %v2047_v25 = vpop.f32.mrb[37].mxu0  ;;  %v2476_v49 = vpop.f32.mrb[69].mxu1  ;;  %v9083_v46 = vadd.f32 %v2045_v57, %v9037_v12  ;;  %v9086_v61 = vadd.f32 %v2474_v9, %v9040_v14 }
 0x388   : > { %v2049_v29 = vpop.f32.mrb[38].mxu0  ;;  %v2478_v4 = vpop.f32.mrb[70].mxu1  ;;  %v9095_v8 = vadd.f32 %v2047_v25, %v9043_v50  ;;  %v9098_v38 = vadd.f32 %v2476_v49, %v9046_v13 }
 0x389   : > { %12965 = vst [vmem:[#allocation89_spill] sm:$0xff] %v9086_v61  ;;  %v9089_v20 = vadd.f32 %v2049_v29, %v9037_v12  ;;  %v9092_v52 = vadd.f32 %v2478_v4, %v9040_v14  ;;  %v2051_v26 = vpop.f32.mrb[39].mxu0  ;;  %v2480_v59 = vpop.f32.mrb[71].mxu1  ;;  %v722_v61 = vld [vmem:[%s8327_s23 + $0x98] sm:$0xff] }
 0x38a   : > { %12967 = vst [vmem:[#allocation91_spill] sm:$0xff] %v9098_v38  ;;  %v9101_v60 = vadd.f32 %v2051_v26, %v9043_v50  ;;  %v9104_v15 = vadd.f32 %v2480_v59, %v9046_v13 }
 0x38b   : > { %12966 = vst [vmem:[#allocation90_spill] sm:$0xff] %v9092_v52  ;;  %3012 = vmatmul.mubr.bf16.gmra.mrb[144].mxu0 %v8924_v11 }
 0x38c   : > { %12968 = vst [vmem:[#allocation92_spill] sm:$0xff] %v9104_v15  ;;  %3021 = vmatprep.mubr.bf16.mxu0 %v8944_v0 }
 0x38e   : > { %v2055_v29 = vpop.f32.mrb[40].mxu0  ;;  %v2484_v4 = vpop.f32.mrb[72].mxu1 }
 0x38f   : > { %v2057_v26 = vpop.f32.mrb[41].mxu0  ;;  %v2486_v59 = vpop.f32.mrb[73].mxu1  ;;  %v9117_v57 = vadd.f32 %v2055_v29, %v9037_v12  ;;  %v9120_v11 = vadd.f32 %v2484_v4, %v9040_v14 }
 0x390   : > { %v2059_v47 = vpop.f32.mrb[42].mxu0  ;;  %v2488_v45 = vpop.f32.mrb[74].mxu1  ;;  %v9129_v33 = vadd.f32 %v2057_v26, %v9043_v50  ;;  %v9132_v3 = vadd.f32 %v2486_v59, %v9046_v13 }
 0x391   : > { %12969 = vst [vmem:[#allocation93_spill] sm:$0xff] %v9120_v11  ;;  %v9123_v0 = vadd.f32 %v2059_v47, %v9037_v12  ;;  %v9126_v9 = vadd.f32 %v2488_v45, %v9040_v14  ;;  %v2061_v25 = vpop.f32.mrb[43].mxu0  ;;  %v2490_v49 = vpop.f32.mrb[75].mxu1 }
 0x392   : > { %12971 = vst [vmem:[#allocation95_spill] sm:$0xff] %v9132_v3  ;;  %v9135_v29 = vadd.f32 %v2061_v25, %v9043_v50  ;;  %v9138_v4 = vadd.f32 %v2490_v49, %v9046_v13 }
 0x393   : > { %12970 = vst [vmem:[#allocation94_spill] sm:$0xff] %v9126_v9  ;;  %3022 = vmatmul.mubr.bf16.gmra.mrb[148].mxu0 %v8948_v17 }
 0x394   : > { %12972 = vst [vmem:[#allocation96_spill] sm:$0xff] %v9138_v4  ;;  %3031 = vmatprep.mubr.bf16.mxu0 %v8968_v63 }
 0x396   : > { %v2065_v59 = vpop.f32.mrb[44].mxu0  ;;  %v2494_v31 = vpop.f32.mrb[76].mxu1 }
 0x397   : > { %v2067_v49 = vpop.f32.mrb[45].mxu0  ;;  %v2496_v53 = vpop.f32.mrb[77].mxu1  ;;  %v9151_v47 = vadd.f32 %v2065_v59, %v9037_v12  ;;  %v9154_v17 = vadd.f32 %v2494_v31, %v9040_v14 }
 0x398   : > { %v2069_v34 = vpop.f32.mrb[46].mxu0  ;;  %v2498_v1 = vpop.f32.mrb[78].mxu1  ;;  %v9163_v37 = vadd.f32 %v2067_v49, %v9043_v50  ;;  %v9166_v27 = vadd.f32 %v2496_v53, %v9046_v13 }
 0x399   : > { %12973 = vst [vmem:[#allocation97_spill] sm:$0xff] %v9151_v47  ;;  %12974 = vst [vmem:[#allocation98_spill] sm:$0xff] %v9154_v17  ;;  %v9157_v63 = vadd.f32 %v2069_v34, %v9037_v12  ;;  %v9160_v45 = vadd.f32 %v2498_v1, %v9040_v14  ;;  %v2071_v26 = vpop.f32.mrb[47].mxu0  ;;  %v2500_v25 = vpop.f32.mrb[79].mxu1 }
 0x39a   : > { %12977 = vst [vmem:[#allocation101_spill] sm:$0xff] %v9166_v27  ;;  %v9169_v59 = vadd.f32 %v2071_v26, %v9043_v50  ;;  %v9172_v31 = vadd.f32 %v2500_v25, %v9046_v13  ;;  %v718_v27 = vld [vmem:[%s8327_s23 + $0x78] sm:$0xff] }
 0x39b   : > { %12975 = vst [vmem:[#allocation99_spill] sm:$0xff] %v9157_v63  ;;  %12976 = vst [vmem:[#allocation100_spill] sm:$0xff] %v9160_v45  ;;  %3032 = vmatmul.mubr.bf16.gmra.mrb[152].mxu0 %v8972_v24 }
 0x39c   : > { %12978 = vst [vmem:[#allocation102_spill] sm:$0xff] %v9172_v31  ;;  %3041 = vmatprep.mubr.bf16.mxu0 %v8992_v36 }
 0x39e   : > { %v2075_v49 = vpop.f32.mrb[48].mxu0  ;;  %v2504_v62 = vpop.f32.mrb[80].mxu1 }
 0x39f   : > { %v2077_v25 = vpop.f32.mrb[49].mxu0  ;;  %v2506_v39 = vpop.f32.mrb[81].mxu1  ;;  %v9185_v24 = vadd.f32 %v2075_v49, %v9037_v12  ;;  %v9188_v1 = vadd.f32 %v2504_v62, %v9040_v14 }
 0x3a0   : > { %v2079_v6 = vpop.f32.mrb[50].mxu0  ;;  %v2508_v34 = vpop.f32.mrb[82].mxu1  ;;  %v9197_v5 = vadd.f32 %v2077_v25, %v9043_v50  ;;  %v9200_v21 = vadd.f32 %v2506_v39, %v9046_v13  ;;  %v703_v25 = vld [vmem:[%s8327_s23] sm:$0xff] }
 0x3a1   : > { %12979 = vst [vmem:[#allocation103_spill] sm:$0xff] %v9185_v24  ;;  %12980 = vst [vmem:[#allocation104_spill] sm:$0xff] %v9188_v1  ;;  %v9191_v36 = vadd.f32 %v2079_v6, %v9037_v12  ;;  %v9194_v26 = vadd.f32 %v2508_v34, %v9040_v14  ;;  %v2081_v53 = vpop.f32.mrb[51].mxu0  ;;  %v2510_v16 = vpop.f32.mrb[83].mxu1  ;;  %v714_v1 = vld [vmem:[%s8327_s23 + $0x58] sm:$0xff] }
 0x3a2   : > { %12983 = vst [vmem:[#allocation107_spill] sm:$0xff] %v9197_v5  ;;  %12984 = vst [vmem:[#allocation108_spill] sm:$0xff] %v9200_v21  ;;  %v9203_v49 = vadd.f32 %v2081_v53, %v9043_v50  ;;  %v9206_v62 = vadd.f32 %v2510_v16, %v9046_v13  ;;  %v708_v16 = vld [vmem:[%s8327_s23 + $0x28] sm:$0xff] }
 0x3a3   : > { %12981 = vst [vmem:[#allocation105_spill] sm:$0xff] %v9191_v36  ;;  %12982 = vst [vmem:[#allocation106_spill] sm:$0xff] %v9194_v26  ;;  %3042 = vmatmul.mubr.bf16.gmra.mrb[156].mxu0 %v8996_v58  ;;  %v9222_v58 = vpack.c.bf16 %v705_v55, %v703_v25  ;;  %v9224_v40 = vpack.c.bf16 %v710_v2, %v708_v16 }
 0x3a4   : > { %12985 = vst [vmem:[#allocation109_spill] sm:$0xff] %v9203_v49  ;;  %12986 = vst [vmem:[#allocation110_spill] sm:$0xff] %v9206_v62  ;;  %3813 = vmatprep.mubr.bf16.mxu0 %v9005_v19 }
 0x3a6   : > { %v2085_v54 = vpop.f32.mrb[52].mxu0  ;;  %v2514_v7 = vpop.f32.mrb[84].mxu1 }
 0x3a7   : > { %v2087_v6 = vpop.f32.mrb[53].mxu0  ;;  %v2516_v41 = vpop.f32.mrb[85].mxu1  ;;  %v9227_v56 = vadd.f32 %v2085_v54, %v9037_v12  ;;  %v9230_v39 = vadd.f32 %v2514_v7, %v9040_v14 }
 0x3a8   : > { %v2089_v51 = vpop.f32.mrb[54].mxu0  ;;  %v2518_v34 = vpop.f32.mrb[86].mxu1  ;;  %v9239_v2 = vadd.f32 %v2087_v6, %v9043_v50  ;;  %v9242_v16 = vadd.f32 %v2516_v41, %v9046_v13  ;;  %v707_v6 = vld [vmem:[%s8327_s23 + $0x20] sm:$0xff] }
 0x3a9   : > { %12987 = vst [vmem:[#allocation111_spill] sm:$0xff] %v9227_v56  ;;  %12988 = vst [vmem:[#allocation112_spill] sm:$0xff] %v9230_v39  ;;  %v9233_v53 = vadd.f32 %v2089_v51, %v9037_v12  ;;  %v9236_v35 = vadd.f32 %v2518_v34, %v9040_v14  ;;  %v2091_v55 = vpop.f32.mrb[55].mxu0  ;;  %v2520_v25 = vpop.f32.mrb[87].mxu1  ;;  %v742_v56 = vld [vmem:[%s8327_s23 + $0x138] sm:$0xff] }
 0x3aa   : > { %12991 = vst [vmem:[#allocation115_spill] sm:$0xff] %v9239_v2  ;;  %12992 = vst [vmem:[#allocation116_spill] sm:$0xff] %v9242_v16  ;;  %v9245_v54 = vadd.f32 %v2091_v55, %v9043_v50  ;;  %v9248_v7 = vadd.f32 %v2520_v25, %v9046_v13  ;;  %v712_v25 = vld [vmem:[%s8327_s23 + $0x48] sm:$0xff] }
 0x3ab   : > { %12989 = vst [vmem:[#allocation113_spill] sm:$0xff] %v9233_v53  ;;  %12990 = vst [vmem:[#allocation114_spill] sm:$0xff] %v9236_v35  ;;  %3814 = vmatmul.mubr.bf16.vlgmr.msra.gmra.mrb[160].mxu0 %v9222_v58  ;;  %v9264_v35 = vpack.c.bf16 %v709_v42, %v707_v6  ;;  %v9266_v17 = vpack.c.bf16 %v714_v1, %v712_v25 }
 0x3ac   : > { %12993 = vst [vmem:[#allocation117_spill] sm:$0xff] %v9245_v54  ;;  %12994 = vst [vmem:[#allocation118_spill] sm:$0xff] %v9248_v7  ;;  %3823 = vmatprep.mubr.bf16.mxu0 %v9224_v40  ;;  %v713_v7 = vld [vmem:[%s8327_s23 + $0x50] sm:$0xff] }
 0x3ae   : > { %v2095_v26 = vpop.f32.mrb[56].mxu0  ;;  %v2524_v21 = vpop.f32.mrb[88].mxu1 }
 0x3af   : > { %v2097_v51 = vpop.f32.mrb[57].mxu0  ;;  %v2526_v39 = vpop.f32.mrb[89].mxu1  ;;  %v9269_v45 = vadd.f32 %v2095_v26, %v9037_v12  ;;  %v9272_v41 = vadd.f32 %v2524_v21, %v9040_v14 }
 0x3b0   : > { %v2099_v62 = vpop.f32.mrb[58].mxu0  ;;  %v2528_v34 = vpop.f32.mrb[90].mxu1  ;;  %v9281_v1 = vadd.f32 %v2097_v51, %v9043_v50  ;;  %v9284_v25 = vadd.f32 %v2526_v39, %v9046_v13  ;;  %v711_v51 = vld [vmem:[%s8327_s23 + $0x40] sm:$0xff] }
 0x3b1   : > { %12995 = vst [vmem:[#allocation119_spill] sm:$0xff] %v9269_v45  ;;  %12996 = vst [vmem:[#allocation120_spill] sm:$0xff] %v9272_v41  ;;  %v9275_v55 = vadd.f32 %v2099_v62, %v9037_v12  ;;  %v9278_v16 = vadd.f32 %v2528_v34, %v9040_v14  ;;  %v2101_v42 = vpop.f32.mrb[59].mxu0  ;;  %v2530_v6 = vpop.f32.mrb[91].mxu1 }
 0x3b2   : > { %12999 = vst [vmem:[#allocation123_spill] sm:$0xff] %v9281_v1  ;;  %13000 = vst [vmem:[#allocation124_spill] sm:$0xff] %v9284_v25  ;;  %v9287_v26 = vadd.f32 %v2101_v42, %v9043_v50  ;;  %v9290_v21 = vadd.f32 %v2530_v6, %v9046_v13  ;;  %v716_v6 = vld [vmem:[%s8327_s23 + $0x68] sm:$0xff] }
 0x3b3   : > { %12997 = vst [vmem:[#allocation121_spill] sm:$0xff] %v9275_v55  ;;  %12998 = vst [vmem:[#allocation122_spill] sm:$0xff] %v9278_v16  ;;  %3824 = vmatmul.mubr.bf16.gmra.mrb[164].mxu0 %v9264_v35  ;;  %v9306_v16 = vpack.c.bf16 %v713_v7, %v711_v51  ;;  %v9308_v3 = vpack.c.bf16 %v718_v27, %v716_v6 }
 0x3b4   : > { %13001 = vst [vmem:[#allocation125_spill] sm:$0xff] %v9287_v26  ;;  %13002 = vst [vmem:[#allocation126_spill] sm:$0xff] %v9290_v21  ;;  %3833 = vmatprep.mubr.bf16.mxu0 %v9266_v17  ;;  %v717_v21 = vld [vmem:[%s8327_s23 + $0x70] sm:$0xff] }
 0x3b6   : > { %v2105_v31 = vpop.f32.mrb[60].mxu0  ;;  %v2534_v11 = vpop.f32.mrb[92].mxu1 }
 0x3b7   : > { %v2107_v62 = vpop.f32.mrb[61].mxu0  ;;  %v2536_v41 = vpop.f32.mrb[93].mxu1  ;;  %v9311_v4 = vadd.f32 %v2105_v31, %v9037_v12  ;;  %v9314_v39 = vadd.f32 %v2534_v11, %v9040_v14 }
 0x3b8   : > { %v2109_v9 = vpop.f32.mrb[62].mxu0  ;;  %v2538_v34 = vpop.f32.mrb[94].mxu1  ;;  %v9323_v27 = vadd.f32 %v2107_v62, %v9043_v50  ;;  %v9326_v6 = vadd.f32 %v2536_v41, %v9046_v13  ;;  %v715_v62 = vld [vmem:[%s8327_s23 + $0x60] sm:$0xff] }
 0x3b9   : > { %13003 = vst [vmem:[#allocation127_spill] sm:$0xff] %v9311_v4  ;;  %13004 = vst [vmem:[#allocation128_spill] sm:$0xff] %v9314_v39  ;;  %v9317_v42 = vadd.f32 %v2109_v9, %v9037_v12  ;;  %v9320_v25 = vadd.f32 %v2538_v34, %v9040_v14  ;;  %v2111_v7 = vpop.f32.mrb[63].mxu0  ;;  %v2540_v51 = vpop.f32.mrb[95].mxu1 }
 0x3ba   : > { %13007 = vst [vmem:[#allocation131_spill] sm:$0xff] %v9323_v27  ;;  %13008 = vst [vmem:[#allocation132_spill] sm:$0xff] %v9326_v6  ;;  %v9329_v31 = vadd.f32 %v2111_v7, %v9043_v50  ;;  %v9332_v11 = vadd.f32 %v2540_v51, %v9046_v13  ;;  %v720_v51 = vld [vmem:[%s8327_s23 + $0x88] sm:$0xff] }
 0x3bb   : > { %13005 = vst [vmem:[#allocation129_spill] sm:$0xff] %v9317_v42  ;;  %13006 = vst [vmem:[#allocation130_spill] sm:$0xff] %v9320_v25  ;;  %3834 = vmatmul.mubr.bf16.gmra.mrb[168].mxu0 %v9306_v16  ;;  %v9348_v25 = vpack.c.bf16 %v717_v21, %v715_v62  ;;  %v9350_v48 = vpack.c.bf16 %v722_v61, %v720_v51 }
 0x3bc   : > { %13009 = vst [vmem:[#allocation133_spill] sm:$0xff] %v9329_v31  ;;  %13010 = vst [vmem:[#allocation134_spill] sm:$0xff] %v9332_v11  ;;  %3843 = vmatprep.mubr.bf16.mxu0 %v9308_v3  ;;  %v721_v11 = vld [vmem:[%s8327_s23 + $0x90] sm:$0xff] }
 0x3be   : > { %v2115_v52 = vpop.f32.mrb[64].mxu0  ;;  %v2544_v38 = vpop.f32.mrb[96].mxu1 }
 0x3bf   : > { %v2117_v9 = vpop.f32.mrb[65].mxu0  ;;  %v2546_v39 = vpop.f32.mrb[97].mxu1  ;;  %v9353_v10 = vadd.f32 %v2115_v52, %v9037_v12  ;;  %v9356_v41 = vadd.f32 %v2544_v38, %v9040_v14 }
 0x3c0   : > { %v2119_v15 = vpop.f32.mrb[66].mxu0  ;;  %v2548_v34 = vpop.f32.mrb[98].mxu1  ;;  %v9365_v61 = vadd.f32 %v2117_v9, %v9043_v50  ;;  %v9368_v51 = vadd.f32 %v2546_v39, %v9046_v13  ;;  %v719_v9 = vld [vmem:[%s8327_s23 + $0x80] sm:$0xff] }
 0x3c1   : > { %13011 = vst [vmem:[#allocation135_spill] sm:$0xff] %v9353_v10  ;;  %13012 = vst [vmem:[#allocation136_spill] sm:$0xff] %v9356_v41  ;;  %v9359_v7 = vadd.f32 %v2119_v15, %v9037_v12  ;;  %v9362_v6 = vadd.f32 %v2548_v34, %v9040_v14  ;;  %v2121_v21 = vpop.f32.mrb[67].mxu0  ;;  %v2550_v62 = vpop.f32.mrb[99].mxu1 }
 0x3c2   : > { %13015 = vst [vmem:[#allocation139_spill] sm:$0xff] %v9365_v61  ;;  %13016 = vst [vmem:[#allocation140_spill] sm:$0xff] %v9368_v51  ;;  %v9371_v52 = vadd.f32 %v2121_v21, %v9043_v50  ;;  %v9374_v38 = vadd.f32 %v2550_v62, %v9046_v13  ;;  %v724_v62 = vld [vmem:[%s8327_s23 + $0xa8] sm:$0xff]  ;;  %v730_v61 = vld [vmem:[%s8327_s23 + $0xd8] sm:$0xff] }
 0x3c3   : > { %13013 = vst [vmem:[#allocation137_spill] sm:$0xff] %v9359_v7  ;;  %13014 = vst [vmem:[#allocation138_spill] sm:$0xff] %v9362_v6  ;;  %3844 = vmatmul.mubr.bf16.gmra.mrb[172].mxu0 %v9348_v25  ;;  %v9390_v7 = vpack.c.bf16 %v721_v11, %v719_v9  ;;  %v9392_v6 = vpack.c.bf16 %v726_v18, %v724_v62 }
 0x3c4   : > { %13017 = vst [vmem:[#allocation141_spill] sm:$0xff] %v9371_v52  ;;  %13018 = vst [vmem:[#allocation142_spill] sm:$0xff] %v9374_v38  ;;  %3853 = vmatprep.mubr.bf16.mxu0 %v9350_v48  ;;  %v725_v38 = vld [vmem:[%s8327_s23 + $0xb0] sm:$0xff] }
 0x3c6   : > { %v2125_v32 = vpop.f32.mrb[68].mxu0  ;;  %v2554_v4 = vpop.f32.mrb[100].mxu1 }
 0x3c7   : > { %v2127_v15 = vpop.f32.mrb[69].mxu0  ;;  %v2556_v10 = vpop.f32.mrb[101].mxu1  ;;  %v9395_v42 = vadd.f32 %v2125_v32, %v9037_v12  ;;  %v9398_v39 = vadd.f32 %v2554_v4, %v9040_v14 }
 0x3c8   : > { %v2129_v34 = vpop.f32.mrb[70].mxu0  ;;  %v2558_v41 = vpop.f32.mrb[102].mxu1  ;;  %v9407_v18 = vadd.f32 %v2127_v15, %v9043_v50  ;;  %v9410_v62 = vadd.f32 %v2556_v10, %v9046_v13  ;;  %v723_v15 = vld [vmem:[%s8327_s23 + $0xa0] sm:$0xff] }
 0x3c9   : > { %13019 = vst [vmem:[#allocation143_spill] sm:$0xff] %v9395_v42  ;;  %13020 = vst [vmem:[#allocation144_spill] sm:$0xff] %v9398_v39  ;;  %v9401_v21 = vadd.f32 %v2129_v34, %v9037_v12  ;;  %v9404_v51 = vadd.f32 %v2558_v41, %v9040_v14  ;;  %v2131_v11 = vpop.f32.mrb[71].mxu0  ;;  %v2560_v9 = vpop.f32.mrb[103].mxu1 }
 0x3ca   : > { %13023 = vst [vmem:[#allocation147_spill] sm:$0xff] %v9407_v18  ;;  %13024 = vst [vmem:[#allocation148_spill] sm:$0xff] %v9410_v62  ;;  %v9413_v32 = vadd.f32 %v2131_v11, %v9043_v50  ;;  %v9416_v4 = vadd.f32 %v2560_v9, %v9046_v13  ;;  %v728_v9 = vld [vmem:[%s8327_s23 + $0xc8] sm:$0xff]  ;;  %v734_v18 = vld [vmem:[%s8327_s23 + $0xf8] sm:$0xff] }
 0x3cb   : > { %13021 = vst [vmem:[#allocation145_spill] sm:$0xff] %v9401_v21  ;;  %13022 = vst [vmem:[#allocation146_spill] sm:$0xff] %v9404_v51  ;;  %3854 = vmatmul.mubr.bf16.gmra.mrb[176].mxu0 %v9390_v7  ;;  %v9432_v21 = vpack.c.bf16 %v725_v38, %v723_v15  ;;  %v9434_v51 = vpack.c.bf16 %v730_v61, %v728_v9 }
 0x3cc   : > { %13025 = vst [vmem:[#allocation149_spill] sm:$0xff] %v9413_v32  ;;  %13026 = vst [vmem:[#allocation150_spill] sm:$0xff] %v9416_v4  ;;  %3863 = vmatprep.mubr.bf16.mxu0 %v9392_v6  ;;  %v729_v4 = vld [vmem:[%s8327_s23 + $0xd0] sm:$0xff] }
 0x3ce   : > { %v2135_v52 = vpop.f32.mrb[72].mxu0  ;;  %v2564_v27 = vpop.f32.mrb[104].mxu1 }
 0x3cf   : > { %v2137_v34 = vpop.f32.mrb[73].mxu0  ;;  %v2566_v42 = vpop.f32.mrb[105].mxu1  ;;  %v9437_v31 = vadd.f32 %v2135_v52, %v9037_v12  ;;  %v9440_v10 = vadd.f32 %v2564_v27, %v9040_v14 }
 0x3d0   : > { %v2139_v41 = vpop.f32.mrb[74].mxu0  ;;  %v2568_v39 = vpop.f32.mrb[106].mxu1  ;;  %v9449_v61 = vadd.f32 %v2137_v34, %v9043_v50  ;;  %v9452_v9 = vadd.f32 %v2566_v42, %v9046_v13  ;;  %v727_v34 = vld [vmem:[%s8327_s23 + $0xc0] sm:$0xff] }
 0x3d1   : > { %13027 = vst [vmem:[#allocation151_spill] sm:$0xff] %v9437_v31  ;;  %13028 = vst [vmem:[#allocation152_spill] sm:$0xff] %v9440_v10  ;;  %v9443_v11 = vadd.f32 %v2139_v41, %v9037_v12  ;;  %v9446_v62 = vadd.f32 %v2568_v39, %v9040_v14  ;;  %v2141_v38 = vpop.f32.mrb[75].mxu0  ;;  %v2570_v15 = vpop.f32.mrb[107].mxu1 }
 0x3d2   : > { %13031 = vst [vmem:[#allocation155_spill] sm:$0xff] %v9449_v61  ;;  %13032 = vst [vmem:[#allocation156_spill] sm:$0xff] %v9452_v9  ;;  %v9455_v52 = vadd.f32 %v2141_v38, %v9043_v50  ;;  %v9458_v27 = vadd.f32 %v2570_v15, %v9046_v13  ;;  %v732_v15 = vld [vmem:[%s8327_s23 + $0xe8] sm:$0xff]  ;;  %v738_v61 = vld [vmem:[%s8327_s23 + $0x118] sm:$0xff] }
 0x3d3   : > { %13029 = vst [vmem:[#allocation153_spill] sm:$0xff] %v9443_v11  ;;  %13030 = vst [vmem:[#allocation154_spill] sm:$0xff] %v9446_v62  ;;  %3864 = vmatmul.mubr.bf16.gmra.mrb[180].mxu0 %v9432_v21  ;;  %v9474_v11 = vpack.c.bf16 %v729_v4, %v727_v34  ;;  %v9476_v62 = vpack.c.bf16 %v734_v18, %v732_v15 }
 0x3d4   : > { %13033 = vst [vmem:[#allocation157_spill] sm:$0xff] %v9455_v52  ;;  %13034 = vst [vmem:[#allocation158_spill] sm:$0xff] %v9458_v27  ;;  %3873 = vmatprep.mubr.bf16.mxu0 %v9434_v51  ;;  %v733_v27 = vld [vmem:[%s8327_s23 + $0xf0] sm:$0xff] }
 0x3d6   : > { %v2145_v32 = vpop.f32.mrb[76].mxu0  ;;  %v2574_v45 = vpop.f32.mrb[108].mxu1 }
 0x3d7   : > { %v2147_v41 = vpop.f32.mrb[77].mxu0  ;;  %v2576_v31 = vpop.f32.mrb[109].mxu1  ;;  %v9479_v55 = vadd.f32 %v2145_v32, %v9037_v12  ;;  %v9482_v42 = vadd.f32 %v2574_v45, %v9040_v14 }
 0x3d8   : > { %v2149_v39 = vpop.f32.mrb[78].mxu0  ;;  %v2578_v10 = vpop.f32.mrb[110].mxu1  ;;  %v9491_v18 = vadd.f32 %v2147_v41, %v9043_v50  ;;  %v9494_v15 = vadd.f32 %v2576_v31, %v9046_v13  ;;  %v731_v41 = vld [vmem:[%s8327_s23 + $0xe0] sm:$0xff] }
 0x3d9   : > { %13035 = vst [vmem:[#allocation159_spill] sm:$0xff] %v9479_v55  ;;  %13036 = vst [vmem:[#allocation160_spill] sm:$0xff] %v9482_v42  ;;  %v9485_v38 = vadd.f32 %v2149_v39, %v9037_v12  ;;  %v9488_v9 = vadd.f32 %v2578_v10, %v9040_v14  ;;  %v2151_v4 = vpop.f32.mrb[79].mxu0  ;;  %v2580_v34 = vpop.f32.mrb[111].mxu1 }
 0x3da   : > { %13039 = vst [vmem:[#allocation163_spill] sm:$0xff] %v9491_v18  ;;  %13040 = vst [vmem:[#allocation164_spill] sm:$0xff] %v9494_v15  ;;  %v9497_v32 = vadd.f32 %v2151_v4, %v9043_v50  ;;  %v9500_v45 = vadd.f32 %v2580_v34, %v9046_v13  ;;  %v736_v34 = vld [vmem:[%s8327_s23 + $0x108] sm:$0xff] }
 0x3db   : > { %13037 = vst [vmem:[#allocation161_spill] sm:$0xff] %v9485_v38  ;;  %13038 = vst [vmem:[#allocation162_spill] sm:$0xff] %v9488_v9  ;;  %3874 = vmatmul.mubr.bf16.gmra.mrb[184].mxu0 %v9474_v11  ;;  %v9516_v38 = vpack.c.bf16 %v733_v27, %v731_v41  ;;  %v9518_v9 = vpack.c.bf16 %v738_v61, %v736_v34  ;;  %v7244_v18 = vld [vmem:[#allocation10 + $0x4] ss:$8 sps:$4 sm:$0xff]  }
 0x3dc   : > { %13041 = vst [vmem:[#allocation165_spill] sm:$0xff] %v9497_v32  ;;  %13042 = vst [vmem:[#allocation166_spill] sm:$0xff] %v9500_v45  ;;  %3883 = vmatprep.mubr.bf16.mxu0 %v9476_v62  ;;  %v735_v45 = vld [vmem:[%s8327_s23 + $0x100] sm:$0xff]  ;;  %v740_v32 = vld [vmem:[%s8327_s23 + $0x128] sm:$0xff]  ;;  %3352 = vmatprep.subr.bf16.mxu1 %v7244_v18 }
 0x3dd   : > { %v9560_v2 = vpack.c.bf16 %v742_v56, %v740_v32 }
 0x3de   : > { %v2155_v52 = vpop.f32.mrb[80].mxu0  ;;  %v2584_v1 = vpop.f32.mrb[112].mxu1 }
 0x3df   : > { %v2157_v39 = vpop.f32.mrb[81].mxu0  ;;  %v2586_v55 = vpop.f32.mrb[113].mxu1  ;;  %v9521_v26 = vadd.f32 %v2155_v52, %v9037_v12  ;;  %v9524_v31 = vadd.f32 %v2584_v1, %v9040_v14 }
 0x3e0   : > { %v2159_v10 = vpop.f32.mrb[82].mxu0  ;;  %v2588_v42 = vpop.f32.mrb[114].mxu1  ;;  %v9533_v61 = vadd.f32 %v2157_v39, %v9043_v50  ;;  %v9536_v34 = vadd.f32 %v2586_v55, %v9046_v13  ;;  %v737_v39 = vld [vmem:[%s8327_s23 + $0x110] sm:$0xff]  ;;  %v7242_v55 = vld [vmem:[#allocation10] ss:$8 sps:$4 sm:$0xff]  }
 0x3e1   : > { %13043 = vst [vmem:[#allocation167_spill] sm:$0xff] %v9521_v26  ;;  %13044 = vst [vmem:[#allocation168_spill] sm:$0xff] %v9524_v31  ;;  %v9527_v4 = vadd.f32 %v2159_v10, %v9037_v12  ;;  %v9530_v15 = vadd.f32 %v2588_v42, %v9040_v14  ;;  %v2161_v27 = vpop.f32.mrb[83].mxu0  ;;  %v2590_v41 = vpop.f32.mrb[115].mxu1  ;;  %3353 = vmatpush1.bf16.msra.mxu1 %v7242_v55  ;;  %v739_v55 = vld [vmem:[%s8327_s23 + $0x120] sm:$0xff] }
 0x3e2   : > { %13047 = vst [vmem:[#allocation171_spill] sm:$0xff] %v9533_v61  ;;  %13048 = vst [vmem:[#allocation172_spill] sm:$0xff] %v9536_v34  ;;  %v9539_v52 = vadd.f32 %v2161_v27, %v9043_v50  ;;  %v9542_v1 = vadd.f32 %v2590_v41, %v9046_v13  ;;  %v744_v61 = vld [vmem:[%s8327_s23 + $0x148] sm:$0xff] }
 0x3e3   : > { %13045 = vst [vmem:[#allocation169_spill] sm:$0xff] %v9527_v4  ;;  %13046 = vst [vmem:[#allocation170_spill] sm:$0xff] %v9530_v15  ;;  %3884 = vmatmul.mubr.bf16.gmra.mrb[188].mxu0 %v9516_v38  ;;  %v9558_v15 = vpack.c.bf16 %v737_v39, %v735_v45 }
 0x3e4   : > { %13049 = vst [vmem:[#allocation173_spill] sm:$0xff] %v9539_v52  ;;  %13050 = vst [vmem:[#allocation174_spill] sm:$0xff] %v9542_v1  ;;  %3893 = vmatprep.mubr.bf16.mxu0 %v9518_v9  ;;  %v7247_v1 = vld [vmem:[#allocation10 + $0x14] ss:$8 sps:$4 sm:$0xff]  }
 0x3e5   : > { %v746_v52 = vld [vmem:[%s8327_s23 + $0x158] sm:$0xff]  ;;  %3354 = vmatprep.subr.bf16.mxu1 %v7247_v1 }
 0x3e6   : > { %v2165_v42 = vpop.f32.mrb[84].mxu0  ;;  %v2594_v26 = vpop.f32.mrb[116].mxu1  ;;  %v9602_v24 = vpack.c.bf16 %v746_v52, %v744_v61 }
 0x3e7   : > { %v2167_v10 = vpop.f32.mrb[85].mxu0  ;;  %v2596_v31 = vpop.f32.mrb[117].mxu1  ;;  %v9563_v27 = vadd.f32 %v2165_v42, %v9037_v12  ;;  %v9566_v41 = vadd.f32 %v2594_v26, %v9040_v14 }
 0x3e8   : > { %v2169_v4 = vpop.f32.mrb[86].mxu0  ;;  %v2598_v53 = vpop.f32.mrb[118].mxu1  ;;  %v9575_v56 = vadd.f32 %v2167_v10, %v9043_v50  ;;  %v9578_v32 = vadd.f32 %v2596_v31, %v9046_v13  ;;  %v741_v10 = vld [vmem:[%s8327_s23 + $0x130] sm:$0xff] }
 0x3e9   : > { %13051 = vst [vmem:[#allocation175_spill] sm:$0xff] %v9563_v27  ;;  %13052 = vst [vmem:[#allocation176_spill] sm:$0xff] %v9566_v41  ;;  %v9569_v34 = vadd.f32 %v2169_v4, %v9037_v12  ;;  %v9572_v18 = vadd.f32 %v2598_v53, %v9040_v14  ;;  %v2171_v45 = vpop.f32.mrb[87].mxu0  ;;  %v2600_v39 = vpop.f32.mrb[119].mxu1  ;;  %v7245_v31 = vld [vmem:[#allocation10 + $0x10] ss:$8 sps:$4 sm:$0xff]  }
 0x3ea   : > { %13055 = vst [vmem:[#allocation179_spill] sm:$0xff] %v9575_v56  ;;  %13056 = vst [vmem:[#allocation180_spill] sm:$0xff] %v9578_v32  ;;  %v9581_v42 = vadd.f32 %v2171_v45, %v9043_v50  ;;  %v9584_v26 = vadd.f32 %v2600_v39, %v9046_v13  ;;  %3355 = vmatpush1.bf16.msra.mxu1 %v7245_v31  ;;  %v743_v31 = vld [vmem:[%s8327_s23 + $0x140] sm:$0xff]  ;;  %v748_v56 = vld [vmem:[%s8327_s23 + $0x168] sm:$0xff] }
 0x3eb   : > { %13053 = vst [vmem:[#allocation177_spill] sm:$0xff] %v9569_v34  ;;  %13054 = vst [vmem:[#allocation178_spill] sm:$0xff] %v9572_v18  ;;  %3894 = vmatmul.mubr.bf16.gmra.mrb[192].mxu0 %v9558_v15  ;;  %v9600_v18 = vpack.c.bf16 %v741_v10, %v739_v55 }
 0x3ec   : > { %13057 = vst [vmem:[#allocation181_spill] sm:$0xff] %v9581_v42  ;;  %13058 = vst [vmem:[#allocation182_spill] sm:$0xff] %v9584_v26  ;;  %3903 = vmatprep.mubr.bf16.mxu0 %v9560_v2  ;;  %v7250_v26 = vld [vmem:[#allocation10 + $0x24] ss:$8 sps:$4 sm:$0xff]   ;;  %v750_v42 = vld [vmem:[%s8327_s23 + $0x178] sm:$0xff] }
 0x3ed   : > { %3356 = vmatprep.subr.bf16.mxu1 %v7250_v26  ;;  %v9644_v5 = vpack.c.bf16 %v750_v42, %v748_v56 }
 0x3ee   : > { %v2175_v53 = vpop.f32.mrb[88].mxu0  ;;  %v2604_v27 = vpop.f32.mrb[120].mxu1 }
 0x3ef   : > { %v2177_v4 = vpop.f32.mrb[89].mxu0  ;;  %v2606_v41 = vpop.f32.mrb[121].mxu1  ;;  %v9605_v45 = vadd.f32 %v2175_v53, %v9037_v12  ;;  %v9608_v39 = vadd.f32 %v2604_v27, %v9040_v14 }
 0x3f0   : > { %v2179_v34 = vpop.f32.mrb[90].mxu0  ;;  %v2608_v54 = vpop.f32.mrb[122].mxu1  ;;  %v9617_v61 = vadd.f32 %v2177_v4, %v9043_v50  ;;  %v9620_v52 = vadd.f32 %v2606_v41, %v9046_v13  ;;  %v745_v4 = vld [vmem:[%s8327_s23 + $0x150] sm:$0xff]  ;;  %v7248_v41 = vld [vmem:[#allocation10 + $0x20] ss:$8 sps:$4 sm:$0xff]  }
 0x3f1   : > { %13059 = vst [vmem:[#allocation183_spill] sm:$0xff] %v9605_v45  ;;  %13060 = vst [vmem:[#allocation184_spill] sm:$0xff] %v9608_v39  ;;  %v9611_v32 = vadd.f32 %v2179_v34, %v9037_v12  ;;  %v9614_v1 = vadd.f32 %v2608_v54, %v9040_v14  ;;  %v2181_v55 = vpop.f32.mrb[91].mxu0  ;;  %v2610_v10 = vpop.f32.mrb[123].mxu1  ;;  %3357 = vmatpush1.bf16.msra.mxu1 %v7248_v41 }
 0x3f2   : > { %13063 = vst [vmem:[#allocation187_spill] sm:$0xff] %v9617_v61  ;;  %13064 = vst [vmem:[#allocation188_spill] sm:$0xff] %v9620_v52  ;;  %v9623_v53 = vadd.f32 %v2181_v55, %v9043_v50  ;;  %v9626_v27 = vadd.f32 %v2610_v10, %v9046_v13 }
 0x3f3   : > { %13061 = vst [vmem:[#allocation185_spill] sm:$0xff] %v9611_v32  ;;  %13062 = vst [vmem:[#allocation186_spill] sm:$0xff] %v9614_v1  ;;  %3904 = vmatmul.mubr.bf16.gmra.mrb[196].mxu0 %v9600_v18  ;;  %v9642_v1 = vpack.c.bf16 %v745_v4, %v743_v31 }
 0x3f4   : > { %13065 = vst [vmem:[#allocation189_spill] sm:$0xff] %v9623_v53  ;;  %13066 = vst [vmem:[#allocation190_spill] sm:$0xff] %v9626_v27  ;;  %3913 = vmatprep.mubr.bf16.mxu0 %v9602_v24 }
 0x3f6   : > { %v2185_v54 = vpop.f32.mrb[92].mxu0  ;;  %v2614_v45 = vpop.f32.mrb[124].mxu1 }
 0x3f7   : > { %v2187_v34 = vpop.f32.mrb[93].mxu0  ;;  %v2616_v39 = vpop.f32.mrb[125].mxu1  ;;  %v9647_v55 = vadd.f32 %v2185_v54, %v9037_v12  ;;  %v9650_v10 = vadd.f32 %v2614_v45, %v9040_v14  ;;  %v7253_v54 = vld [vmem:[#allocation10 + $0x34] ss:$8 sps:$4 sm:$0xff]  }
 0x3f8   : > { %v2189_v32 = vpop.f32.mrb[94].mxu0  ;;  %v2618_v36 = vpop.f32.mrb[126].mxu1  ;;  %v9659_v41 = vadd.f32 %v2187_v34, %v9043_v50  ;;  %v9662_v56 = vadd.f32 %v2616_v39, %v9046_v13  ;;  %v7251_v39 = vld [vmem:[#allocation10 + $0x30] ss:$8 sps:$4 sm:$0xff]   ;;  %3358 = vmatprep.subr.bf16.mxu1 %v7253_v54 }
 0x3f9   : > { %13067 = vst [vmem:[#allocation191_spill] sm:$0xff] %v9647_v55  ;;  %13068 = vst [vmem:[#allocation192_spill] sm:$0xff] %v9650_v10  ;;  %v9653_v52 = vadd.f32 %v2189_v32, %v9037_v12  ;;  %v9656_v26 = vadd.f32 %v2618_v36, %v9040_v14  ;;  %v2191_v31 = vpop.f32.mrb[95].mxu0  ;;  %v2620_v4 = vpop.f32.mrb[127].mxu1  ;;  %v2687_v12 = vld [vmem:[%s13075_s0] sm:$0x3]  ;;  %3359 = vmatpush1.bf16.msra.mxu1 %v7251_v39 }
 0x3fa   : > { %13071 = vst [vmem:[#allocation195_spill] sm:$0xff] %v9659_v41  ;;  %13072 = vst [vmem:[#allocation196_spill] sm:$0xff] %v9662_v56  ;;  %v9665_v42 = vadd.f32 %v2191_v31, %v9043_v50  ;;  %v9668_v45 = vadd.f32 %v2620_v4, %v9046_v13  ;;  %v747_v32 = vld [vmem:[%s8327_s23 + $0x160] sm:$0xff]  ;;  %v749_v50 = vld [vmem:[%s8327_s23 + $0x170] sm:$0xff]  ;;  %v9686_v31 = vrot.slane %v2687_v12, %v8610_v30  ;;  %s11883_s0 = scalar_lea.vmem [#allocation14], %s6573_s13 }
 0x3fb   : > { %13069 = vst [vmem:[#allocation193_spill] sm:$0xff] %v9653_v52  ;;  %13070 = vst [vmem:[#allocation194_spill] sm:$0xff] %v9656_v26  ;;  %3914 = vmatmul.mubr.bf16.gmra.mrb[200].mxu0 %v9642_v1  ;;  %v752_v4 = vld [vmem:[%s8327_s23 + $0x188] sm:$0xff]  ;;  %v754_v14 = vld [vmem:[%s8327_s23 + $0x198] sm:$0xff]  ;;  %v9691_v10 = vrot.slane %v2687_v12, %v8605_v28  ;;  %v9693_v27 = vpack.c.bf16 %v749_v50, %v747_v32  ;;  %s6411_s18 = sshll.u32 %s11883_s0, 4  ;;  %s12391_s18 = int_to_ptr.vmem [resolvable:$true] %s6411_s18 }
 0x3fc   : > { %13073 = vst [vmem:[#allocation197_spill] sm:$0xff] %v9665_v42  ;;  %13074 = vst [vmem:[#allocation198_spill] sm:$0xff] %v9668_v45  ;;  %3923 = vmatprep.mubr.bf16.mxu0 %v9644_v5  ;;  %v9695_v34 = vpack.c.bf16 %v754_v14, %v752_v4  ;;  %v751_v14 = vld [vmem:[%s8327_s23 + $0x180] sm:$0xff]  ;;  %v756_v4 = vld [vmem:[%s8327_s23 + $0x1a8] sm:$0xff]  ;;  %p7871_p12 = scmp.lt.s32.totalorder %s12391_s18, %s7869_s24 }
 0x3fd   : > { %v7254_v50 = vld [vmem:[#allocation10 + $0x40] ss:$8 sps:$4 sm:$0xff]   ;;  %v7256_v39 = vld [vmem:[#allocation10 + $0x44] ss:$8 sps:$4 sm:$0xff]  }
 0x3fe   : > { %v2893_v36 = vpop.f32.mrb[96].mxu0  ;;  %3360 = vmatprep.subr.bf16.mxu1 %v7256_v39 }
 0x3ff   : > { %v2895_v26 = vpop.f32.mrb[97].mxu0  ;;  %v9698_v56 = vadd.f32 %v2893_v36, %v9686_v31  ;;  %v753_v36 = vld [vmem:[%s8327_s23 + $0x190] sm:$0xff]  ;;  %3361 = vmatpush1.bf16.msra.mxu1 %v7254_v50 }
 0x400   : > { %v2897_v13 = vpop.f32.mrb[98].mxu0  ;;  %v9704_v12 = vadd.f32 %v2895_v26, %v9691_v10  ;;  %v758_v26 = vld [vmem:[%s8327_s23 + $0x1b8] sm:$0xff]  ;;  %v9719_v41 = vpack.c.bf16 %v753_v36, %v751_v14  ;;  %v755_v36 = vld [vmem:[%s8327_s23 + $0x1a0] sm:$0xff] }
 0x401   : > { %13076 = vst [vmem:[#allocation199_spill] sm:$0xff] %v9698_v56  ;;  %v9701_v45 = vadd.f32 %v2897_v13, %v9686_v31  ;;  %v2899_v55 = vpop.f32.mrb[99].mxu0  ;;  %v9721_v56 = vpack.c.bf16 %v758_v26, %v756_v4  ;;  %v7257_v50 = vld [vmem:[#allocation10 + $0x50] ss:$8 sps:$4 sm:$0xff]   ;;  %v7259_v4 = vld [vmem:[#allocation10 + $0x54] ss:$8 sps:$4 sm:$0xff]  }
 0x402   : > { %13078 = vst [vmem:[#allocation201_spill] sm:$0xff] %v9704_v12  ;;  %v9707_v54 = vadd.f32 %v2899_v55, %v9691_v10  ;;  %v760_v26 = vld [vmem:[%s8327_s23 + $0x1c8] sm:$0xff]  ;;  %3362 = vmatprep.subr.bf16.mxu1 %v7259_v4 }
 0x403   : > { %13077 = vst [vmem:[#allocation200_spill] sm:$0xff] %v9701_v45  ;;  %3924 = vmatmul.mubr.bf16.gmra.mrb[204].mxu0 %v9693_v27  ;;  %3363 = vmatpush1.bf16.msra.mxu1 %v7257_v50  ;;  %v7260_v50 = vld [vmem:[#allocation10 + $0x60] ss:$8 sps:$4 sm:$0xff]  }
 0x404   : > { %13079 = vst [vmem:[#allocation202_spill] sm:$0xff] %v9707_v54  ;;  %3933 = vmatprep.mubr.bf16.mxu0 %v9695_v34 }
 0x406   : > { %v2903_v52 = vpop.f32.mrb[100].mxu0 }
 0x407   : > { %v2905_v55 = vpop.f32.mrb[101].mxu0  ;;  %v9724_v45 = vadd.f32 %v2903_v52, %v9686_v31 }
 0x408   : > { %v2907_v32 = vpop.f32.mrb[102].mxu0  ;;  %v9730_v54 = vadd.f32 %v2905_v55, %v9691_v10  ;;  %v762_v55 = vld [vmem:[%s8327_s23 + $0x1d8] sm:$0xff] }
 0x409   : > { %13080 = vst [vmem:[#allocation203_spill] sm:$0xff] %v9724_v45  ;;  %v9727_v13 = vadd.f32 %v2907_v32, %v9686_v31  ;;  %v2909_v12 = vpop.f32.mrb[103].mxu0  ;;  %v757_v32 = vld [vmem:[%s8327_s23 + $0x1b0] sm:$0xff]  ;;  %v9747_v45 = vpack.c.bf16 %v762_v55, %v760_v26  ;;  %v7262_v26 = vld [vmem:[#allocation10 + $0x64] ss:$8 sps:$4 sm:$0xff]  }
 0x40a   : > { %13082 = vst [vmem:[#allocation205_spill] sm:$0xff] %v9730_v54  ;;  %v9733_v39 = vadd.f32 %v2909_v12, %v9691_v10  ;;  %v9745_v61 = vpack.c.bf16 %v757_v32, %v755_v36  ;;  %v759_v32 = vld [vmem:[%s8327_s23 + $0x1c0] sm:$0xff]  ;;  %v764_v55 = vld [vmem:[%s8327_s23 + $0x1e8] sm:$0xff]  ;;  %3364 = vmatprep.subr.bf16.mxu1 %v7262_v26 }
 0x40b   : > { %13081 = vst [vmem:[#allocation204_spill] sm:$0xff] %v9727_v13  ;;  %3934 = vmatmul.mubr.bf16.gmra.mrb[208].mxu0 %v9719_v41  ;;  %3365 = vmatpush1.bf16.msra.mxu1 %v7260_v50  ;;  %v7263_v50 = vld [vmem:[#allocation10 + $0x70] ss:$8 sps:$4 sm:$0xff]  }
 0x40c   : > { %13083 = vst [vmem:[#allocation206_spill] sm:$0xff] %v9733_v39  ;;  %3943 = vmatprep.mubr.bf16.mxu0 %v9721_v56 }
 0x40e   : > { %v2913_v42 = vpop.f32.mrb[104].mxu0 }
 0x40f   : > { %v2915_v12 = vpop.f32.mrb[105].mxu0  ;;  %v9750_v52 = vadd.f32 %v2913_v42, %v9686_v31 }
 0x410   : > { %v2917_v14 = vpop.f32.mrb[106].mxu0  ;;  %v9756_v13 = vadd.f32 %v2915_v12, %v9691_v10  ;;  %v766_v12 = vld [vmem:[%s8327_s23 + $0x1f8] sm:$0xff] }
 0x411   : > { %13084 = vst [vmem:[#allocation207_spill] sm:$0xff] %v9750_v52  ;;  %v9753_v54 = vadd.f32 %v2917_v14, %v9686_v31  ;;  %v2919_v39 = vpop.f32.mrb[107].mxu0  ;;  %v761_v14 = vld [vmem:[%s8327_s23 + $0x1d0] sm:$0xff]  ;;  %v9773_v52 = vpack.c.bf16 %v766_v12, %v764_v55 }
 0x412   : > { %13086 = vst [vmem:[#allocation209_spill] sm:$0xff] %v9756_v13  ;;  %v9759_v4 = vadd.f32 %v2919_v39, %v9691_v10  ;;  %v9771_v49 = vpack.c.bf16 %v761_v14, %v759_v32  ;;  %v763_v14 = vld [vmem:[%s8327_s23 + $0x1e0] sm:$0xff]  ;;  %v7265_v55 = vld [vmem:[#allocation10 + $0x74] ss:$8 sps:$4 sm:$0xff]  }
 0x413   : > { %13085 = vst [vmem:[#allocation208_spill] sm:$0xff] %v9753_v54  ;;  %3944 = vmatmul.mubr.bf16.gmra.mrb[212].mxu0 %v9745_v61  ;;  %3366 = vmatprep.subr.bf16.mxu1 %v7265_v55 }
 0x414   : > { %13087 = vst [vmem:[#allocation210_spill] sm:$0xff] %v9759_v4  ;;  %3953 = vmatprep.mubr.bf16.mxu0 %v9747_v45  ;;  %3367 = vmatpush1.bf16.msra.mxu1 %v7263_v50  ;;  %v7266_v50 = vld [vmem:[#allocation10 + $0x80] ss:$8 sps:$4 sm:$0xff]  }
 0x416   : > { %v2923_v53 = vpop.f32.mrb[108].mxu0 }
 0x417   : > { %v2925_v39 = vpop.f32.mrb[109].mxu0  ;;  %v9776_v42 = vadd.f32 %v2923_v53, %v9686_v31 }
 0x418   : > { %v2927_v36 = vpop.f32.mrb[110].mxu0  ;;  %v9782_v54 = vadd.f32 %v2925_v39, %v9691_v10 }
 0x419   : > { %13088 = vst [vmem:[#allocation211_spill] sm:$0xff] %v9776_v42  ;;  %v9779_v13 = vadd.f32 %v2927_v36, %v9686_v31  ;;  %v2929_v4 = vpop.f32.mrb[111].mxu0  ;;  %v765_v36 = vld [vmem:[%s8327_s23 + $0x1f0] sm:$0xff] }
 0x41a   : > { %13090 = vst [vmem:[#allocation213_spill] sm:$0xff] %v9782_v54  ;;  %v9785_v26 = vadd.f32 %v2929_v4, %v9691_v10  ;;  %v9795_v47 = vpack.c.bf16 %v765_v36, %v763_v14  ;;  %v13096_v36 = vpack.c.bf16 %v9067_v44, %v9061_v43 }
 0x41b   : > { %13089 = vst [vmem:[#allocation212_spill] sm:$0xff] %v9779_v13  ;;  %3954 = vmatmul.mubr.bf16.gmra.mrb[216].mxu0 %v9771_v49 }
 0x41c   : > { %13091 = vst [vmem:[#allocation214_spill] sm:$0xff] %v9785_v26  ;;  %3963 = vmatprep.mubr.bf16.mxu0 %v9773_v52 }
 0x41e   : > { %v2933_v12 = vpop.f32.mrb[112].mxu0 }
 0x41f   : > { %v2935_v39 = vpop.f32.mrb[113].mxu0  ;;  %v9798_v32 = vadd.f32 %v2933_v12, %v9686_v31  ;;  %v7268_v12 = vld [vmem:[#allocation10 + $0x84] ss:$8 sps:$4 sm:$0xff]  }
 0x420   : > { %v2937_v4 = vpop.f32.mrb[114].mxu0  ;;  %v9804_v53 = vadd.f32 %v2935_v39, %v9691_v10  ;;  %3368 = vmatprep.subr.bf16.mxu1 %v7268_v12  ;;  %v7271_v12 = vld [vmem:[#allocation10 + $0x94] ss:$8 sps:$4 sm:$0xff]  }
 0x421   : > { %13092 = vst [vmem:[#allocation215_spill] sm:$0xff] %v9798_v32  ;;  %v9801_v42 = vadd.f32 %v2937_v4, %v9686_v31  ;;  %v2939_v13 = vpop.f32.mrb[115].mxu0  ;;  %3369 = vmatpush1.bf16.msra.mxu1 %v7266_v50  ;;  %v7269_v50 = vld [vmem:[#allocation10 + $0x90] ss:$8 sps:$4 sm:$0xff]  }
 0x422   : > { %13094 = vst [vmem:[#allocation217_spill] sm:$0xff] %v9804_v53  ;;  %v9807_v54 = vadd.f32 %v2939_v13, %v9691_v10  ;;  %3370 = vmatprep.subr.bf16.mxu1 %v7271_v12 }
 0x423   : > { %13093 = vst [vmem:[#allocation216_spill] sm:$0xff] %v9801_v42  ;;  %3964 = vmatmul.mubr.bf16.gmra.mrb[220].mxu0 %v9795_v47 }
 0x424   : > { %13095 = vst [vmem:[#allocation218_spill] sm:$0xff] %v9807_v54  ;;  %4531 = vmatprep.mubr.bf16.mxu0 %v13096_v36  ;;  %v7274_v36 = vld [vmem:[#allocation10 + $0xa4] ss:$8 sps:$4 sm:$0xff]  }
 0x425   : > { %3371 = vmatpush1.bf16.msra.mxu1 %v7269_v50 }
 0x426   : > { %v2943_v4 = vpop.f32.mrb[116].mxu0  ;;  %3372 = vmatprep.subr.bf16.mxu1 %v7274_v36 }
 0x427   : > { %v2945_v39 = vpop.f32.mrb[117].mxu0  ;;  %v9818_v26 = vadd.f32 %v2943_v4, %v9686_v31 }
 0x428   : > { %v2947_v13 = vpop.f32.mrb[118].mxu0  ;;  %v9824_v14 = vadd.f32 %v2945_v39, %v9691_v10 }
 0x429   : > { %13097 = vst [vmem:[#allocation219_spill] sm:$0xff] %v9818_v26  ;;  %v9821_v55 = vadd.f32 %v2947_v13, %v9686_v31  ;;  %v2949_v32 = vpop.f32.mrb[119].mxu0  ;;  %v7275_v26 = vld [vmem:[#allocation10 + $0xb0] ss:$8 sps:$4 sm:$0xff]  }
 0x42a   : > { %13099 = vst [vmem:[#allocation221_spill] sm:$0xff] %v9824_v14  ;;  %v9827_v43 = vadd.f32 %v2949_v32, %v9691_v10  ;;  %v7272_v14 = vld [vmem:[#allocation10 + $0xa0] ss:$8 sps:$4 sm:$0xff]  }
 0x42b   : > { %13098 = vst [vmem:[#allocation220_spill] sm:$0xff] %v9821_v55  ;;  %3373 = vmatpush1.bf16.msra.mxu1 %v7272_v14  ;;  %v7280_v14 = vld [vmem:[#allocation10 + $0xc4] ss:$8 sps:$4 sm:$0xff]  }
 0x42c   : > { %13100 = vst [vmem:[#allocation222_spill] sm:$0xff] %v9827_v43 }
 0x42e   : > { %v2953_v4 = vpop.f32.mrb[120].mxu0 }
 0x42f   : > { %v2955_v53 = vpop.f32.mrb[121].mxu0  ;;  %v9834_v54 = vadd.f32 %v2953_v4, %v9686_v31 }
 0x430   : > { %v2957_v13 = vpop.f32.mrb[122].mxu0  ;;  %v9840_v42 = vadd.f32 %v2955_v53, %v9691_v10 }
 0x431   : > { %13101 = vst [vmem:[#allocation223_spill] sm:$0xff] %v9834_v54  ;;  %v9837_v39 = vadd.f32 %v2957_v13, %v9686_v31  ;;  %v2959_v32 = vpop.f32.mrb[123].mxu0  ;;  %v7277_v13 = vld [vmem:[#allocation10 + $0xb4] ss:$8 sps:$4 sm:$0xff]  }
 0x432   : > { %13103 = vst [vmem:[#allocation225_spill] sm:$0xff] %v9840_v42  ;;  %v9843_v44 = vadd.f32 %v2959_v32, %v9691_v10  ;;  %3374 = vmatprep.subr.bf16.mxu1 %v7277_v13  ;;  %v7278_v42 = vld [vmem:[#allocation10 + $0xc0] ss:$8 sps:$4 sm:$0xff]   ;;  %v7283_v13 = vld [vmem:[#allocation10 + $0xd4] ss:$8 sps:$4 sm:$0xff]  }
 0x433   : > { %13102 = vst [vmem:[#allocation224_spill] sm:$0xff] %v9837_v39  ;;  %3375 = vmatpush1.bf16.msra.mxu1 %v7275_v26  ;;  %v7281_v26 = vld [vmem:[#allocation10 + $0xd0] ss:$8 sps:$4 sm:$0xff]  }
 0x434   : > { %13104 = vst [vmem:[#allocation226_spill] sm:$0xff] %v9843_v44  ;;  %3376 = vmatprep.subr.bf16.mxu1 %v7280_v14 }
 0x436   : > { %v2963_v4 = vpop.f32.mrb[124].mxu0 }
 0x437   : > { %v2965_v43 = vpop.f32.mrb[125].mxu0  ;;  %v9850_v53 = vadd.f32 %v2963_v4, %v9686_v31  ;;  %3377 = vmatpush1.bf16.msra.mxu1 %v7278_v42  ;;  %v7286_v42 = vld [vmem:[#allocation10 + $0xe4] ss:$8 sps:$4 sm:$0xff]  }
 0x438   : > { %v2967_v55 = vpop.f32.mrb[126].mxu0  ;;  %v9856_v12 = vadd.f32 %v2965_v43, %v9691_v10  ;;  %3378 = vmatprep.subr.bf16.mxu1 %v7283_v13  ;;  %v7289_v13 = vld [vmem:[#allocation10 + $0xf4] ss:$8 sps:$4 sm:$0xff]  }
 0x439   : > { %13105 = vst [vmem:[#allocation227_spill] sm:$0xff] %v9850_v53  ;;  %v9853_v32 = vadd.f32 %v2967_v55, %v9686_v31  ;;  %v2969_v63 = vpop.f32.mrb[127].mxu0 }
 0x43a   : > { %13107 = vst [vmem:[#allocation229_spill] sm:$0xff] %v9856_v12  ;;  %v9859_v36 = vadd.f32 %v2969_v63, %v9691_v10  ;;  %v7284_v12 = vld [vmem:[#allocation10 + $0xe0] ss:$8 sps:$4 sm:$0xff]  }
 0x43b   : > { %13106 = vst [vmem:[#allocation228_spill] sm:$0xff] %v9853_v32  ;;  %3379 = vmatpush1.bf16.msra.mxu1 %v7281_v26  ;;  %v7287_v26 = vld [vmem:[#allocation10 + $0xf0] ss:$8 sps:$4 sm:$0xff]  }
 0x43c   : > { %13108 = vst [vmem:[#allocation230_spill] sm:$0xff] %v9859_v36  ;;  %3380 = vmatprep.subr.bf16.mxu1 %v7286_v42 }
 0x43e   : > { %v2973_v55 = vpop.f32.mrb[128].mxu0 }
 0x43f   : > { %v2975_v44 = vpop.f32.mrb[129].mxu0  ;;  %v9866_v43 = vadd.f32 %v2973_v55, %v9686_v31  ;;  %3381 = vmatpush1.bf16.msra.mxu1 %v7284_v12 }
 0x440   : > { %v2977_v54 = vpop.f32.mrb[130].mxu0  ;;  %v9872_v50 = vadd.f32 %v2975_v44, %v9691_v10  ;;  %3382 = vmatprep.subr.bf16.mxu1 %v7289_v13 }
 0x441   : > { %13109 = vst [vmem:[#allocation231_spill] sm:$0xff] %v9866_v43  ;;  %v9869_v63 = vadd.f32 %v2977_v54, %v9686_v31  ;;  %v2979_v39 = vpop.f32.mrb[131].mxu0  ;;  %v7307_v43 = vld [vmem:[#allocation13 + $0x54] ss:$8 sps:$4 sm:$0xff]  }
 0x442   : > { %13111 = vst [vmem:[#allocation233_spill] sm:$0xff] %v9872_v50  ;;  %v9875_v14 = vadd.f32 %v2979_v39, %v9691_v10 }
 0x443   : > { %13110 = vst [vmem:[#allocation232_spill] sm:$0xff] %v9869_v63  ;;  %3383 = vmatpush1.bf16.msra.mxu1 %v7287_v26 }
 0x444   : > { %13112 = vst [vmem:[#allocation234_spill] sm:$0xff] %v9875_v14 }
 0x446   : > { %v2983_v54 = vpop.f32.mrb[132].mxu0  ;;  %3385 = vmatmul.mubr.bf16.vlgmr.msra.gmra.mrb[128].mxu1 %v9222_v58 }
 0x447   : > { %v2985_v36 = vpop.f32.mrb[133].mxu0  ;;  %v9882_v44 = vadd.f32 %v2983_v54, %v9686_v31  ;;  %3394 = vmatprep.mubr.bf16.mxu1 %v9224_v40 }
 0x448   : > { %v2987_v53 = vpop.f32.mrb[134].mxu0  ;;  %v9888_v4 = vadd.f32 %v2985_v36, %v9691_v10 }
 0x449   : > { %13113 = vst [vmem:[#allocation235_spill] sm:$0xff] %v9882_v44  ;;  %v9885_v39 = vadd.f32 %v2987_v53, %v9686_v31  ;;  %v2989_v32 = vpop.f32.mrb[135].mxu0 }
 0x44a   : > { %13115 = vst [vmem:[#allocation237_spill] sm:$0xff] %v9888_v4  ;;  %v9891_v42 = vadd.f32 %v2989_v32, %v9691_v10 }
 0x44b   : > { %13114 = vst [vmem:[#allocation236_spill] sm:$0xff] %v9885_v39 }
 0x44c   : > { %13116 = vst [vmem:[#allocation238_spill] sm:$0xff] %v9891_v42 }
 0x44e   : > { %v2993_v53 = vpop.f32.mrb[136].mxu0  ;;  %3395 = vmatmul.mubr.bf16.gmra.mrb[132].mxu1 %v9264_v35 }
 0x44f   : > { %v2995_v54 = vpop.f32.mrb[137].mxu0  ;;  %v9900_v26 = vadd.f32 %v2993_v53, %v9686_v31  ;;  %3404 = vmatprep.mubr.bf16.mxu1 %v9266_v17 }
 0x450   : > { %v2997_v55 = vpop.f32.mrb[138].mxu0  ;;  %v9906_v50 = vadd.f32 %v2995_v54, %v9691_v10 }
 0x451   : > { %13117 = vst [vmem:[#allocation239_spill] sm:$0xff] %v9900_v26  ;;  %v9903_v36 = vadd.f32 %v2997_v55, %v9686_v31  ;;  %v2999_v32 = vpop.f32.mrb[139].mxu0 }
 0x452   : > { %13119 = vst [vmem:[#allocation241_spill] sm:$0xff] %v9906_v50  ;;  %v9909_v12 = vadd.f32 %v2999_v32, %v9691_v10 }
 0x453   : > { %13118 = vst [vmem:[#allocation240_spill] sm:$0xff] %v9903_v36 }
 0x454   : > { %13120 = vst [vmem:[#allocation242_spill] sm:$0xff] %v9909_v12 }
 0x456   : > { %v3003_v53 = vpop.f32.mrb[140].mxu0  ;;  %3405 = vmatmul.mubr.bf16.gmra.mrb[136].mxu1 %v9306_v16 }
 0x457   : > { %v3005_v55 = vpop.f32.mrb[141].mxu0  ;;  %v9918_v14 = vadd.f32 %v3003_v53, %v9686_v31  ;;  %3414 = vmatprep.mubr.bf16.mxu1 %v9308_v3 }
 0x458   : > { %v3007_v42 = vpop.f32.mrb[142].mxu0  ;;  %v9924_v44 = vadd.f32 %v3005_v55, %v9691_v10 }
 0x459   : > { %13121 = vst [vmem:[#allocation243_spill] sm:$0xff] %v9918_v14  ;;  %v9921_v54 = vadd.f32 %v3007_v42, %v9686_v31  ;;  %v3009_v32 = vpop.f32.mrb[143].mxu0  ;;  %v7292_v14 = vld [vmem:[#allocation13 + $0x4] ss:$8 sps:$4 sm:$0xff]  }
 0x45a   : > { %13123 = vst [vmem:[#allocation245_spill] sm:$0xff] %v9924_v44  ;;  %v9927_v13 = vadd.f32 %v3009_v32, %v9691_v10  ;;  %4210 = vmatprep.subr.bf16.mxu1 %v7292_v14 }
 0x45b   : > { %13122 = vst [vmem:[#allocation244_spill] sm:$0xff] %v9921_v54 }
 0x45c   : > { %13124 = vst [vmem:[#allocation246_spill] sm:$0xff] %v9927_v13  ;;  %v7290_v13 = vld [vmem:[#allocation13] ss:$8 sps:$4 sm:$0xff]  }
 0x45d   : > { %4211 = vmatpush1.bf16.msra.mxu1 %v7290_v13  ;;  %v7293_v13 = vld [vmem:[#allocation13 + $0x10] ss:$8 sps:$4 sm:$0xff]  }
 0x45e   : > { %v3013_v53 = vpop.f32.mrb[144].mxu0  ;;  %3415 = vmatmul.mubr.bf16.gmra.mrb[140].mxu1 %v9348_v25 }
 0x45f   : > { %v3015_v42 = vpop.f32.mrb[145].mxu0  ;;  %v9936_v26 = vadd.f32 %v3013_v53, %v9686_v31  ;;  %3424 = vmatprep.mubr.bf16.mxu1 %v9350_v48 }
 0x460   : > { %v3017_v12 = vpop.f32.mrb[146].mxu0  ;;  %v9942_v36 = vadd.f32 %v3015_v42, %v9691_v10 }
 0x461   : > { %13125 = vst [vmem:[#allocation247_spill] sm:$0xff] %v9936_v26  ;;  %v9939_v55 = vadd.f32 %v3017_v12, %v9686_v31  ;;  %v3019_v32 = vpop.f32.mrb[147].mxu0  ;;  %v7295_v26 = vld [vmem:[#allocation13 + $0x14] ss:$8 sps:$4 sm:$0xff]  }
 0x462   : > { %13127 = vst [vmem:[#allocation249_spill] sm:$0xff] %v9942_v36  ;;  %v9945_v4 = vadd.f32 %v3019_v32, %v9691_v10  ;;  %4212 = vmatprep.subr.bf16.mxu1 %v7295_v26 }
 0x463   : > { %13126 = vst [vmem:[#allocation248_spill] sm:$0xff] %v9939_v55  ;;  %4213 = vmatpush1.bf16.msra.mxu1 %v7293_v13  ;;  %v7296_v13 = vld [vmem:[#allocation13 + $0x20] ss:$8 sps:$4 sm:$0xff]  }
 0x464   : > { %13128 = vst [vmem:[#allocation250_spill] sm:$0xff] %v9945_v4 }
 0x466   : > { %v3023_v12 = vpop.f32.mrb[148].mxu0  ;;  %3425 = vmatmul.mubr.bf16.gmra.mrb[144].mxu1 %v9390_v7 }
 0x467   : > { %v3025_v53 = vpop.f32.mrb[149].mxu0  ;;  %v9954_v32 = vadd.f32 %v3023_v12, %v9686_v31  ;;  %3434 = vmatprep.mubr.bf16.mxu1 %v9392_v6 }
 0x468   : > { %v3027_v42 = vpop.f32.mrb[150].mxu0  ;;  %v9960_v44 = vadd.f32 %v3025_v53, %v9691_v10 }
 0x469   : > { %13129 = vst [vmem:[#allocation251_spill] sm:$0xff] %v9954_v32  ;;  %v9957_v54 = vadd.f32 %v3027_v42, %v9686_v31  ;;  %v3029_v50 = vpop.f32.mrb[151].mxu0  ;;  %v7298_v32 = vld [vmem:[#allocation13 + $0x24] ss:$8 sps:$4 sm:$0xff]  }
 0x46a   : > { %13131 = vst [vmem:[#allocation253_spill] sm:$0xff] %v9960_v44  ;;  %v9963_v36 = vadd.f32 %v3029_v50, %v9691_v10  ;;  %4214 = vmatprep.subr.bf16.mxu1 %v7298_v32  ;;  %v3609_v32 = vld [vmem:[%s13141_s22] sm:$0x3] }
 0x46b   : > { %13130 = vst [vmem:[#allocation252_spill] sm:$0xff] %v9957_v54  ;;  %4215 = vmatpush1.bf16.msra.mxu1 %v7296_v13  ;;  %v7302_v13 = vld [vmem:[#allocation13 + $0x40] ss:$8 sps:$4 sm:$0xff]  }
 0x46c   : > { %13132 = vst [vmem:[#allocation254_spill] sm:$0xff] %v9963_v36 }
 0x46e   : > { %v3033_v12 = vpop.f32.mrb[152].mxu0  ;;  %3435 = vmatmul.mubr.bf16.gmra.mrb[148].mxu1 %v9432_v21 }
 0x46f   : > { %v3035_v42 = vpop.f32.mrb[153].mxu0  ;;  %v9972_v50 = vadd.f32 %v3033_v12, %v9686_v31  ;;  %3444 = vmatprep.mubr.bf16.mxu1 %v9434_v51 }
 0x470   : > { %v3037_v53 = vpop.f32.mrb[154].mxu0  ;;  %v9978_v14 = vadd.f32 %v3035_v42, %v9691_v10 }
 0x471   : > { %13133 = vst [vmem:[#allocation255_spill] sm:$0xff] %v9972_v50  ;;  %v9975_v55 = vadd.f32 %v3037_v53, %v9686_v31  ;;  %v3039_v4 = vpop.f32.mrb[155].mxu0 }
 0x472   : > { %13135 = vst [vmem:[#allocation257_spill] sm:$0xff] %v9978_v14  ;;  %v9981_v44 = vadd.f32 %v3039_v4, %v9691_v10 }
 0x473   : > { %13134 = vst [vmem:[#allocation256_spill] sm:$0xff] %v9975_v55 }
 0x474   : > { %13136 = vst [vmem:[#allocation258_spill] sm:$0xff] %v9981_v44  ;;  %v7299_v44 = vld [vmem:[#allocation13 + $0x30] ss:$8 sps:$4 sm:$0xff]  }
 0x476   : > { %v3043_v12 = vpop.f32.mrb[156].mxu0  ;;  %3445 = vmatmul.mubr.bf16.gmra.mrb[152].mxu1 %v9474_v11 }
 0x477   : > { %v3045_v53 = vpop.f32.mrb[157].mxu0  ;;  %v9990_v4 = vadd.f32 %v3043_v12, %v9686_v31  ;;  %3454 = vmatprep.mubr.bf16.mxu1 %v9476_v62 }
 0x478   : > { %v3047_v42 = vpop.f32.mrb[158].mxu0  ;;  %v9996_v26 = vadd.f32 %v3045_v53, %v9691_v10  ;;  %v10010_v53 = vrot.slane %v3609_v32, %v8610_v30 }
 0x479   : > { %13137 = vst [vmem:[#allocation259_spill] sm:$0xff] %v9990_v4  ;;  %v9993_v54 = vadd.f32 %v3047_v42, %v9686_v31  ;;  %v3049_v36 = vpop.f32.mrb[159].mxu0  ;;  %v7301_v31 = vld [vmem:[#allocation13 + $0x34] ss:$8 sps:$4 sm:$0xff]   ;;  %v7304_v4 = vld [vmem:[#allocation13 + $0x44] ss:$8 sps:$4 sm:$0xff]  }
 0x47a   : > { %13139 = vst [vmem:[#allocation261_spill] sm:$0xff] %v9996_v26  ;;  %v9999_v14 = vadd.f32 %v3049_v36, %v9691_v10  ;;  %v10014_v36 = vrot.slane %v3609_v32, %v8605_v28  ;;  %4216 = vmatprep.subr.bf16.mxu1 %v7301_v31 }
 0x47b   : > { %13138 = vst [vmem:[#allocation260_spill] sm:$0xff] %v9993_v54  ;;  %4217 = vmatpush1.bf16.msra.mxu1 %v7299_v44 }
 0x47c   : > { %13140 = vst [vmem:[#allocation262_spill] sm:$0xff] %v9999_v14  ;;  %4218 = vmatprep.subr.bf16.mxu1 %v7304_v4 }
 0x47e   : > { %v3815_v10 = vpop.f32.mrb[160].mxu0  ;;  %3455 = vmatmul.mubr.bf16.gmra.mrb[156].mxu1 %v9516_v38 }
 0x47f   : > { %v3817_v42 = vpop.f32.mrb[161].mxu0  ;;  %v3816_v12 = vadd.f32 %v3815_v10, %v10010_v53  ;;  %4219 = vmatpush1.bf16.msra.mxu1 %v7302_v13  ;;  %3464 = vmatprep.mubr.bf16.mxu1 %v9518_v9  ;;  %v7305_v10 = vld [vmem:[#allocation13 + $0x50] ss:$8 sps:$4 sm:$0xff]  }
 0x480   : > { %v3819_v54 = vpop.f32.mrb[162].mxu0  ;;  %v3818_v50 = vadd.f32 %v3817_v42, %v10014_v36  ;;  %4220 = vmatprep.subr.bf16.mxu1 %v7307_v43 }
 0x481   : > { %v3820_v26 = vadd.f32 %v3819_v54, %v10010_v53  ;;  %v3821_v14 = vpop.f32.mrb[163].mxu0 }
 0x482   : > { %v3822_v55 = vadd.f32 %v3821_v14, %v10014_v36 }
 0x483   : > { %v3974_v39 = vpack.c.bf16 %v3820_v26, %v3816_v12  ;;  %4221 = vmatpush1.bf16.msra.mxu1 %v7305_v10  ;;  %v7308_v12 = vld [vmem:[#allocation13 + $0x60] ss:$8 sps:$4 sm:$0xff]  }
 0x484   : > { %v3975_v32 = vpack.c.bf16 %v3822_v55, %v3818_v50 }
 0x486   : > { %v3825_v44 = vpop.f32.mrb[164].mxu0  ;;  %4499 = vmatprep.subr.bf16.mxu0 %v3975_v32  ;;  %3465 = vmatmul.mubr.bf16.gmra.mrb[160].mxu1 %v9558_v15  ;;  %v7310_v32 = vld [vmem:[#allocation13 + $0x64] ss:$8 sps:$4 sm:$0xff]  }
 0x487   : > { %v3827_v31 = vpop.f32.mrb[165].mxu0  ;;  %4500 = vmatpush1.bf16.xpose.msra.mxu0 %v3974_v39  ;;  %v3826_v4 = vadd.f32 %v3825_v44, %v10010_v53  ;;  %3474 = vmatprep.mubr.bf16.mxu1 %v9560_v2 }
 0x488   : > { %v3829_v54 = vpop.f32.mrb[166].mxu0  ;;  %v3828_v14 = vadd.f32 %v3827_v31, %v10014_v36  ;;  %4222 = vmatprep.subr.bf16.mxu1 %v7310_v32 }
 0x489   : > { %v3830_v42 = vadd.f32 %v3829_v54, %v10010_v53  ;;  %v3831_v63 = vpop.f32.mrb[167].mxu0  ;;  %4223 = vmatpush1.bf16.msra.mxu1 %v7308_v12 }
 0x48a   : > { %v3832_v55 = vadd.f32 %v3831_v63, %v10014_v36 }
 0x48b   : > { %v3976_v50 = vpack.c.bf16 %v3830_v42, %v3826_v4 }
 0x48c   : > { %v3977_v26 = vpack.c.bf16 %v3832_v55, %v3828_v14 }
 0x48e   : > { %v3835_v39 = vpop.f32.mrb[168].mxu0  ;;  %4501 = vmatprep.subr.bf16.mxu0 %v3977_v26  ;;  %3475 = vmatmul.mubr.bf16.gmra.mrb[164].mxu1 %v9600_v18  ;;  %v7313_v26 = vld [vmem:[#allocation13 + $0x74] ss:$8 sps:$4 sm:$0xff]  }
 0x48f   : > { %v3837_v13 = vpop.f32.mrb[169].mxu0  ;;  %4502 = vmatpush1.bf16.xpose.msra.mxu0 %v3976_v50  ;;  %v3836_v43 = vadd.f32 %v3835_v39, %v10010_v53  ;;  %3484 = vmatprep.mubr.bf16.mxu1 %v9602_v24  ;;  %v7311_v50 = vld [vmem:[#allocation13 + $0x70] ss:$8 sps:$4 sm:$0xff]  }
 0x490   : > { %v3839_v44 = vpop.f32.mrb[170].mxu0  ;;  %v3838_v63 = vadd.f32 %v3837_v13, %v10014_v36  ;;  %4224 = vmatprep.subr.bf16.mxu1 %v7313_v26 }
 0x491   : > { %v3840_v31 = vadd.f32 %v3839_v44, %v10010_v53  ;;  %v3841_v54 = vpop.f32.mrb[171].mxu0  ;;  %4225 = vmatpush1.bf16.msra.mxu1 %v7311_v50 }
 0x492   : > { %v3842_v10 = vadd.f32 %v3841_v54, %v10014_v36 }
 0x493   : > { %v3978_v4 = vpack.c.bf16 %v3840_v31, %v3836_v43 }
 0x494   : > { %v3979_v42 = vpack.c.bf16 %v3842_v10, %v3838_v63 }
 0x496   : > { %v3845_v14 = vpop.f32.mrb[172].mxu0  ;;  %4503 = vmatprep.subr.bf16.mxu0 %v3979_v42  ;;  %3485 = vmatmul.mubr.bf16.gmra.mrb[168].mxu1 %v9642_v1  ;;  %v7316_v42 = vld [vmem:[#allocation13 + $0x84] ss:$8 sps:$4 sm:$0xff]  }
 0x497   : > { %v3847_v55 = vpop.f32.mrb[173].mxu0  ;;  %4504 = vmatpush1.bf16.xpose.msra.mxu0 %v3978_v4  ;;  %v3846_v32 = vadd.f32 %v3845_v14, %v10010_v53  ;;  %3494 = vmatprep.mubr.bf16.mxu1 %v9644_v5  ;;  %v7314_v4 = vld [vmem:[#allocation13 + $0x80] ss:$8 sps:$4 sm:$0xff]  }
 0x498   : > { %v3849_v39 = vpop.f32.mrb[174].mxu0  ;;  %v3848_v12 = vadd.f32 %v3847_v55, %v10014_v36  ;;  %4226 = vmatprep.subr.bf16.mxu1 %v7316_v42 }
 0x499   : > { %v3850_v13 = vadd.f32 %v3849_v39, %v10010_v53  ;;  %v3851_v44 = vpop.f32.mrb[175].mxu0  ;;  %4227 = vmatpush1.bf16.msra.mxu1 %v7314_v4 }
 0x49a   : > { %v3852_v43 = vadd.f32 %v3851_v44, %v10014_v36 }
 0x49b   : > { %v3980_v31 = vpack.c.bf16 %v3850_v13, %v3846_v32 }
 0x49c   : > { %v3981_v54 = vpack.c.bf16 %v3852_v43, %v3848_v12 }
 0x49e   : > { %v3855_v63 = vpop.f32.mrb[176].mxu0  ;;  %4505 = vmatprep.subr.bf16.mxu0 %v3981_v54  ;;  %3495 = vmatmul.mubr.bf16.gmra.mrb[172].mxu1 %v9693_v27  ;;  %v7319_v54 = vld [vmem:[#allocation13 + $0x94] ss:$8 sps:$4 sm:$0xff]  }
 0x49f   : > { %v3857_v10 = vpop.f32.mrb[177].mxu0  ;;  %4506 = vmatpush1.bf16.xpose.msra.mxu0 %v3980_v31  ;;  %v3856_v26 = vadd.f32 %v3855_v63, %v10010_v53  ;;  %3504 = vmatprep.mubr.bf16.mxu1 %v9695_v34  ;;  %v7317_v31 = vld [vmem:[#allocation13 + $0x90] ss:$8 sps:$4 sm:$0xff]  }
 0x4a0   : > { %v3859_v14 = vpop.f32.mrb[178].mxu0  ;;  %v3858_v50 = vadd.f32 %v3857_v10, %v10014_v36  ;;  %4228 = vmatprep.subr.bf16.mxu1 %v7319_v54 }
 0x4a1   : > { %v3860_v55 = vadd.f32 %v3859_v14, %v10010_v53  ;;  %v3861_v39 = vpop.f32.mrb[179].mxu0  ;;  %4229 = vmatpush1.bf16.msra.mxu1 %v7317_v31 }
 0x4a2   : > { %v3862_v32 = vadd.f32 %v3861_v39, %v10014_v36 }
 0x4a3   : > { %v3982_v13 = vpack.c.bf16 %v3860_v55, %v3856_v26 }
 0x4a4   : > { %v3983_v44 = vpack.c.bf16 %v3862_v32, %v3858_v50 }
 0x4a6   : > { %v3865_v12 = vpop.f32.mrb[180].mxu0  ;;  %4507 = vmatprep.subr.bf16.mxu0 %v3983_v44  ;;  %3505 = vmatmul.mubr.bf16.gmra.mrb[176].mxu1 %v9719_v41  ;;  %v7322_v44 = vld [vmem:[#allocation13 + $0xa4] ss:$8 sps:$4 sm:$0xff]  }
 0x4a7   : > { %v3867_v43 = vpop.f32.mrb[181].mxu0  ;;  %4508 = vmatpush1.bf16.xpose.msra.mxu0 %v3982_v13  ;;  %v3866_v42 = vadd.f32 %v3865_v12, %v10010_v53  ;;  %3514 = vmatprep.mubr.bf16.mxu1 %v9721_v56  ;;  %v7320_v13 = vld [vmem:[#allocation13 + $0xa0] ss:$8 sps:$4 sm:$0xff]  }
 0x4a8   : > { %v3869_v63 = vpop.f32.mrb[182].mxu0  ;;  %v3868_v4 = vadd.f32 %v3867_v43, %v10014_v36  ;;  %4230 = vmatprep.subr.bf16.mxu1 %v7322_v44  ;;  %v7328_v44 = vld [vmem:[#allocation13 + $0xc4] ss:$8 sps:$4 sm:$0xff]  }
 0x4a9   : > { %v3870_v10 = vadd.f32 %v3869_v63, %v10010_v53  ;;  %v3871_v14 = vpop.f32.mrb[183].mxu0  ;;  %4231 = vmatpush1.bf16.msra.mxu1 %v7320_v13 }
 0x4aa   : > { %v3872_v26 = vadd.f32 %v3871_v14, %v10014_v36 }
 0x4ab   : > { %v3984_v55 = vpack.c.bf16 %v3870_v10, %v3866_v42 }
 0x4ac   : > { %v3985_v39 = vpack.c.bf16 %v3872_v26, %v3868_v4  ;;  %v7325_v26 = vld [vmem:[#allocation13 + $0xb4] ss:$8 sps:$4 sm:$0xff]  }
 0x4ad   : > { %4232 = vmatprep.subr.bf16.mxu1 %v7325_v26  ;;  %v7329_v26 = vld [vmem:[#allocation13 + $0xd0] ss:$8 sps:$4 sm:$0xff]  }
 0x4ae   : > { %v3875_v50 = vpop.f32.mrb[184].mxu0  ;;  %4509 = vmatprep.subr.bf16.mxu0 %v3985_v39  ;;  %3515 = vmatmul.mubr.bf16.gmra.mrb[180].mxu1 %v9745_v61  ;;  %v7323_v39 = vld [vmem:[#allocation13 + $0xb0] ss:$8 sps:$4 sm:$0xff]  }
 0x4af   : > { %v3877_v32 = vpop.f32.mrb[185].mxu0  ;;  %4510 = vmatpush1.bf16.xpose.msra.mxu0 %v3984_v55  ;;  %v3876_v54 = vadd.f32 %v3875_v50, %v10010_v53  ;;  %3524 = vmatprep.mubr.bf16.mxu1 %v9747_v45 }
 0x4b0   : > { %v3879_v12 = vpop.f32.mrb[186].mxu0  ;;  %v3878_v31 = vadd.f32 %v3877_v32, %v10014_v36  ;;  %4233 = vmatpush1.bf16.msra.mxu1 %v7323_v39 }
 0x4b1   : > { %v3880_v43 = vadd.f32 %v3879_v12, %v10010_v53  ;;  %v3881_v63 = vpop.f32.mrb[187].mxu0  ;;  %4234 = vmatprep.subr.bf16.mxu1 %v7328_v44 }
 0x4b2   : > { %v3882_v42 = vadd.f32 %v3881_v63, %v10014_v36 }
 0x4b3   : > { %v3986_v10 = vpack.c.bf16 %v3880_v43, %v3876_v54  ;;  %v7326_v54 = vld [vmem:[#allocation13 + $0xc0] ss:$8 sps:$4 sm:$0xff]  }
 0x4b4   : > { %v3987_v14 = vpack.c.bf16 %v3882_v42, %v3878_v31  ;;  %4235 = vmatpush1.bf16.msra.mxu1 %v7326_v54 }
 0x4b6   : > { %v3885_v4 = vpop.f32.mrb[188].mxu0  ;;  %4511 = vmatprep.subr.bf16.mxu0 %v3987_v14  ;;  %3525 = vmatmul.mubr.bf16.gmra.mrb[184].mxu1 %v9771_v49  ;;  %v7331_v14 = vld [vmem:[#allocation13 + $0xd4] ss:$8 sps:$4 sm:$0xff]  }
 0x4b7   : > { %v3887_v55 = vpop.f32.mrb[189].mxu0  ;;  %4512 = vmatpush1.bf16.xpose.msra.mxu0 %v3986_v10  ;;  %v3886_v32 = vadd.f32 %v3885_v4, %v10010_v53  ;;  %3534 = vmatprep.mubr.bf16.mxu1 %v9773_v52 }
 0x4b8   : > { %v3889_v50 = vpop.f32.mrb[190].mxu0  ;;  %v3888_v43 = vadd.f32 %v3887_v55, %v10014_v36  ;;  %4236 = vmatprep.subr.bf16.mxu1 %v7331_v14  ;;  %v7335_v14 = vld [vmem:[#allocation13 + $0xf0] ss:$8 sps:$4 sm:$0xff]  }
 0x4b9   : > { %v3890_v12 = vadd.f32 %v3889_v50, %v10010_v53  ;;  %v3891_v13 = vpop.f32.mrb[191].mxu0  ;;  %v7334_v50 = vld [vmem:[#allocation13 + $0xe4] ss:$8 sps:$4 sm:$0xff]   ;;  %4237 = vmatpush1.bf16.msra.mxu1 %v7329_v26 }
 0x4ba   : > { %v3892_v63 = vadd.f32 %v3891_v13, %v10014_v36  ;;  %4238 = vmatprep.subr.bf16.mxu1 %v7334_v50 }
 0x4bb   : > { %v3988_v31 = vpack.c.bf16 %v3890_v12, %v3886_v32  ;;  %v7332_v12 = vld [vmem:[#allocation13 + $0xe0] ss:$8 sps:$4 sm:$0xff]  }
 0x4bc   : > { %v3989_v42 = vpack.c.bf16 %v3892_v63, %v3888_v43 }
 0x4bd   : > { %4239 = vmatpush1.bf16.msra.mxu1 %v7332_v12 }
 0x4be   : > { %v3895_v10 = vpop.f32.mrb[192].mxu0  ;;  %4513 = vmatprep.subr.bf16.mxu0 %v3989_v42  ;;  %3535 = vmatmul.mubr.bf16.gmra.mrb[188].mxu1 %v9795_v47  ;;  %v7337_v42 = vld [vmem:[#allocation13 + $0xf4] ss:$8 sps:$4 sm:$0xff]  }
 0x4bf   : > { %v3897_v4 = vpop.f32.mrb[193].mxu0  ;;  %4514 = vmatpush1.bf16.xpose.msra.mxu0 %v3988_v31  ;;  %v3896_v55 = vadd.f32 %v3895_v10, %v10010_v53  ;;  %4242 = vmatprep.mubr.bf16.mxu1 %v9005_v19 }
 0x4c0   : > { %v3899_v39 = vpop.f32.mrb[194].mxu0  ;;  %v3898_v13 = vadd.f32 %v3897_v4, %v10014_v36  ;;  %4240 = vmatprep.subr.bf16.mxu1 %v7337_v42 }
 0x4c1   : > { %v3900_v44 = vadd.f32 %v3899_v39, %v10010_v53  ;;  %v3901_v32 = vpop.f32.mrb[195].mxu0  ;;  %4241 = vmatpush1.bf16.msra.mxu1 %v7335_v14 }
 0x4c2   : > { %v3902_v54 = vadd.f32 %v3901_v32, %v10014_v36 }
 0x4c3   : > { %v3990_v43 = vpack.c.bf16 %v3900_v44, %v3896_v55 }
 0x4c4   : > { %v3991_v63 = vpack.c.bf16 %v3902_v54, %v3898_v13 }
 0x4c6   : > { %v3905_v31 = vpop.f32.mrb[196].mxu0  ;;  %4515 = vmatprep.subr.bf16.mxu0 %v3991_v63  ;;  %4243 = vmatmul.mubr.bf16.vlgmr.msra.gmra.mrb[192].mxu1 %v9222_v58 }
 0x4c7   : > { %v3907_v10 = vpop.f32.mrb[197].mxu0  ;;  %4516 = vmatpush1.bf16.xpose.msra.mxu0 %v3990_v43  ;;  %v3906_v4 = vadd.f32 %v3905_v31, %v10010_v53  ;;  %4252 = vmatprep.mubr.bf16.mxu1 %v9224_v40 }
 0x4c8   : > { %v3909_v26 = vpop.f32.mrb[198].mxu0  ;;  %v3908_v55 = vadd.f32 %v3907_v10, %v10014_v36 }
 0x4c9   : > { %v3910_v39 = vadd.f32 %v3909_v26, %v10010_v53  ;;  %v3911_v50 = vpop.f32.mrb[199].mxu0 }
 0x4ca   : > { %v3912_v44 = vadd.f32 %v3911_v50, %v10014_v36 }
 0x4cb   : > { %v3992_v32 = vpack.c.bf16 %v3910_v39, %v3906_v4 }
 0x4cc   : > { %v3993_v19 = vpack.c.bf16 %v3912_v44, %v3908_v55 }
 0x4ce   : > { %v3915_v12 = vpop.f32.mrb[200].mxu0  ;;  %4517 = vmatprep.subr.bf16.mxu0 %v3993_v19  ;;  %4253 = vmatmul.mubr.bf16.gmra.mrb[196].mxu1 %v9264_v35 }
 0x4cf   : > { %v3917_v13 = vpop.f32.mrb[201].mxu0  ;;  %4518 = vmatpush1.bf16.xpose.msra.mxu0 %v3992_v32  ;;  %v3916_v43 = vadd.f32 %v3915_v12, %v10010_v53  ;;  %4262 = vmatprep.mubr.bf16.mxu1 %v9266_v17 }
 0x4d0   : > { %v3919_v54 = vpop.f32.mrb[202].mxu0  ;;  %v3918_v42 = vadd.f32 %v3917_v13, %v10014_v36 }
 0x4d1   : > { %v3920_v63 = vadd.f32 %v3919_v54, %v10010_v53  ;;  %v3921_v31 = vpop.f32.mrb[203].mxu0 }
 0x4d2   : > { %v3922_v10 = vadd.f32 %v3921_v31, %v10014_v36 }
 0x4d3   : > { %v3994_v14 = vpack.c.bf16 %v3920_v63, %v3916_v43 }
 0x4d4   : > { %v3995_v26 = vpack.c.bf16 %v3922_v10, %v3918_v42 }
 0x4d6   : > { %v3925_v40 = vpop.f32.mrb[204].mxu0  ;;  %4519 = vmatprep.subr.bf16.mxu0 %v3995_v26  ;;  %4263 = vmatmul.mubr.bf16.gmra.mrb[200].mxu1 %v9306_v16 }
 0x4d7   : > { %v3927_v58 = vpop.f32.mrb[205].mxu0  ;;  %4520 = vmatpush1.bf16.xpose.msra.mxu0 %v3994_v14  ;;  %v3926_v39 = vadd.f32 %v3925_v40, %v10010_v53  ;;  %4272 = vmatprep.mubr.bf16.mxu1 %v9308_v3 }
 0x4d8   : > { %v3929_v4 = vpop.f32.mrb[206].mxu0  ;;  %v3928_v44 = vadd.f32 %v3927_v58, %v10014_v36 }
 0x4d9   : > { %v3930_v50 = vadd.f32 %v3929_v4, %v10010_v53  ;;  %v3931_v55 = vpop.f32.mrb[207].mxu0 }
 0x4da   : > { %v3932_v32 = vadd.f32 %v3931_v55, %v10014_v36 }
 0x4db   : > { %v3996_v19 = vpack.c.bf16 %v3930_v50, %v3926_v39 }
 0x4dc   : > { %v3997_v12 = vpack.c.bf16 %v3932_v32, %v3928_v44 }
 0x4de   : > { %v3935_v35 = vpop.f32.mrb[208].mxu0  ;;  %4521 = vmatprep.subr.bf16.mxu0 %v3997_v12  ;;  %4273 = vmatmul.mubr.bf16.gmra.mrb[204].mxu1 %v9348_v25 }
 0x4df   : > { %v3937_v17 = vpop.f32.mrb[209].mxu0  ;;  %4522 = vmatpush1.bf16.xpose.msra.mxu0 %v3996_v19  ;;  %v3936_v54 = vadd.f32 %v3935_v35, %v10010_v53  ;;  %4282 = vmatprep.mubr.bf16.mxu1 %v9350_v48 }
 0x4e0   : > { %v3939_v13 = vpop.f32.mrb[210].mxu0  ;;  %v3938_v31 = vadd.f32 %v3937_v17, %v10014_v36 }
 0x4e1   : > { %v3940_v43 = vadd.f32 %v3939_v13, %v10010_v53  ;;  %v3941_v63 = vpop.f32.mrb[211].mxu0 }
 0x4e2   : > { %v3942_v42 = vadd.f32 %v3941_v63, %v10014_v36 }
 0x4e3   : > { %v3998_v10 = vpack.c.bf16 %v3940_v43, %v3936_v54 }
 0x4e4   : > { %v3999_v14 = vpack.c.bf16 %v3942_v42, %v3938_v31 }
 0x4e6   : > { %v3945_v3 = vpop.f32.mrb[212].mxu0  ;;  %4523 = vmatprep.subr.bf16.mxu0 %v3999_v14  ;;  %4283 = vmatmul.mubr.bf16.gmra.mrb[208].mxu1 %v9390_v7 }
 0x4e7   : > { %v3947_v16 = vpop.f32.mrb[213].mxu0  ;;  %4524 = vmatpush1.bf16.xpose.msra.mxu0 %v3998_v10  ;;  %v3946_v40 = vadd.f32 %v3945_v3, %v10010_v53  ;;  %4292 = vmatprep.mubr.bf16.mxu1 %v9392_v6 }
 0x4e8   : > { %v3949_v26 = vpop.f32.mrb[214].mxu0  ;;  %v3948_v39 = vadd.f32 %v3947_v16, %v10014_v36 }
 0x4e9   : > { %v3950_v58 = vadd.f32 %v3949_v26, %v10010_v53  ;;  %v3951_v4 = vpop.f32.mrb[215].mxu0 }
 0x4ea   : > { %v3952_v50 = vadd.f32 %v3951_v4, %v10014_v36 }
 0x4eb   : > { %v4000_v55 = vpack.c.bf16 %v3950_v58, %v3946_v40 }
 0x4ec   : > { %v4001_v44 = vpack.c.bf16 %v3952_v50, %v3948_v39 }
 0x4ee   : > { %v3955_v48 = vpop.f32.mrb[216].mxu0  ;;  %4525 = vmatprep.subr.bf16.mxu0 %v4001_v44  ;;  %4293 = vmatmul.mubr.bf16.gmra.mrb[212].mxu1 %v9432_v21  ;;  %v13143_v21 = vpack.c.bf16 %v9101_v60, %v9095_v8  ;;  %v13150_v8 = vld [vmem:[#allocation97_spill] sm:$0xff] }
 0x4ef   : > { %v3957_v25 = vpop.f32.mrb[217].mxu0  ;;  %4526 = vmatpush1.bf16.xpose.msra.mxu0 %v4000_v55  ;;  %v3956_v19 = vadd.f32 %v3955_v48, %v10010_v53  ;;  %4302 = vmatprep.mubr.bf16.mxu1 %v9434_v51  ;;  %v13142_v51 = vpack.c.bf16 %v9055_v22, %v9049_v23  ;;  %v13146_v23 = vpack.c.bf16 %v9123_v0, %v9117_v57  ;;  %v13152_v57 = vld [vmem:[#allocation109_spill] sm:$0xff]  ;;  %v13153_v0 = vld [vmem:[#allocation107_spill] sm:$0xff] }
 0x4f0   : > { %v3959_v32 = vpop.f32.mrb[218].mxu0  ;;  %v3958_v17 = vadd.f32 %v3957_v25, %v10014_v36  ;;  %v13147_v22 = vpack.c.bf16 %v9169_v59, %v9163_v37 }
 0x4f1   : > { %v3960_v12 = vadd.f32 %v3959_v32, %v10010_v53  ;;  %v3961_v35 = vpop.f32.mrb[219].mxu0 }
 0x4f2   : > { %v3962_v13 = vadd.f32 %v3961_v35, %v10014_v36 }
 0x4f3   : > { %v4002_v54 = vpack.c.bf16 %v3960_v12, %v3956_v19  ;;  %v13167_v19 = vld [vmem:[#allocation113_spill] sm:$0xff]  ;;  %v13168_v12 = vld [vmem:[#allocation111_spill] sm:$0xff] }
 0x4f4   : > { %v4003_v43 = vpack.c.bf16 %v3962_v13, %v3958_v17  ;;  %v13169_v35 = vpack.c.bf16 %v13167_v19, %v13168_v12  ;;  %v13170_v17 = vld [vmem:[#allocation125_spill] sm:$0xff]  ;;  %v13171_v13 = vld [vmem:[#allocation123_spill] sm:$0xff] }
 0x4f5   : > { %v13199_v12 = vld [vmem:[#allocation137_spill] sm:$0xff] }
 0x4f6   : > { %v3965_v6 = vpop.f32.mrb[220].mxu0  ;;  %4527 = vmatprep.subr.bf16.mxu0 %v4003_v43  ;;  %4303 = vmatmul.mubr.bf16.gmra.mrb[216].mxu1 %v9474_v11  ;;  %v13145_v11 = vpack.c.bf16 %v9135_v29, %v9129_v33  ;;  %v13154_v29 = vpack.c.bf16 %v13152_v57, %v13153_v0 }
 0x4f7   : > { %v3967_v7 = vpop.f32.mrb[221].mxu0  ;;  %4528 = vmatpush1.bf16.xpose.msra.mxu0 %v4002_v54  ;;  %v3966_v31 = vadd.f32 %v3965_v6, %v10010_v53  ;;  %4312 = vmatprep.mubr.bf16.mxu1 %v9476_v62  ;;  %v13144_v62 = vpack.c.bf16 %v9089_v20, %v9083_v46  ;;  %v3180_v46 = vld [vmem:[%s13148_s2] sm:$0x3]  ;;  %v13149_v20 = vld [vmem:[#allocation99_spill] sm:$0xff]  ;;  %v13172_v54 = vpack.c.bf16 %v13170_v17, %v13171_v13  ;;  %v13202_v13 = vld [vmem:[#allocation149_spill] sm:$0xff]  ;;  %s7864_s2 = scalar_lea.vmem %s12391_s18, 16384 }
 0x4f8   : > { %v3969_v63 = vpop.f32.mrb[222].mxu0  ;;  %v3968_v14 = vadd.f32 %v3967_v7, %v10014_v36  ;;  %v10141_v33 = vrot.slane %v3180_v46, %v8610_v30  ;;  %v13151_v60 = vpack.c.bf16 %v13149_v20, %v13150_v8  ;;  %v10167_v58 = vrot.slane %v3180_v46, %v8605_v28  ;;  %p7865_p5 = scmp.ne.s32.totalorder %s12391_s18, %s7864_s2 }
 0x4f9   : > { %v3970_v42 = vadd.f32 %v3969_v63, %v10010_v53  ;;  %v3971_v10 = vpop.f32.mrb[223].mxu0  ;;  %v13160_v53 = vld [vmem:[#allocation117_spill] sm:$0xff] }
 0x4fa   : > { %v3972_v3 = vadd.f32 %v3971_v10, %v10014_v36  ;;  %v13161_v36 = vld [vmem:[#allocation115_spill] sm:$0xff]  ;;  %p7866_p1 = pnand %p7865_p5, %p13988_p10 }
 0x4fb   : > { %v4004_v16 = vpack.c.bf16 %v3970_v42, %v3966_v31  ;;  %v13162_v40 = vpack.c.bf16 %v13160_v53, %v13161_v36 }
 0x4fc   : > { %v4005_v26 = vpack.c.bf16 %v3972_v3, %v3968_v14  ;;  %v13177_v3 = vld [vmem:[#allocation121_spill] sm:$0xff]  ;;  %p7867_p11 = pneg %p7866_p1 }
 0x4fe   : > { %4529 = vmatprep.subr.bf16.mxu0 %v4005_v26  ;;  %4313 = vmatmul.mubr.bf16.gmra.mrb[220].mxu1 %v9516_v38 }
 0x4ff   : > { %4530 = vmatpush1.bf16.xpose.msra.mxu0 %v4004_v16  ;;  %4322 = vmatprep.mubr.bf16.mxu1 %v9518_v9  ;;  %v13178_v16 = vld [vmem:[#allocation119_spill] sm:$0xff] }
 0x500   : > { %v13179_v26 = vpack.c.bf16 %v13177_v3, %v13178_v16  ;;  %v13208_v3 = vld [vmem:[#allocation157_spill] sm:$0xff] }
 0x506   : > { %4532 = vmatmul.mubr.bf16.vlgmr.msra.gmra.mrb[224].mxu0 %v13142_v51  ;;  %4323 = vmatmul.mubr.bf16.gmra.mrb[224].mxu1 %v9558_v15  ;;  %v13157_v15 = vld [vmem:[#allocation105_spill] sm:$0xff] }
 0x507   : > { %4541 = vmatprep.mubr.bf16.mxu0 %v13143_v21  ;;  %4332 = vmatprep.mubr.bf16.mxu1 %v9560_v2 }
 0x50e   : > { %4542 = vmatmul.mubr.bf16.gmra.mrb[228].mxu0 %v13144_v62  ;;  %4333 = vmatmul.mubr.bf16.gmra.mrb[228].mxu1 %v9600_v18  ;;  %v13158_v18 = vld [vmem:[#allocation103_spill] sm:$0xff]  ;;  %v13182_v62 = vld [vmem:[#allocation133_spill] sm:$0xff] }
 0x50f   : > { %4551 = vmatprep.mubr.bf16.mxu0 %v13145_v11  ;;  %4342 = vmatprep.mubr.bf16.mxu1 %v9602_v24 }
 0x516   : > { %4552 = vmatmul.mubr.bf16.gmra.mrb[232].mxu0 %v13146_v23  ;;  %4343 = vmatmul.mubr.bf16.gmra.mrb[232].mxu1 %v9642_v1  ;;  %v13159_v1 = vpack.c.bf16 %v13157_v15, %v13158_v18  ;;  %v13192_v15 = vld [vmem:[#allocation141_spill] sm:$0xff]  ;;  %v13193_v18 = vld [vmem:[#allocation139_spill] sm:$0xff] }
 0x517   : > { %4561 = vmatprep.mubr.bf16.mxu0 %v13147_v22  ;;  %4352 = vmatprep.mubr.bf16.mxu1 %v9644_v5 }
 0x519   : > { %v3386_v37 = vpop.f32.mrb[128].mxu1 }
 0x51a   : > { %v10151_v59 = vadd.f32 %v3386_v37, %v10141_v33  ;;  %v3388_v24 = vpop.f32.mrb[129].mxu1 }
 0x51b   : > { %v3390_v2 = vpop.f32.mrb[130].mxu1  ;;  %v10215_v51 = vadd.f32 %v3388_v24, %v10167_v58  ;;  %v13189_v24 = vld [vmem:[#allocation129_spill] sm:$0xff] }
 0x51c   : > { %13155 = vst [vmem:[#allocation99_spill] sm:$0xff] %v10151_v59  ;;  %v10154_v9 = vadd.f32 %v3390_v2, %v10141_v33  ;;  %v3392_v38 = vpop.f32.mrb[131].mxu1  ;;  %v13190_v2 = vld [vmem:[#allocation127_spill] sm:$0xff] }
 0x51d   : > { %13180 = vst [vmem:[#allocation125_spill] sm:$0xff] %v10215_v51  ;;  %v10218_v21 = vadd.f32 %v3392_v38, %v10167_v58  ;;  %v13191_v38 = vpack.c.bf16 %v13189_v24, %v13190_v2 }
 0x51e   : > { %4562 = vmatmul.mubr.bf16.gmra.mrb[236].mxu0 %v13151_v60  ;;  %13156 = vst [vmem:[#allocation97_spill] sm:$0xff] %v10154_v9  ;;  %4353 = vmatmul.mubr.bf16.gmra.mrb[236].mxu1 %v9693_v27 }
 0x51f   : > { %4571 = vmatprep.mubr.bf16.mxu0 %v13154_v29  ;;  %4362 = vmatprep.mubr.bf16.mxu1 %v9695_v34  ;;  %13181 = vst [vmem:[#allocation123_spill] sm:$0xff] %v10218_v21 }
 0x521   : > { %v3396_v4 = vpop.f32.mrb[132].mxu1 }
 0x522   : > { %v10170_v39 = vadd.f32 %v3396_v4, %v10141_v33  ;;  %v3398_v27 = vpop.f32.mrb[133].mxu1 }
 0x523   : > { %v10173_v50 = vadd.f32 %v3398_v27, %v10167_v58  ;;  %v3400_v34 = vpop.f32.mrb[134].mxu1 }
 0x524   : > { %13163 = vst [vmem:[#allocation109_spill] sm:$0xff] %v10170_v39  ;;  %v10176_v55 = vadd.f32 %v3400_v34, %v10141_v33  ;;  %v3402_v44 = vpop.f32.mrb[135].mxu1 }
 0x525   : > { %13164 = vst [vmem:[#allocation107_spill] sm:$0xff] %v10173_v50  ;;  %v10179_v48 = vadd.f32 %v3402_v44, %v10167_v58 }
 0x526   : > { %4572 = vmatmul.mubr.bf16.gmra.mrb[240].mxu0 %v13159_v1  ;;  %13165 = vst [vmem:[#allocation105_spill] sm:$0xff] %v10176_v55  ;;  %4363 = vmatmul.mubr.bf16.gmra.mrb[240].mxu1 %v9719_v41  ;;  %v13194_v1 = vpack.c.bf16 %v13192_v15, %v13193_v18 }
 0x527   : > { %4581 = vmatprep.mubr.bf16.mxu0 %v13162_v40  ;;  %13166 = vst [vmem:[#allocation103_spill] sm:$0xff] %v10179_v48  ;;  %4372 = vmatprep.mubr.bf16.mxu1 %v9721_v56 }
 0x529   : > { %v3406_v43 = vpop.f32.mrb[136].mxu1 }
 0x52a   : > { %v10194_v6 = vadd.f32 %v3406_v43, %v10141_v33  ;;  %v3408_v41 = vpop.f32.mrb[137].mxu1 }
 0x52b   : > { %v10197_v7 = vadd.f32 %v3408_v41, %v10167_v58  ;;  %v3410_v56 = vpop.f32.mrb[138].mxu1  ;;  %v13205_v41 = vld [vmem:[#allocation145_spill] sm:$0xff] }
 0x52c   : > { %13173 = vst [vmem:[#allocation117_spill] sm:$0xff] %v10194_v6  ;;  %v10200_v63 = vadd.f32 %v3410_v56, %v10141_v33  ;;  %v3412_v31 = vpop.f32.mrb[139].mxu1  ;;  %v13206_v56 = vld [vmem:[#allocation143_spill] sm:$0xff] }
 0x52d   : > { %13174 = vst [vmem:[#allocation115_spill] sm:$0xff] %v10197_v7  ;;  %v10203_v42 = vadd.f32 %v3412_v31, %v10167_v58  ;;  %v13207_v31 = vpack.c.bf16 %v13205_v41, %v13206_v56 }
 0x52e   : > { %4582 = vmatmul.mubr.bf16.gmra.mrb[244].mxu0 %v13169_v35  ;;  %13175 = vst [vmem:[#allocation113_spill] sm:$0xff] %v10200_v63  ;;  %4373 = vmatmul.mubr.bf16.gmra.mrb[244].mxu1 %v9745_v61  ;;  %v13183_v61 = vld [vmem:[#allocation131_spill] sm:$0xff] }
 0x52f   : > { %4591 = vmatprep.mubr.bf16.mxu0 %v13172_v54  ;;  %13176 = vst [vmem:[#allocation111_spill] sm:$0xff] %v10203_v42  ;;  %4382 = vmatprep.mubr.bf16.mxu1 %v9747_v45  ;;  %v13184_v11 = vpack.c.bf16 %v13182_v62, %v13183_v61  ;;  %v13200_v35 = vld [vmem:[#allocation135_spill] sm:$0xff] }
 0x530   : > { %v13201_v17 = vpack.c.bf16 %v13199_v12, %v13200_v35  ;;  %v13203_v54 = vld [vmem:[#allocation147_spill] sm:$0xff] }
 0x531   : > { %v3416_v23 = vpop.f32.mrb[140].mxu1  ;;  %v13204_v43 = vpack.c.bf16 %v13202_v13, %v13203_v54  ;;  %v13212_v62 = vld [vmem:[#allocation151_spill] sm:$0xff] }
 0x532   : > { %v10224_v45 = vadd.f32 %v3416_v23, %v10141_v33  ;;  %v3418_v22 = vpop.f32.mrb[141].mxu1  ;;  %v13215_v23 = vld [vmem:[#allocation163_spill] sm:$0xff] }
 0x533   : > { %v10227_v46 = vadd.f32 %v3418_v22, %v10167_v58  ;;  %v3420_v20 = vpop.f32.mrb[142].mxu1  ;;  %v13225_v12 = vld [vmem:[#allocation171_spill] sm:$0xff] }
 0x534   : > { %13185 = vst [vmem:[#allocation121_spill] sm:$0xff] %v10224_v45  ;;  %v10230_v8 = vadd.f32 %v3420_v20, %v10141_v33  ;;  %v3422_v60 = vpop.f32.mrb[143].mxu1 }
 0x535   : > { %13186 = vst [vmem:[#allocation119_spill] sm:$0xff] %v10227_v46  ;;  %v10235_v0 = vadd.f32 %v3422_v60, %v10167_v58 }
 0x536   : > { %4592 = vmatmul.mubr.bf16.gmra.mrb[248].mxu0 %v13179_v26  ;;  %13187 = vst [vmem:[#allocation133_spill] sm:$0xff] %v10230_v8  ;;  %4383 = vmatmul.mubr.bf16.gmra.mrb[248].mxu1 %v9771_v49  ;;  %v13211_v26 = vld [vmem:[#allocation153_spill] sm:$0xff] }
 0x537   : > { %4601 = vmatprep.mubr.bf16.mxu0 %v13184_v11  ;;  %13188 = vst [vmem:[#allocation131_spill] sm:$0xff] %v10235_v0  ;;  %4392 = vmatprep.mubr.bf16.mxu1 %v9773_v52  ;;  %v13213_v61 = vpack.c.bf16 %v13211_v26, %v13212_v62  ;;  %v13214_v11 = vld [vmem:[#allocation165_spill] sm:$0xff]  ;;  %v13231_v26 = vld [vmem:[#allocation167_spill] sm:$0xff] }
 0x538   : > { %v13216_v22 = vpack.c.bf16 %v13214_v11, %v13215_v23  ;;  %v13234_v11 = vld [vmem:[#allocation181_spill] sm:$0xff]  ;;  %v13235_v23 = vld [vmem:[#allocation179_spill] sm:$0xff] }
 0x539   : > { %v3426_v53 = vpop.f32.mrb[144].mxu1 }
 0x53a   : > { %v10250_v36 = vadd.f32 %v3426_v53, %v10141_v33  ;;  %v3428_v49 = vpop.f32.mrb[145].mxu1  ;;  %v13221_v53 = vld [vmem:[#allocation159_spill] sm:$0xff] }
 0x53b   : > { %v10253_v40 = vadd.f32 %v3428_v49, %v10167_v58  ;;  %v3430_v52 = vpop.f32.mrb[146].mxu1 }
 0x53c   : > { %13195 = vst [vmem:[#allocation129_spill] sm:$0xff] %v10250_v36  ;;  %v10256_v4 = vadd.f32 %v3430_v52, %v10141_v33  ;;  %v3432_v27 = vpop.f32.mrb[147].mxu1 }
 0x53d   : > { %13196 = vst [vmem:[#allocation127_spill] sm:$0xff] %v10253_v40  ;;  %v10259_v34 = vadd.f32 %v3432_v27, %v10167_v58  ;;  %v13224_v27 = vld [vmem:[#allocation173_spill] sm:$0xff] }
 0x53e   : > { %4602 = vmatmul.mubr.bf16.gmra.mrb[252].mxu0 %v13191_v38  ;;  %13197 = vst [vmem:[#allocation141_spill] sm:$0xff] %v10256_v4  ;;  %4393 = vmatmul.mubr.bf16.gmra.mrb[252].mxu1 %v9795_v47  ;;  %v13209_v47 = vld [vmem:[#allocation155_spill] sm:$0xff]  ;;  %v13226_v35 = vpack.c.bf16 %v13224_v27, %v13225_v12 }
 0x53f   : > { %4611 = vmatprep.mubr.bf16.mxu0 %v13194_v1  ;;  %13198 = vst [vmem:[#allocation139_spill] sm:$0xff] %v10259_v34  ;;  %v13210_v16 = vpack.c.bf16 %v13208_v3, %v13209_v47  ;;  %v13220_v1 = vld [vmem:[#allocation161_spill] sm:$0xff] }
 0x540   : > { %v13222_v49 = vpack.c.bf16 %v13220_v1, %v13221_v53 }
 0x541   : > { %v3436_v20 = vpop.f32.mrb[148].mxu1 }
 0x542   : > { %v10285_v60 = vadd.f32 %v3436_v20, %v10141_v33  ;;  %v3438_v24 = vpop.f32.mrb[149].mxu1 }
 0x543   : > { %v10288_v2 = vadd.f32 %v3438_v24, %v10167_v58  ;;  %v3440_v38 = vpop.f32.mrb[150].mxu1 }
 0x544   : > { %13217 = vst [vmem:[#allocation137_spill] sm:$0xff] %v10285_v60  ;;  %v10291_v15 = vadd.f32 %v3440_v38, %v10141_v33  ;;  %v3442_v18 = vpop.f32.mrb[151].mxu1 }
 0x545   : > { %13218 = vst [vmem:[#allocation135_spill] sm:$0xff] %v10288_v2  ;;  %v10297_v52 = vadd.f32 %v3442_v18, %v10167_v58 }
 0x546   : > { %4612 = vmatmul.mubr.bf16.gmra.mrb[0].mxu0 %v13201_v17  ;;  %13219 = vst [vmem:[#allocation149_spill] sm:$0xff] %v10291_v15 }
 0x547   : > { %4621 = vmatprep.mubr.bf16.mxu0 %v13204_v43  ;;  %13223 = vst [vmem:[#allocation147_spill] sm:$0xff] %v10297_v52 }
 0x549   : > { %v3446_v54 = vpop.f32.mrb[152].mxu1 }
 0x54a   : > { %v10307_v43 = vadd.f32 %v3446_v54, %v10141_v33  ;;  %v3448_v41 = vpop.f32.mrb[153].mxu1  ;;  %v13241_v54 = vld [vmem:[#allocation175_spill] sm:$0xff] }
 0x54b   : > { %v10310_v56 = vadd.f32 %v3448_v41, %v10167_v58 }
 0x54c   : > { %13227 = vst [vmem:[#allocation145_spill] sm:$0xff] %v10307_v43 }
 0x54d   : > { %13228 = vst [vmem:[#allocation143_spill] sm:$0xff] %v10310_v56 }
 0x54e   : > { %4622 = vmatmul.mubr.bf16.gmra.mrb[4].mxu0 %v13207_v31  ;;  %v3450_v31 = vpop.f32.mrb[154].mxu1 }
 0x54f   : > { %4631 = vmatprep.mubr.bf16.mxu0 %v13210_v16  ;;  %v10313_v3 = vadd.f32 %v3450_v31, %v10141_v33  ;;  %v3452_v47 = vpop.f32.mrb[155].mxu1  ;;  %v13230_v16 = vld [vmem:[#allocation169_spill] sm:$0xff] }
 0x550   : > { %v13232_v62 = vpack.c.bf16 %v13230_v16, %v13231_v26  ;;  %v13245_v16 = vld [vmem:[#allocation187_spill] sm:$0xff] }
 0x551   : > { %13229 = vst [vmem:[#allocation157_spill] sm:$0xff] %v10313_v3  ;;  %v3456_v38 = vpop.f32.mrb[156].mxu1 }
 0x552   : > { %v10329_v18 = vadd.f32 %v3456_v38, %v10141_v33  ;;  %v3458_v1 = vpop.f32.mrb[157].mxu1 }
 0x553   : > { %v10332_v53 = vadd.f32 %v3458_v1, %v10167_v58 }
 0x554   : > { %13237 = vst [vmem:[#allocation153_spill] sm:$0xff] %v10329_v18 }
 0x555   : > { %13238 = vst [vmem:[#allocation151_spill] sm:$0xff] %v10332_v53 }
 0x556   : > { %4632 = vmatmul.mubr.bf16.gmra.mrb[8].mxu0 %v13213_v61  ;;  %v10319_v61 = vadd.f32 %v3452_v47, %v10167_v58  ;;  %v13244_v47 = vld [vmem:[#allocation189_spill] sm:$0xff] }
 0x557   : > { %4641 = vmatprep.mubr.bf16.mxu0 %v13216_v22  ;;  %v13236_v22 = vpack.c.bf16 %v13234_v11, %v13235_v23  ;;  %v13246_v26 = vpack.c.bf16 %v13244_v47, %v13245_v16 }
 0x558   : > { %13233 = vst [vmem:[#allocation155_spill] sm:$0xff] %v10319_v61 }
 0x55e   : > { %4642 = vmatmul.mubr.bf16.gmra.mrb[12].mxu0 %v13222_v49  ;;  %v3460_v49 = vpop.f32.mrb[158].mxu1 }
 0x55f   : > { %4651 = vmatprep.mubr.bf16.mxu0 %v13226_v35  ;;  %v10335_v27 = vadd.f32 %v3460_v49, %v10141_v33  ;;  %v3462_v12 = vpop.f32.mrb[159].mxu1  ;;  %v13240_v35 = vld [vmem:[#allocation177_spill] sm:$0xff] }
 0x560   : > { %v13242_v41 = vpack.c.bf16 %v13240_v35, %v13241_v54  ;;  %v10341_v31 = vadd.f32 %v3462_v12, %v10167_v58  ;;  %v3466_v23 = vpop.f32.mrb[160].mxu1  ;;  %v13250_v54 = vld [vmem:[#allocation185_spill] sm:$0xff] }
 0x561   : > { %13239 = vst [vmem:[#allocation165_spill] sm:$0xff] %v10335_v27  ;;  %v3468_v38 = vpop.f32.mrb[161].mxu1 }
 0x562   : > { %13243 = vst [vmem:[#allocation163_spill] sm:$0xff] %v10341_v31  ;;  %v10354_v1 = vadd.f32 %v3468_v38, %v10167_v58  ;;  %v3470_v49 = vpop.f32.mrb[162].mxu1 }
 0x563   : > { %v10357_v12 = vadd.f32 %v3470_v49, %v10141_v33  ;;  %v3472_v35 = vpop.f32.mrb[163].mxu1 }
 0x564   : > { %13248 = vst [vmem:[#allocation159_spill] sm:$0xff] %v10354_v1  ;;  %v10363_v16 = vadd.f32 %v3472_v35, %v10167_v58  ;;  %v3476_v49 = vpop.f32.mrb[164].mxu1 }
 0x565   : > { %13249 = vst [vmem:[#allocation173_spill] sm:$0xff] %v10357_v12  ;;  %v10373_v20 = vadd.f32 %v3476_v49, %v10141_v33  ;;  %v3478_v24 = vpop.f32.mrb[165].mxu1 }
 0x566   : > { %4652 = vmatmul.mubr.bf16.gmra.mrb[16].mxu0 %v13232_v62  ;;  %13253 = vst [vmem:[#allocation171_spill] sm:$0xff] %v10363_v16  ;;  %v13255_v62 = vld [vmem:[#allocation195_spill] sm:$0xff]  ;;  %v3480_v35 = vpop.f32.mrb[166].mxu1 }
 0x567   : > { %4661 = vmatprep.mubr.bf16.mxu0 %v13236_v22  ;;  %v10351_v22 = vadd.f32 %v3466_v23, %v10141_v33  ;;  %13257 = vst [vmem:[#allocation169_spill] sm:$0xff] %v10373_v20 }
 0x569   : > { %13247 = vst [vmem:[#allocation161_spill] sm:$0xff] %v10351_v22 }
 0x56e   : > { %4662 = vmatmul.mubr.bf16.gmra.mrb[20].mxu0 %v13242_v41  ;;  %v13251_v41 = vld [vmem:[#allocation183_spill] sm:$0xff] }
 0x56f   : > { %4671 = vmatprep.mubr.bf16.mxu0 %v13246_v26  ;;  %v13252_v47 = vpack.c.bf16 %v13250_v54, %v13251_v41  ;;  %v13254_v26 = vld [vmem:[#allocation197_spill] sm:$0xff]  ;;  %v10376_v54 = vadd.f32 %v3478_v24, %v10167_v58  ;;  %v10379_v41 = vadd.f32 %v3480_v35, %v10141_v33 }
 0x570   : > { %v13256_v23 = vpack.c.bf16 %v13254_v26, %v13255_v62  ;;  %v3482_v62 = vpop.f32.mrb[167].mxu1  ;;  %v13261_v26 = vld [vmem:[#allocation191_spill] sm:$0xff] }
 0x571   : > { %13258 = vst [vmem:[#allocation167_spill] sm:$0xff] %v10376_v54  ;;  %13259 = vst [vmem:[#allocation181_spill] sm:$0xff] %v10379_v41  ;;  %v10385_v38 = vadd.f32 %v3482_v62, %v10167_v58  ;;  %v3486_v24 = vpop.f32.mrb[168].mxu1 }
 0x572   : > { %v10392_v17 = vadd.f32 %v3486_v24, %v10141_v33  ;;  %v3488_v35 = vpop.f32.mrb[169].mxu1 }
 0x573   : > { %13263 = vst [vmem:[#allocation179_spill] sm:$0xff] %v10385_v38  ;;  %v10395_v13 = vadd.f32 %v3488_v35, %v10167_v58  ;;  %v3490_v44 = vpop.f32.mrb[170].mxu1 }
 0x574   : > { %13264 = vst [vmem:[#allocation177_spill] sm:$0xff] %v10392_v17  ;;  %v3492_v62 = vpop.f32.mrb[171].mxu1 }
 0x575   : > { %13265 = vst [vmem:[#allocation175_spill] sm:$0xff] %v10395_v13  ;;  %v3496_v24 = vpop.f32.mrb[172].mxu1 }
 0x576   : > { %4672 = vmatmul.mubr.bf16.gmra.mrb[24].mxu0 %v13252_v47  ;;  %v13260_v47 = vld [vmem:[#allocation193_spill] sm:$0xff]  ;;  %v10408_v11 = vadd.f32 %v3496_v24, %v10141_v33  ;;  %v3498_v35 = vpop.f32.mrb[173].mxu1 }
 0x577   : > { %4681 = vmatprep.mubr.bf16.mxu0 %v13256_v23  ;;  %v13262_v23 = vpack.c.bf16 %v13260_v47, %v13261_v26  ;;  %v10398_v47 = vadd.f32 %v3490_v44, %v10141_v33  ;;  %v10401_v26 = vadd.f32 %v3492_v62, %v10167_v58  ;;  %v10411_v19 = vadd.f32 %v3498_v35, %v10167_v58  ;;  %v3500_v44 = vpop.f32.mrb[174].mxu1 }
 0x578   : > { %13268 = vst [vmem:[#allocation185_spill] sm:$0xff] %v10408_v11  ;;  %v10414_v29 = vadd.f32 %v3500_v44, %v10141_v33  ;;  %v3502_v62 = vpop.f32.mrb[175].mxu1 }
 0x579   : > { %13266 = vst [vmem:[#allocation189_spill] sm:$0xff] %v10398_v47  ;;  %13267 = vst [vmem:[#allocation187_spill] sm:$0xff] %v10401_v26  ;;  %v10417_v37 = vadd.f32 %v3502_v62, %v10167_v58  ;;  %v3506_v24 = vpop.f32.mrb[176].mxu1 }
 0x57a   : > { %13269 = vst [vmem:[#allocation183_spill] sm:$0xff] %v10411_v19  ;;  %13270 = vst [vmem:[#allocation197_spill] sm:$0xff] %v10414_v29  ;;  %v10424_v10 = vadd.f32 %v3506_v24, %v10141_v33  ;;  %v3508_v35 = vpop.f32.mrb[177].mxu1 }
 0x57b   : > { %13271 = vst [vmem:[#allocation195_spill] sm:$0xff] %v10417_v37  ;;  %v10427_v14 = vadd.f32 %v3508_v35, %v10167_v58  ;;  %v3510_v44 = vpop.f32.mrb[178].mxu1 }
 0x57c   : > { %13272 = vst [vmem:[#allocation193_spill] sm:$0xff] %v10424_v10  ;;  %v10430_v25 = vadd.f32 %v3510_v44, %v10141_v33  ;;  %v3512_v62 = vpop.f32.mrb[179].mxu1 }
 0x57d   : > { %13273 = vst [vmem:[#allocation191_spill] sm:$0xff] %v10427_v14  ;;  %v10433_v32 = vadd.f32 %v3512_v62, %v10167_v58 }
 0x57e   : > { %4682 = vmatmul.mubr.bf16.gmra.mrb[28].mxu0 %v13262_v23  ;;  %13274 = vst [vmem:[#allocation263_spill] sm:$0xff] %v10430_v25 }
 0x57f   : > { %13275 = vst [vmem:[#allocation264_spill] sm:$0xff] %v10433_v32 }
 0x581   : > { %v3516_v24 = vpop.f32.mrb[180].mxu1 }
 0x582   : > { %v10440_v5 = vadd.f32 %v3516_v24, %v10141_v33  ;;  %v3518_v35 = vpop.f32.mrb[181].mxu1 }
 0x583   : > { %v10443_v57 = vadd.f32 %v3518_v35, %v10167_v58  ;;  %v3520_v44 = vpop.f32.mrb[182].mxu1 }
 0x584   : > { %13276 = vst [vmem:[#allocation265_spill] sm:$0xff] %v10440_v5  ;;  %v10446_v11 = vadd.f32 %v3520_v44, %v10141_v33  ;;  %v3522_v62 = vpop.f32.mrb[183].mxu1 }
 0x585   : > { %13277 = vst [vmem:[#allocation266_spill] sm:$0xff] %v10443_v57  ;;  %v10449_v29 = vadd.f32 %v3522_v62, %v10167_v58 }
 0x586   : > { %13278 = vst [vmem:[#allocation267_spill] sm:$0xff] %v10446_v11 }
 0x587   : > { %13279 = vst [vmem:[#allocation268_spill] sm:$0xff] %v10449_v29 }
 0x589   : > { %v3526_v24 = vpop.f32.mrb[184].mxu1 }
 0x58a   : > { %v10456_v10 = vadd.f32 %v3526_v24, %v10141_v33  ;;  %v3528_v35 = vpop.f32.mrb[185].mxu1 }
 0x58b   : > { %v10459_v25 = vadd.f32 %v3528_v35, %v10167_v58  ;;  %v3530_v44 = vpop.f32.mrb[186].mxu1 }
 0x58c   : > { %13280 = vst [vmem:[#allocation269_spill] sm:$0xff] %v10456_v10  ;;  %v10462_v14 = vadd.f32 %v3530_v44, %v10141_v33  ;;  %v3532_v62 = vpop.f32.mrb[187].mxu1 }
 0x58d   : > { %13281 = vst [vmem:[#allocation270_spill] sm:$0xff] %v10459_v25  ;;  %v10465_v32 = vadd.f32 %v3532_v62, %v10167_v58 }
 0x58e   : > { %13282 = vst [vmem:[#allocation271_spill] sm:$0xff] %v10462_v14 }
 0x58f   : > { %13283 = vst [vmem:[#allocation272_spill] sm:$0xff] %v10465_v32 }
 0x591   : > { %v3536_v24 = vpop.f32.mrb[188].mxu1 }
 0x592   : > { %v10472_v5 = vadd.f32 %v3536_v24, %v10141_v33  ;;  %v3538_v35 = vpop.f32.mrb[189].mxu1  ;;  %v4038_v24 = vld [vmem:[%s13288_s19] sm:$0x3]  ;;  %s7870_s19 = scalar_lea.vmem %s7869_s24, 32768 }
 0x593   : > { %v10475_v11 = vadd.f32 %v3538_v35, %v10167_v58  ;;  %v3540_v44 = vpop.f32.mrb[190].mxu1  ;;  %v10491_v10 = vrot.slane %v4038_v24, %v8610_v30  ;;  %p7872_p13 = scmp.lt.s32.totalorder %s7870_s19, %s7864_s2 }
 0x594   : > { %13284 = vst [vmem:[#allocation273_spill] sm:$0xff] %v10472_v5  ;;  %v10478_v57 = vadd.f32 %v3540_v44, %v10141_v33  ;;  %v3542_v62 = vpop.f32.mrb[191].mxu1  ;;  %v10494_v33 = vrot.slane %v4038_v24, %v8605_v28 }
 0x595   : > { %13285 = vst [vmem:[#allocation274_spill] sm:$0xff] %v10475_v11  ;;  %v10481_v29 = vadd.f32 %v3542_v62, %v10167_v58  ;;  %p7873_p8 = por %p7872_p13, %p7871_p12 }
 0x596   : > { %13286 = vst [vmem:[#allocation275_spill] sm:$0xff] %v10478_v57 }
 0x597   : > { %13287 = vst [vmem:[#allocation276_spill] sm:$0xff] %v10481_v29  ;;  %p7874_p7 = pnand %p7873_p8, %p7867_p11 }
 0x599   : > { %v4244_v35 = vpop.f32.mrb[192].mxu1 }
 0x59a   : > { %v4246_v44 = vpop.f32.mrb[193].mxu1  ;;  %v10497_v62 = vadd.f32 %v4244_v35, %v10491_v10 }
 0x59b   : > { %v4248_v58 = vpop.f32.mrb[194].mxu1  ;;  %v10503_v5 = vadd.f32 %v4246_v44, %v10494_v33 }
 0x59c   : > { %v10500_v23 = vadd.f32 %v4248_v58, %v10491_v10  ;;  %v4250_v49 = vpop.f32.mrb[195].mxu1 }
 0x59d   : > { %13289 = vst [vmem:[#allocation277_spill] sm:$0xff] %v10503_v5  ;;  %v10506_v57 = vadd.f32 %v4250_v49, %v10494_v33 }
 0x59f   : > { %13290 = vst [vmem:[#allocation278_spill] sm:$0xff] %v10506_v57 }
 0x5a1   : > { %v4254_v28 = vpop.f32.mrb[196].mxu1 }
 0x5a2   : > { %v10513_v35 = vadd.f32 %v4254_v28, %v10491_v10  ;;  %v4256_v11 = vpop.f32.mrb[197].mxu1 }
 0x5a3   : > { %v10516_v58 = vadd.f32 %v4256_v11, %v10494_v33  ;;  %v4258_v29 = vpop.f32.mrb[198].mxu1 }
 0x5a4   : > { %v10519_v44 = vadd.f32 %v4258_v29, %v10491_v10  ;;  %v4260_v49 = vpop.f32.mrb[199].mxu1 }
 0x5a5   : > { %13291 = vst [vmem:[#allocation279_spill] sm:$0xff] %v10516_v58  ;;  %v10522_v14 = vadd.f32 %v4260_v49, %v10494_v33 }
 0x5a7   : > { %13292 = vst [vmem:[#allocation280_spill] sm:$0xff] %v10522_v14 }
 0x5a9   : > { %v4264_v28 = vpop.f32.mrb[200].mxu1 }
 0x5aa   : > { %v10529_v25 = vadd.f32 %v4264_v28, %v10491_v10  ;;  %v4266_v11 = vpop.f32.mrb[201].mxu1 }
 0x5ab   : > { %v10532_v32 = vadd.f32 %v4266_v11, %v10494_v33  ;;  %v4268_v29 = vpop.f32.mrb[202].mxu1 }
 0x5ac   : > { %v10535_v19 = vadd.f32 %v4268_v29, %v10491_v10  ;;  %v4270_v49 = vpop.f32.mrb[203].mxu1 }
 0x5ad   : > { %13293 = vst [vmem:[#allocation281_spill] sm:$0xff] %v10532_v32  ;;  %v10538_v37 = vadd.f32 %v4270_v49, %v10494_v33 }
 0x5af   : > { %13294 = vst [vmem:[#allocation282_spill] sm:$0xff] %v10538_v37 }
 0x5b1   : > { %v4274_v28 = vpop.f32.mrb[204].mxu1 }
 0x5b2   : > { %v10545_v17 = vadd.f32 %v4274_v28, %v10491_v10  ;;  %v4276_v11 = vpop.f32.mrb[205].mxu1 }
 0x5b3   : > { %v10548_v47 = vadd.f32 %v4276_v11, %v10494_v33  ;;  %v4278_v29 = vpop.f32.mrb[206].mxu1 }
 0x5b4   : > { %v10551_v13 = vadd.f32 %v4278_v29, %v10491_v10  ;;  %v4280_v49 = vpop.f32.mrb[207].mxu1 }
 0x5b5   : > { %13295 = vst [vmem:[#allocation283_spill] sm:$0xff] %v10548_v47  ;;  %v10554_v26 = vadd.f32 %v4280_v49, %v10494_v33 }
 0x5b7   : > { %13296 = vst [vmem:[#allocation284_spill] sm:$0xff] %v10554_v26 }
 0x5b9   : > { %v4284_v28 = vpop.f32.mrb[208].mxu1 }
 0x5ba   : > { %v10561_v20 = vadd.f32 %v4284_v28, %v10491_v10  ;;  %v4286_v11 = vpop.f32.mrb[209].mxu1 }
 0x5bb   : > { %v10564_v41 = vadd.f32 %v4286_v11, %v10494_v33  ;;  %v4288_v29 = vpop.f32.mrb[210].mxu1 }
 0x5bc   : > { %v10567_v54 = vadd.f32 %v4288_v29, %v10491_v10  ;;  %v4290_v49 = vpop.f32.mrb[211].mxu1 }
 0x5bd   : > { %13297 = vst [vmem:[#allocation285_spill] sm:$0xff] %v10564_v41  ;;  %v10570_v38 = vadd.f32 %v4290_v49, %v10494_v33 }
 0x5bf   : > { %13298 = vst [vmem:[#allocation286_spill] sm:$0xff] %v10570_v38 }
 0x5c1   : > { %v4294_v24 = vpop.f32.mrb[212].mxu1 }
 0x5c2   : > { %v10577_v22 = vadd.f32 %v4294_v24, %v10491_v10  ;;  %v4296_v11 = vpop.f32.mrb[213].mxu1 }
 0x5c3   : > { %v10582_v29 = vadd.f32 %v4296_v11, %v10494_v33  ;;  %v4298_v1 = vpop.f32.mrb[214].mxu1 }
 0x5c4   : > { %13299 = vst [vmem:[#allocation287_spill] sm:$0xff] %v10577_v22  ;;  %v10587_v49 = vadd.f32 %v4298_v1, %v10491_v10  ;;  %v4300_v30 = vpop.f32.mrb[215].mxu1 }
 0x5c5   : > { %13300 = vst [vmem:[#allocation288_spill] sm:$0xff] %v10582_v29  ;;  %v10594_v24 = vadd.f32 %v4300_v30, %v10494_v33 }
 0x5c6   : > { %13301 = vst [vmem:[#allocation289_spill] sm:$0xff] %v10587_v49 }
 0x5c7   : > { %13302 = vst [vmem:[#allocation290_spill] sm:$0xff] %v10594_v24 }
 0x5c9   : > { %v4304_v27 = vpop.f32.mrb[216].mxu1 }
 0x5ca   : > { %v10601_v31 = vadd.f32 %v4304_v27, %v10491_v10  ;;  %v4306_v1 = vpop.f32.mrb[217].mxu1 }
 0x5cb   : > { %v10608_v30 = vadd.f32 %v4306_v1, %v10494_v33  ;;  %v4308_v56 = vpop.f32.mrb[218].mxu1 }
 0x5cc   : > { %13303 = vst [vmem:[#allocation291_spill] sm:$0xff] %v10601_v31  ;;  %v10611_v61 = vadd.f32 %v4308_v56, %v10491_v10  ;;  %v4310_v60 = vpop.f32.mrb[219].mxu1 }
 0x5cd   : > { %13304 = vst [vmem:[#allocation292_spill] sm:$0xff] %v10608_v30  ;;  %v10614_v11 = vadd.f32 %v4310_v60, %v10494_v33 }
 0x5ce   : > { %13305 = vst [vmem:[#allocation293_spill] sm:$0xff] %v10611_v61 }
 0x5cf   : > { %13306 = vst [vmem:[#allocation294_spill] sm:$0xff] %v10614_v11 }
 0x5d1   : > { %v4314_v36 = vpop.f32.mrb[220].mxu1 }
 0x5d2   : > { %v4316_v40 = vpop.f32.mrb[221].mxu1 }
 0x5d3   : > { %v4318_v34 = vpop.f32.mrb[222].mxu1  ;;  %v10648_v8 = vadd.f32 %v4316_v40, %v10494_v33 }
 0x5d4   : > { %v4320_v45 = vpop.f32.mrb[223].mxu1  ;;  %v10651_v46 = vadd.f32 %v4318_v34, %v10491_v10 }
 0x5d5   : > { %13308 = vst [vmem:[#allocation296_spill] sm:$0xff] %v10648_v8  ;;  %v10654_v0 = vadd.f32 %v4320_v45, %v10494_v33 }
 0x5d6   : > { %13309 = vst [vmem:[#allocation297_spill] sm:$0xff] %v10651_v46 }
 0x5d7   : > { %13310 = vst [vmem:[#allocation298_spill] sm:$0xff] %v10654_v0 }
 0x5d9   : > { %v10579_v12 = vpop.f32.mrb[224].mxu0  ;;  %v4324_v34 = vpop.f32.mrb[224].mxu1 }
 0x5da   : > { %v10584_v16 = vpop.f32.mrb[225].mxu0  ;;  %v4326_v45 = vpop.f32.mrb[225].mxu1 }
 0x5db   : > { %v10589_v18 = vpop.f32.mrb[226].mxu0  ;;  %v4692_v28 = vmax.f32 %v10579_v12, %v10584_v16  ;;  %v4328_v39 = vpop.f32.mrb[226].mxu1  ;;  %v10676_v55 = vadd.f32 %v4326_v45, %v10494_v33 }
 0x5dc   : > { %v10596_v53 = vpop.f32.mrb[227].mxu0  ;;  %v10679_v50 = vadd.f32 %v4328_v39, %v10491_v10 }
 0x5dd   : > { %4693 = vmax.xlane.f32.xlu0 %v4692_v28  ;;  %v4695_v43 = vmax.f32 %v10589_v18, %v10596_v53  ;;  %13311 = vst [vmem:[#allocation299_spill] sm:$0xff] %v10676_v55 }
 0x5e1   : > { %4696 = vmax.xlane.f32.xlu0 %v4695_v43  ;;  %v10618_v28 = vpop.f32.mrb[228].mxu0 }
 0x5e2   : > { %v10622_v15 = vpop.f32.mrb[229].mxu0 }
 0x5e3   : > { %v10624_v1 = vpop.f32.mrb[230].mxu0  ;;  %v4698_v56 = vmax.f32 %v10618_v28, %v10622_v15 }
 0x5e4   : > { %v10628_v2 = vpop.f32.mrb[231].mxu0 }
 0x5e5   : > { %4699 = vmax.xlane.f32.xlu1 %v4698_v56  ;;  %v4701_v60 = vmax.f32 %v10624_v1, %v10628_v2 }
 0x5e9   : > { %4702 = vmax.xlane.f32.xlu1 %v4701_v60  ;;  %v10632_v43 = vpop.f32.mrb[232].mxu0  ;;  %v10645_v60 = vadd.f32 %v4314_v36, %v10491_v10 }
 0x5ea   : > { %v10634_v27 = vpop.f32.mrb[233].mxu0 }
 0x5eb   : > { %v10636_v52 = vpop.f32.mrb[234].mxu0  ;;  %v4704_v3 = vmax.f32 %v10632_v43, %v10634_v27  ;;  %13307 = vst [vmem:[#allocation295_spill] sm:$0xff] %v10645_v60 }
 0x5ec   : > { %v10640_v4 = vpop.f32.mrb[235].mxu0 }
 0x5ed   : > { %4705 = vmax.xlane.f32.xlu0 %v4704_v3  ;;  %v4707_v56 = vmax.f32 %v10636_v52, %v10640_v4  ;;  %v4330_v3 = vpop.f32.mrb[227].mxu1 }
 0x5ee   : > { %v10682_v48 = vadd.f32 %v4330_v3, %v10494_v33  ;;  %v4334_v39 = vpop.f32.mrb[228].mxu1 }
 0x5ef   : > { %4708 = vmax.xlane.f32.xlu1 %v4707_v56  ;;  %v10673_v56 = vadd.f32 %v4324_v34, %v10491_v10  ;;  %v4336_v3 = vpop.f32.mrb[229].mxu1  ;;  %v10701_v0 = vadd.f32 %v4334_v39, %v10491_v10 }
 0x5f0   : > { %13312 = vst [vmem:[#allocation300_spill] sm:$0xff] %v10682_v48  ;;  %v4338_v8 = vpop.f32.mrb[230].mxu1 }
 0x5f1   : > { %v10656_v6 = vpop.f32.mrb[236].mxu0  ;;  %v10707_v30 = vadd.f32 %v4338_v8, %v10491_v10 }
 0x5f2   : > { %v10662_v63 = vpop.f32.mrb[237].mxu0 }
 0x5f3   : > { %v10664_v36 = vpop.f32.mrb[238].mxu0  ;;  %v4710_v40 = vmax.f32 %v10656_v6, %v10662_v63 }
 0x5f4   : > { %v10668_v7 = vpop.f32.mrb[239].mxu0 }
 0x5f5   : > { %4711 = vmax.xlane.f32.xlu0 %v4710_v40  ;;  %v4713_v42 = vmax.f32 %v10664_v36, %v10668_v7  ;;  %v4340_v40 = vpop.f32.mrb[231].mxu1 }
 0x5f6   : > { %v10710_v11 = vadd.f32 %v4340_v40, %v10494_v33  ;;  %v4344_v8 = vpop.f32.mrb[232].mxu1 }
 0x5f7   : > { %4714 = vmax.xlane.f32.xlu1 %v4713_v42  ;;  %v10704_v42 = vadd.f32 %v4336_v3, %v10494_v33  ;;  %v4346_v40 = vpop.f32.mrb[233].mxu1 }
 0x5f8   : > { %13314 = vst [vmem:[#allocation302_spill] sm:$0xff] %v10710_v11  ;;  %v4348_v47 = vpop.f32.mrb[234].mxu1  ;;  %v10732_v26 = vadd.f32 %v4346_v40, %v10494_v33 }
 0x5f9   : > { %v10684_v59 = vpop.f32.mrb[240].mxu0  ;;  %13313 = vst [vmem:[#allocation301_spill] sm:$0xff] %v10704_v42  ;;  %v10735_v32 = vadd.f32 %v4348_v47, %v10491_v10 }
 0x5fa   : > { %v10688_v9 = vpop.f32.mrb[241].mxu0  ;;  %13315 = vst [vmem:[#allocation303_spill] sm:$0xff] %v10732_v26 }
 0x5fb   : > { %v10692_v34 = vpop.f32.mrb[242].mxu0  ;;  %v4716_v45 = vmax.f32 %v10684_v59, %v10688_v9 }
 0x5fc   : > { %v10696_v51 = vpop.f32.mrb[243].mxu0 }
 0x5fd   : > { %4717 = vmax.xlane.f32.xlu0 %v4716_v45  ;;  %v4719_v21 = vmax.f32 %v10692_v34, %v10696_v51  ;;  %v4350_v45 = vpop.f32.mrb[235].mxu1 }
 0x5fe   : > { %v10738_v37 = vadd.f32 %v4350_v45, %v10494_v33  ;;  %v4354_v58 = vpop.f32.mrb[236].mxu1 }
 0x5ff   : > { %4720 = vmax.xlane.f32.xlu1 %v4719_v21  ;;  %v10729_v21 = vadd.f32 %v4344_v8, %v10491_v10  ;;  %v4356_v8 = vpop.f32.mrb[237].mxu1  ;;  %v10749_v40 = vadd.f32 %v4354_v58, %v10491_v10 }
 0x600   : > { %13316 = vst [vmem:[#allocation304_spill] sm:$0xff] %v10738_v37  ;;  %v4358_v47 = vpop.f32.mrb[238].mxu1  ;;  %v10763_v58 = vadd.f32 %v4356_v8, %v10494_v33 }
 0x601   : > { %v10712_v29 = vpop.f32.mrb[244].mxu0  ;;  %v10756_v5 = vadd.f32 %v4358_v47, %v10491_v10  ;;  %v4360_v57 = vpop.f32.mrb[239].mxu1 }
 0x602   : > { %v10718_v24 = vpop.f32.mrb[245].mxu0  ;;  %v4364_v55 = vpop.f32.mrb[240].mxu1  ;;  %13321 = vst [vmem:[#allocation309_spill] sm:$0xff] %v10763_v58  ;;  %v10768_v47 = vadd.f32 %v4360_v57, %v10494_v33 }
 0x603   : > { %v10720_v39 = vpop.f32.mrb[246].mxu0  ;;  %v4722_v3 = vmax.f32 %v10712_v29, %v10718_v24  ;;  %v4366_v37 = vpop.f32.mrb[241].mxu1  ;;  %v10771_v60 = vadd.f32 %v4364_v55, %v10491_v10 }
 0x604   : > { %v10724_v41 = vpop.f32.mrb[247].mxu0  ;;  %v4368_v48 = vpop.f32.mrb[242].mxu1  ;;  %13322 = vst [vmem:[#allocation310_spill] sm:$0xff] %v10768_v47  ;;  %v10785_v57 = vadd.f32 %v4366_v37, %v10494_v33 }
 0x605   : > { %4723 = vmax.xlane.f32.xlu0 %v4722_v3  ;;  %v4725_v38 = vmax.f32 %v10720_v39, %v10724_v41  ;;  %v4370_v46 = vpop.f32.mrb[243].mxu1 }
 0x606   : > { %v4374_v61 = vpop.f32.mrb[244].mxu1  ;;  %13325 = vst [vmem:[#allocation313_spill] sm:$0xff] %v10785_v57  ;;  %v10788_v55 = vadd.f32 %v4370_v46, %v10494_v33 }
 0x607   : > { %4726 = vmax.xlane.f32.xlu1 %v4725_v38 }
 0x608   : > { %13326 = vst [vmem:[#allocation314_spill] sm:$0xff] %v10788_v55 }
 0x609   : > { %v10740_v3 = vpop.f32.mrb[248].mxu0 }
 0x60a   : > { %13317 = vst [vmem:[#allocation305_spill] sm:$0xff] %v10740_v3  ;;  %v10746_v42 = vpop.f32.mrb[249].mxu0 }
 0x60b   : > { %13318 = vst [vmem:[#allocation306_spill] sm:$0xff] %v10746_v42  ;;  %v10751_v11 = vpop.f32.mrb[250].mxu0  ;;  %v4728_v45 = vmax.f32 %v10740_v3, %v10746_v42 }
 0x60c   : > { %13319 = vst [vmem:[#allocation307_spill] sm:$0xff] %v10751_v11  ;;  %v10758_v14 = vpop.f32.mrb[251].mxu0 }
 0x60d   : > { %13320 = vst [vmem:[#allocation308_spill] sm:$0xff] %v10758_v14  ;;  %4729 = vmax.xlane.f32.xlu0 %v4728_v45  ;;  %v4731_v38 = vmax.f32 %v10751_v11, %v10758_v14  ;;  %v10774_v45 = vadd.f32 %v4368_v48, %v10491_v10  ;;  %v10791_v48 = vadd.f32 %v4374_v61, %v10491_v10  ;;  %v4376_v14 = vpop.f32.mrb[245].mxu1 }
 0x60e   : > { %v4378_v58 = vpop.f32.mrb[246].mxu1  ;;  %v10807_v3 = vadd.f32 %v4376_v14, %v10494_v33 }
 0x60f   : > { %4732 = vmax.xlane.f32.xlu1 %v4731_v38  ;;  %13327 = vst [vmem:[#allocation315_spill] sm:$0xff] %v10791_v48  ;;  %v10802_v37 = vadd.f32 %v4378_v58, %v10491_v10  ;;  %v4380_v46 = vpop.f32.mrb[247].mxu1 }
 0x610   : > { %v4384_v42 = vpop.f32.mrb[248].mxu1  ;;  %13331 = vst [vmem:[#allocation319_spill] sm:$0xff] %v10807_v3  ;;  %v10812_v47 = vadd.f32 %v4380_v46, %v10494_v33 }
 0x611   : > { %v10776_v31 = vpop.f32.mrb[252].mxu0  ;;  %13330 = vst [vmem:[#allocation318_spill] sm:$0xff] %v10802_v37  ;;  %v10815_v58 = vadd.f32 %v4384_v42, %v10491_v10 }
 0x612   : > { %13323 = vst [vmem:[#allocation311_spill] sm:$0xff] %v10776_v31  ;;  %v10782_v38 = vpop.f32.mrb[253].mxu0  ;;  %13332 = vst [vmem:[#allocation320_spill] sm:$0xff] %v10812_v47 }
 0x613   : > { %13324 = vst [vmem:[#allocation312_spill] sm:$0xff] %v10782_v38  ;;  %v10793_v11 = vpop.f32.mrb[254].mxu0  ;;  %v4734_v8 = vmax.f32 %v10776_v31, %v10782_v38  ;;  %v4386_v31 = vpop.f32.mrb[249].mxu1 }
 0x614   : > { %13328 = vst [vmem:[#allocation316_spill] sm:$0xff] %v10793_v11  ;;  %v10797_v26 = vpop.f32.mrb[255].mxu0  ;;  %v4388_v22 = vpop.f32.mrb[250].mxu1 }
 0x615   : > { %13329 = vst [vmem:[#allocation317_spill] sm:$0xff] %v10797_v26  ;;  %4735 = vmax.xlane.f32.xlu0 %v4734_v8  ;;  %v4737_v61 = vmax.f32 %v10793_v11, %v10797_v26  ;;  %v10818_v8 = vadd.f32 %v4388_v22, %v10491_v10  ;;  %v4390_v57 = vpop.f32.mrb[251].mxu1 }
 0x616   : > { %v4394_v14 = vpop.f32.mrb[252].mxu1  ;;  %v10832_v42 = vadd.f32 %v4390_v57, %v10494_v33 }
 0x617   : > { %4738 = vmax.xlane.f32.xlu1 %v4737_v61  ;;  %v10827_v61 = vadd.f32 %v4386_v31, %v10494_v33  ;;  %v4396_v22 = vpop.f32.mrb[253].mxu1  ;;  %v10839_v48 = vadd.f32 %v4394_v14, %v10491_v10 }
 0x618   : > { %13335 = vst [vmem:[#allocation323_spill] sm:$0xff] %v10832_v42  ;;  %v4398_v37 = vpop.f32.mrb[254].mxu1 }
 0x619   : > { %v10820_v55 = vpop.f32.mrb[0].mxu0  ;;  %13334 = vst [vmem:[#allocation322_spill] sm:$0xff] %v10827_v61  ;;  %v10846_v46 = vadd.f32 %v4398_v37, %v10491_v10 }
 0x61a   : > { %v10822_v26 = vpop.f32.mrb[1].mxu0 }
 0x61b   : > { %13333 = vst [vmem:[#allocation321_spill] sm:$0xff] %v10822_v26  ;;  %v10834_v11 = vpop.f32.mrb[2].mxu0  ;;  %v4740_v49 = vmax.f32 %v10820_v55, %v10822_v26 }
 0x61c   : > { %v10841_v38 = vpop.f32.mrb[3].mxu0 }
 0x61d   : > { %13336 = vst [vmem:[#allocation324_spill] sm:$0xff] %v10841_v38  ;;  %4741 = vmax.xlane.f32.xlu0 %v4740_v49  ;;  %v4743_v57 = vmax.f32 %v10834_v11, %v10841_v38 }
 0x61f   : > { %4744 = vmax.xlane.f32.xlu1 %v4743_v57 }
 0x621   : > { %v10852_v47 = vpop.f32.mrb[4].mxu0 }
 0x622   : > { %13337 = vst [vmem:[#allocation325_spill] sm:$0xff] %v10852_v47  ;;  %v10854_v14 = vpop.f32.mrb[5].mxu0 }
 0x623   : > { %13338 = vst [vmem:[#allocation326_spill] sm:$0xff] %v10854_v14  ;;  %v10856_v26 = vpop.f32.mrb[6].mxu0  ;;  %v4746_v31 = vmax.f32 %v10852_v47, %v10854_v14 }
 0x624   : > { %13339 = vst [vmem:[#allocation327_spill] sm:$0xff] %v10856_v26  ;;  %v10860_v61 = vpop.f32.mrb[7].mxu0 }
 0x625   : > { %13340 = vst [vmem:[#allocation328_spill] sm:$0xff] %v10860_v61  ;;  %4747 = vmax.xlane.f32.xlu0 %v4746_v31  ;;  %v4749_v10 = vmax.f32 %v10856_v26, %v10860_v61  ;;  %v10877_v31 = vadd.f32 %v4396_v22, %v10494_v33 }
 0x627   : > { %4750 = vmax.xlane.f32.xlu1 %v4749_v10  ;;  %13345 = vst [vmem:[#allocation333_spill] sm:$0xff] %v10877_v31  ;;  %v4400_v10 = vpop.f32.mrb[255].mxu1 }
 0x628   : > { %v10880_v61 = vadd.f32 %v4400_v10, %v10494_v33 }
 0x629   : > { %v10864_v49 = vpop.f32.mrb[8].mxu0 }
 0x62a   : > { %13341 = vst [vmem:[#allocation329_spill] sm:$0xff] %v10864_v49  ;;  %v10866_v37 = vpop.f32.mrb[9].mxu0  ;;  %13346 = vst [vmem:[#allocation334_spill] sm:$0xff] %v10880_v61 }
 0x62b   : > { %13342 = vst [vmem:[#allocation330_spill] sm:$0xff] %v10866_v37  ;;  %v10868_v57 = vpop.f32.mrb[10].mxu0  ;;  %v4752_v3 = vmax.f32 %v10864_v49, %v10866_v37 }
 0x62c   : > { %13343 = vst [vmem:[#allocation331_spill] sm:$0xff] %v10868_v57  ;;  %v10872_v42 = vpop.f32.mrb[11].mxu0 }
 0x62d   : > { %13344 = vst [vmem:[#allocation332_spill] sm:$0xff] %v10872_v42  ;;  %4753 = vmax.xlane.f32.xlu0 %v4752_v3  ;;  %v4755_v14 = vmax.f32 %v10868_v57, %v10872_v42 }
 0x62f   : > { %4756 = vmax.xlane.f32.xlu1 %v4755_v14 }
 0x631   : > { %v10882_v26 = vpop.f32.mrb[12].mxu0 }
 0x632   : > { %13347 = vst [vmem:[#allocation335_spill] sm:$0xff] %v10882_v26  ;;  %v10884_v47 = vpop.f32.mrb[13].mxu0 }
 0x633   : > { %13348 = vst [vmem:[#allocation336_spill] sm:$0xff] %v10884_v47  ;;  %v10888_v49 = vpop.f32.mrb[14].mxu0  ;;  %v4758_v3 = vmax.f32 %v10882_v26, %v10884_v47 }
 0x634   : > { %13349 = vst [vmem:[#allocation337_spill] sm:$0xff] %v10888_v49  ;;  %v10892_v42 = vpop.f32.mrb[15].mxu0 }
 0x635   : > { %13350 = vst [vmem:[#allocation338_spill] sm:$0xff] %v10892_v42  ;;  %4759 = vmax.xlane.f32.xlu0 %v4758_v3  ;;  %v4761_v22 = vmax.f32 %v10888_v49, %v10892_v42 }
 0x637   : > { %4762 = vmax.xlane.f32.xlu1 %v4761_v22 }
 0x639   : > { %v10896_v33 = vpop.f32.mrb[16].mxu0 }
 0x63a   : > { %13351 = vst [vmem:[#allocation339_spill] sm:$0xff] %v10896_v33  ;;  %v10898_v14 = vpop.f32.mrb[17].mxu0 }
 0x63b   : > { %13352 = vst [vmem:[#allocation340_spill] sm:$0xff] %v10898_v14  ;;  %v10900_v10 = vpop.f32.mrb[18].mxu0  ;;  %v4764_v37 = vmax.f32 %v10896_v33, %v10898_v14 }
 0x63c   : > { %13353 = vst [vmem:[#allocation341_spill] sm:$0xff] %v10900_v10  ;;  %v10904_v31 = vpop.f32.mrb[19].mxu0 }
 0x63d   : > { %13354 = vst [vmem:[#allocation342_spill] sm:$0xff] %v10904_v31  ;;  %4765 = vmax.xlane.f32.xlu0 %v4764_v37  ;;  %v4767_v47 = vmax.f32 %v10900_v10, %v10904_v31 }
 0x63f   : > { %4768 = vmax.xlane.f32.xlu1 %v4767_v47 }
 0x641   : > { %v10908_v3 = vpop.f32.mrb[20].mxu0 }
 0x642   : > { %13355 = vst [vmem:[#allocation343_spill] sm:$0xff] %v10908_v3  ;;  %v10910_v42 = vpop.f32.mrb[21].mxu0 }
 0x643   : > { %13356 = vst [vmem:[#allocation344_spill] sm:$0xff] %v10910_v42  ;;  %v10912_v22 = vpop.f32.mrb[22].mxu0  ;;  %v4770_v49 = vmax.f32 %v10908_v3, %v10910_v42 }
 0x644   : > { %13357 = vst [vmem:[#allocation345_spill] sm:$0xff] %v10912_v22  ;;  %v10916_v26 = vpop.f32.mrb[23].mxu0 }
 0x645   : > { %13358 = vst [vmem:[#allocation346_spill] sm:$0xff] %v10916_v26  ;;  %4771 = vmax.xlane.f32.xlu0 %v4770_v49  ;;  %v4773_v14 = vmax.f32 %v10912_v22, %v10916_v26 }
 0x647   : > { %4774 = vmax.xlane.f32.xlu1 %v4773_v14 }
 0x649   : > { %v10920_v37 = vpop.f32.mrb[24].mxu0 }
 0x64a   : > { %13359 = vst [vmem:[#allocation347_spill] sm:$0xff] %v10920_v37  ;;  %v10922_v31 = vpop.f32.mrb[25].mxu0 }
 0x64b   : > { %13360 = vst [vmem:[#allocation348_spill] sm:$0xff] %v10922_v31  ;;  %v10924_v47 = vpop.f32.mrb[26].mxu0  ;;  %v4776_v10 = vmax.f32 %v10920_v37, %v10922_v31 }
 0x64c   : > { %13361 = vst [vmem:[#allocation349_spill] sm:$0xff] %v10924_v47  ;;  %v10928_v33 = vpop.f32.mrb[27].mxu0 }
 0x64d   : > { %13362 = vst [vmem:[#allocation350_spill] sm:$0xff] %v10928_v33  ;;  %4777 = vmax.xlane.f32.xlu0 %v4776_v10  ;;  %v4779_v42 = vmax.f32 %v10924_v47, %v10928_v33 }
 0x64f   : > { %4780 = vmax.xlane.f32.xlu1 %v4779_v42 }
 0x651   : > { %v10932_v49 = vpop.f32.mrb[28].mxu0 }
 0x652   : > { %13363 = vst [vmem:[#allocation351_spill] sm:$0xff] %v10932_v49  ;;  %v10934_v26 = vpop.f32.mrb[29].mxu0 }
 0x653   : > { %13364 = vst [vmem:[#allocation352_spill] sm:$0xff] %v10934_v26  ;;  %v10936_v14 = vpop.f32.mrb[30].mxu0  ;;  %v4782_v22 = vmax.f32 %v10932_v49, %v10934_v26 }
 0x654   : > { %v10940_v3 = vpop.f32.mrb[31].mxu0 }
 0x655   : > { %13365 = vst [vmem:[#allocation353_spill] sm:$0xff] %v10940_v3  ;;  %4783 = vmax.xlane.f32.xlu0 %v4782_v22  ;;  %v4785_v31 = vmax.f32 %v10936_v14, %v10940_v3 }
 0x657   : > { %4786 = vmax.xlane.f32.xlu1 %v4785_v31 }
 0x66a   : > { %v4694_v10 = vpop.xlane.xlu0 %4693 }
 0x66b   : > { %v4788_v33 = vsub.f32 %v10579_v12, %v4694_v10  ;;  %v4789_v42 = vsub.f32 %v10584_v16, %v4694_v10 }
 0x66d   : > { %v4852_v47 = vmul.f32 1.442695, %v4788_v33  ;;  %v4854_v37 = vmul.f32 1.442695, %v4789_v42 }
 0x66e   : > { %v4697_v61 = vpop.xlane.xlu0 %4696 }
 0x66f   : > { %v4790_v57 = vsub.f32 %v10589_v18, %v4697_v61  ;;  %v4791_v38 = vsub.f32 %v10596_v53, %v4697_v61  ;;  %7338 = vpow2.f32 %v4852_v47 }
 0x670   : > { %7340 = vpow2.f32 %v4854_v37 }
 0x671   : > { %v4856_v26 = vmul.f32 1.442695, %v4790_v57  ;;  %v4858_v49 = vmul.f32 1.442695, %v4791_v38 }
 0x672   : > { %v4700_v22 = vpop.xlane.xlu1 %4699 }
 0x673   : > { %7342 = vpow2.f32 %v4856_v26  ;;  %v4792_v31 = vsub.f32 %v10618_v28, %v4700_v22  ;;  %v4793_v3 = vsub.f32 %v10622_v15, %v4700_v22 }
 0x674   : > { %7344 = vpow2.f32 %v4858_v49 }
 0x675   : > { %v4860_v12 = vmul.f32 1.442695, %v4792_v31  ;;  %v4862_v16 = vmul.f32 1.442695, %v4793_v3  ;;  %v12849_v3 = vmov 1065369472  }
 0x676   : > { %v4703_v33 = vpop.xlane.xlu1 %4702  ;;  %5237 = vmatprep.mubr.bf16.mxu0 %v12849_v3 }
 0x677   : > { %v4794_v10 = vsub.f32 %v10624_v1, %v4703_v33  ;;  %v4795_v18 = vsub.f32 %v10628_v2, %v4703_v33  ;;  %7346 = vpow2.f32 %v4860_v12 }
 0x678   : > { %7348 = vpow2.f32 %v4862_v16 }
 0x679   : > { %v4864_v53 = vmul.f32 1.442695, %v4794_v10  ;;  %v4866_v61 = vmul.f32 1.442695, %v4795_v18  ;;  %v7339_v57 = vpop.eup %7338  ;;  %v13366_v10 = vpack.c.bf16 %v10679_v50, %v10673_v56  ;;  %v13368_v50 = vpack.c.bf16 %v10707_v30, %v10701_v0 }
 0x67a   : > { %v4706_v38 = vpop.xlane.xlu0 %4705  ;;  %v7341_v15 = vpop.eup %7340  ;;  %v13370_v30 = vpack.c.bf16 %v10735_v32, %v10729_v21  ;;  %v13372_v32 = vpack.c.bf16 %v10756_v5, %v10749_v40  ;;  %v13374_v40 = vpack.c.bf16 %v10774_v45, %v10771_v60  ;;  %v13377_v60 = vld [vmem:[#allocation315_spill] sm:$0xff] }
 0x67b   : > { %7350 = vpow2.f32 %v4864_v53  ;;  %v4796_v26 = vsub.f32 %v10632_v43, %v4706_v38  ;;  %v4797_v28 = vsub.f32 %v10634_v27, %v4706_v38 }
 0x67c   : > { %7352 = vpow2.f32 %v4866_v61  ;;  %v4709_v37 = vpop.xlane.xlu1 %4708  ;;  %v13367_v61 = vpack.c.bf16 %v10500_v23, %v10497_v62  ;;  %v13369_v23 = vpack.c.bf16 %v10519_v44, %v10513_v35 }
 0x67d   : > { %v7343_v1 = vpop.eup %7342  ;;  %v4868_v47 = vmul.f32 1.442695, %v4796_v26  ;;  %v4798_v2 = vsub.f32 %v10636_v52, %v4709_v37  ;;  %v4799_v49 = vsub.f32 %v10640_v4, %v4709_v37  ;;  %v4870_v31 = vmul.f32 1.442695, %v4797_v28 }
 0x67e   : > { %v7345_v42 = vpop.eup %7344  ;;  %v4980_v22 = vpack.c.bf16 %v7343_v1, %v7339_v57 }
 0x67f   : > { %v4872_v12 = vmul.f32 1.442695, %v4798_v2  ;;  %v4874_v16 = vmul.f32 1.442695, %v4799_v49  ;;  %v4981_v43 = vpack.c.bf16 %v7345_v42, %v7341_v15  ;;  %7354 = vpow2.f32 %v4868_v47 }
 0x680   : > { %v13371_v2 = vpack.c.bf16 %v10535_v19, %v10529_v25  ;;  %v13373_v25 = vpack.c.bf16 %v10551_v13, %v10545_v17 }
 0x681   : > { %7356 = vpow2.f32 %v4872_v12  ;;  %5012 = vmatprep.subr.bf16.mxu1 %v4981_v43  ;;  %5205 = vmatprep.subr.bf16.mxu0 %v4981_v43  ;;  %v7347_v33 = vpop.eup %7346 }
 0x682   : > { %7358 = vpow2.f32 %v4874_v16  ;;  %5013 = vmatpush1.bf16.xpose.msra.mxu1 %v4980_v22  ;;  %5206 = vmatpush1.bf16.xpose.msra.mxu0 %v4980_v22  ;;  %v4712_v27 = vpop.xlane.xlu0 %4711  ;;  %v7349_v18 = vpop.eup %7348 }
 0x683   : > { %7360 = vpow2.f32 %v4870_v31  ;;  %v4800_v52 = vsub.f32 %v10656_v6, %v4712_v27  ;;  %v4801_v4 = vsub.f32 %v10662_v63, %v4712_v27  ;;  %4467 = vxpose.xlu0.c.b16.start [1/8] %v13366_v10, 128 }
 0x684   : > { %v4715_v53 = vpop.xlane.xlu1 %4714  ;;  %4435 = vxpose.xlu1.c.b16.start [1/8] %v13367_v61, 128 }
 0x685   : > { %v7351_v38 = vpop.eup %7350  ;;  %v4876_v57 = vmul.f32 1.442695, %v4800_v52  ;;  %v4802_v26 = vsub.f32 %v10664_v36, %v4715_v53  ;;  %v4803_v28 = vsub.f32 %v10668_v7, %v4715_v53  ;;  %v4878_v37 = vmul.f32 1.442695, %v4801_v4 }
 0x686   : > { %v7353_v15 = vpop.eup %7352  ;;  %v4982_v6 = vpack.c.bf16 %v7351_v38, %v7347_v33  ;;  %v13376_v38 = vld [vmem:[#allocation318_spill] sm:$0xff] }
 0x687   : > { %v4880_v63 = vmul.f32 1.442695, %v4802_v26  ;;  %v4882_v1 = vmul.f32 1.442695, %v4803_v28  ;;  %4468 = vxpose.xlu0.c.b16.cont [2/8] %v13368_v50, 128  ;;  %v4983_v56 = vpack.c.bf16 %v7353_v15, %v7349_v18  ;;  %7362 = vpow2.f32 %v4876_v57  ;;  %v13379_v57 = vld [vmem:[#allocation289_spill] sm:$0xff] }
 0x688   : > { %4436 = vxpose.xlu1.c.b16.cont [2/8] %v13369_v23, 128  ;;  %v13375_v18 = vpack.c.bf16 %v10567_v54, %v10561_v20  ;;  %v13378_v45 = vpack.c.bf16 %v13376_v38, %v13377_v60  ;;  %v13382_v28 = vld [vmem:[#allocation305_spill] sm:$0xff]  ;;  %v13404_v38 = vld [vmem:[#allocation302_spill] sm:$0xff] }
 0x689   : > { %7364 = vpow2.f32 %v4880_v63  ;;  %5014 = vmatprep.subr.bf16.mxu1 %v4983_v56  ;;  %5207 = vmatprep.subr.bf16.mxu0 %v4983_v56  ;;  %v7355_v62 = vpop.eup %7354  ;;  %v13384_v63 = vpack.c.bf16 %v10818_v8, %v10815_v58  ;;  %v13390_v58 = vpack.c.bf16 %v10846_v46, %v10839_v48  ;;  %v13391_v8 = vld [vmem:[#allocation297_spill] sm:$0xff]  ;;  %v13396_v46 = vld [vmem:[#allocation300_spill] sm:$0xff] }
 0x68a   : > { %7366 = vpow2.f32 %v4882_v1  ;;  %5015 = vmatpush1.bf16.xpose.msra.mxu1 %v4982_v6  ;;  %5208 = vmatpush1.bf16.xpose.msra.mxu0 %v4982_v6  ;;  %v4718_v7 = vpop.xlane.xlu0 %4717  ;;  %v13383_v6 = vld [vmem:[#allocation306_spill] sm:$0xff]  ;;  %v13405_v60 = vld [vmem:[#allocation301_spill] sm:$0xff] }
 0x68b   : > { %v7357_v36 = vpop.eup %7356  ;;  %7368 = vpow2.f32 %v4878_v37  ;;  %v4804_v47 = vsub.f32 %v10684_v59, %v4718_v7  ;;  %v4805_v0 = vsub.f32 %v10688_v9, %v4718_v7  ;;  %4469 = vxpose.xlu0.c.b16.cont [3/8] %v13370_v30, 128  ;;  %v13385_v7 = vld [vmem:[#allocation307_spill] sm:$0xff]  ;;  %v13387_v30 = vld [vmem:[#allocation293_spill] sm:$0xff] }
 0x68c   : > { %v7359_v35 = vpop.eup %7358  ;;  %v4721_v44 = vpop.xlane.xlu1 %4720  ;;  %4437 = vxpose.xlu1.c.b16.cont [3/8] %v13371_v2, 128  ;;  %v4984_v49 = vpack.c.bf16 %v7357_v36, %v7355_v62 }
 0x68d   : > { %v7361_v42 = vpop.eup %7360  ;;  %v4884_v22 = vmul.f32 1.442695, %v4804_v47  ;;  %v4806_v31 = vsub.f32 %v10692_v34, %v4721_v44  ;;  %v4807_v12 = vsub.f32 %v10696_v51, %v4721_v44  ;;  %v4886_v16 = vmul.f32 1.442695, %v4805_v0  ;;  %v13386_v47 = vld [vmem:[#allocation308_spill] sm:$0xff] }
 0x68e   : > { %v4985_v59 = vpack.c.bf16 %v7359_v35, %v7361_v42  ;;  %v13388_v35 = vld [vmem:[#allocation291_spill] sm:$0xff] }
 0x68f   : > { %v4888_v9 = vmul.f32 1.442695, %v4806_v31  ;;  %v4890_v43 = vmul.f32 1.442695, %v4807_v12  ;;  %4470 = vxpose.xlu0.c.b16.cont [4/8] %v13372_v32, 128  ;;  %7370 = vpow2.f32 %v4884_v22  ;;  %v13389_v44 = vpack.c.bf16 %v13387_v30, %v13388_v35  ;;  %v13392_v31 = vld [vmem:[#allocation295_spill] sm:$0xff]  ;;  %v13415_v30 = vld [vmem:[#allocation282_spill] sm:$0xff] }
 0x690   : > { %5016 = vmatprep.subr.bf16.mxu1 %v4985_v59  ;;  %5209 = vmatprep.subr.bf16.mxu0 %v4985_v59  ;;  %v13393_v12 = vpack.c.bf16 %v13391_v8, %v13392_v31  ;;  %v13416_v35 = vld [vmem:[#allocation281_spill] sm:$0xff]  ;;  %v13421_v31 = vld [vmem:[#allocation284_spill] sm:$0xff] }
 0x691   : > { %7372 = vpow2.f32 %v4888_v9  ;;  %4438 = vxpose.xlu1.c.b16.cont [4/8] %v13373_v25, 128  ;;  %v7363_v19 = vpop.eup %7362  ;;  %v13395_v25 = vld [vmem:[#allocation312_spill] sm:$0xff] }
 0x692   : > { %7374 = vpow2.f32 %v4890_v43  ;;  %5017 = vmatpush1.bf16.xpose.msra.mxu1 %v4984_v49  ;;  %5210 = vmatpush1.bf16.xpose.msra.mxu0 %v4984_v49  ;;  %v4724_v51 = vpop.xlane.xlu0 %4723  ;;  %v13394_v43 = vld [vmem:[#allocation311_spill] sm:$0xff] }
 0x693   : > { %v7365_v34 = vpop.eup %7364  ;;  %7376 = vpow2.f32 %v4886_v16  ;;  %v4808_v21 = vsub.f32 %v10712_v29, %v4724_v51  ;;  %v4809_v5 = vsub.f32 %v10718_v24, %v4724_v51  ;;  %4471 = vxpose.xlu0.c.b16.cont [5/8] %v13374_v40, 128 }
 0x694   : > { %v7367_v27 = vpop.eup %7366  ;;  %v4727_v33 = vpop.xlane.xlu1 %4726  ;;  %v4986_v52 = vpack.c.bf16 %v7365_v34, %v7363_v19  ;;  %v13397_v19 = vld [vmem:[#allocation299_spill] sm:$0xff] }
 0x695   : > { %v7369_v17 = vpop.eup %7368  ;;  %v4892_v13 = vmul.f32 1.442695, %v4808_v21  ;;  %v4810_v4 = vsub.f32 %v10720_v39, %v4727_v33  ;;  %v4811_v10 = vsub.f32 %v10724_v41, %v4727_v33  ;;  %4439 = vxpose.xlu1.c.b16.cont [5/8] %v13375_v18, 128  ;;  %v4894_v53 = vmul.f32 1.442695, %v4809_v5  ;;  %v13380_v39 = vld [vmem:[#allocation287_spill] sm:$0xff]  ;;  %v13399_v33 = vld [vmem:[#allocation316_spill] sm:$0xff] }
 0x696   : > { %v4987_v29 = vpack.c.bf16 %v7367_v27, %v7369_v17  ;;  %v13381_v26 = vpack.c.bf16 %v13379_v57, %v13380_v39  ;;  %v13398_v51 = vpack.c.bf16 %v13396_v46, %v13397_v19  ;;  %v13400_v17 = vld [vmem:[#allocation317_spill] sm:$0xff]  ;;  %v13407_v57 = vld [vmem:[#allocation280_spill] sm:$0xff]  ;;  %v13408_v39 = vld [vmem:[#allocation279_spill] sm:$0xff] }
 0x697   : > { %v4896_v24 = vmul.f32 1.442695, %v4810_v4  ;;  %v4898_v61 = vmul.f32 1.442695, %v4811_v10  ;;  %4472 = vxpose.xlu0.c.b16.cont [6/8] %v13378_v45, 128  ;;  %7378 = vpow2.f32 %v4892_v13  ;;  %v13401_v4 = vld [vmem:[#allocation278_spill] sm:$0xff]  ;;  %v13402_v10 = vld [vmem:[#allocation277_spill] sm:$0xff]  ;;  %v13406_v45 = vpack.c.bf16 %v13404_v38, %v13405_v60 }
 0x698   : > { %5018 = vmatprep.subr.bf16.mxu1 %v4987_v29  ;;  %5211 = vmatprep.subr.bf16.mxu0 %v4987_v29  ;;  %v13403_v18 = vpack.c.bf16 %v13401_v4, %v13402_v10  ;;  %v13426_v46 = vld [vmem:[#allocation314_spill] sm:$0xff]  ;;  %v13427_v19 = vld [vmem:[#allocation313_spill] sm:$0xff]  ;;  %v13434_v38 = vld [vmem:[#allocation320_spill] sm:$0xff] }
 0x699   : > { %7380 = vpow2.f32 %v4896_v24  ;;  %4440 = vxpose.xlu1.c.b16.cont [6/8] %v13381_v26, 128  ;;  %v7371_v41 = vpop.eup %7370  ;;  %v13409_v26 = vpack.c.bf16 %v13407_v57, %v13408_v39  ;;  %v13431_v4 = vld [vmem:[#allocation286_spill] sm:$0xff]  ;;  %v13432_v10 = vld [vmem:[#allocation285_spill] sm:$0xff]  ;;  %v13435_v60 = vld [vmem:[#allocation319_spill] sm:$0xff] }
 0x69a   : > { %7382 = vpow2.f32 %v4898_v61  ;;  %5019 = vmatpush1.bf16.xpose.msra.mxu1 %v4986_v52  ;;  %5212 = vmatpush1.bf16.xpose.msra.mxu0 %v4986_v52  ;;  %v4730_v20 = vpop.xlane.xlu0 %4729  ;;  %v13437_v57 = vld [vmem:[#allocation290_spill] sm:$0xff]  ;;  %v13438_v39 = vld [vmem:[#allocation288_spill] sm:$0xff] }
 0x69b   : > { %v7373_v54 = vpop.eup %7372  ;;  %7384 = vpow2.f32 %v4894_v53  ;;  %v4812_v15 = vsub.f32 %v13382_v28, %v4730_v20  ;;  %v4813_v37 = vsub.f32 %v13383_v6, %v4730_v20  ;;  %4473 = vxpose.xlu0.c.b16.cont [7/8] %v13384_v63, 128  ;;  %v13412_v63 = vld [vmem:[#allocation303_spill] sm:$0xff] }
 0x69c   : > { %v7375_v1 = vpop.eup %7374  ;;  %v4733_v50 = vpop.xlane.xlu1 %4732  ;;  %v4988_v56 = vpack.c.bf16 %v7373_v54, %v7371_v41 }
 0x69d   : > { %v7377_v23 = vpop.eup %7376  ;;  %v4900_v62 = vmul.f32 1.442695, %v4812_v15  ;;  %v4814_v36 = vsub.f32 %v13385_v7, %v4733_v50  ;;  %v4815_v0 = vsub.f32 %v13386_v47, %v4733_v50  ;;  %4441 = vxpose.xlu1.c.b16.cont [7/8] %v13389_v44, 128  ;;  %v4902_v49 = vmul.f32 1.442695, %v4813_v37  ;;  %v13410_v15 = vld [vmem:[#allocation321_spill] sm:$0xff]  ;;  %v13411_v37 = vld [vmem:[#allocation304_spill] sm:$0xff] }
 0x69e   : > { %v4989_v2 = vpack.c.bf16 %v7375_v1, %v7377_v23  ;;  %v13413_v1 = vpack.c.bf16 %v13411_v37, %v13412_v63  ;;  %v13414_v47 = vld [vmem:[#allocation324_spill] sm:$0xff]  ;;  %v13417_v44 = vpack.c.bf16 %v13415_v30, %v13416_v35  ;;  %v13442_v63 = vld [vmem:[#allocation323_spill] sm:$0xff] }
 0x69f   : > { %v4904_v42 = vmul.f32 1.442695, %v4814_v36  ;;  %v4906_v22 = vmul.f32 1.442695, %v4815_v0  ;;  %4474 = vxpose.xlu0.c.b16.end [8/8] %v13390_v58, 128  ;;  %7386 = vpow2.f32 %v4900_v62  ;;  %v13419_v58 = vld [vmem:[#allocation309_spill] sm:$0xff]  ;;  %v13446_v30 = vld [vmem:[#allocation332_spill] sm:$0xff] }
 0x6a0   : > { %5020 = vmatprep.subr.bf16.mxu1 %v4989_v2  ;;  %5213 = vmatprep.subr.bf16.mxu0 %v4989_v2 }
 0x6a1   : > { %7388 = vpow2.f32 %v4904_v42  ;;  %4442 = vxpose.xlu1.c.b16.end [8/8] %v13393_v12, 128  ;;  %v7379_v59 = vpop.eup %7378 }
 0x6a2   : > { %7390 = vpow2.f32 %v4906_v22  ;;  %5021 = vmatpush1.bf16.xpose.msra.mxu1 %v4988_v56  ;;  %5214 = vmatpush1.bf16.xpose.msra.mxu0 %v4988_v56  ;;  %v4736_v16 = vpop.xlane.xlu0 %4735  ;;  %v13418_v22 = vld [vmem:[#allocation310_spill] sm:$0xff] }
 0x6a3   : > { %v7381_v9 = vpop.eup %7380  ;;  %7392 = vpow2.f32 %v4902_v49  ;;  %v4816_v32 = vsub.f32 %v13394_v43, %v4736_v16  ;;  %v4817_v48 = vsub.f32 %v13395_v25, %v4736_v16  ;;  %4483 = vxpose.xlu0.c.b16.start [1/8] %v13398_v51, 128  ;;  %v13420_v8 = vpack.c.bf16 %v13418_v22, %v13419_v58  ;;  %v13424_v43 = vld [vmem:[#allocation325_spill] sm:$0xff]  ;;  %v13425_v25 = vld [vmem:[#allocation326_spill] sm:$0xff] }
 0x6a4   : > { %v7383_v34 = vpop.eup %7382  ;;  %v4739_v21 = vpop.xlane.xlu1 %4738  ;;  %v4990_v5 = vpack.c.bf16 %v7381_v9, %v7379_v59  ;;  %v13428_v51 = vpack.c.bf16 %v13426_v46, %v13427_v19  ;;  %v13457_v46 = vld [vmem:[#allocation336_spill] sm:$0xff] }
 0x6a5   : > { %v7385_v40 = vpop.eup %7384  ;;  %v4908_v27 = vmul.f32 1.442695, %v4816_v32  ;;  %v4818_v52 = vsub.f32 %v13399_v33, %v4739_v21  ;;  %v4819_v13 = vsub.f32 %v13400_v17, %v4739_v21  ;;  %4451 = vxpose.xlu1.c.b16.start [1/8] %v13403_v18, 128  ;;  %v4910_v53 = vmul.f32 1.442695, %v4817_v48  ;;  %v13429_v33 = vld [vmem:[#allocation327_spill] sm:$0xff]  ;;  %v13430_v17 = vld [vmem:[#allocation328_spill] sm:$0xff] }
 0x6a6   : > { %v4991_v29 = vpack.c.bf16 %v7383_v34, %v7385_v40  ;;  %v13433_v18 = vpack.c.bf16 %v13431_v4, %v13432_v10 }
 0x6a7   : > { %v4912_v24 = vmul.f32 1.442695, %v4818_v52  ;;  %v4914_v61 = vmul.f32 1.442695, %v4819_v13  ;;  %4484 = vxpose.xlu0.c.b16.cont [2/8] %v13406_v45, 128  ;;  %7394 = vpow2.f32 %v4908_v27  ;;  %v13436_v45 = vpack.c.bf16 %v13434_v38, %v13435_v60  ;;  %v13461_v60 = vld [vmem:[#allocation340_spill] sm:$0xff] }
 0x6a8   : > { %5022 = vmatprep.subr.bf16.mxu1 %v4991_v29  ;;  %5215 = vmatprep.subr.bf16.mxu0 %v4991_v29 }
 0x6a9   : > { %7396 = vpow2.f32 %v4912_v24  ;;  %4452 = vxpose.xlu1.c.b16.cont [2/8] %v13409_v26, 128  ;;  %v7387_v41 = vpop.eup %7386  ;;  %v13439_v26 = vpack.c.bf16 %v13437_v57, %v13438_v39 }
 0x6aa   : > { %7398 = vpow2.f32 %v4914_v61  ;;  %5023 = vmatpush1.bf16.xpose.msra.mxu1 %v4990_v5  ;;  %5216 = vmatpush1.bf16.xpose.msra.mxu0 %v4990_v5  ;;  %v4742_v20 = vpop.xlane.xlu0 %4741 }
 0x6ab   : > { %v7389_v54 = vpop.eup %7388  ;;  %7400 = vpow2.f32 %v4910_v53  ;;  %v4820_v28 = vsub.f32 %v10820_v55, %v4742_v20  ;;  %v4821_v6 = vsub.f32 %v13410_v15, %v4742_v20  ;;  %4485 = vxpose.xlu0.c.b16.cont [3/8] %v13413_v1, 128  ;;  %v13443_v1 = vld [vmem:[#allocation322_spill] sm:$0xff] }
 0x6ac   : > { %v7391_v50 = vpop.eup %7390  ;;  %v4745_v56 = vpop.xlane.xlu1 %4744  ;;  %v4992_v23 = vpack.c.bf16 %v7389_v54, %v7387_v41 }
 0x6ad   : > { %v7393_v62 = vpop.eup %7392  ;;  %v4916_v7 = vmul.f32 1.442695, %v4820_v28  ;;  %v4822_v36 = vsub.f32 %v10834_v11, %v4745_v56  ;;  %v4823_v0 = vsub.f32 %v13414_v47, %v4745_v56  ;;  %4453 = vxpose.xlu1.c.b16.cont [3/8] %v13417_v44, 128  ;;  %v4918_v2 = vmul.f32 1.442695, %v4821_v6  ;;  %v13422_v11 = vld [vmem:[#allocation283_spill] sm:$0xff]  ;;  %v13440_v28 = vld [vmem:[#allocation329_spill] sm:$0xff] }
 0x6ae   : > { %v4993_v55 = vpack.c.bf16 %v7391_v50, %v7393_v62  ;;  %v13423_v12 = vpack.c.bf16 %v13421_v31, %v13422_v11  ;;  %v13441_v6 = vld [vmem:[#allocation330_spill] sm:$0xff]  ;;  %v13444_v50 = vpack.c.bf16 %v13442_v63, %v13443_v1  ;;  %v13445_v47 = vld [vmem:[#allocation331_spill] sm:$0xff]  ;;  %v13451_v31 = vld [vmem:[#allocation333_spill] sm:$0xff] }
 0x6af   : > { %v4920_v49 = vmul.f32 1.442695, %v4822_v36  ;;  %v4922_v42 = vmul.f32 1.442695, %v4823_v0  ;;  %4486 = vxpose.xlu0.c.b16.cont [4/8] %v13420_v8, 128  ;;  %7402 = vpow2.f32 %v4916_v7  ;;  %v13447_v44 = vld [vmem:[#allocation294_spill] sm:$0xff] }
 0x6b0   : > { %5024 = vmatprep.subr.bf16.mxu1 %v4993_v55  ;;  %5217 = vmatprep.subr.bf16.mxu0 %v4993_v55  ;;  %v13448_v55 = vld [vmem:[#allocation292_spill] sm:$0xff]  ;;  %v13450_v8 = vld [vmem:[#allocation334_spill] sm:$0xff] }
 0x6b1   : > { %7404 = vpow2.f32 %v4920_v49  ;;  %4454 = vxpose.xlu1.c.b16.cont [4/8] %v13423_v12, 128  ;;  %v7395_v59 = vpop.eup %7394  ;;  %v13452_v11 = vpack.c.bf16 %v13450_v8, %v13451_v31  ;;  %v13453_v12 = vld [vmem:[#allocation298_spill] sm:$0xff] }
 0x6b2   : > { %7406 = vpow2.f32 %v4922_v42  ;;  %5025 = vmatpush1.bf16.xpose.msra.mxu1 %v4992_v23  ;;  %5218 = vmatpush1.bf16.xpose.msra.mxu0 %v4992_v23  ;;  %v4748_v16 = vpop.xlane.xlu0 %4747 }
 0x6b3   : > { %v7397_v9 = vpop.eup %7396  ;;  %7408 = vpow2.f32 %v4918_v2  ;;  %v4824_v32 = vsub.f32 %v13424_v43, %v4748_v16  ;;  %v4825_v48 = vsub.f32 %v13425_v25, %v4748_v16  ;;  %4487 = vxpose.xlu0.c.b16.cont [5/8] %v13428_v51, 128  ;;  %v13449_v2 = vpack.c.bf16 %v13447_v44, %v13448_v55  ;;  %v13456_v25 = vld [vmem:[#allocation335_spill] sm:$0xff] }
 0x6b4   : > { %v7399_v34 = vpop.eup %7398  ;;  %v4751_v21 = vpop.xlane.xlu1 %4750  ;;  %v4994_v5 = vpack.c.bf16 %v7397_v9, %v7395_v59  ;;  %v13454_v59 = vld [vmem:[#allocation296_spill] sm:$0xff] }
 0x6b5   : > { %v7401_v40 = vpop.eup %7400  ;;  %v4924_v27 = vmul.f32 1.442695, %v4824_v32  ;;  %v4826_v52 = vsub.f32 %v13429_v33, %v4751_v21  ;;  %v4827_v13 = vsub.f32 %v13430_v17, %v4751_v21  ;;  %4455 = vxpose.xlu1.c.b16.cont [5/8] %v13433_v18, 128  ;;  %v4926_v53 = vmul.f32 1.442695, %v4825_v48 }
 0x6b6   : > { %v4995_v29 = vpack.c.bf16 %v7399_v34, %v7401_v40  ;;  %v13455_v16 = vpack.c.bf16 %v13453_v12, %v13454_v59 }
 0x6b7   : > { %v4928_v24 = vmul.f32 1.442695, %v4826_v52  ;;  %v4930_v61 = vmul.f32 1.442695, %v4827_v13  ;;  %4488 = vxpose.xlu0.c.b16.cont [6/8] %v13436_v45, 128  ;;  %7410 = vpow2.f32 %v4924_v27  ;;  %v13458_v27 = vld [vmem:[#allocation337_spill] sm:$0xff]  ;;  %v13459_v52 = vld [vmem:[#allocation338_spill] sm:$0xff] }
 0x6b8   : > { %5026 = vmatprep.subr.bf16.mxu1 %v4995_v29  ;;  %5219 = vmatprep.subr.bf16.mxu0 %v4995_v29 }
 0x6b9   : > { %7412 = vpow2.f32 %v4928_v24  ;;  %4456 = vxpose.xlu1.c.b16.cont [6/8] %v13439_v26, 128  ;;  %v7403_v41 = vpop.eup %7402 }
 0x6ba   : > { %7414 = vpow2.f32 %v4930_v61  ;;  %5027 = vmatpush1.bf16.xpose.msra.mxu1 %v4994_v5  ;;  %5220 = vmatpush1.bf16.xpose.msra.mxu0 %v4994_v5  ;;  %v4754_v20 = vpop.xlane.xlu0 %4753  ;;  %v13460_v61 = vld [vmem:[#allocation339_spill] sm:$0xff] }
 0x6bb   : > { %v7405_v54 = vpop.eup %7404  ;;  %7416 = vpow2.f32 %v4926_v53  ;;  %v4828_v15 = vsub.f32 %v13440_v28, %v4754_v20  ;;  %v4829_v37 = vsub.f32 %v13441_v6, %v4754_v20  ;;  %4489 = vxpose.xlu0.c.b16.cont [7/8] %v13444_v50, 128 }
 0x6bc   : > { %v7407_v56 = vpop.eup %7406  ;;  %v4757_v23 = vpop.xlane.xlu1 %4756  ;;  %v4996_v62 = vpack.c.bf16 %v7405_v54, %v7403_v41  ;;  %v13462_v54 = vld [vmem:[#allocation341_spill] sm:$0xff] }
 0x6bd   : > { %v7409_v7 = vpop.eup %7408  ;;  %v4932_v36 = vmul.f32 1.442695, %v4828_v15  ;;  %v4830_v0 = vsub.f32 %v13445_v47, %v4757_v23  ;;  %v4831_v35 = vsub.f32 %v13446_v30, %v4757_v23  ;;  %4457 = vxpose.xlu1.c.b16.cont [7/8] %v13449_v2, 128  ;;  %v4934_v42 = vmul.f32 1.442695, %v4829_v37  ;;  %v13463_v15 = vld [vmem:[#allocation342_spill] sm:$0xff]  ;;  %v13465_v47 = vld [vmem:[#allocation344_spill] sm:$0xff] }
 0x6be   : > { %v4997_v49 = vpack.c.bf16 %v7407_v56, %v7409_v7  ;;  %v13464_v7 = vld [vmem:[#allocation343_spill] sm:$0xff] }
 0x6bf   : > { %v4936_v22 = vmul.f32 1.442695, %v4830_v0  ;;  %v4938_v58 = vmul.f32 1.442695, %v4831_v35  ;;  %4490 = vxpose.xlu0.c.b16.end [8/8] %v13452_v11, 128  ;;  %7418 = vpow2.f32 %v4932_v36 }
 0x6c0   : > { %5028 = vmatprep.subr.bf16.mxu1 %v4997_v49  ;;  %5221 = vmatprep.subr.bf16.mxu0 %v4997_v49  ;;  %v13466_v49 = vld [vmem:[#allocation345_spill] sm:$0xff] }
 0x6c1   : > { %7420 = vpow2.f32 %v4936_v22  ;;  %4458 = vxpose.xlu1.c.b16.end [8/8] %v13455_v16, 128  ;;  %v7411_v9 = vpop.eup %7410  ;;  %v13467_v22 = vld [vmem:[#allocation346_spill] sm:$0xff] }
 0x6c2   : > { %7422 = vpow2.f32 %v4938_v58  ;;  %5029 = vmatpush1.bf16.xpose.msra.mxu1 %v4996_v62  ;;  %5222 = vmatpush1.bf16.xpose.msra.mxu0 %v4996_v62  ;;  %v4760_v43 = vpop.xlane.xlu0 %4759 }
 0x6c3   : > { %v7413_v32 = vpop.eup %7412  ;;  %7424 = vpow2.f32 %v4934_v42  ;;  %v4832_v48 = vsub.f32 %v13456_v25, %v4760_v43  ;;  %v4833_v19 = vsub.f32 %v13457_v46, %v4760_v43  ;;  %v13468_v43 = vld [vmem:[#allocation347_spill] sm:$0xff]  ;;  %v13469_v25 = vld [vmem:[#allocation348_spill] sm:$0xff] }
 0x6c4   : > { %v7415_v51 = vpop.eup %7414  ;;  %v4763_v34 = vpop.xlane.xlu1 %4762  ;;  %v4998_v21 = vpack.c.bf16 %v7413_v32, %v7411_v9 }
 0x6c5   : > { %v7417_v5 = vpop.eup %7416  ;;  %v4940_v40 = vmul.f32 1.442695, %v4832_v48  ;;  %v4834_v33 = vsub.f32 %v13458_v27, %v4763_v34  ;;  %v4835_v17 = vsub.f32 %v13459_v52, %v4763_v34  ;;  %v4942_v4 = vmul.f32 1.442695, %v4833_v19 }
 0x6c6   : > { %v4999_v13 = vpack.c.bf16 %v7415_v51, %v7417_v5 }
 0x6c7   : > { %v4944_v10 = vmul.f32 1.442695, %v4834_v33  ;;  %v4946_v18 = vmul.f32 1.442695, %v4835_v17  ;;  %7426 = vpow2.f32 %v4940_v40  ;;  %v13470_v40 = vld [vmem:[#allocation349_spill] sm:$0xff]  ;;  %v13471_v33 = vld [vmem:[#allocation350_spill] sm:$0xff] }
 0x6c8   : > { %5030 = vmatprep.subr.bf16.mxu1 %v4999_v13  ;;  %5223 = vmatprep.subr.bf16.mxu0 %v4999_v13 }
 0x6c9   : > { %7428 = vpow2.f32 %v4944_v10  ;;  %v7419_v29 = vpop.eup %7418 }
 0x6ca   : > { %7430 = vpow2.f32 %v4946_v18  ;;  %5031 = vmatpush1.bf16.xpose.msra.mxu1 %v4998_v21  ;;  %5224 = vmatpush1.bf16.xpose.msra.mxu0 %v4998_v21  ;;  %v4766_v53 = vpop.xlane.xlu0 %4765 }
 0x6cb   : > { %v7421_v24 = vpop.eup %7420  ;;  %7432 = vpow2.f32 %v4942_v4  ;;  %v4836_v38 = vsub.f32 %v13460_v61, %v4766_v53  ;;  %v4837_v45 = vsub.f32 %v13461_v60, %v4766_v53  ;;  %v13472_v53 = vld [vmem:[#allocation351_spill] sm:$0xff]  ;;  %v13473_v61 = vld [vmem:[#allocation352_spill] sm:$0xff] }
 0x6cc   : > { %v7423_v57 = vpop.eup %7422  ;;  %v4769_v39 = vpop.xlane.xlu1 %4768  ;;  %v5000_v26 = vpack.c.bf16 %v7421_v24, %v7419_v29 }
 0x6cd   : > { %v7425_v41 = vpop.eup %7424  ;;  %v4948_v20 = vmul.f32 1.442695, %v4836_v38  ;;  %v4838_v28 = vsub.f32 %v13462_v54, %v4769_v39  ;;  %v4839_v6 = vsub.f32 %v13463_v15, %v4769_v39  ;;  %v4950_v63 = vmul.f32 1.442695, %v4837_v45  ;;  %v13474_v54 = vld [vmem:[#allocation353_spill] sm:$0xff] }
 0x6ce   : > { %v5001_v37 = vpack.c.bf16 %v7423_v57, %v7425_v41 }
 0x6cf   : > { %v4952_v1 = vmul.f32 1.442695, %v4838_v28  ;;  %v4954_v50 = vmul.f32 1.442695, %v4839_v6  ;;  %7434 = vpow2.f32 %v4948_v20 }
 0x6d0   : > { %5032 = vmatprep.subr.bf16.mxu1 %v5001_v37  ;;  %5225 = vmatprep.subr.bf16.mxu0 %v5001_v37 }
 0x6d1   : > { %7436 = vpow2.f32 %v4952_v1  ;;  %v7427_v56 = vpop.eup %7426 }
 0x6d2   : > { %7438 = vpow2.f32 %v4954_v50  ;;  %5033 = vmatpush1.bf16.xpose.msra.mxu1 %v5000_v26  ;;  %5226 = vmatpush1.bf16.xpose.msra.mxu0 %v5000_v26  ;;  %v4772_v23 = vpop.xlane.xlu0 %4771 }
 0x6d3   : > { %v7429_v62 = vpop.eup %7428  ;;  %7440 = vpow2.f32 %v4950_v63  ;;  %v4840_v36 = vsub.f32 %v13464_v7, %v4772_v23  ;;  %v4841_v0 = vsub.f32 %v13465_v47, %v4772_v23 }
 0x6d4   : > { %v7431_v30 = vpop.eup %7430  ;;  %v4775_v35 = vpop.xlane.xlu1 %4774  ;;  %v5002_v44 = vpack.c.bf16 %v7429_v62, %v7427_v56 }
 0x6d5   : > { %v7433_v55 = vpop.eup %7432  ;;  %v4956_v2 = vmul.f32 1.442695, %v4840_v36  ;;  %v4842_v42 = vsub.f32 %v13466_v49, %v4775_v35  ;;  %v4843_v58 = vsub.f32 %v13467_v22, %v4775_v35  ;;  %v4958_v31 = vmul.f32 1.442695, %v4841_v0  ;;  %v13478_v22 = vld [vmem:[#allocation86_spill] sm:$0xff] }
 0x6d6   : > { %v5003_v8 = vpack.c.bf16 %v7431_v30, %v7433_v55  ;;  %v13476_v55 = vld [vmem:[#allocation87_spill] sm:$0xff] }
 0x6d7   : > { %v4960_v11 = vmul.f32 1.442695, %v4842_v42  ;;  %v4962_v12 = vmul.f32 1.442695, %v4843_v58  ;;  %7442 = vpow2.f32 %v4956_v2  ;;  %v13479_v58 = vld [vmem:[#allocation85_spill] sm:$0xff] }
 0x6d8   : > { %5034 = vmatprep.subr.bf16.mxu1 %v5003_v8  ;;  %5227 = vmatprep.subr.bf16.mxu0 %v5003_v8  ;;  %v13480_v8 = vpack.c.bf16 %v13478_v22, %v13479_v58  ;;  %v13526_v58 = vld [vmem:[#allocation138_spill] sm:$0xff] }
 0x6d9   : > { %7444 = vpow2.f32 %v4960_v11  ;;  %v7435_v59 = vpop.eup %7434  ;;  %v13482_v11 = vld [vmem:[#allocation91_spill] sm:$0xff] }
 0x6da   : > { %7446 = vpow2.f32 %v4962_v12  ;;  %5035 = vmatpush1.bf16.xpose.msra.mxu1 %v5002_v44  ;;  %5228 = vmatpush1.bf16.xpose.msra.mxu0 %v5002_v44  ;;  %v4778_v16 = vpop.xlane.xlu0 %4777  ;;  %v13475_v44 = vld [vmem:[#allocation88_spill] sm:$0xff] }
 0x6db   : > { %v7437_v9 = vpop.eup %7436  ;;  %7448 = vpow2.f32 %v4958_v31  ;;  %v4844_v32 = vsub.f32 %v13468_v43, %v4778_v16  ;;  %v4845_v48 = vsub.f32 %v13469_v25, %v4778_v16  ;;  %v13477_v2 = vpack.c.bf16 %v13475_v44, %v13476_v55  ;;  %v13481_v31 = vld [vmem:[#allocation92_spill] sm:$0xff]  ;;  %v13485_v43 = vld [vmem:[#allocation89_spill] sm:$0xff]  ;;  %v13523_v55 = vld [vmem:[#allocation142_spill] sm:$0xff] }
 0x6dc   : > { %v7439_v46 = vpop.eup %7438  ;;  %v4781_v19 = vpop.xlane.xlu1 %4780  ;;  %v5004_v51 = vpack.c.bf16 %v7437_v9, %v7435_v59  ;;  %v13483_v12 = vpack.c.bf16 %v13481_v31, %v13482_v11  ;;  %v13484_v9 = vld [vmem:[#allocation90_spill] sm:$0xff]  ;;  %v13487_v25 = vld [vmem:[#allocation96_spill] sm:$0xff] }
 0x6dd   : > { %v7441_v34 = vpop.eup %7440  ;;  %v4964_v21 = vmul.f32 1.442695, %v4844_v32  ;;  %v4966_v5 = vmul.f32 1.442695, %v4845_v48  ;;  %v4846_v27 = vsub.f32 %v13470_v40, %v4781_v19  ;;  %v4847_v52 = vsub.f32 %v13471_v33, %v4781_v19  ;;  %v13488_v48 = vld [vmem:[#allocation95_spill] sm:$0xff]  ;;  %v13493_v40 = vld [vmem:[#allocation102_spill] sm:$0xff] }
 0x6de   : > { %v5005_v17 = vpack.c.bf16 %v7439_v46, %v7441_v34  ;;  %v13486_v32 = vpack.c.bf16 %v13484_v9, %v13485_v43  ;;  %v13489_v46 = vpack.c.bf16 %v13487_v25, %v13488_v48  ;;  %v13490_v34 = vld [vmem:[#allocation94_spill] sm:$0xff] }
 0x6df   : > { %7450 = vpow2.f32 %v4964_v21  ;;  %v4968_v13 = vmul.f32 1.442695, %v4846_v27  ;;  %v4970_v4 = vmul.f32 1.442695, %v4847_v52  ;;  %v13491_v21 = vld [vmem:[#allocation93_spill] sm:$0xff]  ;;  %v13529_v11 = vld [vmem:[#allocation150_spill] sm:$0xff] }
 0x6e0   : > { %7452 = vpow2.f32 %v4966_v5  ;;  %5036 = vmatprep.subr.bf16.mxu1 %v5005_v17  ;;  %5229 = vmatprep.subr.bf16.mxu0 %v5005_v17  ;;  %v13492_v5 = vpack.c.bf16 %v13490_v34, %v13491_v21  ;;  %v13494_v27 = vld [vmem:[#allocation101_spill] sm:$0xff]  ;;  %v13532_v43 = vld [vmem:[#allocation146_spill] sm:$0xff] }
 0x6e1   : > { %7454 = vpow2.f32 %v4968_v13  ;;  %v7443_v10 = vpop.eup %7442  ;;  %v13495_v33 = vpack.c.bf16 %v13493_v40, %v13494_v27  ;;  %v13496_v13 = vld [vmem:[#allocation100_spill] sm:$0xff]  ;;  %v13535_v48 = vld [vmem:[#allocation158_spill] sm:$0xff] }
 0x6e2   : > { %7456 = vpow2.f32 %v4970_v4  ;;  %5037 = vmatpush1.bf16.xpose.msra.mxu1 %v5004_v51  ;;  %5230 = vmatpush1.bf16.xpose.msra.mxu0 %v5004_v51  ;;  %v4784_v18 = vpop.xlane.xlu0 %4783  ;;  %v13497_v4 = vld [vmem:[#allocation98_spill] sm:$0xff] }
 0x6e3   : > { %v7445_v29 = vpop.eup %7444  ;;  %v4848_v24 = vsub.f32 %v13472_v53, %v4784_v18  ;;  %v4849_v38 = vsub.f32 %v13473_v61, %v4784_v18  ;;  %v13499_v18 = vld [vmem:[#allocation110_spill] sm:$0xff] }
 0x6e4   : > { %v7447_v60 = vpop.eup %7446  ;;  %v4787_v45 = vpop.xlane.xlu1 %4786  ;;  %v5006_v57 = vpack.c.bf16 %v7445_v29, %v7443_v10  ;;  %v13498_v10 = vpack.c.bf16 %v13496_v13, %v13497_v4  ;;  %v13500_v29 = vld [vmem:[#allocation108_spill] sm:$0xff]  ;;  %v13538_v21 = vld [vmem:[#allocation154_spill] sm:$0xff] }
 0x6e5   : > { %v7449_v39 = vpop.eup %7448  ;;  %v4972_v26 = vmul.f32 1.442695, %v4848_v24  ;;  %v4974_v41 = vmul.f32 1.442695, %v4849_v38  ;;  %v4850_v20 = vsub.f32 %v10936_v14, %v4787_v45  ;;  %v4851_v28 = vsub.f32 %v13474_v54, %v4787_v45  ;;  %v13502_v38 = vld [vmem:[#allocation106_spill] sm:$0xff] }
 0x6e6   : > { %v5007_v15 = vpack.c.bf16 %v7447_v60, %v7449_v39  ;;  %v13501_v53 = vpack.c.bf16 %v13499_v18, %v13500_v29  ;;  %v13503_v60 = vld [vmem:[#allocation104_spill] sm:$0xff]  ;;  %v13508_v54 = vld [vmem:[#allocation114_spill] sm:$0xff] }
 0x6e7   : > { %7458 = vpow2.f32 %v4972_v26  ;;  %v4976_v6 = vmul.f32 1.442695, %v4850_v20  ;;  %v4978_v37 = vmul.f32 1.442695, %v4851_v28  ;;  %v13504_v45 = vpack.c.bf16 %v13502_v38, %v13503_v60  ;;  %v13506_v39 = vld [vmem:[#allocation116_spill] sm:$0xff]  ;;  %v13541_v27 = vld [vmem:[#allocation166_spill] sm:$0xff] }
 0x6e8   : > { %7460 = vpow2.f32 %v4974_v41  ;;  %5038 = vmatprep.subr.bf16.mxu1 %v5007_v15  ;;  %5231 = vmatprep.subr.bf16.mxu0 %v5007_v15  ;;  %v13509_v28 = vld [vmem:[#allocation112_spill] sm:$0xff]  ;;  %v13544_v4 = vld [vmem:[#allocation162_spill] sm:$0xff] }
 0x6e9   : > { %v7451_v63 = vpop.eup %7450  ;;  %7462 = vpow2.f32 %v4976_v6  ;;  %v4475_v1 = vpop.trf.xlu0  ;;  %v13510_v15 = vpack.c.bf16 %v13508_v54, %v13509_v28  ;;  %v13511_v6 = vld [vmem:[#allocation126_spill] sm:$0xff] }
 0x6ea   : > { %v7453_v50 = vpop.eup %7452  ;;  %7464 = vpow2.f32 %v4978_v37  ;;  %5039 = vmatpush1.bf16.xpose.msra.mxu1 %v5006_v57  ;;  %5232 = vmatpush1.bf16.xpose.msra.mxu0 %v5006_v57  ;;  %v13505_v57 = vld [vmem:[#allocation118_spill] sm:$0xff]  ;;  %v13512_v37 = vld [vmem:[#allocation124_spill] sm:$0xff] }
 0x6eb   : > { %v7455_v56 = vpop.eup %7454  ;;  %5044 = vmatprep.mubr.bf16.mxu1 %v4475_v1  ;;  %v4443_v49 = vpop.trf.xlu1  ;;  %v13507_v26 = vpack.c.bf16 %v13505_v57, %v13506_v39  ;;  %v13547_v29 = vld [vmem:[#allocation174_spill] sm:$0xff] }
 0x6ec   : > { %v7457_v23 = vpop.eup %7456  ;;  %v5008_v14 = vpack.c.bf16 %v7455_v56, %v7451_v63  ;;  %v13513_v63 = vpack.c.bf16 %v13511_v6, %v13512_v37  ;;  %v13514_v56 = vld [vmem:[#allocation122_spill] sm:$0xff] }
 0x6ed   : > { %v5009_v62 = vpack.c.bf16 %v7457_v23, %v7453_v50  ;;  %v4476_v42 = vpop.trf.xlu0  ;;  %v13515_v23 = vld [vmem:[#allocation120_spill] sm:$0xff]  ;;  %v13550_v60 = vld [vmem:[#allocation170_spill] sm:$0xff] }
 0x6ee   : > { %v13553_v39 = vld [vmem:[#allocation182_spill] sm:$0xff] }
 0x6ef   : > { %5040 = vmatprep.subr.bf16.mxu1 %v5009_v62  ;;  %5233 = vmatprep.subr.bf16.mxu0 %v5009_v62  ;;  %v4444_v59 = vpop.trf.xlu1  ;;  %v13517_v62 = vld [vmem:[#allocation134_spill] sm:$0xff] }
 0x6f0   : > { %v13556_v28 = vld [vmem:[#allocation178_spill] sm:$0xff] }
 0x6f1   : > { %v7459_v7 = vpop.eup %7458  ;;  %v4477_v16 = vpop.trf.xlu0  ;;  %v13559_v37 = vld [vmem:[#allocation190_spill] sm:$0xff] }
 0x6f2   : > { %v7461_v36 = vpop.eup %7460  ;;  %5041 = vmatpush1.bf16.xpose.msra.mxu1 %v5008_v14  ;;  %5234 = vmatpush1.bf16.xpose.msra.mxu0 %v5008_v14  ;;  %v13516_v14 = vpack.c.bf16 %v13514_v56, %v13515_v23  ;;  %v13562_v23 = vld [vmem:[#allocation186_spill] sm:$0xff] }
 0x6f3   : > { %v7463_v47 = vpop.eup %7462  ;;  %v4445_v19 = vpop.trf.xlu1 }
 0x6f4   : > { %v7465_v0 = vpop.eup %7464  ;;  %v5010_v30 = vpack.c.bf16 %v7463_v47, %v7459_v7  ;;  %v13518_v7 = vld [vmem:[#allocation132_spill] sm:$0xff] }
 0x6f5   : > { %v5011_v35 = vpack.c.bf16 %v7465_v0, %v7461_v36  ;;  %v4478_v51 = vpop.trf.xlu0  ;;  %v13519_v36 = vpack.c.bf16 %v13517_v62, %v13518_v7  ;;  %v13565_v7 = vld [vmem:[#allocation198_spill] sm:$0xff] }
 0x6f7   : > { %5042 = vmatprep.subr.bf16.mxu1 %v5011_v35  ;;  %5235 = vmatprep.subr.bf16.mxu0 %v5011_v35  ;;  %v4446_v52 = vpop.trf.xlu1  ;;  %v13521_v35 = vld [vmem:[#allocation128_spill] sm:$0xff] }
 0x6f9   : > { %v4479_v17 = vpop.trf.xlu0 }
 0x6fa   : > { %5043 = vmatpush1.bf16.xpose.msra.mxu1 %v5010_v30  ;;  %5236 = vmatpush1.bf16.xpose.msra.mxu0 %v5010_v30  ;;  %v13520_v30 = vld [vmem:[#allocation130_spill] sm:$0xff] }
 0x6fb   : > { %5384 = vmatprep.subr.bf16.mxu1 %v13477_v2  ;;  %v4447_v24 = vpop.trf.xlu1  ;;  %v13522_v44 = vpack.c.bf16 %v13520_v30, %v13521_v35  ;;  %v13524_v2 = vld [vmem:[#allocation140_spill] sm:$0xff]  ;;  %v13568_v30 = vld [vmem:[#allocation194_spill] sm:$0xff] }
 0x6fc   : > { %v13569_v35 = vld [vmem:[#allocation192_spill] sm:$0xff] }
 0x6fd   : > { %v4480_v61 = vpop.trf.xlu0 }
 0x6ff   : > { %v4448_v41 = vpop.trf.xlu1 }
 0x701   : > { %5045 = vmatmul.mubr.bf16.vlgmr.msra.gmra.mrb[0].mxu1 %v4443_v49  ;;  %5238 = vmatmul.mubr.bf16.vlgmr.msra.gmra.mrb[32].mxu0 %v12849_v3  ;;  %v4481_v20 = vpop.trf.xlu0  ;;  %v13525_v49 = vpack.c.bf16 %v13523_v55, %v13524_v2  ;;  %v13571_v55 = vld [vmem:[#allocation123_spill] sm:$0xff]  ;;  %v13572_v2 = vld [vmem:[#allocation125_spill] sm:$0xff] }
 0x702   : > { %5385 = vmatpush1.bf16.xpose.msra.mxu1 %v13480_v8  ;;  %5054 = vmatprep.mubr.bf16.mxu1 %v4476_v42  ;;  %v13527_v8 = vld [vmem:[#allocation136_spill] sm:$0xff] }
 0x703   : > { %5386 = vmatprep.subr.bf16.mxu1 %v13483_v12  ;;  %v4449_v1 = vpop.trf.xlu1  ;;  %v13528_v31 = vpack.c.bf16 %v13526_v58, %v13527_v8  ;;  %v13530_v12 = vld [vmem:[#allocation148_spill] sm:$0xff]  ;;  %v13577_v8 = vld [vmem:[#allocation103_spill] sm:$0xff] }
 0x705   : > { %v4482_v50 = vpop.trf.xlu0 }
 0x707   : > { %v4450_v47 = vpop.trf.xlu1 }
 0x709   : > { %5055 = vmatmul.mubr.bf16.gmra.mrb[4].mxu1 %v4444_v59  ;;  %v4491_v0 = vpop.trf.xlu0  ;;  %v13531_v59 = vpack.c.bf16 %v13529_v11, %v13530_v12  ;;  %v13580_v12 = vld [vmem:[#allocation105_spill] sm:$0xff] }
 0x70a   : > { %5387 = vmatpush1.bf16.xpose.msra.mxu1 %v13486_v32  ;;  %5064 = vmatprep.mubr.bf16.mxu1 %v4477_v16  ;;  %v13533_v32 = vld [vmem:[#allocation144_spill] sm:$0xff] }
 0x70b   : > { %5388 = vmatprep.subr.bf16.mxu1 %v13489_v46  ;;  %v4459_v42 = vpop.trf.xlu1  ;;  %v13534_v25 = vpack.c.bf16 %v13532_v43, %v13533_v32  ;;  %v13536_v46 = vld [vmem:[#allocation156_spill] sm:$0xff]  ;;  %v13584_v43 = vld [vmem:[#allocation115_spill] sm:$0xff] }
 0x70d   : > { %v4492_v22 = vpop.trf.xlu0 }
 0x70f   : > { %v4460_v16 = vpop.trf.xlu1 }
 0x711   : > { %5065 = vmatmul.mubr.bf16.gmra.mrb[8].mxu1 %v4445_v19  ;;  %v4493_v9 = vpop.trf.xlu0  ;;  %v13537_v19 = vpack.c.bf16 %v13535_v48, %v13536_v46  ;;  %v13587_v48 = vld [vmem:[#allocation117_spill] sm:$0xff] }
 0x712   : > { %5389 = vmatpush1.bf16.xpose.msra.mxu1 %v13492_v5  ;;  %5074 = vmatprep.mubr.bf16.mxu1 %v4478_v51  ;;  %v13539_v5 = vld [vmem:[#allocation152_spill] sm:$0xff] }
 0x713   : > { %5390 = vmatprep.subr.bf16.mxu1 %v13495_v33  ;;  %v4461_v51 = vpop.trf.xlu1  ;;  %v13540_v40 = vpack.c.bf16 %v13538_v21, %v13539_v5  ;;  %v13542_v33 = vld [vmem:[#allocation164_spill] sm:$0xff]  ;;  %v13592_v21 = vld [vmem:[#allocation133_spill] sm:$0xff] }
 0x714   : > { %v13593_v5 = vld [vmem:[#allocation121_spill] sm:$0xff] }
 0x715   : > { %v4494_v34 = vpop.trf.xlu0 }
 0x719   : > { %5075 = vmatmul.mubr.bf16.gmra.mrb[12].mxu1 %v4446_v52  ;;  %v13543_v52 = vpack.c.bf16 %v13541_v27, %v13542_v33  ;;  %v4495_v13 = vpop.trf.xlu0  ;;  %v13595_v27 = vld [vmem:[#allocation139_spill] sm:$0xff] }
 0x71a   : > { %5391 = vmatpush1.bf16.xpose.msra.mxu1 %v13498_v10  ;;  %5084 = vmatprep.mubr.bf16.mxu1 %v4479_v17  ;;  %v4462_v17 = vpop.trf.xlu1  ;;  %v13545_v10 = vld [vmem:[#allocation160_spill] sm:$0xff]  ;;  %v13596_v33 = vld [vmem:[#allocation127_spill] sm:$0xff] }
 0x71b   : > { %5392 = vmatprep.subr.bf16.mxu1 %v13501_v53  ;;  %v13546_v18 = vpack.c.bf16 %v13544_v4, %v13545_v10  ;;  %v13548_v53 = vld [vmem:[#allocation172_spill] sm:$0xff]  ;;  %v13601_v10 = vld [vmem:[#allocation147_spill] sm:$0xff] }
 0x71d   : > { %v4496_v38 = vpop.trf.xlu0 }
 0x721   : > { %5085 = vmatmul.mubr.bf16.gmra.mrb[16].mxu1 %v4447_v24  ;;  %v13549_v24 = vpack.c.bf16 %v13547_v29, %v13548_v53  ;;  %v4497_v54 = vpop.trf.xlu0  ;;  %v13604_v53 = vld [vmem:[#allocation149_spill] sm:$0xff] }
 0x722   : > { %5393 = vmatpush1.bf16.xpose.msra.mxu1 %v13504_v45  ;;  %5094 = vmatprep.mubr.bf16.mxu1 %v4480_v61  ;;  %v4463_v61 = vpop.trf.xlu1  ;;  %v13551_v45 = vld [vmem:[#allocation168_spill] sm:$0xff] }
 0x723   : > { %5394 = vmatprep.subr.bf16.mxu1 %v13507_v26  ;;  %v13552_v57 = vpack.c.bf16 %v13550_v60, %v13551_v45  ;;  %v13554_v26 = vld [vmem:[#allocation180_spill] sm:$0xff]  ;;  %v13608_v60 = vld [vmem:[#allocation143_spill] sm:$0xff] }
 0x725   : > { %v4498_v56 = vpop.trf.xlu0 }
 0x729   : > { %5095 = vmatmul.mubr.bf16.gmra.mrb[20].mxu1 %v4448_v41  ;;  %v13555_v41 = vpack.c.bf16 %v13553_v39, %v13554_v26  ;;  %v13611_v39 = vld [vmem:[#allocation145_spill] sm:$0xff] }
 0x72a   : > { %5395 = vmatpush1.bf16.xpose.msra.mxu1 %v13510_v15  ;;  %5104 = vmatprep.mubr.bf16.mxu1 %v4481_v20  ;;  %v4464_v20 = vpop.trf.xlu1  ;;  %v13557_v15 = vld [vmem:[#allocation176_spill] sm:$0xff] }
 0x72b   : > { %5396 = vmatprep.subr.bf16.mxu1 %v13513_v63  ;;  %v13558_v6 = vpack.c.bf16 %v13556_v28, %v13557_v15  ;;  %v13560_v63 = vld [vmem:[#allocation188_spill] sm:$0xff]  ;;  %v13616_v28 = vld [vmem:[#allocation165_spill] sm:$0xff] }
 0x72c   : > { %v13617_v15 = vld [vmem:[#allocation153_spill] sm:$0xff] }
 0x731   : > { %5105 = vmatmul.mubr.bf16.gmra.mrb[24].mxu1 %v4449_v1  ;;  %v13561_v1 = vpack.c.bf16 %v13559_v37, %v13560_v63  ;;  %v13619_v37 = vld [vmem:[#allocation171_spill] sm:$0xff] }
 0x732   : > { %5397 = vmatpush1.bf16.xpose.msra.mxu1 %v13516_v14  ;;  %5114 = vmatprep.mubr.bf16.mxu1 %v4482_v50  ;;  %v4465_v50 = vpop.trf.xlu1  ;;  %v13563_v14 = vld [vmem:[#allocation184_spill] sm:$0xff]  ;;  %v13620_v63 = vld [vmem:[#allocation159_spill] sm:$0xff] }
 0x733   : > { %5398 = vmatprep.subr.bf16.mxu1 %v13519_v36  ;;  %v13564_v62 = vpack.c.bf16 %v13562_v23, %v13563_v14  ;;  %v13566_v36 = vld [vmem:[#allocation196_spill] sm:$0xff]  ;;  %v13625_v14 = vld [vmem:[#allocation179_spill] sm:$0xff] }
 0x739   : > { %5115 = vmatmul.mubr.bf16.gmra.mrb[28].mxu1 %v4450_v47  ;;  %v13567_v47 = vpack.c.bf16 %v13565_v7, %v13566_v36  ;;  %v13628_v36 = vld [vmem:[#allocation181_spill] sm:$0xff] }
 0x73a   : > { %5399 = vmatpush1.bf16.xpose.msra.mxu1 %v13522_v44  ;;  %5124 = vmatprep.mubr.bf16.mxu1 %v4491_v0  ;;  %v4466_v0 = vpop.trf.xlu1  ;;  %v13570_v44 = vpack.c.bf16 %v13568_v30, %v13569_v35  ;;  %v13631_v30 = vld [vmem:[#allocation187_spill] sm:$0xff] }
 0x73b   : > { %5400 = vmatprep.subr.bf16.mxu1 %v13525_v49  ;;  %v13573_v49 = vpack.c.bf16 %v13571_v55, %v13572_v2  ;;  %v13632_v35 = vld [vmem:[#allocation175_spill] sm:$0xff]  ;;  %v13634_v55 = vld [vmem:[#allocation189_spill] sm:$0xff] }
 0x73c   : > { %v13635_v2 = vld [vmem:[#allocation177_spill] sm:$0xff] }
 0x741   : > { %5125 = vmatmul.mubr.bf16.gmra.mrb[32].mxu1 %v4459_v42  ;;  %v13574_v42 = vld [vmem:[#allocation97_spill] sm:$0xff] }
 0x742   : > { %5401 = vmatpush1.bf16.xpose.msra.mxu1 %v13528_v31  ;;  %5134 = vmatprep.mubr.bf16.mxu1 %v4492_v22  ;;  %v13575_v22 = vld [vmem:[#allocation99_spill] sm:$0xff] }
 0x743   : > { %5402 = vmatprep.subr.bf16.mxu1 %v13531_v59  ;;  %v13576_v58 = vpack.c.bf16 %v13574_v42, %v13575_v22  ;;  %v13578_v31 = vld [vmem:[#allocation107_spill] sm:$0xff]  ;;  %v13581_v59 = vld [vmem:[#allocation109_spill] sm:$0xff] }
 0x744   : > { %v13579_v11 = vpack.c.bf16 %v13577_v8, %v13578_v31  ;;  %v13637_v42 = vld [vmem:[#allocation195_spill] sm:$0xff] }
 0x745   : > { %v13638_v22 = vld [vmem:[#allocation183_spill] sm:$0xff] }
 0x749   : > { %5135 = vmatmul.mubr.bf16.gmra.mrb[36].mxu1 %v4460_v16  ;;  %v13582_v16 = vpack.c.bf16 %v13580_v12, %v13581_v59 }
 0x74a   : > { %5403 = vmatpush1.bf16.xpose.msra.mxu1 %v13534_v25  ;;  %5144 = vmatprep.mubr.bf16.mxu1 %v4493_v9  ;;  %v13583_v9 = vld [vmem:[#allocation111_spill] sm:$0xff]  ;;  %v13586_v25 = vld [vmem:[#allocation113_spill] sm:$0xff] }
 0x74b   : > { %5404 = vmatprep.subr.bf16.mxu1 %v13537_v19  ;;  %v13585_v32 = vpack.c.bf16 %v13583_v9, %v13584_v43  ;;  %v13588_v46 = vpack.c.bf16 %v13586_v25, %v13587_v48  ;;  %v13589_v19 = vld [vmem:[#allocation131_spill] sm:$0xff]  ;;  %v13647_v25 = vld [vmem:[#allocation185_spill] sm:$0xff] }
 0x751   : > { %5145 = vmatmul.mubr.bf16.gmra.mrb[40].mxu1 %v4461_v51  ;;  %v13590_v51 = vld [vmem:[#allocation119_spill] sm:$0xff] }
 0x752   : > { %5405 = vmatpush1.bf16.xpose.msra.mxu1 %v13540_v40  ;;  %5154 = vmatprep.mubr.bf16.mxu1 %v4494_v34  ;;  %v13591_v34 = vpack.c.bf16 %v13589_v19, %v13590_v51  ;;  %v13594_v40 = vpack.c.bf16 %v13592_v21, %v13593_v5  ;;  %v13650_v19 = vld [vmem:[#allocation191_spill] sm:$0xff] }
 0x753   : > { %5406 = vmatprep.subr.bf16.mxu1 %v13543_v52  ;;  %v13597_v52 = vpack.c.bf16 %v13595_v27, %v13596_v33  ;;  %v13656_v27 = vld [vmem:[#allocation263_spill] sm:$0xff]  ;;  %v13657_v33 = vld [vmem:[#allocation193_spill] sm:$0xff] }
 0x759   : > { %5155 = vmatmul.mubr.bf16.gmra.mrb[44].mxu1 %v4462_v17  ;;  %v13598_v17 = vld [vmem:[#allocation141_spill] sm:$0xff] }
 0x75a   : > { %5407 = vmatpush1.bf16.xpose.msra.mxu1 %v13546_v18  ;;  %5164 = vmatprep.mubr.bf16.mxu1 %v4495_v13  ;;  %v13599_v13 = vld [vmem:[#allocation129_spill] sm:$0xff]  ;;  %v13602_v18 = vld [vmem:[#allocation135_spill] sm:$0xff] }
 0x75b   : > { %5408 = vmatprep.subr.bf16.mxu1 %v13549_v24  ;;  %v13600_v4 = vpack.c.bf16 %v13598_v17, %v13599_v13  ;;  %v13603_v29 = vpack.c.bf16 %v13601_v10, %v13602_v18  ;;  %v13605_v24 = vld [vmem:[#allocation137_spill] sm:$0xff]  ;;  %v13659_v17 = vld [vmem:[#allocation268_spill] sm:$0xff]  ;;  %v13660_v13 = vld [vmem:[#allocation266_spill] sm:$0xff] }
 0x761   : > { %5165 = vmatmul.mubr.bf16.gmra.mrb[48].mxu1 %v4463_v61  ;;  %v13606_v61 = vpack.c.bf16 %v13604_v53, %v13605_v24  ;;  %v13666_v24 = vld [vmem:[#allocation267_spill] sm:$0xff] }
 0x762   : > { %5409 = vmatpush1.bf16.xpose.msra.mxu1 %v13552_v57  ;;  %5174 = vmatprep.mubr.bf16.mxu1 %v4496_v38  ;;  %v13607_v38 = vld [vmem:[#allocation155_spill] sm:$0xff]  ;;  %v13610_v57 = vld [vmem:[#allocation157_spill] sm:$0xff] }
 0x763   : > { %5410 = vmatprep.subr.bf16.mxu1 %v13555_v41  ;;  %v13609_v45 = vpack.c.bf16 %v13607_v38, %v13608_v60  ;;  %v13612_v26 = vpack.c.bf16 %v13610_v57, %v13611_v39  ;;  %v13613_v41 = vld [vmem:[#allocation163_spill] sm:$0xff]  ;;  %v13669_v60 = vld [vmem:[#allocation272_spill] sm:$0xff] }
 0x769   : > { %5175 = vmatmul.mubr.bf16.gmra.mrb[52].mxu1 %v4464_v20  ;;  %v13614_v20 = vld [vmem:[#allocation151_spill] sm:$0xff] }
 0x76a   : > { %5411 = vmatpush1.bf16.xpose.msra.mxu1 %v13558_v6  ;;  %5184 = vmatprep.mubr.bf16.mxu1 %v4497_v54  ;;  %v13615_v54 = vpack.c.bf16 %v13613_v41, %v13614_v20  ;;  %v13618_v6 = vpack.c.bf16 %v13616_v28, %v13617_v15  ;;  %v13677_v28 = vld [vmem:[#allocation269_spill] sm:$0xff] }
 0x76b   : > { %5412 = vmatprep.subr.bf16.mxu1 %v13561_v1  ;;  %v13621_v1 = vpack.c.bf16 %v13619_v37, %v13620_v63  ;;  %v13680_v37 = vld [vmem:[#allocation274_spill] sm:$0xff] }
 0x771   : > { %5185 = vmatmul.mubr.bf16.gmra.mrb[56].mxu1 %v4465_v50  ;;  %v13622_v50 = vld [vmem:[#allocation173_spill] sm:$0xff] }
 0x772   : > { %5413 = vmatpush1.bf16.xpose.msra.mxu1 %v13564_v62  ;;  %5194 = vmatprep.mubr.bf16.mxu1 %v4498_v56  ;;  %v13623_v56 = vld [vmem:[#allocation161_spill] sm:$0xff]  ;;  %v13626_v62 = vld [vmem:[#allocation167_spill] sm:$0xff] }
 0x773   : > { %5414 = vmatprep.subr.bf16.mxu1 %v13567_v47  ;;  %v13624_v23 = vpack.c.bf16 %v13622_v50, %v13623_v56  ;;  %v13627_v7 = vpack.c.bf16 %v13625_v14, %v13626_v62  ;;  %v13629_v47 = vld [vmem:[#allocation169_spill] sm:$0xff]  ;;  %v13686_v14 = vld [vmem:[#allocation275_spill] sm:$0xff] }
 0x774   : > { %v13687_v62 = vld [vmem:[#allocation273_spill] sm:$0xff] }
 0x779   : > { %5195 = vmatmul.mubr.bf16.gmra.mrb[60].mxu1 %v4466_v0  ;;  %v13630_v0 = vpack.c.bf16 %v13628_v36, %v13629_v47 }
 0x77a   : > { %5415 = vmatpush1.bf16.xpose.msra.mxu1 %v13570_v44  ;;  %5416 = vmatprep.mubr.bf16.mxu1 %v13573_v49  ;;  %v13633_v44 = vpack.c.bf16 %v13631_v30, %v13632_v35  ;;  %v13636_v49 = vpack.c.bf16 %v13634_v55, %v13635_v2 }
 0x781   : > { %5417 = vmatmul.mubr.bf16.vlgmr.msra.gmra.mrb[64].mxu1 %v13576_v58  ;;  %v13639_v58 = vpack.c.bf16 %v13637_v42, %v13638_v22 }
 0x782   : > { %5426 = vmatprep.mubr.bf16.mxu1 %v13579_v11 }
 0x789   : > { %5427 = vmatmul.mubr.bf16.gmra.mrb[68].mxu1 %v13582_v16 }
 0x78a   : > { %5436 = vmatprep.mubr.bf16.mxu1 %v13585_v32  ;;  %v13646_v32 = vld [vmem:[#allocation197_spill] sm:$0xff] }
 0x78b   : > { %v13648_v48 = vpack.c.bf16 %v13646_v32, %v13647_v25 }
 0x791   : > { %5437 = vmatmul.mubr.bf16.gmra.mrb[72].mxu1 %v13588_v46  ;;  %v13649_v46 = vld [vmem:[#allocation264_spill] sm:$0xff] }
 0x792   : > { %5446 = vmatprep.mubr.bf16.mxu1 %v13591_v34  ;;  %v13651_v51 = vpack.c.bf16 %v13649_v46, %v13650_v19 }
 0x799   : > { %5447 = vmatmul.mubr.bf16.gmra.mrb[76].mxu1 %v13594_v40 }
 0x79a   : > { %5456 = vmatprep.mubr.bf16.mxu1 %v13597_v52  ;;  %v13658_v52 = vpack.c.bf16 %v13656_v27, %v13657_v33 }
 0x7a1   : > { %5457 = vmatmul.mubr.bf16.gmra.mrb[80].mxu1 %v13600_v4  ;;  %v13661_v4 = vpack.c.bf16 %v13659_v17, %v13660_v13 }
 0x7a2   : > { %5466 = vmatprep.mubr.bf16.mxu1 %v13603_v29 }
 0x7a9   : > { %5467 = vmatmul.mubr.bf16.gmra.mrb[84].mxu1 %v13606_v61  ;;  %v13667_v61 = vld [vmem:[#allocation265_spill] sm:$0xff] }
 0x7aa   : > { %5476 = vmatprep.mubr.bf16.mxu1 %v13609_v45  ;;  %v13668_v38 = vpack.c.bf16 %v13666_v24, %v13667_v61  ;;  %v13670_v45 = vld [vmem:[#allocation270_spill] sm:$0xff] }
 0x7ab   : > { %v13671_v57 = vpack.c.bf16 %v13669_v60, %v13670_v45 }
 0x7b1   : > { %5477 = vmatmul.mubr.bf16.gmra.mrb[88].mxu1 %v13612_v26 }
 0x7b2   : > { %5486 = vmatprep.mubr.bf16.mxu1 %v13615_v54  ;;  %v13676_v54 = vld [vmem:[#allocation271_spill] sm:$0xff] }
 0x7b3   : > { %v13678_v15 = vpack.c.bf16 %v13676_v54, %v13677_v28 }
 0x7b9   : > { %5487 = vmatmul.mubr.bf16.gmra.mrb[92].mxu1 %v13618_v6  ;;  %v13679_v6 = vld [vmem:[#allocation276_spill] sm:$0xff] }
 0x7ba   : > { %5496 = vmatprep.mubr.bf16.mxu1 %v13621_v1  ;;  %v13681_v63 = vpack.c.bf16 %v13679_v6, %v13680_v37 }
 0x7c1   : > { %5497 = vmatmul.mubr.bf16.gmra.mrb[96].mxu1 %v13624_v23 }
 0x7c2   : > { %5506 = vmatprep.mubr.bf16.mxu1 %v13627_v7  ;;  %v13688_v7 = vpack.c.bf16 %v13686_v14, %v13687_v62 }
 0x7c9   : > { %5507 = vmatmul.mubr.bf16.gmra.mrb[100].mxu1 %v13630_v0 }
 0x7ca   : > { %5516 = vmatprep.mubr.bf16.mxu1 %v13633_v44 }
 0x7d1   : > { %5517 = vmatmul.mubr.bf16.gmra.mrb[104].mxu1 %v13636_v49 }
 0x7d2   : > { %5526 = vmatprep.mubr.bf16.mxu1 %v13639_v58 }
 0x7d4   : > { %v11271_v8 = vpop.f32.mrb[0].mxu1  ;;  %v11273_v31 = vpop.f32.mrb[32].mxu0 }
 0x7d5   : > { %13640 = vst [vmem:[#allocation318_spill] sm:$0xff] %v11271_v8  ;;  %13641 = vst [vmem:[#allocation315_spill] sm:$0xff] %v11273_v31  ;;  %v11275_v11 = vpop.f32.mrb[1].mxu1  ;;  %v11277_v12 = vpop.f32.mrb[33].mxu0 }
 0x7d6   : > { %13642 = vst [vmem:[#allocation289_spill] sm:$0xff] %v11275_v11  ;;  %13643 = vst [vmem:[#allocation287_spill] sm:$0xff] %v11277_v12  ;;  %v11279_v59 = vpop.f32.mrb[2].mxu1  ;;  %v5243_v16 = vpop.f32.mrb[34].mxu0 }
 0x7d7   : > { %13644 = vst [vmem:[#allocation305_spill] sm:$0xff] %v11279_v59  ;;  %v11281_v9 = vpop.f32.mrb[3].mxu1  ;;  %v5244_v43 = vpop.f32.mrb[35].mxu0 }
 0x7d8   : > { %13645 = vst [vmem:[#allocation306_spill] sm:$0xff] %v11281_v9 }
 0x7d9   : > { %5527 = vmatmul.mubr.bf16.gmra.mrb[108].mxu1 %v13648_v48 }
 0x7da   : > { %5536 = vmatprep.mubr.bf16.mxu1 %v13651_v51 }
 0x7dc   : > { %v11289_v34 = vpop.f32.mrb[4].mxu1 }
 0x7dd   : > { %13652 = vst [vmem:[#allocation307_spill] sm:$0xff] %v11289_v34  ;;  %v11291_v21 = vpop.f32.mrb[5].mxu1 }
 0x7de   : > { %13653 = vst [vmem:[#allocation308_spill] sm:$0xff] %v11291_v21  ;;  %v11293_v5 = vpop.f32.mrb[6].mxu1 }
 0x7df   : > { %13654 = vst [vmem:[#allocation293_spill] sm:$0xff] %v11293_v5  ;;  %v11295_v40 = vpop.f32.mrb[7].mxu1 }
 0x7e0   : > { %13655 = vst [vmem:[#allocation291_spill] sm:$0xff] %v11295_v40 }
 0x7e1   : > { %5537 = vmatmul.mubr.bf16.gmra.mrb[112].mxu1 %v13658_v52 }
 0x7e2   : > { %5546 = vmatprep.mubr.bf16.mxu1 %v13661_v4 }
 0x7e4   : > { %v11303_v10 = vpop.f32.mrb[8].mxu1 }
 0x7e5   : > { %13662 = vst [vmem:[#allocation297_spill] sm:$0xff] %v11303_v10  ;;  %v11305_v18 = vpop.f32.mrb[9].mxu1 }
 0x7e6   : > { %13663 = vst [vmem:[#allocation295_spill] sm:$0xff] %v11305_v18  ;;  %v11307_v29 = vpop.f32.mrb[10].mxu1 }
 0x7e7   : > { %13664 = vst [vmem:[#allocation311_spill] sm:$0xff] %v11307_v29  ;;  %v11309_v53 = vpop.f32.mrb[11].mxu1 }
 0x7e8   : > { %13665 = vst [vmem:[#allocation312_spill] sm:$0xff] %v11309_v53 }
 0x7e9   : > { %5547 = vmatmul.mubr.bf16.gmra.mrb[116].mxu1 %v13668_v38 }
 0x7ea   : > { %5556 = vmatprep.mubr.bf16.mxu1 %v13671_v57 }
 0x7ec   : > { %v11317_v39 = vpop.f32.mrb[12].mxu1 }
 0x7ed   : > { %13672 = vst [vmem:[#allocation300_spill] sm:$0xff] %v11317_v39  ;;  %v11319_v26 = vpop.f32.mrb[13].mxu1 }
 0x7ee   : > { %13673 = vst [vmem:[#allocation299_spill] sm:$0xff] %v11319_v26  ;;  %v11321_v41 = vpop.f32.mrb[14].mxu1 }
 0x7ef   : > { %13674 = vst [vmem:[#allocation316_spill] sm:$0xff] %v11321_v41  ;;  %v11323_v20 = vpop.f32.mrb[15].mxu1 }
 0x7f0   : > { %13675 = vst [vmem:[#allocation317_spill] sm:$0xff] %v11323_v20 }
 0x7f1   : > { %5557 = vmatmul.mubr.bf16.gmra.mrb[120].mxu1 %v13678_v15 }
 0x7f2   : > { %5566 = vmatprep.mubr.bf16.mxu1 %v13681_v63 }
 0x7f4   : > { %v11331_v1 = vpop.f32.mrb[16].mxu1 }
 0x7f5   : > { %13682 = vst [vmem:[#allocation278_spill] sm:$0xff] %v11331_v1  ;;  %v11333_v50 = vpop.f32.mrb[17].mxu1 }
 0x7f6   : > { %13683 = vst [vmem:[#allocation277_spill] sm:$0xff] %v11333_v50  ;;  %v11335_v56 = vpop.f32.mrb[18].mxu1 }
 0x7f7   : > { %13684 = vst [vmem:[#allocation302_spill] sm:$0xff] %v11335_v56  ;;  %v11337_v23 = vpop.f32.mrb[19].mxu1 }
 0x7f8   : > { %13685 = vst [vmem:[#allocation301_spill] sm:$0xff] %v11337_v23 }
 0x7f9   : > { %5567 = vmatmul.mubr.bf16.gmra.mrb[124].mxu1 %v13688_v7 }
 0x7fa   : > { %6122 = vmatprep.mubr.bf16.mxu1 %v12849_v3 }
 0x7fc   : > { %v11343_v36 = vpop.f32.mrb[20].mxu1 }
 0x7fd   : > { %13689 = vst [vmem:[#allocation280_spill] sm:$0xff] %v11343_v36  ;;  %v11345_v47 = vpop.f32.mrb[21].mxu1 }
 0x7fe   : > { %13690 = vst [vmem:[#allocation279_spill] sm:$0xff] %v11345_v47  ;;  %v11347_v0 = vpop.f32.mrb[22].mxu1 }
 0x7ff   : > { %13691 = vst [vmem:[#allocation321_spill] sm:$0xff] %v11347_v0  ;;  %v11349_v30 = vpop.f32.mrb[23].mxu1 }
 0x800   : > { %13692 = vst [vmem:[#allocation304_spill] sm:$0xff] %v11349_v30 }
 0x804   : > { %v11351_v35 = vpop.f32.mrb[24].mxu1 }
 0x805   : > { %13693 = vst [vmem:[#allocation303_spill] sm:$0xff] %v11351_v35  ;;  %v11353_v44 = vpop.f32.mrb[25].mxu1 }
 0x806   : > { %13694 = vst [vmem:[#allocation324_spill] sm:$0xff] %v11353_v44  ;;  %v11355_v55 = vpop.f32.mrb[26].mxu1 }
 0x807   : > { %13695 = vst [vmem:[#allocation282_spill] sm:$0xff] %v11355_v55  ;;  %v11357_v2 = vpop.f32.mrb[27].mxu1 }
 0x808   : > { %13696 = vst [vmem:[#allocation281_spill] sm:$0xff] %v11357_v2 }
 0x80c   : > { %v11359_v49 = vpop.f32.mrb[28].mxu1 }
 0x80d   : > { %13697 = vst [vmem:[#allocation310_spill] sm:$0xff] %v11359_v49  ;;  %v11361_v42 = vpop.f32.mrb[29].mxu1 }
 0x80e   : > { %13698 = vst [vmem:[#allocation309_spill] sm:$0xff] %v11361_v42  ;;  %v11363_v22 = vpop.f32.mrb[30].mxu1 }
 0x80f   : > { %13699 = vst [vmem:[#allocation284_spill] sm:$0xff] %v11363_v22  ;;  %v11365_v58 = vpop.f32.mrb[31].mxu1 }
 0x810   : > { %13700 = vst [vmem:[#allocation283_spill] sm:$0xff] %v11365_v58 }
 0x814   : > { %v11367_v16 = vpop.f32.mrb[32].mxu1 }
 0x815   : > { %13701 = vst [vmem:[#allocation325_spill] sm:$0xff] %v11367_v16  ;;  %v11369_v43 = vpop.f32.mrb[33].mxu1 }
 0x816   : > { %13702 = vst [vmem:[#allocation326_spill] sm:$0xff] %v11369_v43  ;;  %v11371_v32 = vpop.f32.mrb[34].mxu1 }
 0x817   : > { %13703 = vst [vmem:[#allocation314_spill] sm:$0xff] %v11371_v32  ;;  %v11373_v25 = vpop.f32.mrb[35].mxu1 }
 0x818   : > { %13704 = vst [vmem:[#allocation313_spill] sm:$0xff] %v11373_v25 }
 0x81c   : > { %v11375_v48 = vpop.f32.mrb[36].mxu1 }
 0x81d   : > { %13705 = vst [vmem:[#allocation327_spill] sm:$0xff] %v11375_v48  ;;  %v11377_v46 = vpop.f32.mrb[37].mxu1 }
 0x81e   : > { %13706 = vst [vmem:[#allocation328_spill] sm:$0xff] %v11377_v46  ;;  %v11379_v19 = vpop.f32.mrb[38].mxu1 }
 0x81f   : > { %13707 = vst [vmem:[#allocation286_spill] sm:$0xff] %v11379_v19  ;;  %v11381_v51 = vpop.f32.mrb[39].mxu1 }
 0x820   : > { %13708 = vst [vmem:[#allocation285_spill] sm:$0xff] %v11381_v51 }
 0x824   : > { %v11383_v27 = vpop.f32.mrb[40].mxu1 }
 0x825   : > { %13709 = vst [vmem:[#allocation320_spill] sm:$0xff] %v11383_v27  ;;  %v11385_v33 = vpop.f32.mrb[41].mxu1 }
 0x826   : > { %13710 = vst [vmem:[#allocation319_spill] sm:$0xff] %v11385_v33  ;;  %v11387_v52 = vpop.f32.mrb[42].mxu1 }
 0x827   : > { %13711 = vst [vmem:[#allocation290_spill] sm:$0xff] %v11387_v52  ;;  %v11389_v17 = vpop.f32.mrb[43].mxu1 }
 0x828   : > { %13712 = vst [vmem:[#allocation288_spill] sm:$0xff] %v11389_v17 }
 0x82c   : > { %v11391_v13 = vpop.f32.mrb[44].mxu1 }
 0x82d   : > { %13713 = vst [vmem:[#allocation329_spill] sm:$0xff] %v11391_v13  ;;  %v11393_v4 = vpop.f32.mrb[45].mxu1 }
 0x82e   : > { %13714 = vst [vmem:[#allocation330_spill] sm:$0xff] %v11393_v4  ;;  %v11395_v24 = vpop.f32.mrb[46].mxu1 }
 0x82f   : > { %13715 = vst [vmem:[#allocation323_spill] sm:$0xff] %v11395_v24  ;;  %v11397_v61 = vpop.f32.mrb[47].mxu1 }
 0x830   : > { %13716 = vst [vmem:[#allocation322_spill] sm:$0xff] %v11397_v61 }
 0x834   : > { %v11399_v38 = vpop.f32.mrb[48].mxu1 }
 0x835   : > { %13717 = vst [vmem:[#allocation331_spill] sm:$0xff] %v11399_v38  ;;  %v11401_v60 = vpop.f32.mrb[49].mxu1 }
 0x836   : > { %13718 = vst [vmem:[#allocation332_spill] sm:$0xff] %v11401_v60  ;;  %v11403_v45 = vpop.f32.mrb[50].mxu1 }
 0x837   : > { %13719 = vst [vmem:[#allocation294_spill] sm:$0xff] %v11403_v45  ;;  %v11405_v57 = vpop.f32.mrb[51].mxu1 }
 0x838   : > { %13720 = vst [vmem:[#allocation292_spill] sm:$0xff] %v11405_v57 }
 0x83c   : > { %v11407_v54 = vpop.f32.mrb[52].mxu1 }
 0x83d   : > { %13721 = vst [vmem:[#allocation334_spill] sm:$0xff] %v11407_v54  ;;  %v11409_v28 = vpop.f32.mrb[53].mxu1 }
 0x83e   : > { %13722 = vst [vmem:[#allocation333_spill] sm:$0xff] %v11409_v28  ;;  %v11411_v15 = vpop.f32.mrb[54].mxu1 }
 0x83f   : > { %13723 = vst [vmem:[#allocation298_spill] sm:$0xff] %v11411_v15  ;;  %v11413_v6 = vpop.f32.mrb[55].mxu1 }
 0x840   : > { %13724 = vst [vmem:[#allocation296_spill] sm:$0xff] %v11413_v6 }
 0x844   : > { %v11415_v37 = vpop.f32.mrb[56].mxu1 }
 0x845   : > { %13725 = vst [vmem:[#allocation335_spill] sm:$0xff] %v11415_v37  ;;  %v11417_v63 = vpop.f32.mrb[57].mxu1 }
 0x846   : > { %13726 = vst [vmem:[#allocation336_spill] sm:$0xff] %v11417_v63  ;;  %v11419_v14 = vpop.f32.mrb[58].mxu1 }
 0x847   : > { %13727 = vst [vmem:[#allocation337_spill] sm:$0xff] %v11419_v14  ;;  %v11421_v62 = vpop.f32.mrb[59].mxu1 }
 0x848   : > { %13728 = vst [vmem:[#allocation338_spill] sm:$0xff] %v11421_v62 }
 0x84c   : > { %v11423_v7 = vpop.f32.mrb[60].mxu1 }
 0x84d   : > { %13729 = vst [vmem:[#allocation339_spill] sm:$0xff] %v11423_v7  ;;  %v11425_v3 = vpop.f32.mrb[61].mxu1 }
 0x84e   : > { %13730 = vst [vmem:[#allocation340_spill] sm:$0xff] %v11425_v3  ;;  %v11427_v58 = vpop.f32.mrb[62].mxu1 }
 0x84f   : > { %13731 = vst [vmem:[#allocation341_spill] sm:$0xff] %v11427_v58  ;;  %v11429_v42 = vpop.f32.mrb[63].mxu1 }
 0x850   : > { %13732 = vst [vmem:[#allocation342_spill] sm:$0xff] %v11429_v42 }
 0x854   : > { %v11431_v2 = vpop.f32.mrb[64].mxu1 }
 0x855   : > { %v11433_v28 = vpop.f32.mrb[65].mxu1 }
 0x856   : > { %v11435_v6 = vpop.f32.mrb[66].mxu1  ;;  %v5577_v63 = vmax.f32 %v11431_v2, %v11433_v28 }
 0x857   : > { %v11439_v44 = vpop.f32.mrb[67].mxu1 }
 0x858   : > { %5578 = vmax.xlane.f32.xlu0 %v5577_v63  ;;  %v5580_v62 = vmax.f32 %v11435_v6, %v11439_v44 }
 0x85a   : > { %5581 = vmax.xlane.f32.xlu1 %v5580_v62 }
 0x85c   : > { %v11443_v3 = vpop.f32.mrb[68].mxu1 }
 0x85d   : > { %v11445_v57 = vpop.f32.mrb[69].mxu1 }
 0x85e   : > { %v11447_v42 = vpop.f32.mrb[70].mxu1  ;;  %v5583_v30 = vmax.f32 %v11443_v3, %v11445_v57 }
 0x85f   : > { %v11451_v60 = vpop.f32.mrb[71].mxu1 }
 0x860   : > { %5584 = vmax.xlane.f32.xlu0 %v5583_v30  ;;  %v5586_v47 = vmax.f32 %v11447_v42, %v11451_v60 }
 0x862   : > { %5587 = vmax.xlane.f32.xlu1 %v5586_v47 }
 0x864   : > { %v11455_v63 = vpop.f32.mrb[72].mxu1 }
 0x865   : > { %v11457_v61 = vpop.f32.mrb[73].mxu1 }
 0x866   : > { %v11459_v62 = vpop.f32.mrb[74].mxu1  ;;  %v5589_v23 = vmax.f32 %v11455_v63, %v11457_v61 }
 0x867   : > { %v11463_v4 = vpop.f32.mrb[75].mxu1 }
 0x868   : > { %5590 = vmax.xlane.f32.xlu0 %v5589_v23  ;;  %v5592_v50 = vmax.f32 %v11459_v62, %v11463_v4 }
 0x86a   : > { %5593 = vmax.xlane.f32.xlu1 %v5592_v50 }
 0x86c   : > { %v11467_v30 = vpop.f32.mrb[76].mxu1 }
 0x86d   : > { %v11469_v17 = vpop.f32.mrb[77].mxu1 }
 0x86e   : > { %v11471_v47 = vpop.f32.mrb[78].mxu1  ;;  %v5595_v20 = vmax.f32 %v11467_v30, %v11469_v17 }
 0x86f   : > { %v11475_v33 = vpop.f32.mrb[79].mxu1 }
 0x870   : > { %5596 = vmax.xlane.f32.xlu0 %v5595_v20  ;;  %v5598_v26 = vmax.f32 %v11471_v47, %v11475_v33 }
 0x872   : > { %5599 = vmax.xlane.f32.xlu1 %v5598_v26 }
 0x874   : > { %v11479_v23 = vpop.f32.mrb[80].mxu1 }
 0x875   : > { %v11481_v51 = vpop.f32.mrb[81].mxu1 }
 0x876   : > { %v11483_v50 = vpop.f32.mrb[82].mxu1  ;;  %v5601_v53 = vmax.f32 %v11479_v23, %v11481_v51 }
 0x877   : > { %v11487_v46 = vpop.f32.mrb[83].mxu1 }
 0x878   : > { %5602 = vmax.xlane.f32.xlu0 %v5601_v53  ;;  %v5604_v18 = vmax.f32 %v11483_v50, %v11487_v46 }
 0x87a   : > { %5605 = vmax.xlane.f32.xlu1 %v5604_v18 }
 0x87c   : > { %v11491_v20 = vpop.f32.mrb[84].mxu1 }
 0x87d   : > { %v11493_v25 = vpop.f32.mrb[85].mxu1 }
 0x87e   : > { %v11495_v26 = vpop.f32.mrb[86].mxu1  ;;  %v5607_v40 = vmax.f32 %v11491_v20, %v11493_v25 }
 0x87f   : > { %v11499_v43 = vpop.f32.mrb[87].mxu1 }
 0x880   : > { %5608 = vmax.xlane.f32.xlu0 %v5607_v40  ;;  %v5610_v21 = vmax.f32 %v11495_v26, %v11499_v43 }
 0x882   : > { %5611 = vmax.xlane.f32.xlu1 %v5610_v21 }
 0x884   : > { %v11503_v53 = vpop.f32.mrb[88].mxu1 }
 0x885   : > { %v11505_v58 = vpop.f32.mrb[89].mxu1 }
 0x886   : > { %v11507_v18 = vpop.f32.mrb[90].mxu1  ;;  %v5613_v9 = vmax.f32 %v11503_v53, %v11505_v58 }
 0x887   : > { %v11511_v7 = vpop.f32.mrb[91].mxu1 }
 0x888   : > { %5614 = vmax.xlane.f32.xlu0 %v5613_v9  ;;  %v5616_v11 = vmax.f32 %v11507_v18, %v11511_v7 }
 0x88a   : > { %5617 = vmax.xlane.f32.xlu1 %v5616_v11 }
 0x88c   : > { %v11515_v40 = vpop.f32.mrb[92].mxu1 }
 0x88d   : > { %v11517_v14 = vpop.f32.mrb[93].mxu1 }
 0x88e   : > { %v11519_v21 = vpop.f32.mrb[94].mxu1  ;;  %v5619_v22 = vmax.f32 %v11515_v40, %v11517_v14 }
 0x88f   : > { %v11523_v37 = vpop.f32.mrb[95].mxu1 }
 0x890   : > { %5620 = vmax.xlane.f32.xlu0 %v5619_v22  ;;  %v5622_v49 = vmax.f32 %v11519_v21, %v11523_v37 }
 0x892   : > { %5623 = vmax.xlane.f32.xlu1 %v5622_v49 }
 0x894   : > { %v11527_v9 = vpop.f32.mrb[96].mxu1 }
 0x895   : > { %v11529_v15 = vpop.f32.mrb[97].mxu1 }
 0x896   : > { %v11531_v11 = vpop.f32.mrb[98].mxu1  ;;  %v5625_v55 = vmax.f32 %v11527_v9, %v11529_v15 }
 0x897   : > { %v11535_v54 = vpop.f32.mrb[99].mxu1 }
 0x898   : > { %5626 = vmax.xlane.f32.xlu0 %v5625_v55  ;;  %v5628_v35 = vmax.f32 %v11531_v11, %v11535_v54 }
 0x89a   : > { %5629 = vmax.xlane.f32.xlu1 %v5628_v35 }
 0x89c   : > { %v11539_v22 = vpop.f32.mrb[100].mxu1 }
 0x89d   : > { %v11541_v45 = vpop.f32.mrb[101].mxu1 }
 0x89e   : > { %v11543_v49 = vpop.f32.mrb[102].mxu1  ;;  %v5631_v12 = vmax.f32 %v11539_v22, %v11541_v45 }
 0x89f   : > { %v11547_v0 = vpop.f32.mrb[103].mxu1 }
 0x8a0   : > { %5632 = vmax.xlane.f32.xlu0 %v5631_v12  ;;  %v5634_v38 = vmax.f32 %v11543_v49, %v11547_v0 }
 0x8a2   : > { %5635 = vmax.xlane.f32.xlu1 %v5634_v38 }
 0x8a4   : > { %v11551_v55 = vpop.f32.mrb[104].mxu1 }
 0x8a5   : > { %v11553_v36 = vpop.f32.mrb[105].mxu1 }
 0x8a6   : > { %v11555_v35 = vpop.f32.mrb[106].mxu1  ;;  %v5637_v24 = vmax.f32 %v11551_v55, %v11553_v36 }
 0x8a7   : > { %v11559_v56 = vpop.f32.mrb[107].mxu1 }
 0x8a8   : > { %5638 = vmax.xlane.f32.xlu0 %v5637_v24  ;;  %v5640_v13 = vmax.f32 %v11555_v35, %v11559_v56 }
 0x8aa   : > { %5641 = vmax.xlane.f32.xlu1 %v5640_v13 }
 0x8ac   : > { %v11563_v12 = vpop.f32.mrb[108].mxu1 }
 0x8ad   : > { %v11565_v1 = vpop.f32.mrb[109].mxu1 }
 0x8ae   : > { %v11567_v38 = vpop.f32.mrb[110].mxu1  ;;  %v5643_v52 = vmax.f32 %v11563_v12, %v11565_v1 }
 0x8af   : > { %v11571_v41 = vpop.f32.mrb[111].mxu1 }
 0x8b0   : > { %5644 = vmax.xlane.f32.xlu0 %v5643_v52  ;;  %v5646_v27 = vmax.f32 %v11567_v38, %v11571_v41 }
 0x8b2   : > { %5647 = vmax.xlane.f32.xlu1 %v5646_v27 }
 0x8b4   : > { %v11575_v24 = vpop.f32.mrb[112].mxu1 }
 0x8b5   : > { %v11577_v39 = vpop.f32.mrb[113].mxu1 }
 0x8b6   : > { %v11579_v13 = vpop.f32.mrb[114].mxu1  ;;  %v5649_v19 = vmax.f32 %v11575_v24, %v11577_v39 }
 0x8b7   : > { %13733 = vst [vmem:[#allocation343_spill] sm:$0xff] %v11579_v13  ;;  %v11583_v29 = vpop.f32.mrb[115].mxu1 }
 0x8b8   : > { %13734 = vst [vmem:[#allocation344_spill] sm:$0xff] %v11583_v29  ;;  %5650 = vmax.xlane.f32.xlu0 %v5649_v19  ;;  %v5652_v48 = vmax.f32 %v11579_v13, %v11583_v29 }
 0x8ba   : > { %5653 = vmax.xlane.f32.xlu1 %v5652_v48 }
 0x8bc   : > { %v11587_v52 = vpop.f32.mrb[116].mxu1 }
 0x8bd   : > { %13735 = vst [vmem:[#allocation345_spill] sm:$0xff] %v11587_v52  ;;  %v11589_v10 = vpop.f32.mrb[117].mxu1 }
 0x8be   : > { %13736 = vst [vmem:[#allocation346_spill] sm:$0xff] %v11589_v10  ;;  %v11591_v27 = vpop.f32.mrb[118].mxu1  ;;  %v5655_v32 = vmax.f32 %v11587_v52, %v11589_v10 }
 0x8bf   : > { %13737 = vst [vmem:[#allocation347_spill] sm:$0xff] %v11591_v27  ;;  %v11595_v5 = vpop.f32.mrb[119].mxu1 }
 0x8c0   : > { %13738 = vst [vmem:[#allocation348_spill] sm:$0xff] %v11595_v5  ;;  %5656 = vmax.xlane.f32.xlu0 %v5655_v32  ;;  %v5658_v16 = vmax.f32 %v11591_v27, %v11595_v5 }
 0x8c2   : > { %5659 = vmax.xlane.f32.xlu1 %v5658_v16 }
 0x8c4   : > { %v11599_v19 = vpop.f32.mrb[120].mxu1 }
 0x8c5   : > { %13739 = vst [vmem:[#allocation349_spill] sm:$0xff] %v11599_v19  ;;  %v11601_v34 = vpop.f32.mrb[121].mxu1 }
 0x8c6   : > { %13740 = vst [vmem:[#allocation350_spill] sm:$0xff] %v11601_v34  ;;  %v11603_v48 = vpop.f32.mrb[122].mxu1  ;;  %v5661_v59 = vmax.f32 %v11599_v19, %v11601_v34 }
 0x8c7   : > { %13741 = vst [vmem:[#allocation351_spill] sm:$0xff] %v11603_v48  ;;  %v11607_v8 = vpop.f32.mrb[123].mxu1 }
 0x8c8   : > { %13742 = vst [vmem:[#allocation352_spill] sm:$0xff] %v11607_v8  ;;  %5662 = vmax.xlane.f32.xlu0 %v5661_v59  ;;  %v5664_v31 = vmax.f32 %v11603_v48, %v11607_v8 }
 0x8ca   : > { %5665 = vmax.xlane.f32.xlu1 %v5664_v31 }
 0x8cc   : > { %v11611_v32 = vpop.f32.mrb[124].mxu1 }
 0x8cd   : > { %13743 = vst [vmem:[#allocation353_spill] sm:$0xff] %v11611_v32  ;;  %v11613_v5 = vpop.f32.mrb[125].mxu1 }
 0x8ce   : > { %13744 = vst [vmem:[#allocation88_spill] sm:$0xff] %v11613_v5  ;;  %v11615_v16 = vpop.f32.mrb[126].mxu1  ;;  %v5667_v27 = vmax.f32 %v11611_v32, %v11613_v5 }
 0x8cf   : > { %v11619_v10 = vpop.f32.mrb[127].mxu1 }
 0x8d0   : > { %13745 = vst [vmem:[#allocation87_spill] sm:$0xff] %v11619_v10  ;;  %5668 = vmax.xlane.f32.xlu0 %v5667_v27  ;;  %v5670_v34 = vmax.f32 %v11615_v16, %v11619_v10 }
 0x8d2   : > { %5671 = vmax.xlane.f32.xlu1 %v5670_v34 }
 0x8e5   : > { %v5579_v59 = vpop.xlane.xlu0 %5578 }
 0x8e6   : > { %v5673_v8 = vsub.f32 %v11431_v2, %v5579_v59  ;;  %v5674_v31 = vsub.f32 %v11433_v28, %v5579_v59 }
 0x8e7   : > { %v5582_v48 = vpop.xlane.xlu1 %5581 }
 0x8e8   : > { %v5737_v19 = vmul.f32 1.442695, %v5673_v8  ;;  %v5675_v52 = vsub.f32 %v11435_v6, %v5582_v48  ;;  %v5676_v29 = vsub.f32 %v11439_v44, %v5582_v48  ;;  %v5739_v13 = vmul.f32 1.442695, %v5674_v31 }
 0x8ea   : > { %v5741_v5 = vmul.f32 1.442695, %v5675_v52  ;;  %v5743_v32 = vmul.f32 1.442695, %v5676_v29  ;;  %7466 = vpow2.f32 %v5737_v19 }
 0x8ec   : > { %7468 = vpow2.f32 %v5741_v5 }
 0x8ed   : > { %7470 = vpow2.f32 %v5743_v32  ;;  %v5585_v27 = vpop.xlane.xlu0 %5584 }
 0x8ee   : > { %7472 = vpow2.f32 %v5739_v13  ;;  %v5677_v34 = vsub.f32 %v11443_v3, %v5585_v27  ;;  %v5678_v2 = vsub.f32 %v11445_v57, %v5585_v27 }
 0x8ef   : > { %v5588_v10 = vpop.xlane.xlu1 %5587 }
 0x8f0   : > { %v5745_v28 = vmul.f32 1.442695, %v5677_v34  ;;  %v5679_v8 = vsub.f32 %v11447_v42, %v5588_v10  ;;  %v5680_v6 = vsub.f32 %v11451_v60, %v5588_v10  ;;  %v5747_v59 = vmul.f32 1.442695, %v5678_v2 }
 0x8f2   : > { %v5749_v44 = vmul.f32 1.442695, %v5679_v8  ;;  %v5751_v48 = vmul.f32 1.442695, %v5680_v6  ;;  %7474 = vpow2.f32 %v5745_v28  ;;  %v13746_v8 = vld [vmem:[#allocation232_spill] sm:$0xff]  ;;  %v13747_v6 = vld [vmem:[#allocation231_spill] sm:$0xff] }
 0x8f4   : > { %7476 = vpow2.f32 %v5749_v44  ;;  %v7467_v29 = vpop.eup %7466 }
 0x8f5   : > { %7478 = vpow2.f32 %v5751_v48  ;;  %v5591_v5 = vpop.xlane.xlu0 %5590 }
 0x8f6   : > { %v7469_v52 = vpop.eup %7468  ;;  %7480 = vpow2.f32 %v5747_v59  ;;  %v5681_v3 = vsub.f32 %v11455_v63, %v5591_v5  ;;  %v5682_v57 = vsub.f32 %v11457_v61, %v5591_v5  ;;  %v13748_v59 = vpack.c.bf16 %v13746_v8, %v13747_v6  ;;  %v13749_v5 = vld [vmem:[#allocation200_spill] sm:$0xff]  ;;  %v13759_v8 = vld [vmem:[#allocation239_spill] sm:$0xff] }
 0x8f7   : > { %v7471_v13 = vpop.eup %7470  ;;  %v5594_v19 = vpop.xlane.xlu1 %5593  ;;  %v5865_v32 = vpack.c.bf16 %v7469_v52, %v7467_v29  ;;  %v13750_v52 = vld [vmem:[#allocation199_spill] sm:$0xff] }
 0x8f8   : > { %v7473_v42 = vpop.eup %7472  ;;  %v5753_v31 = vmul.f32 1.442695, %v5681_v3  ;;  %v5683_v10 = vsub.f32 %v11459_v62, %v5594_v19  ;;  %v5684_v60 = vsub.f32 %v11463_v4, %v5594_v19  ;;  %v5755_v34 = vmul.f32 1.442695, %v5682_v57 }
 0x8f9   : > { %v5866_v27 = vpack.c.bf16 %v7471_v13, %v7473_v42  ;;  %v13751_v3 = vpack.c.bf16 %v13749_v5, %v13750_v52 }
 0x8fa   : > { %v5757_v2 = vmul.f32 1.442695, %v5683_v10  ;;  %v5759_v28 = vmul.f32 1.442695, %v5684_v60  ;;  %7482 = vpow2.f32 %v5753_v31  ;;  %v13752_v10 = vld [vmem:[#allocation236_spill] sm:$0xff]  ;;  %v13753_v60 = vld [vmem:[#allocation235_spill] sm:$0xff] }
 0x8fb   : > { %5897 = vmatprep.subr.bf16.mxu0 %v5866_v27  ;;  %6090 = vmatprep.subr.bf16.mxu1 %v5866_v27  ;;  %v13754_v27 = vpack.c.bf16 %v13752_v10, %v13753_v60  ;;  %v13765_v10 = vld [vmem:[#allocation243_spill] sm:$0xff] }
 0x8fc   : > { %7484 = vpow2.f32 %v5757_v2  ;;  %5898 = vmatpush1.bf16.xpose.msra.mxu0 %v5865_v32  ;;  %6091 = vmatpush1.bf16.xpose.msra.mxu1 %v5865_v32  ;;  %v7475_v61 = vpop.eup %7474 }
 0x8fd   : > { %7486 = vpow2.f32 %v5759_v28  ;;  %v5597_v63 = vpop.xlane.xlu0 %5596  ;;  %3116 = vxpose.xlu0.c.b16.start [1/8] %v13748_v59, 128  ;;  %v13755_v28 = vld [vmem:[#allocation204_spill] sm:$0xff] }
 0x8fe   : > { %v7477_v62 = vpop.eup %7476  ;;  %7488 = vpow2.f32 %v5755_v34  ;;  %v5685_v4 = vsub.f32 %v11467_v30, %v5597_v63  ;;  %v5686_v44 = vsub.f32 %v11469_v17, %v5597_v63  ;;  %v13758_v63 = vld [vmem:[#allocation240_spill] sm:$0xff] }
 0x8ff   : > { %v7479_v48 = vpop.eup %7478  ;;  %v5600_v29 = vpop.xlane.xlu1 %5599  ;;  %3084 = vxpose.xlu1.c.b16.start [1/8] %v13751_v3, 128  ;;  %v5867_v57 = vpack.c.bf16 %v7477_v62, %v7475_v61  ;;  %v13760_v6 = vpack.c.bf16 %v13758_v63, %v13759_v8 }
 0x900   : > { %v7481_v13 = vpop.eup %7480  ;;  %v5761_v19 = vmul.f32 1.442695, %v5685_v4  ;;  %v5687_v32 = vsub.f32 %v11471_v47, %v5600_v29  ;;  %v5688_v42 = vsub.f32 %v11475_v33, %v5600_v29  ;;  %v5763_v30 = vmul.f32 1.442695, %v5686_v44  ;;  %v13756_v47 = vld [vmem:[#allocation203_spill] sm:$0xff] }
 0x901   : > { %v5868_v31 = vpack.c.bf16 %v7479_v48, %v7481_v13  ;;  %3117 = vxpose.xlu0.c.b16.cont [2/8] %v13754_v27, 128  ;;  %v13757_v61 = vpack.c.bf16 %v13755_v28, %v13756_v47  ;;  %v13761_v13 = vld [vmem:[#allocation208_spill] sm:$0xff]  ;;  %v13771_v28 = vld [vmem:[#allocation247_spill] sm:$0xff] }
 0x902   : > { %v5765_v17 = vmul.f32 1.442695, %v5687_v32  ;;  %v5767_v34 = vmul.f32 1.442695, %v5688_v42  ;;  %7490 = vpow2.f32 %v5761_v19  ;;  %v13762_v19 = vld [vmem:[#allocation207_spill] sm:$0xff] }
 0x903   : > { %5899 = vmatprep.subr.bf16.mxu0 %v5868_v31  ;;  %6092 = vmatprep.subr.bf16.mxu1 %v5868_v31  ;;  %v13763_v32 = vpack.c.bf16 %v13761_v13, %v13762_v19  ;;  %v13764_v31 = vld [vmem:[#allocation244_spill] sm:$0xff]  ;;  %v13777_v13 = vld [vmem:[#allocation251_spill] sm:$0xff] }
 0x904   : > { %7492 = vpow2.f32 %v5765_v17  ;;  %5900 = vmatpush1.bf16.xpose.msra.mxu0 %v5867_v57  ;;  %6093 = vmatpush1.bf16.xpose.msra.mxu1 %v5867_v57  ;;  %v7483_v2 = vpop.eup %7482  ;;  %v13766_v60 = vpack.c.bf16 %v13764_v31, %v13765_v10 }
 0x905   : > { %7494 = vpow2.f32 %v5767_v34  ;;  %3085 = vxpose.xlu1.c.b16.cont [2/8] %v13757_v61, 128  ;;  %v5603_v33 = vpop.xlane.xlu0 %5602  ;;  %3118 = vxpose.xlu0.c.b16.cont [3/8] %v13760_v6, 128 }
 0x906   : > { %v7485_v59 = vpop.eup %7484  ;;  %7496 = vpow2.f32 %v5763_v30  ;;  %v5689_v62 = vsub.f32 %v11479_v23, %v5603_v33  ;;  %v5690_v4 = vsub.f32 %v11481_v51, %v5603_v33  ;;  %v13768_v30 = vld [vmem:[#allocation211_spill] sm:$0xff] }
 0x907   : > { %v7487_v44 = vpop.eup %7486  ;;  %v5606_v48 = vpop.xlane.xlu1 %5605  ;;  %v5869_v29 = vpack.c.bf16 %v7485_v59, %v7483_v2  ;;  %v13770_v2 = vld [vmem:[#allocation248_spill] sm:$0xff] }
 0x908   : > { %v7489_v5 = vpop.eup %7488  ;;  %v5769_v52 = vmul.f32 1.442695, %v5689_v62  ;;  %v5691_v3 = vsub.f32 %v11483_v50, %v5606_v48  ;;  %v5692_v57 = vsub.f32 %v11487_v46, %v5606_v48  ;;  %v5771_v23 = vmul.f32 1.442695, %v5690_v4  ;;  %v13767_v46 = vld [vmem:[#allocation212_spill] sm:$0xff] }
 0x909   : > { %3086 = vxpose.xlu1.c.b16.cont [3/8] %v13763_v32, 128  ;;  %v5870_v42 = vpack.c.bf16 %v7487_v44, %v7489_v5  ;;  %3119 = vxpose.xlu0.c.b16.cont [4/8] %v13766_v60, 128  ;;  %v13769_v17 = vpack.c.bf16 %v13767_v46, %v13768_v30  ;;  %v13772_v47 = vpack.c.bf16 %v13770_v2, %v13771_v28  ;;  %v13774_v5 = vld [vmem:[#allocation215_spill] sm:$0xff]  ;;  %v13782_v60 = vld [vmem:[#allocation256_spill] sm:$0xff] }
 0x90a   : > { %v5773_v51 = vmul.f32 1.442695, %v5691_v3  ;;  %v5775_v27 = vmul.f32 1.442695, %v5692_v57  ;;  %7498 = vpow2.f32 %v5769_v52  ;;  %v13776_v57 = vld [vmem:[#allocation252_spill] sm:$0xff] }
 0x90b   : > { %5901 = vmatprep.subr.bf16.mxu0 %v5870_v42  ;;  %6094 = vmatprep.subr.bf16.mxu1 %v5870_v42  ;;  %v13778_v19 = vpack.c.bf16 %v13776_v57, %v13777_v13  ;;  %v13780_v42 = vld [vmem:[#allocation219_spill] sm:$0xff] }
 0x90c   : > { %7500 = vpow2.f32 %v5773_v51  ;;  %5902 = vmatpush1.bf16.xpose.msra.mxu0 %v5869_v29  ;;  %6095 = vmatpush1.bf16.xpose.msra.mxu1 %v5869_v29  ;;  %v7491_v50 = vpop.eup %7490  ;;  %v13773_v29 = vld [vmem:[#allocation216_spill] sm:$0xff] }
 0x90d   : > { %7502 = vpow2.f32 %v5775_v27  ;;  %3087 = vxpose.xlu1.c.b16.cont [4/8] %v13769_v17, 128  ;;  %v5609_v34 = vpop.xlane.xlu0 %5608  ;;  %3120 = vxpose.xlu0.c.b16.cont [5/8] %v13772_v47, 128  ;;  %v13775_v52 = vpack.c.bf16 %v13773_v29, %v13774_v5 }
 0x90e   : > { %v7493_v61 = vpop.eup %7492  ;;  %7504 = vpow2.f32 %v5771_v23  ;;  %v5693_v33 = vsub.f32 %v11491_v20, %v5609_v34  ;;  %v5694_v63 = vsub.f32 %v11493_v25, %v5609_v34  ;;  %v13783_v23 = vld [vmem:[#allocation255_spill] sm:$0xff] }
 0x90f   : > { %v7495_v8 = vpop.eup %7494  ;;  %v5612_v6 = vpop.xlane.xlu1 %5611  ;;  %v5871_v59 = vpack.c.bf16 %v7493_v61, %v7491_v50  ;;  %v13784_v51 = vpack.c.bf16 %v13782_v60, %v13783_v23  ;;  %v13797_v60 = vld [vmem:[#allocation202_spill] sm:$0xff]  ;;  %v13798_v23 = vld [vmem:[#allocation201_spill] sm:$0xff] }
 0x910   : > { %v7497_v62 = vpop.eup %7496  ;;  %v5777_v4 = vmul.f32 1.442695, %v5693_v33  ;;  %v5695_v44 = vsub.f32 %v11495_v26, %v5612_v6  ;;  %v5696_v48 = vsub.f32 %v11499_v43, %v5612_v6  ;;  %v5779_v20 = vmul.f32 1.442695, %v5694_v63  ;;  %v13779_v43 = vld [vmem:[#allocation220_spill] sm:$0xff]  ;;  %v13786_v63 = vld [vmem:[#allocation223_spill] sm:$0xff] }
 0x911   : > { %3088 = vxpose.xlu1.c.b16.cont [5/8] %v13775_v52, 128  ;;  %v5872_v3 = vpack.c.bf16 %v7495_v8, %v7497_v62  ;;  %3121 = vxpose.xlu0.c.b16.cont [6/8] %v13778_v19, 128  ;;  %v13781_v31 = vpack.c.bf16 %v13779_v43, %v13780_v42  ;;  %v13785_v33 = vld [vmem:[#allocation224_spill] sm:$0xff]  ;;  %v13789_v62 = vld [vmem:[#allocation259_spill] sm:$0xff]  ;;  %v13794_v52 = vld [vmem:[#allocation234_spill] sm:$0xff] }
 0x912   : > { %v5781_v25 = vmul.f32 1.442695, %v5695_v44  ;;  %v5783_v32 = vmul.f32 1.442695, %v5696_v48  ;;  %7506 = vpow2.f32 %v5777_v4  ;;  %v13787_v8 = vpack.c.bf16 %v13785_v33, %v13786_v63  ;;  %v13792_v48 = vld [vmem:[#allocation227_spill] sm:$0xff] }
 0x913   : > { %5903 = vmatprep.subr.bf16.mxu0 %v5872_v3  ;;  %6096 = vmatprep.subr.bf16.mxu1 %v5872_v3  ;;  %v13795_v3 = vld [vmem:[#allocation233_spill] sm:$0xff] }
 0x914   : > { %7508 = vpow2.f32 %v5781_v25  ;;  %5904 = vmatpush1.bf16.xpose.msra.mxu0 %v5871_v59  ;;  %6097 = vmatpush1.bf16.xpose.msra.mxu1 %v5871_v59  ;;  %v7499_v26 = vpop.eup %7498  ;;  %v13788_v59 = vld [vmem:[#allocation260_spill] sm:$0xff]  ;;  %v13796_v57 = vpack.c.bf16 %v13794_v52, %v13795_v3  ;;  %v13812_v52 = vld [vmem:[#allocation246_spill] sm:$0xff]  ;;  %v13813_v3 = vld [vmem:[#allocation245_spill] sm:$0xff] }
 0x915   : > { %7510 = vpow2.f32 %v5783_v32  ;;  %3089 = vxpose.xlu1.c.b16.cont [6/8] %v13781_v31, 128  ;;  %v5615_v10 = vpop.xlane.xlu0 %5614  ;;  %3122 = vxpose.xlu0.c.b16.cont [7/8] %v13784_v51, 128  ;;  %v13790_v4 = vpack.c.bf16 %v13788_v59, %v13789_v62  ;;  %v13799_v51 = vpack.c.bf16 %v13797_v60, %v13798_v23 }
 0x916   : > { %v7501_v27 = vpop.eup %7500  ;;  %7512 = vpow2.f32 %v5779_v20  ;;  %v5697_v50 = vsub.f32 %v11503_v53, %v5615_v10  ;;  %v5698_v46 = vsub.f32 %v11505_v58, %v5615_v10 }
 0x917   : > { %v7503_v30 = vpop.eup %7502  ;;  %v5618_v17 = vpop.xlane.xlu1 %5617  ;;  %v5873_v34 = vpack.c.bf16 %v7501_v27, %v7499_v26 }
 0x918   : > { %v7505_v2 = vpop.eup %7504  ;;  %v5785_v28 = vmul.f32 1.442695, %v5697_v50  ;;  %v5699_v47 = vsub.f32 %v11507_v18, %v5618_v17  ;;  %v5700_v61 = vsub.f32 %v11511_v7, %v5618_v17  ;;  %v5787_v53 = vmul.f32 1.442695, %v5698_v46  ;;  %v13791_v7 = vld [vmem:[#allocation228_spill] sm:$0xff]  ;;  %v13800_v50 = vld [vmem:[#allocation238_spill] sm:$0xff] }
 0x919   : > { %3090 = vxpose.xlu1.c.b16.cont [7/8] %v13787_v8, 128  ;;  %v5874_v6 = vpack.c.bf16 %v7503_v30, %v7505_v2  ;;  %3123 = vxpose.xlu0.c.b16.end [8/8] %v13790_v4, 128  ;;  %v13793_v29 = vpack.c.bf16 %v13791_v7, %v13792_v48  ;;  %v13801_v46 = vld [vmem:[#allocation237_spill] sm:$0xff]  ;;  %v13809_v7 = vld [vmem:[#allocation210_spill] sm:$0xff] }
 0x91a   : > { %v5789_v58 = vmul.f32 1.442695, %v5699_v47  ;;  %v5791_v44 = vmul.f32 1.442695, %v5700_v61  ;;  %7514 = vpow2.f32 %v5785_v28  ;;  %v13802_v30 = vpack.c.bf16 %v13800_v50, %v13801_v46  ;;  %v13806_v47 = vld [vmem:[#allocation242_spill] sm:$0xff]  ;;  %v13807_v61 = vld [vmem:[#allocation241_spill] sm:$0xff] }
 0x91b   : > { %5905 = vmatprep.subr.bf16.mxu0 %v5874_v6  ;;  %6098 = vmatprep.subr.bf16.mxu1 %v5874_v6  ;;  %v13808_v33 = vpack.c.bf16 %v13806_v47, %v13807_v61  ;;  %v13810_v48 = vld [vmem:[#allocation209_spill] sm:$0xff] }
 0x91c   : > { %7516 = vpow2.f32 %v5789_v58  ;;  %5906 = vmatpush1.bf16.xpose.msra.mxu0 %v5873_v34  ;;  %6099 = vmatpush1.bf16.xpose.msra.mxu1 %v5873_v34  ;;  %v7507_v18 = vpop.eup %7506  ;;  %v13804_v34 = vld [vmem:[#allocation205_spill] sm:$0xff] }
 0x91d   : > { %7518 = vpow2.f32 %v5791_v44  ;;  %3091 = vxpose.xlu1.c.b16.end [8/8] %v13793_v29, 128  ;;  %v5621_v5 = vpop.xlane.xlu0 %5620  ;;  %3132 = vxpose.xlu0.c.b16.start [1/8] %v13796_v57, 128  ;;  %v13811_v29 = vpack.c.bf16 %v13809_v7, %v13810_v48  ;;  %v13814_v57 = vpack.c.bf16 %v13812_v52, %v13813_v3  ;;  %v13828_v47 = vld [vmem:[#allocation221_spill] sm:$0xff] }
 0x91e   : > { %v7509_v13 = vpop.eup %7508  ;;  %7520 = vpow2.f32 %v5787_v53  ;;  %v5701_v19 = vsub.f32 %v11515_v40, %v5621_v5  ;;  %v5702_v20 = vsub.f32 %v11517_v14, %v5621_v5  ;;  %v13834_v52 = vld [vmem:[#allocation225_spill] sm:$0xff] }
 0x91f   : > { %v7511_v25 = vpop.eup %7510  ;;  %v5624_v32 = vpop.xlane.xlu1 %5623  ;;  %v5875_v26 = vpack.c.bf16 %v7509_v13, %v7507_v18 }
 0x920   : > { %v7513_v43 = vpop.eup %7512  ;;  %v5793_v42 = vmul.f32 1.442695, %v5701_v19  ;;  %v5703_v31 = vsub.f32 %v11519_v21, %v5624_v32  ;;  %v5704_v10 = vsub.f32 %v11523_v37, %v5624_v32  ;;  %v5795_v40 = vmul.f32 1.442695, %v5702_v20  ;;  %v13803_v37 = vld [vmem:[#allocation206_spill] sm:$0xff]  ;;  %v13816_v19 = vld [vmem:[#allocation213_spill] sm:$0xff] }
 0x921   : > { %3100 = vxpose.xlu1.c.b16.start [1/8] %v13799_v51, 128  ;;  %v5876_v27 = vpack.c.bf16 %v7511_v25, %v7513_v43  ;;  %3133 = vxpose.xlu0.c.b16.cont [2/8] %v13802_v30, 128  ;;  %v13805_v2 = vpack.c.bf16 %v13803_v37, %v13804_v34  ;;  %v13818_v32 = vld [vmem:[#allocation250_spill] sm:$0xff]  ;;  %v13825_v34 = vld [vmem:[#allocation253_spill] sm:$0xff] }
 0x922   : > { %v5797_v14 = vmul.f32 1.442695, %v5703_v31  ;;  %v5799_v17 = vmul.f32 1.442695, %v5704_v10  ;;  %7522 = vpow2.f32 %v5793_v42  ;;  %v13824_v37 = vld [vmem:[#allocation254_spill] sm:$0xff] }
 0x923   : > { %5907 = vmatprep.subr.bf16.mxu0 %v5876_v27  ;;  %6100 = vmatprep.subr.bf16.mxu1 %v5876_v27 }
 0x924   : > { %7524 = vpow2.f32 %v5797_v14  ;;  %5908 = vmatpush1.bf16.xpose.msra.mxu0 %v5875_v26  ;;  %6101 = vmatpush1.bf16.xpose.msra.mxu1 %v5875_v26  ;;  %v7515_v21 = vpop.eup %7514  ;;  %v13819_v26 = vld [vmem:[#allocation249_spill] sm:$0xff] }
 0x925   : > { %7526 = vpow2.f32 %v5799_v17  ;;  %3101 = vxpose.xlu1.c.b16.cont [2/8] %v13805_v2, 128  ;;  %v5627_v28 = vpop.xlane.xlu0 %5626  ;;  %3134 = vxpose.xlu0.c.b16.cont [3/8] %v13808_v33, 128  ;;  %v13820_v43 = vpack.c.bf16 %v13818_v32, %v13819_v26  ;;  %v13822_v14 = vld [vmem:[#allocation217_spill] sm:$0xff]  ;;  %v13826_v2 = vpack.c.bf16 %v13824_v37, %v13825_v34 }
 0x926   : > { %v7517_v63 = vpop.eup %7516  ;;  %7528 = vpow2.f32 %v5795_v40  ;;  %v5705_v8 = vsub.f32 %v11527_v9, %v5627_v28  ;;  %v5706_v6 = vsub.f32 %v11529_v15, %v5627_v28  ;;  %v13821_v40 = vld [vmem:[#allocation218_spill] sm:$0xff]  ;;  %v7605_v34 = vld [vmem:[%s8327_s23 + $0x8] sm:$0xff] }
 0x927   : > { %v7519_v59 = vpop.eup %7518  ;;  %v5630_v62 = vpop.xlane.xlu1 %5629  ;;  %v5877_v4 = vpack.c.bf16 %v7517_v63, %v7515_v21  ;;  %v13823_v17 = vpack.c.bf16 %v13821_v40, %v13822_v14  ;;  %v13830_v63 = vld [vmem:[#allocation258_spill] sm:$0xff] }
 0x928   : > { %v7521_v53 = vpop.eup %7520  ;;  %v5801_v58 = vmul.f32 1.442695, %v5705_v8  ;;  %v5707_v44 = vsub.f32 %v11531_v11, %v5630_v62  ;;  %v5708_v18 = vsub.f32 %v11535_v54, %v5630_v62  ;;  %v5803_v9 = vmul.f32 1.442695, %v5706_v6  ;;  %v13815_v54 = vld [vmem:[#allocation214_spill] sm:$0xff]  ;;  %v13831_v8 = vld [vmem:[#allocation257_spill] sm:$0xff] }
 0x929   : > { %3102 = vxpose.xlu1.c.b16.cont [3/8] %v13811_v29, 128  ;;  %v5878_v5 = vpack.c.bf16 %v7519_v59, %v7521_v53  ;;  %3135 = vxpose.xlu0.c.b16.cont [4/8] %v13814_v57, 128  ;;  %v13817_v20 = vpack.c.bf16 %v13815_v54, %v13816_v19  ;;  %v13832_v6 = vpack.c.bf16 %v13830_v63, %v13831_v8  ;;  %v13840_v54 = vld [vmem:[#allocation229_spill] sm:$0xff]  ;;  %v7606_v63 = vld [vmem:[%s8327_s23 + $0x30] sm:$0xff] }
 0x92a   : > { %v5805_v15 = vmul.f32 1.442695, %v5707_v44  ;;  %v5807_v13 = vmul.f32 1.442695, %v5708_v18  ;;  %7530 = vpow2.f32 %v5801_v58 }
 0x92b   : > { %5909 = vmatprep.subr.bf16.mxu0 %v5878_v5  ;;  %6102 = vmatprep.subr.bf16.mxu1 %v5878_v5  ;;  %v13833_v5 = vld [vmem:[#allocation226_spill] sm:$0xff] }
 0x92c   : > { %7532 = vpow2.f32 %v5805_v15  ;;  %5910 = vmatpush1.bf16.xpose.msra.mxu0 %v5877_v4  ;;  %6103 = vmatpush1.bf16.xpose.msra.mxu1 %v5877_v4  ;;  %v7523_v11 = vpop.eup %7522  ;;  %v13835_v3 = vpack.c.bf16 %v13833_v5, %v13834_v52  ;;  %v13837_v15 = vld [vmem:[#allocation261_spill] sm:$0xff] }
 0x92d   : > { %7534 = vpow2.f32 %v5807_v13  ;;  %3103 = vxpose.xlu1.c.b16.cont [4/8] %v13817_v20, 128  ;;  %v5633_v25 = vpop.xlane.xlu0 %5632  ;;  %3136 = vxpose.xlu0.c.b16.cont [5/8] %v13820_v43, 128 }
 0x92e   : > { %v7525_v42 = vpop.eup %7524  ;;  %7536 = vpow2.f32 %v5803_v9  ;;  %v5709_v31 = vsub.f32 %v11539_v22, %v5633_v25  ;;  %v5710_v10 = vsub.f32 %v11541_v45, %v5633_v25  ;;  %v13836_v9 = vld [vmem:[#allocation262_spill] sm:$0xff]  ;;  %v7602_v25 = vld [vmem:[%s8327_s23] sm:$0xff] }
 0x92f   : > { %v7527_v60 = vpop.eup %7526  ;;  %v5636_v23 = vpop.xlane.xlu1 %5635  ;;  %v5879_v51 = vpack.c.bf16 %v7525_v42, %v7523_v11 }
 0x930   : > { %v7529_v27 = vpop.eup %7528  ;;  %v5809_v50 = vmul.f32 1.442695, %v5709_v31  ;;  %v5711_v46 = vsub.f32 %v11543_v49, %v5636_v23  ;;  %v5712_v30 = vsub.f32 %v11547_v0, %v5636_v23  ;;  %v5811_v22 = vmul.f32 1.442695, %v5710_v10  ;;  %v13827_v0 = vld [vmem:[#allocation222_spill] sm:$0xff] }
 0x931   : > { %3104 = vxpose.xlu1.c.b16.cont [5/8] %v13823_v17, 128  ;;  %v5880_v21 = vpack.c.bf16 %v7527_v60, %v7529_v27  ;;  %3137 = vxpose.xlu0.c.b16.cont [6/8] %v13826_v2, 128  ;;  %v13829_v61 = vpack.c.bf16 %v13827_v0, %v13828_v47  ;;  %v13843_v47 = vld [vmem:[#allocation344_spill] sm:$0xff] }
 0x932   : > { %v5813_v45 = vmul.f32 1.442695, %v5711_v46  ;;  %v5815_v28 = vmul.f32 1.442695, %v5712_v30  ;;  %7538 = vpow2.f32 %v5809_v50  ;;  %v7603_v46 = vld [vmem:[%s8327_s23 + $0x10] sm:$0xff] }
 0x933   : > { %5911 = vmatprep.subr.bf16.mxu0 %v5880_v21  ;;  %6104 = vmatprep.subr.bf16.mxu1 %v5880_v21 }
 0x934   : > { %7540 = vpow2.f32 %v5813_v45  ;;  %5912 = vmatpush1.bf16.xpose.msra.mxu0 %v5879_v51  ;;  %6105 = vmatpush1.bf16.xpose.msra.mxu1 %v5879_v51  ;;  %v7531_v49 = vpop.eup %7530 }
 0x935   : > { %7542 = vpow2.f32 %v5815_v28  ;;  %3105 = vxpose.xlu1.c.b16.cont [6/8] %v13829_v61, 128  ;;  %v5639_v33 = vpop.xlane.xlu0 %5638  ;;  %3138 = vxpose.xlu0.c.b16.cont [7/8] %v13832_v6, 128 }
 0x936   : > { %v7533_v59 = vpop.eup %7532  ;;  %7544 = vpow2.f32 %v5811_v22  ;;  %v5713_v62 = vsub.f32 %v11551_v55, %v5639_v33  ;;  %v5714_v4 = vsub.f32 %v11553_v36, %v5639_v33  ;;  %v13838_v55 = vpack.c.bf16 %v13836_v9, %v13837_v15  ;;  %v13846_v9 = vld [vmem:[#allocation347_spill] sm:$0xff] }
 0x937   : > { %v7535_v53 = vpop.eup %7534  ;;  %v5642_v58 = vpop.xlane.xlu1 %5641  ;;  %v5881_v44 = vpack.c.bf16 %v7533_v59, %v7531_v49  ;;  %v13842_v49 = vld [vmem:[#allocation343_spill] sm:$0xff] }
 0x938   : > { %v7537_v18 = vpop.eup %7536  ;;  %v5817_v7 = vmul.f32 1.442695, %v5713_v62  ;;  %v5715_v48 = vsub.f32 %v11555_v35, %v5642_v58  ;;  %v5716_v29 = vsub.f32 %v11559_v56, %v5642_v58  ;;  %v5819_v36 = vmul.f32 1.442695, %v5714_v4  ;;  %v13839_v35 = vld [vmem:[#allocation230_spill] sm:$0xff]  ;;  %v7608_v4 = vld [vmem:[%s8327_s23 + $0x40] sm:$0xff] }
 0x939   : > { %3106 = vxpose.xlu1.c.b16.cont [7/8] %v13835_v3, 128  ;;  %v5882_v57 = vpack.c.bf16 %v7535_v53, %v7537_v18  ;;  %3139 = vxpose.xlu0.c.b16.end [8/8] %v13838_v55, 128  ;;  %v13841_v19 = vpack.c.bf16 %v13839_v35, %v13840_v54  ;;  %v13844_v58 = vld [vmem:[#allocation345_spill] sm:$0xff]  ;;  %v13845_v18 = vld [vmem:[#allocation346_spill] sm:$0xff]  ;;  %v13847_v55 = vld [vmem:[#allocation348_spill] sm:$0xff] }
 0x93a   : > { %v5821_v13 = vmul.f32 1.442695, %v5715_v48  ;;  %v5823_v11 = vmul.f32 1.442695, %v5716_v29  ;;  %7546 = vpow2.f32 %v5817_v7 }
 0x93b   : > { %5913 = vmatprep.subr.bf16.mxu0 %v5882_v57  ;;  %6106 = vmatprep.subr.bf16.mxu1 %v5882_v57  ;;  %v7609_v57 = vld [vmem:[%s8327_s23 + $0x28] sm:$0xff] }
 0x93c   : > { %7548 = vpow2.f32 %v5821_v13  ;;  %5914 = vmatpush1.bf16.xpose.msra.mxu0 %v5881_v44  ;;  %6107 = vmatpush1.bf16.xpose.msra.mxu1 %v5881_v44  ;;  %v7539_v56 = vpop.eup %7538 }
 0x93d   : > { %7550 = vpow2.f32 %v5823_v11  ;;  %3107 = vxpose.xlu1.c.b16.end [8/8] %v13841_v19, 128  ;;  %v5645_v20 = vpop.xlane.xlu0 %5644  ;;  %1541 = vxpose.xlu0.b32.start [1/16] %v7602_v25, 128  ;;  %v7610_v11 = vld [vmem:[%s8327_s23 + $0x50] sm:$0xff]  ;;  %v7611_v19 = vld [vmem:[%s8327_s23 + $0x38] sm:$0xff] }
 0x93e   : > { %v7541_v32 = vpop.eup %7540  ;;  %7552 = vpow2.f32 %v5819_v36  ;;  %v5717_v26 = vsub.f32 %v11563_v12, %v5645_v20  ;;  %v5718_v43 = vsub.f32 %v11565_v1, %v5645_v20 }
 0x93f   : > { %v7543_v42 = vpop.eup %7542  ;;  %v5648_v31 = vpop.xlane.xlu1 %5647  ;;  %v5883_v10 = vpack.c.bf16 %v7541_v32, %v7539_v56  ;;  %v7612_v32 = vld [vmem:[%s8327_s23 + $0x60] sm:$0xff] }
 0x940   : > { %v7545_v60 = vpop.eup %7544  ;;  %v5825_v23 = vmul.f32 1.442695, %v5717_v26  ;;  %v5719_v51 = vsub.f32 %v11567_v38, %v5648_v31  ;;  %v5720_v27 = vsub.f32 %v11571_v41, %v5648_v31  ;;  %v5827_v30 = vmul.f32 1.442695, %v5718_v43  ;;  %v7604_v38 = vld [vmem:[%s8327_s23 + $0x20] sm:$0xff]  ;;  %v13848_v43 = vld [vmem:[#allocation349_spill] sm:$0xff] }
 0x941   : > { %v5884_v50 = vpack.c.bf16 %v7543_v42, %v7545_v60  ;;  %1542 = vxpose.xlu0.b32.cont [2/16] %v7603_v46, 128  ;;  %v13849_v31 = vld [vmem:[#allocation350_spill] sm:$0xff] }
 0x942   : > { %v5829_v40 = vmul.f32 1.442695, %v5719_v51  ;;  %v5831_v14 = vmul.f32 1.442695, %v5720_v27  ;;  %7554 = vpow2.f32 %v5825_v23 }
 0x943   : > { %5915 = vmatprep.subr.bf16.mxu0 %v5884_v50  ;;  %6108 = vmatprep.subr.bf16.mxu1 %v5884_v50 }
 0x944   : > { %7556 = vpow2.f32 %v5829_v40  ;;  %5916 = vmatpush1.bf16.xpose.msra.mxu0 %v5883_v10  ;;  %6109 = vmatpush1.bf16.xpose.msra.mxu1 %v5883_v10  ;;  %v7547_v1 = vpop.eup %7546  ;;  %v13850_v40 = vld [vmem:[#allocation351_spill] sm:$0xff] }
 0x945   : > { %7558 = vpow2.f32 %v5831_v14  ;;  %v5651_v12 = vpop.xlane.xlu0 %5650  ;;  %1543 = vxpose.xlu0.b32.cont [3/16] %v7604_v38, 128 }
 0x946   : > { %v7549_v41 = vpop.eup %7548  ;;  %7560 = vpow2.f32 %v5827_v30  ;;  %v5721_v17 = vsub.f32 %v11575_v24, %v5651_v12  ;;  %v5722_v21 = vsub.f32 %v11577_v39, %v5651_v12  ;;  %v7607_v39 = vld [vmem:[%s8327_s23 + $0x18] sm:$0xff]  ;;  %v7613_v30 = vld [vmem:[%s8327_s23 + $0x48] sm:$0xff] }
 0x947   : > { %v7551_v37 = vpop.eup %7550  ;;  %1573 = vxpose.xlu1.b32.start [1/16] %v7605_v34, 128  ;;  %v5654_v2 = vpop.xlane.xlu1 %5653  ;;  %v5885_v22 = vpack.c.bf16 %v7549_v41, %v7547_v1  ;;  %v13851_v1 = vld [vmem:[#allocation352_spill] sm:$0xff]  ;;  %v7614_v41 = vld [vmem:[%s8327_s23 + $0x70] sm:$0xff] }
 0x948   : > { %v7553_v45 = vpop.eup %7552  ;;  %v5833_v28 = vmul.f32 1.442695, %v5721_v17  ;;  %v5723_v0 = vsub.f32 %v13842_v49, %v5654_v2  ;;  %v5724_v61 = vsub.f32 %v13843_v47, %v5654_v2  ;;  %v5835_v8 = vmul.f32 1.442695, %v5722_v21  ;;  %v7616_v2 = vld [vmem:[%s8327_s23 + $0x80] sm:$0xff] }
 0x949   : > { %v5886_v33 = vpack.c.bf16 %v7551_v37, %v7553_v45  ;;  %1544 = vxpose.xlu0.b32.cont [4/16] %v7606_v63, 128  ;;  %v7615_v37 = vld [vmem:[%s8327_s23 + $0x58] sm:$0xff] }
 0x94a   : > { %v5837_v24 = vmul.f32 1.442695, %v5723_v0  ;;  %v5839_v6 = vmul.f32 1.442695, %v5724_v61  ;;  %7562 = vpow2.f32 %v5833_v28  ;;  %v13852_v28 = vld [vmem:[#allocation353_spill] sm:$0xff]  ;;  %v13853_v0 = vld [vmem:[#allocation88_spill] sm:$0xff] }
 0x94b   : > { %5917 = vmatprep.subr.bf16.mxu0 %v5886_v33  ;;  %6110 = vmatprep.subr.bf16.mxu1 %v5886_v33 }
 0x94c   : > { %7564 = vpow2.f32 %v5837_v24  ;;  %1574 = vxpose.xlu1.b32.cont [2/16] %v7607_v39, 128  ;;  %5918 = vmatpush1.bf16.xpose.msra.mxu0 %v5885_v22  ;;  %v7555_v59 = vpop.eup %7554  ;;  %v7617_v39 = vld [vmem:[%s8327_s23 + $0x68] sm:$0xff] }
 0x94d   : > { %7566 = vpow2.f32 %v5839_v6  ;;  %6111 = vmatpush1.bf16.xpose.msra.mxu1 %v5885_v22  ;;  %v5657_v62 = vpop.xlane.xlu0 %5656  ;;  %1545 = vxpose.xlu0.b32.cont [5/16] %v7608_v4, 128 }
 0x94e   : > { %v7557_v53 = vpop.eup %7556  ;;  %7568 = vpow2.f32 %v5835_v8  ;;  %v5725_v44 = vsub.f32 %v13844_v58, %v5657_v62  ;;  %v5726_v7 = vsub.f32 %v13845_v18, %v5657_v62  ;;  %v13854_v62 = vld [vmem:[#allocation87_spill] sm:$0xff]  ;;  %v7618_v58 = vld [vmem:[%s8327_s23 + $0x90] sm:$0xff] }
 0x94f   : > { %v7559_v48 = vpop.eup %7558  ;;  %v5660_v29 = vpop.xlane.xlu1 %5659  ;;  %v5887_v5 = vpack.c.bf16 %v7557_v53, %v7555_v59 }
 0x950   : > { %v7561_v52 = vpop.eup %7560  ;;  %v5841_v3 = vmul.f32 1.442695, %v5725_v44  ;;  %1575 = vxpose.xlu1.b32.cont [3/16] %v7609_v57, 128  ;;  %v5727_v15 = vsub.f32 %v13846_v9, %v5660_v29  ;;  %v5728_v36 = vsub.f32 %v13847_v55, %v5660_v29  ;;  %v5843_v56 = vmul.f32 1.442695, %v5726_v7  ;;  %v7619_v29 = vld [vmem:[%s8327_s23 + $0x78] sm:$0xff] }
 0x951   : > { %v5888_v13 = vpack.c.bf16 %v7559_v48, %v7561_v52  ;;  %1546 = vxpose.xlu0.b32.cont [6/16] %v7610_v11, 128 }
 0x952   : > { %v5845_v35 = vmul.f32 1.442695, %v5727_v15  ;;  %v5847_v54 = vmul.f32 1.442695, %v5728_v36  ;;  %7570 = vpow2.f32 %v5841_v3  ;;  %v7621_v15 = vld [vmem:[%s8327_s23 + $0x88] sm:$0xff]  ;;  %v7622_v36 = vld [vmem:[%s8327_s23 + $0xb0] sm:$0xff] }
 0x953   : > { %5919 = vmatprep.subr.bf16.mxu0 %v5888_v13  ;;  %6112 = vmatprep.subr.bf16.mxu1 %v5888_v13 }
 0x954   : > { %7572 = vpow2.f32 %v5845_v35  ;;  %1576 = vxpose.xlu1.b32.cont [4/16] %v7611_v19, 128  ;;  %5920 = vmatpush1.bf16.xpose.msra.mxu0 %v5887_v5  ;;  %v7563_v20 = vpop.eup %7562 }
 0x955   : > { %7574 = vpow2.f32 %v5847_v54  ;;  %6113 = vmatpush1.bf16.xpose.msra.mxu1 %v5887_v5  ;;  %v5663_v25 = vpop.xlane.xlu0 %5662  ;;  %1547 = vxpose.xlu0.b32.cont [7/16] %v7612_v32, 128  ;;  %v7620_v5 = vld [vmem:[%s8327_s23 + $0xa0] sm:$0xff] }
 0x956   : > { %v7565_v26 = vpop.eup %7564  ;;  %7576 = vpow2.f32 %v5843_v56  ;;  %v5729_v42 = vsub.f32 %v13848_v43, %v5663_v25  ;;  %v5730_v10 = vsub.f32 %v13849_v31, %v5663_v25  ;;  %v7623_v56 = vld [vmem:[%s8327_s23 + $0x98] sm:$0xff]  ;;  %v7624_v54 = vld [vmem:[%s8327_s23 + $0xc0] sm:$0xff]  ;;  %v7625_v43 = vld [vmem:[%s8327_s23 + $0xa8] sm:$0xff] }
 0x957   : > { %v7567_v60 = vpop.eup %7566  ;;  %v5666_v23 = vpop.xlane.xlu1 %5665  ;;  %v5889_v51 = vpack.c.bf16 %v7565_v26, %v7563_v20  ;;  %v7626_v31 = vld [vmem:[%s8327_s23 + $0xd0] sm:$0xff] }
 0x958   : > { %v7569_v27 = vpop.eup %7568  ;;  %v5849_v50 = vmul.f32 1.442695, %v5729_v42  ;;  %v5851_v46 = vmul.f32 1.442695, %v5730_v10  ;;  %1577 = vxpose.xlu1.b32.cont [5/16] %v7613_v30, 128  ;;  %v5731_v14 = vsub.f32 %v13850_v40, %v5666_v23  ;;  %v5732_v12 = vsub.f32 %v13851_v1, %v5666_v23  ;;  %v7628_v23 = vld [vmem:[%s8327_s23 + $0xe0] sm:$0xff] }
 0x959   : > { %v5890_v38 = vpack.c.bf16 %v7567_v60, %v7569_v27  ;;  %1548 = vxpose.xlu0.b32.cont [8/16] %v7614_v41, 128  ;;  %v7627_v60 = vld [vmem:[%s8327_s23 + $0xb8] sm:$0xff]  ;;  %v13855_v1 = vmov 1065369472  }
 0x95a   : > { %7578 = vpow2.f32 %v5849_v50  ;;  %v5853_v17 = vmul.f32 1.442695, %v5731_v14  ;;  %v5855_v21 = vmul.f32 1.442695, %v5732_v12  ;;  %v7629_v50 = vld [vmem:[%s8327_s23 + $0xc8] sm:$0xff]  ;;  %v7631_v14 = vld [vmem:[%s8327_s23 + $0xd8] sm:$0xff] }
 0x95b   : > { %7580 = vpow2.f32 %v5851_v46  ;;  %5921 = vmatprep.subr.bf16.mxu0 %v5890_v38  ;;  %6114 = vmatprep.subr.bf16.mxu1 %v5890_v38  ;;  %v7630_v46 = vld [vmem:[%s8327_s23 + $0xf0] sm:$0xff]  ;;  %v7632_v12 = vld [vmem:[%s8327_s23 + $0x100] sm:$0xff]  ;;  %v7633_v38 = vld [vmem:[%s8327_s23 + $0xe8] sm:$0xff] }
 0x95c   : > { %7582 = vpow2.f32 %v5853_v17  ;;  %1578 = vxpose.xlu1.b32.cont [6/16] %v7615_v37, 128  ;;  %5922 = vmatpush1.bf16.xpose.msra.mxu0 %v5889_v51  ;;  %v7571_v34 = vpop.eup %7570  ;;  %v7634_v17 = vld [vmem:[%s8327_s23 + $0x110] sm:$0xff]  ;;  %v7635_v37 = vld [vmem:[%s8327_s23 + $0xf8] sm:$0xff] }
 0x95d   : > { %7584 = vpow2.f32 %v5855_v21  ;;  %6115 = vmatpush1.bf16.xpose.msra.mxu1 %v5889_v51  ;;  %1549 = vxpose.xlu0.b32.cont [9/16] %v7616_v2, 128  ;;  %v5669_v22 = vpop.xlane.xlu0 %5668 }
 0x95e   : > { %v7573_v45 = vpop.eup %7572  ;;  %v5733_v49 = vsub.f32 %v13852_v28, %v5669_v22  ;;  %v5734_v47 = vsub.f32 %v13853_v0, %v5669_v22  ;;  %v7638_v28 = vld [vmem:[%s8327_s23 + $0x130] sm:$0xff] }
 0x95f   : > { %v7575_v61 = vpop.eup %7574  ;;  %v5672_v33 = vpop.xlane.xlu1 %5671  ;;  %v5891_v63 = vpack.c.bf16 %v7573_v45, %v7571_v34  ;;  %v7636_v34 = vld [vmem:[%s8327_s23 + $0x120] sm:$0xff]  ;;  %v7637_v45 = vld [vmem:[%s8327_s23 + $0x108] sm:$0xff] }
 0x960   : > { %v7577_v8 = vpop.eup %7576  ;;  %v5857_v24 = vmul.f32 1.442695, %v5733_v49  ;;  %v5859_v6 = vmul.f32 1.442695, %v5734_v47  ;;  %1579 = vxpose.xlu1.b32.cont [7/16] %v7617_v39, 128  ;;  %v5735_v59 = vsub.f32 %v11615_v16, %v5672_v33  ;;  %v5736_v4 = vsub.f32 %v13854_v62, %v5672_v33  ;;  %v7639_v49 = vld [vmem:[%s8327_s23 + $0x118] sm:$0xff]  ;;  %v7640_v47 = vld [vmem:[%s8327_s23 + $0x140] sm:$0xff] }
 0x961   : > { %v5892_v53 = vpack.c.bf16 %v7575_v61, %v7577_v8  ;;  %1550 = vxpose.xlu0.b32.cont [10/16] %v7618_v58, 128  ;;  %v7641_v33 = vld [vmem:[%s8327_s23 + $0x128] sm:$0xff]  ;;  %v7644_v39 = vld [vmem:[%s8327_s23 + $0x160] sm:$0xff]  ;;  %v7647_v58 = vld [vmem:[%s8327_s23 + $0x158] sm:$0xff] }
 0x962   : > { %7586 = vpow2.f32 %v5857_v24  ;;  %v5861_v44 = vmul.f32 1.442695, %v5735_v59  ;;  %v5863_v18 = vmul.f32 1.442695, %v5736_v4  ;;  %v7645_v59 = vld [vmem:[%s8327_s23 + $0x148] sm:$0xff]  ;;  %v7646_v4 = vld [vmem:[%s8327_s23 + $0x170] sm:$0xff] }
 0x963   : > { %7588 = vpow2.f32 %v5859_v6  ;;  %5923 = vmatprep.subr.bf16.mxu0 %v5892_v53  ;;  %6116 = vmatprep.subr.bf16.mxu1 %v5892_v53  ;;  %v3124_v7 = vpop.trf.xlu0  ;;  %v7643_v6 = vld [vmem:[%s8327_s23 + $0x138] sm:$0xff] }
 0x964   : > { %v7579_v48 = vpop.eup %7578  ;;  %7590 = vpow2.f32 %v5861_v44  ;;  %1580 = vxpose.xlu1.b32.cont [8/16] %v7619_v29, 128  ;;  %5924 = vmatpush1.bf16.xpose.msra.mxu0 %v5891_v63  ;;  %v7648_v44 = vld [vmem:[%s8327_s23 + $0x180] sm:$0xff]  ;;  %v7650_v29 = vld [vmem:[%s8327_s23 + $0x190] sm:$0xff] }
 0x965   : > { %v7581_v16 = vpop.eup %7580  ;;  %7592 = vpow2.f32 %v5863_v18  ;;  %6117 = vmatpush1.bf16.xpose.msra.mxu1 %v5891_v63  ;;  %1551 = vxpose.xlu0.b32.cont [11/16] %v7620_v5, 128  ;;  %v7642_v63 = vld [vmem:[%s8327_s23 + $0x150] sm:$0xff] }
 0x966   : > { %v7583_v52 = vpop.eup %7582  ;;  %5929 = vmatprep.mubr.bf16.mxu0 %v3124_v7 }
 0x967   : > { %v7585_v3 = vpop.eup %7584  ;;  %v5893_v57 = vpack.c.bf16 %v7583_v52, %v7579_v48  ;;  %v3125_v9 = vpop.trf.xlu0  ;;  %v7649_v48 = vld [vmem:[%s8327_s23 + $0x168] sm:$0xff]  ;;  %v7652_v52 = vld [vmem:[%s8327_s23 + $0x1a0] sm:$0xff] }
 0x968   : > { %1581 = vxpose.xlu1.b32.cont [9/16] %v7621_v15, 128  ;;  %v5894_v55 = vpack.c.bf16 %v7585_v3, %v7581_v16  ;;  %v3092_v20 = vpop.trf.xlu1  ;;  %v7651_v16 = vld [vmem:[%s8327_s23 + $0x178] sm:$0xff] }
 0x969   : > { %1552 = vxpose.xlu0.b32.cont [12/16] %v7622_v36, 128 }
 0x96a   : > { %5925 = vmatprep.subr.bf16.mxu0 %v5894_v55  ;;  %6118 = vmatprep.subr.bf16.mxu1 %v5894_v55  ;;  %v13856_v55 = vld [vmem:[#allocation315_spill] sm:$0xff] }
 0x96b   : > { %v3126_v13 = vpop.trf.xlu0  ;;  %7594 = vrcp.f32 %v13856_v55  ;;  %v13874_v55 = vld [vmem:[#allocation26_spill] sm:$0xff] }
 0x96c   : > { %v7587_v11 = vpop.eup %7586  ;;  %1582 = vxpose.xlu1.b32.cont [10/16] %v7623_v56, 128  ;;  %5926 = vmatpush1.bf16.xpose.msra.mxu0 %v5893_v57  ;;  %v3093_v10 = vpop.trf.xlu1  ;;  %v7657_v56 = vld [vmem:[%s8327_s23 + $0x1a8] sm:$0xff] }
 0x96d   : > { %v7589_v35 = vpop.eup %7588  ;;  %6119 = vmatpush1.bf16.xpose.msra.mxu1 %v5893_v57  ;;  %1553 = vxpose.xlu0.b32.cont [13/16] %v7624_v54, 128  ;;  %v7653_v57 = vld [vmem:[%s8327_s23 + $0x188] sm:$0xff]  ;;  %v7658_v54 = vld [vmem:[%s8327_s23 + $0x1d0] sm:$0xff] }
 0x96e   : > { %v7591_v19 = vpop.eup %7590 }
 0x96f   : > { %v7593_v25 = vpop.eup %7592  ;;  %v5895_v32 = vpack.c.bf16 %v7591_v19, %v7587_v11  ;;  %v3127_v26 = vpop.trf.xlu0  ;;  %v7656_v11 = vld [vmem:[%s8327_s23 + $0x1c0] sm:$0xff] }
 0x970   : > { %1583 = vxpose.xlu1.b32.cont [11/16] %v7625_v43, 128  ;;  %v5896_v42 = vpack.c.bf16 %v7593_v25, %v7589_v35  ;;  %v3094_v27 = vpop.trf.xlu1 }
 0x971   : > { %1554 = vxpose.xlu0.b32.cont [14/16] %v7626_v31, 128 }
 0x972   : > { %5927 = vmatprep.subr.bf16.mxu0 %v5896_v42  ;;  %6120 = vmatprep.subr.bf16.mxu1 %v5896_v42  ;;  %v13857_v42 = vld [vmem:[#allocation20_spill] sm:$0xff] }
 0x973   : > { %v3128_v51 = vpop.trf.xlu0 }
 0x974   : > { %1584 = vxpose.xlu1.b32.cont [12/16] %v7627_v60, 128  ;;  %5928 = vmatpush1.bf16.xpose.msra.mxu0 %v5895_v32  ;;  %v3095_v30 = vpop.trf.xlu1  ;;  %v7662_v60 = vld [vmem:[%s8327_s23 + $0x1f0] sm:$0xff] }
 0x975   : > { %6121 = vmatpush1.bf16.xpose.msra.mxu1 %v5895_v32  ;;  %1555 = vxpose.xlu0.b32.cont [15/16] %v7628_v23, 128  ;;  %v7595_v25 = vpop.eup %7594  ;;  %v7660_v32 = vld [vmem:[%s8327_s23 + $0x1e0] sm:$0xff]  ;;  %v13858_v23 = vld [vmem:[#allocation318_spill] sm:$0xff] }
 0x976   : > { %v11869_v31 = vrot.slane %v7595_v25, %v13857_v42 }
 0x977   : > { %v3129_v40 = vpop.trf.xlu0 }
 0x978   : > { %1585 = vxpose.xlu1.b32.cont [13/16] %v7629_v50, 128  ;;  %v3096_v41 = vpop.trf.xlu1 }
 0x979   : > { %1556 = vxpose.xlu0.b32.end [16/16] %v7630_v46, 128  ;;  %v13859_v46 = vld [vmem:[#allocation24_spill] sm:$0xff] }
 0x97b   : > { %5930 = vmatmul.mubr.bf16.vlgmr.msra.gmra.mrb[36].mxu0 %v3092_v20  ;;  %v3130_v21 = vpop.trf.xlu0  ;;  %v7659_v20 = vld [vmem:[%s8327_s23 + $0x1b8] sm:$0xff] }
 0x97c   : > { %1586 = vxpose.xlu1.b32.cont [14/16] %v7631_v14, 128  ;;  %6123 = vmatmul.mubr.bf16.vlgmr.msra.gmra.mrb[128].mxu1 %v13855_v1  ;;  %v3097_v2 = vpop.trf.xlu1  ;;  %v13860_v14 = vld [vmem:[#allocation305_spill] sm:$0xff] }
 0x97d   : > { %1605 = vxpose.xlu0.b32.start [1/16] %v7632_v12, 128  ;;  %5939 = vmatprep.mubr.bf16.mxu0 %v3125_v9  ;;  %v7654_v9 = vld [vmem:[%s8327_s23 + $0x1b0] sm:$0xff]  ;;  %v5258_v1 = vmul.f32 %v11869_v31, %v13860_v14  ;;  %v7664_v12 = vld [vmem:[%s8327_s23 + $0x1e8] sm:$0xff] }
 0x97f   : > { %v3131_v22 = vpop.trf.xlu0 }
 0x980   : > { %1587 = vxpose.xlu1.b32.cont [15/16] %v7633_v38, 128  ;;  %v3098_v0 = vpop.trf.xlu1  ;;  %v13861_v38 = vld [vmem:[#allocation21_spill] sm:$0xff] }
 0x981   : > { %1606 = vxpose.xlu0.b32.cont [2/16] %v7634_v17, 128 }
 0x983   : > { %5940 = vmatmul.mubr.bf16.gmra.mrb[40].mxu0 %v3093_v10  ;;  %v3140_v61 = vpop.trf.xlu0  ;;  %v7661_v10 = vld [vmem:[%s8327_s23 + $0x1c8] sm:$0xff] }
 0x984   : > { %1588 = vxpose.xlu1.b32.end [16/16] %v7635_v37, 128  ;;  %5949 = vmatprep.mubr.bf16.mxu0 %v3126_v13  ;;  %v3099_v8 = vpop.trf.xlu1  ;;  %v7655_v13 = vld [vmem:[%s8327_s23 + $0x198] sm:$0xff] }
 0x985   : > { %1607 = vxpose.xlu0.b32.cont [3/16] %v7636_v34, 128  ;;  %v13862_v37 = vld [vmem:[#allocation307_spill] sm:$0xff] }
 0x986   : > { %v5260_v34 = vmul.f32 %v11869_v31, %v13862_v37 }
 0x987   : > { %v11825_v24 = vpop.trf.xlu0 }
 0x988   : > { %1637 = vxpose.xlu1.b32.start [1/16] %v7637_v45, 128  ;;  %v3108_v62 = vpop.trf.xlu1 }
 0x989   : > { %1608 = vxpose.xlu0.b32.cont [4/16] %v7638_v28, 128 }
 0x98b   : > { %5950 = vmatmul.mubr.bf16.gmra.mrb[44].mxu0 %v3094_v27  ;;  %v11831_v53 = vpop.trf.xlu0  ;;  %v7663_v27 = vld [vmem:[%s8327_s23 + $0x1d8] sm:$0xff] }
 0x98c   : > { %1638 = vxpose.xlu1.b32.cont [2/16] %v7639_v49, 128  ;;  %5959 = vmatprep.mubr.bf16.mxu0 %v3127_v26  ;;  %v11835_v18 = vpop.trf.xlu1  ;;  %v13864_v49 = vld [vmem:[#allocation325_spill] sm:$0xff] }
 0x98d   : > { %1609 = vxpose.xlu0.b32.cont [5/16] %v7640_v47, 128  ;;  %v13865_v47 = vld [vmem:[#allocation293_spill] sm:$0xff] }
 0x98f   : > { %v11837_v7 = vpop.trf.xlu0 }
 0x990   : > { %1639 = vxpose.xlu1.b32.cont [3/16] %v7641_v33, 128  ;;  %v11842_v5 = vpop.trf.xlu1  ;;  %v13866_v33 = vld [vmem:[#allocation22_spill] sm:$0xff] }
 0x991   : > { %1610 = vxpose.xlu0.b32.cont [6/16] %v7642_v63, 128 }
 0x993   : > { %5960 = vmatmul.mubr.bf16.gmra.mrb[48].mxu0 %v3095_v30  ;;  %v11845_v3 = vpop.trf.xlu0 }
 0x994   : > { %1640 = vxpose.xlu1.b32.cont [4/16] %v7643_v6, 128  ;;  %5969 = vmatprep.mubr.bf16.mxu0 %v3128_v51  ;;  %v11849_v15 = vpop.trf.xlu1  ;;  %v5256_v51 = vmul.f32 %v11869_v31, %v13858_v23 }
 0x995   : > { %1611 = vxpose.xlu0.b32.cont [7/16] %v7644_v39, 128 }
 0x997   : > { %v11852_v36 = vpop.trf.xlu0 }
 0x998   : > { %1641 = vxpose.xlu1.b32.cont [5/16] %v7645_v59, 128  ;;  %v11857_v35 = vpop.trf.xlu1  ;;  %v13868_v59 = vld [vmem:[#allocation314_spill] sm:$0xff] }
 0x999   : > { %1612 = vxpose.xlu0.b32.cont [8/16] %v7646_v4, 128  ;;  %v13869_v4 = vld [vmem:[#allocation297_spill] sm:$0xff] }
 0x99b   : > { %5970 = vmatmul.mubr.bf16.gmra.mrb[52].mxu0 %v3096_v41  ;;  %v11860_v19 = vpop.trf.xlu0 }
 0x99c   : > { %1642 = vxpose.xlu1.b32.cont [6/16] %v7647_v58, 128  ;;  %5979 = vmatprep.mubr.bf16.mxu0 %v3129_v40  ;;  %v11864_v26 = vpop.trf.xlu1  ;;  %v13870_v58 = vld [vmem:[#allocation23_spill] sm:$0xff] }
 0x99d   : > { %1613 = vxpose.xlu0.b32.cont [9/16] %v7648_v44, 128 }
 0x99f   : > { %v11866_v43 = vpop.trf.xlu0 }
 0x9a0   : > { %1643 = vxpose.xlu1.b32.cont [7/16] %v7649_v48, 128  ;;  %v11878_v50 = vpop.trf.xlu1  ;;  %v13871_v48 = vld [vmem:[#allocation32_spill] sm:$0xff] }
 0x9a1   : > { %1614 = vxpose.xlu0.b32.cont [10/16] %v7650_v29, 128 }
 0x9a3   : > { %5980 = vmatmul.mubr.bf16.gmra.mrb[56].mxu0 %v3097_v2  ;;  %v7665_v2 = vld [vmem:[%s8327_s23 + $0x1f8] sm:$0xff]  ;;  %s6828_s23 = sshll.u32 %s8078_s1, 14  ;;  %s6398_s1 = scalar_lea.sflag [#allocation4], %s8323_s17 }
 0x9a4   : > { %1644 = vxpose.xlu1.b32.cont [8/16] %v7651_v16, 128  ;;  %5989 = vmatprep.mubr.bf16.mxu0 %v3130_v21  ;;  %v11888_v21 = vpop.trf.xlu1  ;;  %s12389_s7 = scalar_lea.hbm %s13987_s20, %s6828_s23 }
 0x9a5   : > { %1615 = vxpose.xlu0.b32.cont [11/16] %v7652_v52, 128  ;;  %v13872_v52 = vld [vmem:[#allocation327_spill] sm:$0xff] }
 0x9a8   : > { %1645 = vxpose.xlu1.b32.cont [9/16] %v7653_v57, 128  ;;  %v5292_v57 = vmul.f32 %v11869_v31, %v13872_v52  ;;  %v13895_v52 = vld [vmem:[#allocation44_spill] sm:$0xff] }
 0x9a9   : > { %1616 = vxpose.xlu0.b32.cont [12/16] %v7654_v9, 128 }
 0x9ab   : > { %5990 = vmatmul.mubr.bf16.gmra.mrb[60].mxu0 %v3098_v0  ;;  %v5288_v0 = vmul.f32 %v11869_v31, %v13864_v49 }
 0x9ac   : > { %1646 = vxpose.xlu1.b32.cont [10/16] %v7655_v13, 128  ;;  %5999 = vmatprep.mubr.bf16.mxu0 %v3131_v22  ;;  %v13863_v22 = vld [vmem:[#allocation28_spill] sm:$0xff] }
 0x9ad   : > { %1617 = vxpose.xlu0.b32.cont [13/16] %v7656_v11, 128 }
 0x9b0   : > { %1647 = vxpose.xlu1.b32.cont [11/16] %v7657_v56, 128 }
 0x9b1   : > { %1618 = vxpose.xlu0.b32.cont [14/16] %v7658_v54, 128 }
 0x9b3   : > { %6000 = vmatmul.mubr.bf16.gmra.mrb[64].mxu0 %v3099_v8 }
 0x9b4   : > { %1648 = vxpose.xlu1.b32.cont [12/16] %v7659_v20, 128  ;;  %6009 = vmatprep.mubr.bf16.mxu0 %v3140_v61  ;;  %v5262_v61 = vmul.f32 %v11869_v31, %v13865_v47  ;;  %v13876_v20 = vld [vmem:[#allocation286_spill] sm:$0xff]  ;;  %v13887_v47 = vld [vmem:[#allocation40_spill] sm:$0xff] }
 0x9b5   : > { %1619 = vxpose.xlu0.b32.cont [15/16] %v7660_v32, 128  ;;  %v5294_v25 = vmul.f32 %v11869_v31, %v13876_v20  ;;  %v13877_v32 = vld [vmem:[#allocation300_spill] sm:$0xff] }
 0x9b8   : > { %1649 = vxpose.xlu1.b32.cont [13/16] %v7661_v10, 128  ;;  %v5268_v10 = vmul.f32 %v11869_v31, %v13877_v32  ;;  %v13901_v32 = vld [vmem:[#allocation294_spill] sm:$0xff] }
 0x9b9   : > { %1620 = vxpose.xlu0.b32.end [16/16] %v7662_v60, 128  ;;  %v13878_v60 = vld [vmem:[#allocation27_spill] sm:$0xff] }
 0x9bb   : > { %6010 = vmatmul.mubr.bf16.gmra.mrb[68].mxu0 %v3108_v62  ;;  %v5290_v62 = vmul.f32 %v11869_v31, %v13868_v59 }
 0x9bc   : > { %1650 = vxpose.xlu1.b32.cont [14/16] %v7663_v27, 128  ;;  %6019 = vmatprep.mubr.bf16.mxu0 %v11825_v24  ;;  %v13867_v24 = vld [vmem:[#allocation25_spill] sm:$0xff]  ;;  %v13879_v27 = vld [vmem:[#allocation36_spill] sm:$0xff] }
 0x9bd   : > { %1669 = vxpose.xlu0.b32.start [1/16] %v13859_v46, 128  ;;  %v1557_v30 = vpop.trf.xlu0 }
 0x9be   : > { %v5320_v40 = vadd.f32 %v5256_v51, %v1557_v30 }
 0x9c0   : > { %6269 = vst [vmem:[%s11883_s0] sm:$0xff] %v5320_v40  ;;  %1651 = vxpose.xlu1.b32.cont [15/16] %v7664_v12, 128  ;;  %v13880_v40 = vld [vmem:[#allocation320_spill] sm:$0xff]  ;;  %v13882_v12 = vld [vmem:[#allocation30_spill] sm:$0xff] }
 0x9c1   : > { %1670 = vxpose.xlu0.b32.cont [2/16] %v13861_v38, 128  ;;  %v1558_v41 = vpop.trf.xlu0  ;;  %v5296_v14 = vmul.f32 %v11869_v31, %v13880_v40 }
 0x9c2   : > { %v5322_v17 = vadd.f32 %v5258_v1, %v1558_v41 }
 0x9c3   : > { %6020 = vmatmul.mubr.bf16.gmra.mrb[72].mxu0 %v11835_v18 }
 0x9c4   : > { %6271 = vst [vmem:[%s11883_s0 + $0x10] sm:$0xff] %v5322_v17  ;;  %1652 = vxpose.xlu1.b32.end [16/16] %v7665_v2, 128  ;;  %6029 = vmatprep.mubr.bf16.mxu0 %v11831_v53  ;;  %v5264_v53 = vmul.f32 %v11869_v31, %v13869_v4 }
 0x9c5   : > { %1671 = vxpose.xlu0.b32.cont [3/16] %v13863_v22, 128  ;;  %v1559_v45 = vpop.trf.xlu0  ;;  %v13885_v22 = vld [vmem:[#allocation278_spill] sm:$0xff] }
 0x9c6   : > { %v5324_v28 = vadd.f32 %v5260_v34, %v1559_v45  ;;  %v13884_v34 = vld [vmem:[#allocation290_spill] sm:$0xff]  ;;  %v5272_v45 = vmul.f32 %v11869_v31, %v13885_v22 }
 0x9c7   : > { %v5298_v2 = vmul.f32 %v11869_v31, %v13884_v34  ;;  %v13909_v34 = vld [vmem:[#allocation298_spill] sm:$0xff] }
 0x9c8   : > { %6273 = vst [vmem:[%s11883_s0 + $0x20] sm:$0xff] %v5324_v28  ;;  %1701 = vxpose.xlu1.b32.start [1/16] %v13866_v33, 128  ;;  %v1589_v63 = vpop.trf.xlu1  ;;  %v13886_v28 = vld [vmem:[#allocation31_spill] sm:$0xff]  ;;  %v13910_v22 = vld [vmem:[#allocation310_spill] sm:$0xff] }
 0x9c9   : > { %v5352_v8 = vadd.f32 %v5288_v0, %v1589_v63  ;;  %1672 = vxpose.xlu0.b32.cont [4/16] %v13867_v24, 128  ;;  %v1560_v6 = vpop.trf.xlu0  ;;  %v13888_v63 = vld [vmem:[#allocation329_spill] sm:$0xff] }
 0x9ca   : > { %v5326_v39 = vadd.f32 %v5262_v61, %v1560_v6  ;;  %v13890_v6 = vld [vmem:[#allocation34_spill] sm:$0xff] }
 0x9cb   : > { %6301 = vst [vmem:[%s11883_s0 + $0x100] sm:$0xff] %v5352_v8  ;;  %6030 = vmatmul.mubr.bf16.gmra.mrb[76].mxu0 %v11842_v5  ;;  %v13873_v5 = vld [vmem:[#allocation311_spill] sm:$0xff]  ;;  %v5300_v8 = vmul.f32 %v11869_v31, %v13888_v63 }
 0x9cc   : > { %6275 = vst [vmem:[%s11883_s0 + $0x30] sm:$0xff] %v5326_v39  ;;  %1702 = vxpose.xlu1.b32.cont [2/16] %v13870_v58, 128  ;;  %v1590_v44 = vpop.trf.xlu1  ;;  %6039 = vmatprep.mubr.bf16.mxu0 %v11837_v7  ;;  %v5266_v9 = vmul.f32 %v11869_v31, %v13873_v5  ;;  %v13875_v7 = vld [vmem:[#allocation29_spill] sm:$0xff] }
 0x9cd   : > { %v5354_v18 = vadd.f32 %v5290_v62, %v1590_v44  ;;  %1673 = vxpose.xlu0.b32.cont [5/16] %v13871_v48, 128  ;;  %v1561_v29 = vpop.trf.xlu0  ;;  %v13893_v44 = vld [vmem:[#allocation280_spill] sm:$0xff]  ;;  %v13894_v48 = vld [vmem:[#allocation35_spill] sm:$0xff] }
 0x9ce   : > { %v5328_v16 = vadd.f32 %v5264_v53, %v1561_v29  ;;  %v13892_v53 = vld [vmem:[#allocation323_spill] sm:$0xff] }
 0x9cf   : > { %6303 = vst [vmem:[%s11883_s0 + $0x110] sm:$0xff] %v5354_v18  ;;  %v5302_v58 = vmul.f32 %v11869_v31, %v13892_v53  ;;  %v5276_v18 = vmul.f32 %v11869_v31, %v13893_v44 }
 0x9d0   : > { %6277 = vst [vmem:[%s11883_s0 + $0x40] sm:$0xff] %v5328_v16  ;;  %1703 = vxpose.xlu1.b32.cont [3/16] %v13874_v55, 128  ;;  %v1591_v13 = vpop.trf.xlu1 }
 0x9d1   : > { %v5356_v11 = vadd.f32 %v5292_v57, %v1591_v13  ;;  %1674 = vxpose.xlu0.b32.cont [6/16] %v13875_v7, 128  ;;  %v1562_v56 = vpop.trf.xlu0 }
 0x9d2   : > { %v5330_v54 = vadd.f32 %v5266_v9, %v1562_v56  ;;  %v13896_v9 = vld [vmem:[#allocation331_spill] sm:$0xff] }
 0x9d3   : > { %6305 = vst [vmem:[%s11883_s0 + $0x120] sm:$0xff] %v5356_v11  ;;  %6040 = vmatmul.mubr.bf16.gmra.mrb[80].mxu0 %v11849_v15  ;;  %v13881_v15 = vld [vmem:[#allocation316_spill] sm:$0xff]  ;;  %v5304_v55 = vmul.f32 %v11869_v31, %v13896_v9  ;;  %v13898_v11 = vld [vmem:[#allocation38_spill] sm:$0xff] }
 0x9d4   : > { %6279 = vst [vmem:[%s11883_s0 + $0x50] sm:$0xff] %v5330_v54  ;;  %1704 = vxpose.xlu1.b32.cont [4/16] %v13878_v60, 128  ;;  %v1592_v23 = vpop.trf.xlu1  ;;  %6049 = vmatprep.mubr.bf16.mxu0 %v11845_v3  ;;  %v5270_v1 = vmul.f32 %v11869_v31, %v13881_v15  ;;  %v13883_v3 = vld [vmem:[#allocation33_spill] sm:$0xff]  ;;  %v13902_v60 = vld [vmem:[#allocation303_spill] sm:$0xff]  ;;  %v13905_v15 = vld [vmem:[#allocation334_spill] sm:$0xff] }
 0x9d5   : > { %v5358_v51 = vadd.f32 %v5294_v25, %v1592_v23  ;;  %1675 = vxpose.xlu0.b32.cont [7/16] %v13879_v27, 128  ;;  %v1563_v46 = vpop.trf.xlu0  ;;  %v13900_v25 = vld [vmem:[#allocation287_spill] sm:$0xff]  ;;  %v5280_v23 = vmul.f32 %v11869_v31, %v13902_v60  ;;  %v13926_v60 = vld [vmem:[#allocation308_spill] sm:$0xff] }
 0x9d6   : > { %v5332_v30 = vadd.f32 %v5268_v10, %v1563_v46  ;;  %7596 = vrcp.f32 %v13900_v25  ;;  %v5306_v10 = vmul.f32 %v11869_v31, %v13901_v32  ;;  %v13925_v32 = vld [vmem:[#allocation341_spill] sm:$0xff] }
 0x9d7   : > { %6307 = vst [vmem:[%s11883_s0 + $0x130] sm:$0xff] %v5358_v51  ;;  %v13903_v51 = vld [vmem:[#allocation39_spill] sm:$0xff] }
 0x9d8   : > { %6281 = vst [vmem:[%s11883_s0 + $0x60] sm:$0xff] %v5332_v30  ;;  %1705 = vxpose.xlu1.b32.cont [5/16] %v13882_v12, 128  ;;  %v1593_v38 = vpop.trf.xlu1  ;;  %v13904_v30 = vld [vmem:[#allocation48_spill] sm:$0xff] }
 0x9d9   : > { %v5360_v41 = vadd.f32 %v5296_v14, %v1593_v38  ;;  %1676 = vxpose.xlu0.b32.cont [8/16] %v13883_v3, 128  ;;  %v1564_v17 = vpop.trf.xlu0  ;;  %v13907_v38 = vld [vmem:[#allocation42_spill] sm:$0xff] }
 0x9da   : > { %v5334_v37 = vadd.f32 %v5270_v1, %v1564_v17  ;;  %v5308_v1 = vmul.f32 %v11869_v31, %v13905_v15  ;;  %v13929_v15 = vld [vmem:[#allocation326_spill] sm:$0xff] }
 0x9db   : > { %6309 = vst [vmem:[%s11883_s0 + $0x140] sm:$0xff] %v5360_v41  ;;  %6050 = vmatmul.mubr.bf16.gmra.mrb[84].mxu0 %v11857_v35  ;;  %v13889_v35 = vld [vmem:[#allocation302_spill] sm:$0xff] }
 0x9dc   : > { %6283 = vst [vmem:[%s11883_s0 + $0x70] sm:$0xff] %v5334_v37  ;;  %1706 = vxpose.xlu1.b32.cont [6/16] %v13886_v28, 128  ;;  %v1594_v49 = vpop.trf.xlu1  ;;  %6059 = vmatprep.mubr.bf16.mxu0 %v11852_v36  ;;  %v5274_v24 = vmul.f32 %v11869_v31, %v13889_v35  ;;  %v13891_v36 = vld [vmem:[#allocation37_spill] sm:$0xff]  ;;  %v13911_v28 = vld [vmem:[#allocation43_spill] sm:$0xff] }
 0x9dd   : > { %v5362_v0 = vadd.f32 %v5298_v2, %v1594_v49  ;;  %1677 = vxpose.xlu0.b32.cont [9/16] %v13887_v47, 128  ;;  %v1565_v61 = vpop.trf.xlu0  ;;  %v5310_v2 = vmul.f32 %v11869_v31, %v13909_v34 }
 0x9de   : > { %v5336_v33 = vadd.f32 %v5272_v45, %v1565_v61  ;;  %v5284_v45 = vmul.f32 %v11869_v31, %v13910_v22  ;;  %v13912_v61 = vld [vmem:[#allocation52_spill] sm:$0xff] }
 0x9df   : > { %6311 = vst [vmem:[%s11883_s0 + $0x150] sm:$0xff] %v5362_v0 }
 0x9e0   : > { %6285 = vst [vmem:[%s11883_s0 + $0x80] sm:$0xff] %v5336_v33  ;;  %1707 = vxpose.xlu1.b32.cont [7/16] %v13890_v6, 128  ;;  %v1595_v39 = vpop.trf.xlu1  ;;  %v7597_v0 = vpop.eup %7596 }
 0x9e1   : > { %v5364_v59 = vadd.f32 %v5300_v8, %v1595_v39  ;;  %1678 = vxpose.xlu0.b32.cont [10/16] %v13891_v36, 128  ;;  %v1566_v62 = vpop.trf.xlu0  ;;  %v13913_v8 = vld [vmem:[#allocation335_spill] sm:$0xff]  ;;  %v13915_v39 = vld [vmem:[#allocation46_spill] sm:$0xff] }
 0x9e2   : > { %v5338_v4 = vadd.f32 %v5274_v24, %v1566_v62  ;;  %v5312_v35 = vmul.f32 %v11869_v31, %v13913_v8  ;;  %v13914_v24 = vld [vmem:[#allocation284_spill] sm:$0xff]  ;;  %v13916_v62 = vld [vmem:[#allocation49_spill] sm:$0xff] }
 0x9e3   : > { %6313 = vst [vmem:[%s11883_s0 + $0x160] sm:$0xff] %v5364_v59  ;;  %6060 = vmatmul.mubr.bf16.gmra.mrb[88].mxu0 %v11864_v26  ;;  %v13897_v26 = vld [vmem:[#allocation321_spill] sm:$0xff]  ;;  %v5286_v6 = vmul.f32 %v11869_v31, %v13914_v24  ;;  %v13938_v8 = vld [vmem:[#allocation312_spill] sm:$0xff]  ;;  %v13939_v24 = vld [vmem:[#allocation58_spill] sm:$0xff] }
 0x9e4   : > { %6287 = vst [vmem:[%s11883_s0 + $0x90] sm:$0xff] %v5338_v4  ;;  %1708 = vxpose.xlu1.b32.cont [8/16] %v13894_v48, 128  ;;  %v1596_v29 = vpop.trf.xlu1  ;;  %6069 = vmatprep.mubr.bf16.mxu0 %v11860_v19  ;;  %v5278_v13 = vmul.f32 %v11869_v31, %v13897_v26  ;;  %v13899_v19 = vld [vmem:[#allocation41_spill] sm:$0xff] }
 0x9e5   : > { %v5366_v16 = vadd.f32 %v5302_v58, %v1596_v29  ;;  %1679 = vxpose.xlu0.b32.cont [11/16] %v13895_v52, 128  ;;  %v1567_v57 = vpop.trf.xlu0  ;;  %v13917_v58 = vld [vmem:[#allocation337_spill] sm:$0xff]  ;;  %v13919_v29 = vld [vmem:[#allocation47_spill] sm:$0xff] }
 0x9e6   : > { %v5340_v5 = vadd.f32 %v5276_v18, %v1567_v57  ;;  %v5314_v44 = vmul.f32 %v11869_v31, %v13917_v58  ;;  %v13918_v18 = vld [vmem:[#allocation289_spill] sm:$0xff]  ;;  %v13920_v57 = vld [vmem:[#allocation56_spill] sm:$0xff]  ;;  %v13942_v58 = vld [vmem:[#allocation299_spill] sm:$0xff] }
 0x9e7   : > { %6315 = vst [vmem:[%s11883_s0 + $0x170] sm:$0xff] %v5366_v16 }
 0x9e8   : > { %6289 = vst [vmem:[%s11883_s0 + $0xa0] sm:$0xff] %v5340_v5  ;;  %1709 = vxpose.xlu1.b32.cont [9/16] %v13898_v11, 128  ;;  %v1597_v7 = vpop.trf.xlu1 }
 0x9e9   : > { %v5368_v56 = vadd.f32 %v5304_v55, %v1597_v7  ;;  %1680 = vxpose.xlu0.b32.cont [12/16] %v13899_v19, 128  ;;  %v1568_v54 = vpop.trf.xlu0  ;;  %v13921_v55 = vld [vmem:[#allocation339_spill] sm:$0xff]  ;;  %v13923_v7 = vld [vmem:[#allocation50_spill] sm:$0xff] }
 0x9ea   : > { %v5342_v20 = vadd.f32 %v5278_v13, %v1568_v54  ;;  %v5316_v26 = vmul.f32 %v11869_v31, %v13921_v55  ;;  %v13922_v13 = vld [vmem:[#allocation306_spill] sm:$0xff]  ;;  %v13924_v54 = vld [vmem:[#allocation53_spill] sm:$0xff] }
 0x9eb   : > { %6317 = vst [vmem:[%s11883_s0 + $0x180] sm:$0xff] %v5368_v56  ;;  %6070 = vmatmul.mubr.bf16.gmra.mrb[92].mxu0 %v11878_v50  ;;  %v13906_v50 = vld [vmem:[#allocation282_spill] sm:$0xff]  ;;  %v13946_v55 = vld [vmem:[#allocation317_spill] sm:$0xff] }
 0x9ec   : > { %6291 = vst [vmem:[%s11883_s0 + $0xb0] sm:$0xff] %v5342_v20  ;;  %1710 = vxpose.xlu1.b32.cont [10/16] %v13903_v51, 128  ;;  %v1598_v27 = vpop.trf.xlu1  ;;  %6079 = vmatprep.mubr.bf16.mxu0 %v11866_v43  ;;  %v5282_v12 = vmul.f32 %v11869_v31, %v13906_v50  ;;  %v13908_v43 = vld [vmem:[#allocation45_spill] sm:$0xff]  ;;  %v13927_v51 = vld [vmem:[#allocation51_spill] sm:$0xff] }
 0x9ed   : > { %v5370_v46 = vadd.f32 %v5306_v10, %v1598_v27  ;;  %1681 = vxpose.xlu0.b32.cont [13/16] %v13904_v30, 128  ;;  %v1569_v40 = vpop.trf.xlu0  ;;  %v5318_v10 = vmul.f32 %v11869_v31, %v13925_v32  ;;  %v13928_v30 = vld [vmem:[#allocation60_spill] sm:$0xff]  ;;  %v13930_v31 = vld [vmem:[#allocation291_spill] sm:$0xff]  ;;  %v13950_v32 = vld [vmem:[#allocation277_spill] sm:$0xff] }
 0x9ee   : > { %v5344_v14 = vadd.f32 %v5280_v23, %v1569_v40 }
 0x9ef   : > { %6319 = vst [vmem:[%s11883_s0 + $0x190] sm:$0xff] %v5370_v46 }
 0x9f0   : > { %6293 = vst [vmem:[%s11883_s0 + $0xc0] sm:$0xff] %v5344_v14  ;;  %1711 = vxpose.xlu1.b32.cont [11/16] %v13907_v38, 128  ;;  %v1599_v41 = vpop.trf.xlu1 }
 0x9f1   : > { %v5372_v3 = vadd.f32 %v5308_v1, %v1599_v41  ;;  %1682 = vxpose.xlu0.b32.cont [14/16] %v13908_v43, 128  ;;  %v1570_v17 = vpop.trf.xlu0 }
 0x9f2   : > { %v5346_v37 = vadd.f32 %v5282_v12, %v1570_v17  ;;  %v13931_v12 = vld [vmem:[#allocation54_spill] sm:$0xff] }
 0x9f3   : > { %6321 = vst [vmem:[%s11883_s0 + $0x1a0] sm:$0xff] %v5372_v3  ;;  %6080 = vmatmul.mubr.bf16.gmra.mrb[96].mxu0 %v11888_v21  ;;  %v12008_v21 = vrot.slane %v7597_v0, %v13857_v42  ;;  %v13932_v3 = vld [vmem:[#allocation57_spill] sm:$0xff]  ;;  %v13936_v0 = vld [vmem:[#allocation64_spill] sm:$0xff] }
 0x9f4   : > { %6295 = vst [vmem:[%s11883_s0 + $0xd0] sm:$0xff] %v5346_v37  ;;  %1712 = vxpose.xlu1.b32.cont [12/16] %v13911_v28, 128  ;;  %v1600_v49 = vpop.trf.xlu1  ;;  %v13933_v37 = vld [vmem:[#allocation313_spill] sm:$0xff] }
 0x9f5   : > { %v5374_v47 = vadd.f32 %v5310_v2, %v1600_v49  ;;  %1683 = vxpose.xlu0.b32.cont [15/16] %v13912_v61, 128  ;;  %v1571_v33 = vpop.trf.xlu0  ;;  %v5257_v48 = vmul.f32 %v12008_v21, %v13918_v18  ;;  %v5259_v11 = vmul.f32 %v12008_v21, %v13922_v13  ;;  %v5261_v23 = vmul.f32 %v12008_v21, %v13926_v60  ;;  %v13934_v2 = vld [vmem:[#allocation295_spill] sm:$0xff]  ;;  %v13947_v13 = vld [vmem:[#allocation62_spill] sm:$0xff] }
 0x9f6   : > { %v5348_v63 = vadd.f32 %v5284_v45, %v1571_v33  ;;  %v5289_v1 = vmul.f32 %v12008_v21, %v13929_v15  ;;  %v5263_v50 = vmul.f32 %v12008_v21, %v13930_v31  ;;  %v5291_v34 = vmul.f32 %v12008_v21, %v13933_v37  ;;  %v13935_v45 = vld [vmem:[#allocation55_spill] sm:$0xff]  ;;  %v13937_v33 = vld [vmem:[#allocation328_spill] sm:$0xff]  ;;  %v13954_v15 = vld [vmem:[#allocation301_spill] sm:$0xff] }
 0x9f7   : > { %6323 = vst [vmem:[%s11883_s0 + $0x1b0] sm:$0xff] %v5374_v47  ;;  %v5265_v22 = vmul.f32 %v12008_v21, %v13934_v2  ;;  %v13943_v18 = vld [vmem:[#allocation59_spill] sm:$0xff]  ;;  %v13955_v31 = vld [vmem:[#allocation66_spill] sm:$0xff] }
 0x9f8   : > { %6297 = vst [vmem:[%s11883_s0 + $0xe0] sm:$0xff] %v5348_v63  ;;  %1713 = vxpose.xlu1.b32.cont [13/16] %v13915_v39, 128  ;;  %v1601_v59 = vpop.trf.xlu1  ;;  %v5293_v63 = vmul.f32 %v12008_v21, %v13937_v33  ;;  %v13951_v60 = vld [vmem:[#allocation63_spill] sm:$0xff]  ;;  %v13962_v33 = vld [vmem:[#allocation304_spill] sm:$0xff] }
 0x9f9   : > { %v5376_v36 = vadd.f32 %v5312_v35, %v1601_v59  ;;  %1684 = vxpose.xlu0.b32.end [16/16] %v13916_v62, 128  ;;  %v1572_v4 = vpop.trf.xlu0  ;;  %v5267_v35 = vmul.f32 %v12008_v21, %v13938_v8  ;;  %v13940_v59 = vld [vmem:[#allocation61_spill] sm:$0xff]  ;;  %v13958_v37 = vld [vmem:[#allocation279_spill] sm:$0xff]  ;;  %v13963_v8 = vld [vmem:[#allocation70_spill] sm:$0xff] }
 0x9fa   : > { %v5350_v53 = vadd.f32 %v5286_v6, %v1572_v4  ;;  %v13941_v4 = vld [vmem:[#allocation285_spill] sm:$0xff]  ;;  %v13959_v2 = vld [vmem:[#allocation67_spill] sm:$0xff] }
 0x9fb   : > { %6325 = vst [vmem:[%s11883_s0 + $0x1c0] sm:$0xff] %v5376_v36 }
 0x9fc   : > { %6299 = vst [vmem:[%s11883_s0 + $0xf0] sm:$0xff] %v5350_v53  ;;  %1714 = vxpose.xlu1.b32.cont [14/16] %v13919_v29, 128  ;;  %v1602_v16 = vpop.trf.xlu1  ;;  %v5295_v53 = vmul.f32 %v12008_v21, %v13941_v4  ;;  %v13966_v4 = vld [vmem:[#allocation324_spill] sm:$0xff] }
 0x9fd   : > { %v5378_v52 = vadd.f32 %v5314_v44, %v1602_v16  ;;  %1733 = vxpose.xlu0.b32.start [1/16] %v13920_v57, 128  ;;  %v1621_v5 = vpop.trf.xlu0  ;;  %v5269_v44 = vmul.f32 %v12008_v21, %v13942_v58  ;;  %v13944_v16 = vld [vmem:[#allocation68_spill] sm:$0xff]  ;;  %v13967_v58 = vld [vmem:[#allocation71_spill] sm:$0xff] }
 0x9fe   : > { %v5321_v9 = vadd.f32 %v5257_v48, %v1621_v5  ;;  %v13945_v5 = vld [vmem:[#allocation319_spill] sm:$0xff] }
 0x9ff   : > { %6327 = vst [vmem:[%s11883_s0 + $0x1d0] sm:$0xff] %v5378_v52 }
 0xa00   : > { %6270 = vst [vmem:[%s11883_s0 + $0x8] sm:$0xff] %v5321_v9  ;;  %1715 = vxpose.xlu1.b32.cont [15/16] %v13923_v7, 128  ;;  %v1603_v56 = vpop.trf.xlu1  ;;  %v5297_v9 = vmul.f32 %v12008_v21, %v13945_v5  ;;  %v13970_v5 = vld [vmem:[#allocation281_spill] sm:$0xff] }
 0xa01   : > { %v5380_v19 = vadd.f32 %v5316_v26, %v1603_v56  ;;  %1734 = vxpose.xlu0.b32.cont [2/16] %v13924_v54, 128  ;;  %v1622_v20 = vpop.trf.xlu0  ;;  %v5271_v26 = vmul.f32 %v12008_v21, %v13946_v55  ;;  %v13948_v56 = vld [vmem:[#allocation65_spill] sm:$0xff]  ;;  %v13971_v55 = vld [vmem:[#allocation74_spill] sm:$0xff] }
 0xa02   : > { %v5323_v25 = vadd.f32 %v5259_v11, %v1622_v20  ;;  %v13949_v20 = vld [vmem:[#allocation288_spill] sm:$0xff] }
 0xa03   : > { %6329 = vst [vmem:[%s11883_s0 + $0x1e0] sm:$0xff] %v5380_v19 }
 0xa04   : > { %6272 = vst [vmem:[%s11883_s0 + $0x18] sm:$0xff] %v5323_v25  ;;  %1716 = vxpose.xlu1.b32.end [16/16] %v13927_v51, 128  ;;  %v1604_v27 = vpop.trf.xlu1  ;;  %v5299_v25 = vmul.f32 %v12008_v21, %v13949_v20  ;;  %v13974_v20 = vld [vmem:[#allocation309_spill] sm:$0xff] }
 0xa05   : > { %v5382_v46 = vadd.f32 %v5318_v10, %v1604_v27  ;;  %1735 = vxpose.xlu0.b32.cont [3/16] %v13928_v30, 128  ;;  %v1623_v40 = vpop.trf.xlu0  ;;  %v5273_v10 = vmul.f32 %v12008_v21, %v13950_v32  ;;  %v13952_v27 = vld [vmem:[#allocation72_spill] sm:$0xff]  ;;  %v13975_v32 = vld [vmem:[#allocation75_spill] sm:$0xff] }
 0xa06   : > { %v5325_v14 = vadd.f32 %v5261_v23, %v1623_v40  ;;  %v13953_v40 = vld [vmem:[#allocation330_spill] sm:$0xff] }
 0xa07   : > { %6331 = vst [vmem:[%s11883_s0 + $0x1f0] sm:$0xff] %v5382_v46 }
 0xa08   : > { %6274 = vst [vmem:[%s11883_s0 + $0x28] sm:$0xff] %v5325_v14  ;;  %1765 = vxpose.xlu1.b32.start [1/16] %v13931_v12, 128  ;;  %v1653_v38 = vpop.trf.xlu1  ;;  %v5301_v14 = vmul.f32 %v12008_v21, %v13953_v40  ;;  %v13978_v40 = vld [vmem:[#allocation283_spill] sm:$0xff] }
 0xa09   : > { %v5353_v41 = vadd.f32 %v5289_v1, %v1653_v38  ;;  %1736 = vxpose.xlu0.b32.cont [4/16] %v13932_v3, 128  ;;  %v1624_v43 = vpop.trf.xlu0  ;;  %v5275_v1 = vmul.f32 %v12008_v21, %v13954_v15  ;;  %v13956_v38 = vld [vmem:[#allocation69_spill] sm:$0xff]  ;;  %v13979_v15 = vld [vmem:[#allocation78_spill] sm:$0xff] }
 0xa0a   : > { %v5327_v17 = vadd.f32 %v5263_v50, %v1624_v43  ;;  %v13957_v43 = vld [vmem:[#allocation322_spill] sm:$0xff] }
 0xa0b   : > { %6302 = vst [vmem:[%s11883_s0 + $0x108] sm:$0xff] %v5353_v41 }
 0xa0c   : > { %6276 = vst [vmem:[%s11883_s0 + $0x38] sm:$0xff] %v5327_v17  ;;  %1766 = vxpose.xlu1.b32.cont [2/16] %v13935_v45, 128  ;;  %v1654_v28 = vpop.trf.xlu1  ;;  %v5303_v17 = vmul.f32 %v12008_v21, %v13957_v43  ;;  %v13982_v43 = vld [vmem:[#allocation79_spill] sm:$0xff] }
 0xa0d   : > { %v5355_v49 = vadd.f32 %v5291_v34, %v1654_v28  ;;  %1737 = vxpose.xlu0.b32.cont [5/16] %v13936_v0, 128  ;;  %v1625_v47 = vpop.trf.xlu0  ;;  %v5277_v34 = vmul.f32 %v12008_v21, %v13958_v37  ;;  %v13960_v28 = vld [vmem:[#allocation76_spill] sm:$0xff] }
 0xa0e   : > { %v5329_v61 = vadd.f32 %v5265_v22, %v1625_v47  ;;  %v13961_v47 = vld [vmem:[#allocation332_spill] sm:$0xff] }
 0xa0f   : > { %6304 = vst [vmem:[%s11883_s0 + $0x118] sm:$0xff] %v5355_v49 }
 0xa10   : > { %6278 = vst [vmem:[%s11883_s0 + $0x48] sm:$0xff] %v5329_v61  ;;  %1767 = vxpose.xlu1.b32.cont [3/16] %v13939_v24, 128  ;;  %v1655_v6 = vpop.trf.xlu1  ;;  %v5305_v61 = vmul.f32 %v12008_v21, %v13961_v47  ;;  %v13985_v47 = vld [vmem:[#allocation342_spill] sm:$0xff] }
 0xa11   : > { %v5357_v39 = vadd.f32 %v5293_v63, %v1655_v6  ;;  %1738 = vxpose.xlu0.b32.cont [6/16] %v13940_v59, 128  ;;  %v1626_v36 = vpop.trf.xlu0  ;;  %v5279_v63 = vmul.f32 %v12008_v21, %v13962_v33  ;;  %v13964_v6 = vld [vmem:[#allocation73_spill] sm:$0xff]  ;;  %v13986_v33 = vld [vmem:[#allocation83_spill] sm:$0xff] }
 0xa12   : > { %v5331_v62 = vadd.f32 %v5267_v35, %v1626_v36  ;;  %v13965_v36 = vld [vmem:[#allocation292_spill] sm:$0xff] }
 0xa13   : > { %6306 = vst [vmem:[%s11883_s0 + $0x128] sm:$0xff] %v5357_v39 }
 0xa14   : > { %6280 = vst [vmem:[%s11883_s0 + $0x58] sm:$0xff] %v5331_v62  ;;  %1768 = vxpose.xlu1.b32.cont [4/16] %v13943_v18, 128  ;;  %v1656_v48 = vpop.trf.xlu1  ;;  %v5307_v62 = vmul.f32 %v12008_v21, %v13965_v36 }
 0xa15   : > { %v5359_v29 = vadd.f32 %v5295_v53, %v1656_v48  ;;  %1739 = vxpose.xlu0.b32.cont [7/16] %v13944_v16, 128  ;;  %v1627_v52 = vpop.trf.xlu0  ;;  %v5281_v53 = vmul.f32 %v12008_v21, %v13966_v4  ;;  %v13968_v48 = vld [vmem:[#allocation80_spill] sm:$0xff] }
 0xa16   : > { %v5333_v57 = vadd.f32 %v5269_v44, %v1627_v52  ;;  %v13969_v52 = vld [vmem:[#allocation333_spill] sm:$0xff] }
 0xa17   : > { %6308 = vst [vmem:[%s11883_s0 + $0x138] sm:$0xff] %v5359_v29 }
 0xa18   : > { %6282 = vst [vmem:[%s11883_s0 + $0x68] sm:$0xff] %v5333_v57  ;;  %1769 = vxpose.xlu1.b32.cont [5/16] %v13947_v13, 128  ;;  %v1657_v11 = vpop.trf.xlu1  ;;  %v5309_v57 = vmul.f32 %v12008_v21, %v13969_v52 }
 0xa19   : > { %v5361_v7 = vadd.f32 %v5297_v9, %v1657_v11  ;;  %1740 = vxpose.xlu0.b32.cont [8/16] %v13948_v56, 128  ;;  %v1628_v19 = vpop.trf.xlu0  ;;  %v5283_v9 = vmul.f32 %v12008_v21, %v13970_v5  ;;  %v13972_v11 = vld [vmem:[#allocation77_spill] sm:$0xff] }
 0xa1a   : > { %v5335_v54 = vadd.f32 %v5271_v26, %v1628_v19  ;;  %v13973_v19 = vld [vmem:[#allocation296_spill] sm:$0xff] }
 0xa1b   : > { %6310 = vst [vmem:[%s11883_s0 + $0x148] sm:$0xff] %v5361_v7 }
 0xa1c   : > { %6284 = vst [vmem:[%s11883_s0 + $0x78] sm:$0xff] %v5335_v54  ;;  %1770 = vxpose.xlu1.b32.cont [6/16] %v13951_v60, 128  ;;  %v1658_v23 = vpop.trf.xlu1  ;;  %v5311_v54 = vmul.f32 %v12008_v21, %v13973_v19 }
 0xa1d   : > { %v5363_v51 = vadd.f32 %v5299_v25, %v1658_v23  ;;  %1741 = vxpose.xlu0.b32.cont [9/16] %v13952_v27, 128  ;;  %v1629_v46 = vpop.trf.xlu0  ;;  %v5285_v25 = vmul.f32 %v12008_v21, %v13974_v20  ;;  %v13976_v23 = vld [vmem:[#allocation84_spill] sm:$0xff] }
 0xa1e   : > { %v5337_v30 = vadd.f32 %v5273_v10, %v1629_v46  ;;  %v13977_v46 = vld [vmem:[#allocation336_spill] sm:$0xff] }
 0xa1f   : > { %6312 = vst [vmem:[%s11883_s0 + $0x158] sm:$0xff] %v5363_v51 }
 0xa20   : > { %6286 = vst [vmem:[%s11883_s0 + $0x88] sm:$0xff] %v5337_v30  ;;  %1771 = vxpose.xlu1.b32.cont [7/16] %v13955_v31, 128  ;;  %v1659_v50 = vpop.trf.xlu1  ;;  %v5313_v30 = vmul.f32 %v12008_v21, %v13977_v46 }
 0xa21   : > { %v5365_v12 = vadd.f32 %v5301_v14, %v1659_v50  ;;  %1742 = vxpose.xlu0.b32.cont [10/16] %v13956_v38, 128  ;;  %v1630_v41 = vpop.trf.xlu0  ;;  %v5287_v14 = vmul.f32 %v12008_v21, %v13978_v40  ;;  %v13980_v50 = vld [vmem:[#allocation81_spill] sm:$0xff] }
 0xa22   : > { %v5339_v3 = vadd.f32 %v5275_v1, %v1630_v41  ;;  %v13981_v41 = vld [vmem:[#allocation338_spill] sm:$0xff] }
 0xa23   : > { %6314 = vst [vmem:[%s11883_s0 + $0x168] sm:$0xff] %v5365_v12 }
 0xa24   : > { %6288 = vst [vmem:[%s11883_s0 + $0x98] sm:$0xff] %v5339_v3  ;;  %1772 = vxpose.xlu1.b32.cont [8/16] %v13959_v2, 128  ;;  %v1660_v22 = vpop.trf.xlu1  ;;  %v5315_v3 = vmul.f32 %v12008_v21, %v13981_v41  ;;  %v13983_v2 = vld [vmem:[#allocation340_spill] sm:$0xff] }
 0xa25   : > { %v5367_v45 = vadd.f32 %v5303_v17, %v1660_v22  ;;  %1743 = vxpose.xlu0.b32.cont [11/16] %v13960_v28, 128  ;;  %v1631_v49 = vpop.trf.xlu0  ;;  %v5317_v22 = vmul.f32 %v12008_v21, %v13983_v2 }
 0xa26   : > { %v5341_v0 = vadd.f32 %v5277_v34, %v1631_v49 }
 0xa27   : > { %6316 = vst [vmem:[%s11883_s0 + $0x178] sm:$0xff] %v5367_v45  ;;  %v13984_v45 = vld [vmem:[#allocation82_spill] sm:$0xff] }
 0xa28   : > { %6290 = vst [vmem:[%s11883_s0 + $0xa8] sm:$0xff] %v5341_v0  ;;  %1773 = vxpose.xlu1.b32.cont [9/16] %v13963_v8, 128  ;;  %v1661_v35 = vpop.trf.xlu1 }
 0xa29   : > { %v5369_v24 = vadd.f32 %v5305_v61, %v1661_v35  ;;  %1744 = vxpose.xlu0.b32.cont [12/16] %v13964_v6, 128  ;;  %v1632_v39 = vpop.trf.xlu0  ;;  %v5319_v61 = vmul.f32 %v12008_v21, %v13985_v47 }
 0xa2a   : > { %v5343_v59 = vadd.f32 %v5279_v63, %v1632_v39 }
 0xa2b   : > { %6318 = vst [vmem:[%s11883_s0 + $0x188] sm:$0xff] %v5369_v24 }
 0xa2c   : > { %6292 = vst [vmem:[%s11883_s0 + $0xb8] sm:$0xff] %v5343_v59  ;;  %1774 = vxpose.xlu1.b32.cont [10/16] %v13967_v58, 128  ;;  %v1662_v44 = vpop.trf.xlu1 }
 0xa2d   : > { %v5371_v18 = vadd.f32 %v5307_v62, %v1662_v44  ;;  %1745 = vxpose.xlu0.b32.cont [13/16] %v13968_v48, 128  ;;  %v1633_v29 = vpop.trf.xlu0 }
 0xa2e   : > { %v5345_v16 = vadd.f32 %v5281_v53, %v1633_v29 }
 0xa2f   : > { %6320 = vst [vmem:[%s11883_s0 + $0x198] sm:$0xff] %v5371_v18 }
 0xa30   : > { %6294 = vst [vmem:[%s11883_s0 + $0xc8] sm:$0xff] %v5345_v16  ;;  %1775 = vxpose.xlu1.b32.cont [11/16] %v13971_v55, 128  ;;  %v1663_v26 = vpop.trf.xlu1 }
 0xa31   : > { %v5373_v13 = vadd.f32 %v5309_v57, %v1663_v26  ;;  %1746 = vxpose.xlu0.b32.cont [14/16] %v13972_v11, 128  ;;  %v1634_v7 = vpop.trf.xlu0 }
 0xa32   : > { %v5347_v56 = vadd.f32 %v5283_v9, %v1634_v7 }
 0xa33   : > { %6322 = vst [vmem:[%s11883_s0 + $0x1a8] sm:$0xff] %v5373_v13 }
 0xa34   : > { %6296 = vst [vmem:[%s11883_s0 + $0xd8] sm:$0xff] %v5347_v56  ;;  %1776 = vxpose.xlu1.b32.cont [12/16] %v13975_v32, 128  ;;  %v1664_v10 = vpop.trf.xlu1 }
 0xa35   : > { %v5375_v60 = vadd.f32 %v5311_v54, %v1664_v10  ;;  %1747 = vxpose.xlu0.b32.cont [15/16] %v13976_v23, 128  ;;  %v1635_v51 = vpop.trf.xlu0 }
 0xa36   : > { %v5349_v27 = vadd.f32 %v5285_v25, %v1635_v51 }
 0xa37   : > { %6324 = vst [vmem:[%s11883_s0 + $0x1b8] sm:$0xff] %v5375_v60 }
 0xa38   : > { %6298 = vst [vmem:[%s11883_s0 + $0xe8] sm:$0xff] %v5349_v27  ;;  %1777 = vxpose.xlu1.b32.cont [13/16] %v13979_v15, 128  ;;  %v1665_v1 = vpop.trf.xlu1 }
 0xa39   : > { %v5377_v31 = vadd.f32 %v5313_v30, %v1665_v1  ;;  %1748 = vxpose.xlu0.b32.end [16/16] %v13980_v50, 128  ;;  %v1636_v12 = vpop.trf.xlu0 }
 0xa3a   : > { %v5351_v38 = vadd.f32 %v5287_v14, %v1636_v12 }
 0xa3b   : > { %6326 = vst [vmem:[%s11883_s0 + $0x1c8] sm:$0xff] %v5377_v31 }
 0xa3c   : > { %6300 = vst [vmem:[%s11883_s0 + $0xf8] sm:$0xff] %v5351_v38  ;;  %1778 = vxpose.xlu1.b32.cont [14/16] %v13982_v43, 128  ;;  %v1666_v17 = vpop.trf.xlu1 }
 0xa3d   : > { %v5379_v37 = vadd.f32 %v5315_v3, %v1666_v17  ;;  %v1685_v34 = vpop.trf.xlu0 }
 0xa3f   : > { %6328 = vst [vmem:[%s11883_s0 + $0x1d8] sm:$0xff] %v5379_v37 }
 0xa40   : > { %1779 = vxpose.xlu1.b32.cont [15/16] %v13984_v45, 128  ;;  %v1667_v28 = vpop.trf.xlu1 }
 0xa41   : > { %v5381_v49 = vadd.f32 %v5317_v22, %v1667_v28  ;;  %v1686_v0 = vpop.trf.xlu0 }
 0xa43   : > { %6330 = vst [vmem:[%s11883_s0 + $0x1e8] sm:$0xff] %v5381_v49 }
 0xa44   : > { %1780 = vxpose.xlu1.b32.end [16/16] %v13986_v33, 128  ;;  %v1668_v63 = vpop.trf.xlu1 }
 0xa45   : > { %v5383_v8 = vadd.f32 %v5319_v61, %v1668_v63  ;;  %v1687_v35 = vpop.trf.xlu0 }
 0xa47   : > { %6332 = vst [vmem:[%s11883_s0 + $0x1f8] sm:$0xff] %v5383_v8 }
 0xa48   : > { %v12157_v24 = vpop.trf.xlu1 }
 0xa49   : > { %v1688_v6 = vpop.trf.xlu0 }
 0xa4c   : > { %v12159_v39 = vpop.trf.xlu1 }
 0xa4d   : > { %v1689_v59 = vpop.trf.xlu0 }
 0xa4e   : > { %v5931_v36 = vpop.f32.mrb[36].mxu0 }
 0xa4f   : > { %v6124_v62 = vpop.f32.mrb[128].mxu1  ;;  %v12161_v4 = vpop.f32.mrb[37].mxu0 }
 0xa50   : > { %7598 = vrcp.f32 %v6124_v62  ;;  %v6126_v53 = vpop.f32.mrb[129].mxu1  ;;  %v5935_v21 = vpop.f32.mrb[38].mxu0 }
 0xa51   : > { %v12163_v58 = vpop.f32.mrb[39].mxu0  ;;  %v1690_v44 = vpop.trf.xlu0  ;;  %7600 = vrcp.f32 %v6126_v53 }
 0xa52   : > { %v12165_v18 = vpop.trf.xlu1  ;;  %v6128_v48 = vpop.f32.mrb[130].mxu1 }
 0xa53   : > { %v6129_v29 = vpop.f32.mrb[131].mxu1 }
 0xa55   : > { %v1691_v16 = vpop.trf.xlu0 }
 0xa56   : > { %v5941_v52 = vpop.f32.mrb[40].mxu0  ;;  %v12167_v57 = vpop.trf.xlu1 }
 0xa57   : > { %v12169_v5 = vpop.f32.mrb[41].mxu0 }
 0xa58   : > { %v5945_v9 = vpop.f32.mrb[42].mxu0 }
 0xa59   : > { %v12171_v55 = vpop.f32.mrb[43].mxu0  ;;  %v1692_v26 = vpop.trf.xlu0 }
 0xa5a   : > { %v7599_v13 = vpop.eup %7598  ;;  %v12173_v11 = vpop.trf.xlu1 }
 0xa5b   : > { %v12176_v7 = vrot.slane %v7599_v13, %v13857_v42 }
 0xa5d   : > { %v6141_v56 = vmul.f32 %v12176_v7, %v5931_v36  ;;  %v6143_v19 = vmul.f32 %v12176_v7, %v5935_v21  ;;  %v6145_v54 = vmul.f32 %v12176_v7, %v5941_v52  ;;  %v6147_v20 = vmul.f32 %v12176_v7, %v5945_v9  ;;  %v1693_v25 = vpop.trf.xlu0  ;;  %v7601_v21 = vpop.eup %7600 }
 0xa5e   : > { %v5951_v32 = vpop.f32.mrb[44].mxu0  ;;  %v12182_v10 = vpop.trf.xlu1  ;;  %v12228_v9 = vrot.slane %v7601_v21, %v13857_v42 }
 0xa5f   : > { %v6205_v60 = vadd.f32 %v6141_v56, %v1685_v34  ;;  %v6207_v23 = vadd.f32 %v6143_v19, %v1686_v0  ;;  %v6209_v51 = vadd.f32 %v6145_v54, %v1687_v35  ;;  %v6211_v27 = vadd.f32 %v6147_v20, %v1688_v6  ;;  %v12184_v46 = vpop.f32.mrb[45].mxu0 }
 0xa60   : > { %v6149_v30 = vmul.f32 %v12176_v7, %v5951_v32  ;;  %v5955_v40 = vpop.f32.mrb[46].mxu0  ;;  %v6142_v32 = vmul.f32 %v12228_v9, %v12161_v4 }
 0xa61   : > { %6333 = vst [vmem:[%s11883_s0 + $0x200] sm:$0xff] %v6205_v60  ;;  %6335 = vst [vmem:[%s11883_s0 + $0x210] sm:$0xff] %v6207_v23  ;;  %v6151_v14 = vmul.f32 %v12176_v7, %v5955_v40  ;;  %v12192_v15 = vpop.f32.mrb[47].mxu0  ;;  %v1694_v1 = vpop.trf.xlu0  ;;  %v6144_v40 = vmul.f32 %v12228_v9, %v12163_v58 }
 0xa62   : > { %6337 = vst [vmem:[%s11883_s0 + $0x220] sm:$0xff] %v6209_v51  ;;  %6339 = vst [vmem:[%s11883_s0 + $0x230] sm:$0xff] %v6211_v27  ;;  %v6213_v31 = vadd.f32 %v6149_v30, %v1689_v59  ;;  %v12194_v50 = vpop.trf.xlu1 }
 0xa63   : > { %v6215_v12 = vadd.f32 %v6151_v14, %v1690_v44 }
 0xa64   : > { %6341 = vst [vmem:[%s11883_s0 + $0x240] sm:$0xff] %v6213_v31 }
 0xa65   : > { %6343 = vst [vmem:[%s11883_s0 + $0x250] sm:$0xff] %v6215_v12  ;;  %v1695_v38 = vpop.trf.xlu0 }
 0xa66   : > { %v5961_v41 = vpop.f32.mrb[48].mxu0  ;;  %v12198_v3 = vpop.trf.xlu1 }
 0xa67   : > { %v6153_v43 = vmul.f32 %v12176_v7, %v5961_v41  ;;  %v12201_v17 = vpop.f32.mrb[49].mxu0 }
 0xa68   : > { %v5965_v37 = vpop.f32.mrb[50].mxu0 }
 0xa69   : > { %v6217_v34 = vadd.f32 %v6153_v43, %v1691_v16  ;;  %v6155_v2 = vmul.f32 %v12176_v7, %v5965_v37  ;;  %v12204_v22 = vpop.f32.mrb[51].mxu0  ;;  %v1696_v45 = vpop.trf.xlu0  ;;  %v6146_v37 = vmul.f32 %v12228_v9, %v12169_v5 }
 0xa6a   : > { %v12206_v28 = vpop.trf.xlu1 }
 0xa6b   : > { %6345 = vst [vmem:[%s11883_s0 + $0x260] sm:$0xff] %v6217_v34  ;;  %v6219_v49 = vadd.f32 %v6155_v2, %v1692_v26 }
 0xa6d   : > { %6347 = vst [vmem:[%s11883_s0 + $0x270] sm:$0xff] %v6219_v49  ;;  %v1697_v0 = vpop.trf.xlu0 }
 0xa6e   : > { %v5971_v47 = vpop.f32.mrb[52].mxu0  ;;  %v12210_v61 = vpop.trf.xlu1 }
 0xa6f   : > { %v6157_v33 = vmul.f32 %v12176_v7, %v5971_v47  ;;  %v12213_v63 = vpop.f32.mrb[53].mxu0  ;;  %v6148_v47 = vmul.f32 %v12228_v9, %v12171_v55 }
 0xa70   : > { %v5975_v8 = vpop.f32.mrb[54].mxu0 }
 0xa71   : > { %v6221_v35 = vadd.f32 %v6157_v33, %v1693_v25  ;;  %v6159_v6 = vmul.f32 %v12176_v7, %v5975_v8  ;;  %v12216_v59 = vpop.f32.mrb[55].mxu0  ;;  %v1698_v36 = vpop.trf.xlu0 }
 0xa72   : > { %v12218_v62 = vpop.trf.xlu1 }
 0xa73   : > { %6349 = vst [vmem:[%s11883_s0 + $0x280] sm:$0xff] %v6221_v35  ;;  %v6223_v53 = vadd.f32 %v6159_v6, %v1694_v1 }
 0xa75   : > { %6351 = vst [vmem:[%s11883_s0 + $0x290] sm:$0xff] %v6223_v53  ;;  %v1699_v44 = vpop.trf.xlu0 }
 0xa76   : > { %v5981_v48 = vpop.f32.mrb[56].mxu0  ;;  %v12222_v29 = vpop.trf.xlu1 }
 0xa77   : > { %v6161_v16 = vmul.f32 %v12176_v7, %v5981_v48  ;;  %v12225_v52 = vpop.f32.mrb[57].mxu0  ;;  %v6150_v48 = vmul.f32 %v12228_v9, %v12184_v46 }
 0xa78   : > { %v5985_v26 = vpop.f32.mrb[58].mxu0 }
 0xa79   : > { %v6225_v13 = vadd.f32 %v6161_v16, %v1695_v38  ;;  %v6163_v56 = vmul.f32 %v12176_v7, %v5985_v26  ;;  %v12231_v19 = vpop.f32.mrb[59].mxu0  ;;  %v1700_v54 = vpop.trf.xlu0 }
 0xa7a   : > { %v12233_v20 = vpop.trf.xlu1 }
 0xa7b   : > { %6353 = vst [vmem:[%s11883_s0 + $0x2a0] sm:$0xff] %v6225_v13  ;;  %v6227_v25 = vadd.f32 %v6163_v56, %v1696_v45 }
 0xa7d   : > { %6355 = vst [vmem:[%s11883_s0 + $0x2b0] sm:$0xff] %v6227_v25  ;;  %v1749_v60 = vpop.trf.xlu0  ;;  %v6152_v25 = vmul.f32 %v12228_v9, %v12192_v15 }
 0xa7e   : > { %v5991_v42 = vpop.f32.mrb[60].mxu0  ;;  %v6206_v23 = vadd.f32 %v6142_v32, %v1749_v60  ;;  %v12239_v51 = vpop.trf.xlu1 }
 0xa7f   : > { %v6165_v27 = vmul.f32 %v12176_v7, %v5991_v42  ;;  %v12242_v30 = vpop.f32.mrb[61].mxu0 }
 0xa80   : > { %6334 = vst [vmem:[%s11883_s0 + $0x208] sm:$0xff] %v6206_v23  ;;  %v5995_v14 = vpop.f32.mrb[62].mxu0 }
 0xa81   : > { %v6229_v1 = vadd.f32 %v6165_v27, %v1697_v0  ;;  %v6167_v4 = vmul.f32 %v12176_v7, %v5995_v14  ;;  %v12248_v31 = vpop.f32.mrb[63].mxu0  ;;  %v1750_v12 = vpop.trf.xlu0 }
 0xa82   : > { %v6208_v38 = vadd.f32 %v6144_v40, %v1750_v12  ;;  %v12250_v41 = vpop.trf.xlu1 }
 0xa83   : > { %6357 = vst [vmem:[%s11883_s0 + $0x2c0] sm:$0xff] %v6229_v1  ;;  %v6231_v43 = vadd.f32 %v6167_v4, %v1698_v36  ;;  %v6154_v4 = vmul.f32 %v12228_v9, %v12201_v17 }
 0xa84   : > { %6336 = vst [vmem:[%s11883_s0 + $0x218] sm:$0xff] %v6208_v38 }
 0xa85   : > { %6359 = vst [vmem:[%s11883_s0 + $0x2d0] sm:$0xff] %v6231_v43  ;;  %v1751_v58 = vpop.trf.xlu0 }
 0xa86   : > { %v6001_v34 = vpop.f32.mrb[64].mxu0  ;;  %v6210_v2 = vadd.f32 %v6146_v37, %v1751_v58  ;;  %v12257_v45 = vpop.trf.xlu1 }
 0xa87   : > { %v6169_v49 = vmul.f32 %v12176_v7, %v6001_v34  ;;  %v12260_v0 = vpop.f32.mrb[65].mxu0 }
 0xa88   : > { %6338 = vst [vmem:[%s11883_s0 + $0x228] sm:$0xff] %v6210_v2  ;;  %v6005_v33 = vpop.f32.mrb[66].mxu0 }
 0xa89   : > { %v6233_v5 = vadd.f32 %v6169_v49, %v1699_v44  ;;  %v6171_v8 = vmul.f32 %v12176_v7, %v6005_v33  ;;  %v12266_v35 = vpop.f32.mrb[67].mxu0  ;;  %v1752_v6 = vpop.trf.xlu0 }
 0xa8a   : > { %v6212_v36 = vadd.f32 %v6148_v47, %v1752_v6  ;;  %v1781_v53 = vpop.trf.xlu1 }
 0xa8b   : > { %6361 = vst [vmem:[%s11883_s0 + $0x2e0] sm:$0xff] %v6233_v5  ;;  %v6235_v21 = vadd.f32 %v6171_v8, %v1700_v54 }
 0xa8c   : > { %6340 = vst [vmem:[%s11883_s0 + $0x238] sm:$0xff] %v6212_v36 }
 0xa8d   : > { %6363 = vst [vmem:[%s11883_s0 + $0x2f0] sm:$0xff] %v6235_v21  ;;  %v1753_v16 = vpop.trf.xlu0  ;;  %v6158_v21 = vmul.f32 %v12228_v9, %v12213_v63 }
 0xa8e   : > { %v6011_v55 = vpop.f32.mrb[68].mxu0  ;;  %v6214_v26 = vadd.f32 %v6150_v48, %v1753_v16  ;;  %v1782_v44 = vpop.trf.xlu1 }
 0xa8f   : > { %v6173_v13 = vmul.f32 %v12176_v7, %v6011_v55  ;;  %v6013_v56 = vpop.f32.mrb[69].mxu0 }
 0xa90   : > { %6342 = vst [vmem:[%s11883_s0 + $0x248] sm:$0xff] %v6214_v26  ;;  %v6174_v54 = vmul.f32 %v12228_v9, %v6013_v56  ;;  %v6015_v46 = vpop.f32.mrb[70].mxu0 }
 0xa91   : > { %v6237_v32 = vadd.f32 %v6173_v13, %v12157_v24  ;;  %v6175_v60 = vmul.f32 %v12176_v7, %v6015_v46  ;;  %v6017_v42 = vpop.f32.mrb[71].mxu0  ;;  %v1754_v23 = vpop.trf.xlu0 }
 0xa92   : > { %v6238_v27 = vadd.f32 %v6174_v54, %v1781_v53  ;;  %v6176_v40 = vmul.f32 %v12228_v9, %v6017_v42  ;;  %v6216_v14 = vadd.f32 %v6152_v25, %v1754_v23  ;;  %v1783_v1 = vpop.trf.xlu1 }
 0xa93   : > { %6365 = vst [vmem:[%s11883_s0 + $0x300] sm:$0xff] %v6237_v32  ;;  %v6239_v15 = vadd.f32 %v6175_v60, %v12159_v39  ;;  %v6156_v39 = vmul.f32 %v12228_v9, %v12204_v22 }
 0xa94   : > { %6366 = vst [vmem:[%s11883_s0 + $0x308] sm:$0xff] %v6238_v27  ;;  %6344 = vst [vmem:[%s11883_s0 + $0x258] sm:$0xff] %v6216_v14  ;;  %v6240_v24 = vadd.f32 %v6176_v40, %v1782_v44  ;;  %v6162_v40 = vmul.f32 %v12228_v9, %v12225_v52 }
 0xa95   : > { %6367 = vst [vmem:[%s11883_s0 + $0x310] sm:$0xff] %v6239_v15  ;;  %v1755_v12 = vpop.trf.xlu0 }
 0xa96   : > { %6368 = vst [vmem:[%s11883_s0 + $0x318] sm:$0xff] %v6240_v24  ;;  %v6021_v38 = vpop.f32.mrb[72].mxu0  ;;  %v6218_v43 = vadd.f32 %v6154_v4, %v1755_v12  ;;  %v1784_v37 = vpop.trf.xlu1 }
 0xa97   : > { %v6177_v58 = vmul.f32 %v12176_v7, %v6021_v38  ;;  %v6023_v34 = vpop.f32.mrb[73].mxu0 }
 0xa98   : > { %6346 = vst [vmem:[%s11883_s0 + $0x268] sm:$0xff] %v6218_v43  ;;  %v6178_v17 = vmul.f32 %v12228_v9, %v6023_v34  ;;  %v6025_v2 = vpop.f32.mrb[74].mxu0 }
 0xa99   : > { %v6241_v49 = vadd.f32 %v6177_v58, %v12165_v18  ;;  %v6179_v47 = vmul.f32 %v12176_v7, %v6025_v2  ;;  %v6027_v33 = vpop.f32.mrb[75].mxu0  ;;  %v1756_v5 = vpop.trf.xlu0 }
 0xa9a   : > { %v6242_v8 = vadd.f32 %v6178_v17, %v1783_v1  ;;  %v6180_v6 = vmul.f32 %v12228_v9, %v6027_v33  ;;  %v6220_v36 = vadd.f32 %v6156_v39, %v1756_v5  ;;  %v1785_v53 = vpop.trf.xlu1 }
 0xa9b   : > { %6369 = vst [vmem:[%s11883_s0 + $0x320] sm:$0xff] %v6241_v49  ;;  %v6243_v22 = vadd.f32 %v6179_v47, %v12167_v57  ;;  %v6160_v57 = vmul.f32 %v12228_v9, %v12216_v59  ;;  %v6166_v47 = vmul.f32 %v12228_v9, %v12242_v30 }
 0xa9c   : > { %6370 = vst [vmem:[%s11883_s0 + $0x328] sm:$0xff] %v6242_v8  ;;  %6348 = vst [vmem:[%s11883_s0 + $0x278] sm:$0xff] %v6220_v36  ;;  %v6244_v18 = vadd.f32 %v6180_v6, %v1784_v37 }
 0xa9d   : > { %6371 = vst [vmem:[%s11883_s0 + $0x330] sm:$0xff] %v6243_v22  ;;  %v1757_v48 = vpop.trf.xlu0 }
 0xa9e   : > { %6372 = vst [vmem:[%s11883_s0 + $0x338] sm:$0xff] %v6244_v18  ;;  %v6031_v16 = vpop.f32.mrb[76].mxu0  ;;  %v6222_v55 = vadd.f32 %v6158_v21, %v1757_v48  ;;  %v1786_v26 = vpop.trf.xlu1 }
 0xa9f   : > { %v6181_v44 = vmul.f32 %v12176_v7, %v6031_v16  ;;  %v6033_v13 = vpop.f32.mrb[77].mxu0 }
 0xaa0   : > { %6350 = vst [vmem:[%s11883_s0 + $0x288] sm:$0xff] %v6222_v55  ;;  %v6182_v63 = vmul.f32 %v12228_v9, %v6033_v13  ;;  %v6035_v56 = vpop.f32.mrb[78].mxu0 }
 0xaa1   : > { %v6245_v25 = vadd.f32 %v6181_v44, %v12173_v11  ;;  %v6183_v54 = vmul.f32 %v12176_v7, %v6035_v56  ;;  %v6037_v46 = vpop.f32.mrb[79].mxu0  ;;  %v1758_v32 = vpop.trf.xlu0 }
 0xaa2   : > { %v6246_v60 = vadd.f32 %v6182_v63, %v1785_v53  ;;  %v6184_v42 = vmul.f32 %v12228_v9, %v6037_v46  ;;  %v6224_v23 = vadd.f32 %v6160_v57, %v1758_v32  ;;  %v1787_v27 = vpop.trf.xlu1  ;;  %v6170_v57 = vmul.f32 %v12228_v9, %v12260_v0 }
 0xaa3   : > { %6373 = vst [vmem:[%s11883_s0 + $0x340] sm:$0xff] %v6245_v25  ;;  %v6247_v59 = vadd.f32 %v6183_v54, %v12182_v10  ;;  %v6164_v10 = vmul.f32 %v12228_v9, %v12231_v19 }
 0xaa4   : > { %6374 = vst [vmem:[%s11883_s0 + $0x348] sm:$0xff] %v6246_v60  ;;  %6352 = vst [vmem:[%s11883_s0 + $0x298] sm:$0xff] %v6224_v23  ;;  %v6248_v11 = vadd.f32 %v6184_v42, %v1786_v26 }
 0xaa5   : > { %6375 = vst [vmem:[%s11883_s0 + $0x350] sm:$0xff] %v6247_v59  ;;  %v1759_v14 = vpop.trf.xlu0 }
 0xaa6   : > { %6376 = vst [vmem:[%s11883_s0 + $0x358] sm:$0xff] %v6248_v11  ;;  %v6041_v1 = vpop.f32.mrb[80].mxu0  ;;  %v6226_v15 = vadd.f32 %v6162_v40, %v1759_v14  ;;  %v1788_v4 = vpop.trf.xlu1 }
 0xaa7   : > { %v6185_v24 = vmul.f32 %v12176_v7, %v6041_v1  ;;  %v6043_v12 = vpop.f32.mrb[81].mxu0 }
 0xaa8   : > { %6354 = vst [vmem:[%s11883_s0 + $0x2a8] sm:$0xff] %v6226_v15  ;;  %v6186_v52 = vmul.f32 %v12228_v9, %v6043_v12  ;;  %v6045_v38 = vpop.f32.mrb[82].mxu0 }
 0xaa9   : > { %v6249_v43 = vadd.f32 %v6185_v24, %v12194_v50  ;;  %v6187_v37 = vmul.f32 %v12176_v7, %v6045_v38  ;;  %v6047_v58 = vpop.f32.mrb[83].mxu0  ;;  %v1760_v34 = vpop.trf.xlu0 }
 0xaaa   : > { %v6250_v39 = vadd.f32 %v6186_v52, %v1787_v27  ;;  %v6188_v17 = vmul.f32 %v12228_v9, %v6047_v58  ;;  %v6228_v2 = vadd.f32 %v6164_v10, %v1760_v34  ;;  %v1789_v49 = vpop.trf.xlu1 }
 0xaab   : > { %6377 = vst [vmem:[%s11883_s0 + $0x360] sm:$0xff] %v6249_v43  ;;  %v6251_v19 = vadd.f32 %v6187_v37, %v12198_v3  ;;  %v6168_v3 = vmul.f32 %v12228_v9, %v12248_v31 }
 0xaac   : > { %6378 = vst [vmem:[%s11883_s0 + $0x368] sm:$0xff] %v6250_v39  ;;  %6356 = vst [vmem:[%s11883_s0 + $0x2b8] sm:$0xff] %v6228_v2  ;;  %v6252_v50 = vadd.f32 %v6188_v17, %v1788_v4 }
 0xaad   : > { %6379 = vst [vmem:[%s11883_s0 + $0x370] sm:$0xff] %v6251_v19  ;;  %v1761_v33 = vpop.trf.xlu0 }
 0xaae   : > { %6380 = vst [vmem:[%s11883_s0 + $0x378] sm:$0xff] %v6252_v50  ;;  %v6051_v5 = vpop.f32.mrb[84].mxu0  ;;  %v6230_v8 = vadd.f32 %v6166_v47, %v1761_v33  ;;  %v1790_v6 = vpop.trf.xlu1 }
 0xaaf   : > { %v6189_v36 = vmul.f32 %v12176_v7, %v6051_v5  ;;  %v6053_v53 = vpop.f32.mrb[85].mxu0 }
 0xab0   : > { %6358 = vst [vmem:[%s11883_s0 + $0x2c8] sm:$0xff] %v6230_v8  ;;  %v6190_v30 = vmul.f32 %v12228_v9, %v6053_v53  ;;  %v6055_v22 = vpop.f32.mrb[86].mxu0 }
 0xab1   : > { %v6253_v21 = vadd.f32 %v6189_v36, %v12206_v28  ;;  %v6191_v18 = vmul.f32 %v12176_v7, %v6055_v22  ;;  %v6057_v48 = vpop.f32.mrb[87].mxu0  ;;  %v1762_v16 = vpop.trf.xlu0 }
 0xab2   : > { %v6254_v55 = vadd.f32 %v6190_v30, %v1789_v49  ;;  %v6192_v26 = vmul.f32 %v12228_v9, %v6057_v48  ;;  %v6232_v44 = vadd.f32 %v6168_v3, %v1762_v16  ;;  %v1791_v13 = vpop.trf.xlu1 }
 0xab3   : > { %6381 = vst [vmem:[%s11883_s0 + $0x380] sm:$0xff] %v6253_v21  ;;  %v6255_v31 = vadd.f32 %v6191_v18, %v12210_v61  ;;  %v6172_v61 = vmul.f32 %v12228_v9, %v12266_v35 }
 0xab4   : > { %6382 = vst [vmem:[%s11883_s0 + $0x388] sm:$0xff] %v6254_v55  ;;  %6360 = vst [vmem:[%s11883_s0 + $0x2d8] sm:$0xff] %v6232_v44  ;;  %v6256_v28 = vadd.f32 %v6192_v26, %v1790_v6 }
 0xab5   : > { %6383 = vst [vmem:[%s11883_s0 + $0x390] sm:$0xff] %v6255_v31  ;;  %v1763_v63 = vpop.trf.xlu0 }
 0xab6   : > { %6384 = vst [vmem:[%s11883_s0 + $0x398] sm:$0xff] %v6256_v28  ;;  %v6061_v56 = vpop.f32.mrb[88].mxu0  ;;  %v6234_v25 = vadd.f32 %v6170_v57, %v1763_v63  ;;  %v1792_v54 = vpop.trf.xlu1 }
 0xab7   : > { %v6193_v46 = vmul.f32 %v12176_v7, %v6061_v56  ;;  %v6063_v32 = vpop.f32.mrb[89].mxu0 }
 0xab8   : > { %6362 = vst [vmem:[%s11883_s0 + $0x2e8] sm:$0xff] %v6234_v25  ;;  %v6194_v0 = vmul.f32 %v12228_v9, %v6063_v32  ;;  %v6065_v60 = vpop.f32.mrb[90].mxu0 }
 0xab9   : > { %v6257_v42 = vadd.f32 %v6193_v46, %v12218_v62  ;;  %v6195_v23 = vmul.f32 %v12176_v7, %v6065_v60  ;;  %v6067_v27 = vpop.f32.mrb[91].mxu0  ;;  %v1764_v59 = vpop.trf.xlu0 }
 0xaba   : > { %v6258_v40 = vadd.f32 %v6194_v0, %v1791_v13  ;;  %v6196_v11 = vmul.f32 %v12228_v9, %v6067_v27  ;;  %v6236_v14 = vadd.f32 %v6172_v61, %v1764_v59  ;;  %v1793_v1 = vpop.trf.xlu1 }
 0xabb   : > { %6385 = vst [vmem:[%s11883_s0 + $0x3a0] sm:$0xff] %v6257_v42  ;;  %v6259_v35 = vadd.f32 %v6195_v23, %v12222_v29 }
 0xabc   : > { %6386 = vst [vmem:[%s11883_s0 + $0x3a8] sm:$0xff] %v6258_v40  ;;  %6364 = vst [vmem:[%s11883_s0 + $0x2f8] sm:$0xff] %v6236_v14  ;;  %v6260_v15 = vadd.f32 %v6196_v11, %v1792_v54 }
 0xabd   : > { %6387 = vst [vmem:[%s11883_s0 + $0x3b0] sm:$0xff] %v6259_v35 }
 0xabe   : > { %6388 = vst [vmem:[%s11883_s0 + $0x3b8] sm:$0xff] %v6260_v15  ;;  %v6071_v62 = vpop.f32.mrb[92].mxu0  ;;  %v1794_v4 = vpop.trf.xlu1 }
 0xabf   : > { %v6197_v24 = vmul.f32 %v12176_v7, %v6071_v62  ;;  %v6073_v12 = vpop.f32.mrb[93].mxu0 }
 0xac0   : > { %v6198_v10 = vmul.f32 %v12228_v9, %v6073_v12  ;;  %v6075_v52 = vpop.f32.mrb[94].mxu0 }
 0xac1   : > { %v6261_v38 = vadd.f32 %v6197_v24, %v12233_v20  ;;  %v6199_v29 = vmul.f32 %v12176_v7, %v6075_v52  ;;  %v6077_v43 = vpop.f32.mrb[95].mxu0 }
 0xac2   : > { %v6262_v37 = vadd.f32 %v6198_v10, %v1793_v1  ;;  %v6200_v58 = vmul.f32 %v12228_v9, %v6077_v43  ;;  %v1795_v39 = vpop.trf.xlu1 }
 0xac3   : > { %6389 = vst [vmem:[%s11883_s0 + $0x3c0] sm:$0xff] %v6261_v38  ;;  %v6263_v34 = vadd.f32 %v6199_v29, %v12239_v51 }
 0xac4   : > { %6390 = vst [vmem:[%s11883_s0 + $0x3c8] sm:$0xff] %v6262_v37  ;;  %v6264_v17 = vadd.f32 %v6200_v58, %v1794_v4 }
 0xac5   : > { %6391 = vst [vmem:[%s11883_s0 + $0x3d0] sm:$0xff] %v6263_v34 }
 0xac6   : > { %6392 = vst [vmem:[%s11883_s0 + $0x3d8] sm:$0xff] %v6264_v17  ;;  %v6081_v2 = vpop.f32.mrb[96].mxu0  ;;  %v1796_v5 = vpop.trf.xlu1 }
 0xac7   : > { %v6201_v20 = vmul.f32 %v12176_v7, %v6081_v2  ;;  %v6083_v49 = vpop.f32.mrb[97].mxu0 }
 0xac8   : > { %v6202_v19 = vmul.f32 %v12228_v9, %v6083_v49  ;;  %v6085_v47 = vpop.f32.mrb[98].mxu0 }
 0xac9   : > { %v6265_v51 = vadd.f32 %v6201_v20, %v12250_v41  ;;  %v6203_v50 = vmul.f32 %v12176_v7, %v6085_v47  ;;  %v6087_v33 = vpop.f32.mrb[99].mxu0 }
 0xaca   : > { %v6266_v8 = vadd.f32 %v6202_v19, %v1795_v39  ;;  %v6204_v6 = vmul.f32 %v12228_v9, %v6087_v33 }
 0xacb   : > { %6393 = vst [vmem:[%s11883_s0 + $0x3e0] sm:$0xff] %v6265_v51  ;;  %v6267_v36 = vadd.f32 %v6203_v50, %v12257_v45 }
 0xacc   : > { %6394 = vst [vmem:[%s11883_s0 + $0x3e8] sm:$0xff] %v6266_v8  ;;  %v6268_v7 = vadd.f32 %v6204_v6, %v1796_v5 }
 0xacd   : > { %6395 = vst [vmem:[%s11883_s0 + $0x3f0] sm:$0xff] %v6267_v36 }
 0xace   : > { %6396 = vst [vmem:[%s11883_s0 + $0x3f8] sm:$0xff] %v6268_v7 }
 0xacf   : > { %7877 = shalt.err (!%p7874_p7)
}
 0xad0   : > { %s7878_s13 = scalar_lea.hbm %s12389_s7, 16384  ;;  %s7882_s5 = scalar_lea.hbm %s13987_s20, 32768 }
 0xad1   : > { %p7879_p9 = scmp.ne.s32.totalorder %s12389_s7, %s7878_s13  ;;  %p7883_p0 = scmp.lt.u32.totalorder %s12389_s7, %s13987_s20 }
 0xad2   : > { %p7884_p2 = scmp.lt.u32.totalorder %s7882_s5, %s7878_s13  ;;  %p7886_p5 = scmp.lt.u32.totalorder %s7878_s13, %s12389_s7 }
 0xad3   : > { %p7880_p4 = pnand %p7879_p9, %p13988_p10 }
 0xad4   : > { %p7885_p6 = por %p7884_p2, %p7883_p0 }
 0xad5   : > { %p7881_p3 = pneg %p7880_p4 }
 0xad6   : > { %p7887_p1 = por %p7886_p5, %p7885_p6 }
 0xad8   : > { %p7888_p11 = pnand %p7887_p1, %p7881_p3 }
 0xada   : > { %7891 = shalt.err (!%p7888_p11)
}
 0xadb   : > { %s7960_s2 = smov 256   ;;  %s7961_s24 = smov 16  }
 0xadc   : > { %6915 = dma.vmem_to_hbm [thread:$0]  (%p13988_p10), %s12391_s18, 16384, %s12389_s7, %s6398_s1, %s7960_s2, %s7960_s2, %s7961_s24  }
 0xadd PF: > { %s6426_s19 = sand.u32 1, %s7930_s27   ;;  %p13989_p12 = scmp.ne.s32.totalorder %s12882_s26, 0 }
 0xade   : > { %p13990_p13 = scmp.ge.s32.totalorder %s7942_s30, 2  ;;  %s6427_s13 = scalar_lea.sflag [#allocation4], %s6426_s19 }
 0xae0   : > { %p6941_p8 = pnand %p13990_p13, %p13989_p12 }
 0xae2   : > { %7925 = dma.done.wait (!%p6941_p8), %s6427_s13, 16384  }
 0xae3   : > { %7927 = vsyncadd (!%p6941_p8), %s6427_s13, 4294950912  ;;  %p34_p7 = scmp.ge.s32.totalorder %s8244_s21, 4   ;;  %s13991_s27 = smov %s7934_s28 }
 0xae4   : > { %s13992_s28 = smov %s7938_s29  ;;  %s13993_s29 = smov %s8255_s11 }
 0xae5   : > { %s13994_s30 = smov %s8244_s21  ;;  %36 = sbr.rel (!%p34_p7) target bundleno = 20 (0x14), region = 164 }
 0xaec   :  { %6432 = vsyncpa [#allocation3], 1 }
 0xaed   :  { %6434 = vsyncpa [#allocation3 + $0x1], 1 }
 0xaee   :  { %6435 = vsyncpa [#allocation6], 1 }
 0xaef   :  { %6436 = vsyncpa [#allocation9], 1 }
 0xaf0   :  { %6437 = vsyncpa [#allocation12], 1 }
 0xaf1   :  { %6438 = vsyncpa [#allocation4], 1 }
 0xaf2   :  { %6440 = vsyncpa [#allocation4 + $0x1], 1 }

</bundles_post_ra>
